<compile_context>
chip_gen: v6e
topology: v6e:2x2x1
jax: 0.10.0
libtpu: 0.0.40
codegen_flags: <defaults>
</compile_context>

<pallas_src>
import functools
import math

import jax
import jax.numpy as jnp
from jax.experimental import pallas as pl
from jax.experimental.pallas import tpu as pltpu

EPS = 1e-5  # nn.LayerNorm default


def _layer_norm(x, g, b):
    mu = jnp.mean(x, axis=-1, keepdims=True)
    var = jnp.mean((x - mu) ** 2, axis=-1, keepdims=True)
    return (x - mu) * jax.lax.rsqrt(var + EPS) * g + b


def transformer_kernel(x_ref, qkv_w_ref, ckv_w_ref, proj_w_ref, vecs_ref,
                       ffn_w1_ref, ffn_b1_ref, ffn_w2_ref, fc_w_ref, fc_b_ref,
                       o_ref, *, d_model, seq, tb, ffn_chunk):
    D = d_model
    S = seq
    M = tb * S
    F = ffn_w1_ref.shape[2]
    inv_s = 1.0 / S  # static constant

    # x arrives bf16; cast to f32 once for residual / LayerNorm math, keep the
    # bf16 copy for every matmul that consumes raw x.
    x_bf = x_ref[...].reshape(M, D)               # (M, D) bf16
    xf = x_bf.astype(jnp.float32)                 # (M, D) f32

    def V(i):                                     # (1, D) bias / LN row (f32)
        return vecs_ref[i:i + 1, :]

    def bdot(a_bf, w_bf):                         # bf16 MXU matmul, f32 acc
        return jnp.dot(a_bf, w_bf, preferred_element_type=jnp.float32)

    def mha_core(q, k, v, wo, bo):
        # q is pre-scaled by 1/sqrt(D) (folded into the Q weights/biases).
        q_bf = q.astype(jnp.bfloat16).reshape(tb, S, D)
        k_bf = k.astype(jnp.bfloat16).reshape(tb, S, D)
        v_bf = v.astype(jnp.bfloat16).reshape(tb, S, D)
        s = jnp.einsum('bqd,bkd->bqk', q_bf, k_bf,
                       preferred_element_type=jnp.float32)
        m = jnp.max(s, axis=-1, keepdims=True)
        e = jnp.exp(s - m)
        p = e * pl.reciprocal(jnp.sum(e, axis=-1, keepdims=True), approx=True)
        o = jnp.einsum('bqk,bkd->bqd', p.astype(jnp.bfloat16), v_bf,
                       preferred_element_type=jnp.float32)
        return bdot(o.reshape(M, D).astype(jnp.bfloat16), wo) + bo

    def self_attn(inp_bf, w_qkv, wo, bq, bk, bv, bo):
        qkv = bdot(inp_bf, w_qkv)                            # (M, 3D) fused QKV
        return mha_core(qkv[:, :D] + bq, qkv[:, D:2 * D] + bk,
                        qkv[:, 2 * D:] + bv, wo, bo)

    def cross_attn(tgt_bf, mem_bf, wq, w_kv, wo, bq, bk, bv, bo):
        q = bdot(tgt_bf, wq) + bq
        kv = bdot(mem_bf, w_kv)                              # (M, 2D) fused K|V
        return mha_core(q, kv[:, :D] + bk, kv[:, D:] + bv, wo, bo)

    def ffn(inp_bf, idx):
        # Chunked over the hidden dim F so the (M, F) intermediate never
        # materializes; linear2's bias is added by the caller.
        acc = jnp.zeros((M, D), jnp.float32)
        for f0 in range(0, F, ffn_chunk):
            f1 = min(f0 + ffn_chunk, F)
            h = jnp.maximum(
                bdot(inp_bf, ffn_w1_ref[idx, :, f0:f1])
                + ffn_b1_ref[idx:idx + 1, f0:f1], 0.0)
            acc = acc + bdot(h.astype(jnp.bfloat16), ffn_w2_ref[idx, f0:f1, :])
        return acc

    # -------- encoder layer (post-norm) --------
    sa = self_attn(x_bf, qkv_w_ref[0], proj_w_ref[0], V(0), V(1), V(2), V(3))
    src = _layer_norm(xf + sa, V(5), V(6))                       # norm1
    src_bf = src.astype(jnp.bfloat16)
    src = _layer_norm(src + ffn(src_bf, 0) + V(4), V(7), V(8))   # norm2
    memory = _layer_norm(src, V(9), V(10))                       # encoder.norm
    memory_bf = memory.astype(jnp.bfloat16)

    # -------- decoder layer (post-norm) --------
    sa = self_attn(x_bf, qkv_w_ref[1], proj_w_ref[1], V(11), V(12), V(13), V(14))
    t = _layer_norm(xf + sa, V(20), V(21))                       # norm1
    t_bf = t.astype(jnp.bfloat16)
    ca = cross_attn(t_bf, memory_bf, proj_w_ref[2], ckv_w_ref[...], proj_w_ref[3],
                    V(15), V(16), V(17), V(18))
    t = _layer_norm(t + ca, V(22), V(23))                        # norm2
    t_bf = t.astype(jnp.bfloat16)
    t = _layer_norm(t + ffn(t_bf, 1) + V(19), V(24), V(25))      # norm3
    dec = _layer_norm(t, V(26), V(27))                           # decoder.norm

    # -------- mean over seq + fc (lane-dense (TB, O) block per step) --------
    pooled = jnp.sum(dec.reshape(tb, S, D), axis=1) * inv_s      # (TB, D)
    out = bdot(pooled.astype(jnp.bfloat16), fc_w_ref[...]) + fc_b_ref[...]
    o_ref[0] = out


def _vmem_bytes_estimate(tb, S, D, F, O, ffn_chunk, single_buffer_weights):
    """Rough VMEM footprint: weights + double-buffered x/out blocks + the
    largest live intermediates ((M,3D) QKV slab, a handful of (M,D) f32
    temporaries, per-batch scores, chunked FFN hidden)."""
    M = tb * S
    wmul = 1 if single_buffer_weights else 2
    w_bf16 = (2 * D * 3 * D) + (D * 2 * D) + (4 * D * D) \
             + (2 * D * F) + (2 * F * D) + (D * O)
    w_f32 = 28 * D + 2 * F + O
    weights = wmul * (2 * w_bf16 + 4 * w_f32)
    io = 2 * (tb * S * D * 2) + 2 * (tb * O * 4)
    acts = 4 * (M * 3 * D + 8 * M * D + tb * S * S + 2 * M * ffn_chunk)
    return weights + io + acts


def _vmem_capacity_bytes():
    try:
        return int(pltpu.get_tpu_info().vmem_capacity_bytes)
    except Exception:
        return 64 * 1024 * 1024   # conservative (v7x per-TensorCore VMEM)


def _choose_tb(B, S, D, F, O, ffn_chunk, budget):
    # Target M = tb*S >= 256 rows for MXU fill; keep >= 2 grid steps when the
    # batch allows (2 TensorCores on v7x); shrink until the VMEM estimate fits.
    tb = max(1, pl.cdiv(256, S))
    if B >= 2:
        tb = min(tb, pl.cdiv(B, 2))
    tb = max(1, min(tb, B))
    while tb > 1 and _vmem_bytes_estimate(tb, S, D, F, O, ffn_chunk, True) > budget:
        tb = max(1, tb // 2)
    return tb


def transformer_forward(x, params, *, tb=None, ffn_chunk=512):
    B, S, D = x.shape
    O = params["fc_w"].shape[1]
    F = params["ffn_w1"].shape[2]
    chunk = min(ffn_chunk, F)

    cap = _vmem_capacity_bytes()
    budget = int(0.80 * cap)
    if tb is None:
        tb = _choose_tb(B, S, D, F, O, chunk, budget)
    tb = max(1, min(tb, B))

    Bp = pl.cdiv(B, tb) * tb
    x_bf = x.astype(jnp.bfloat16)            # halve the only per-step HBM DMA
    if Bp != B:                              # pad batch to a multiple of tb
        x_bf = jnp.concatenate(
            [x_bf, jnp.zeros((Bp - B, S, D), jnp.bfloat16)], axis=0)
    G = Bp // tb

    est = _vmem_bytes_estimate(tb, S, D, F, O, chunk, True)
    vmem_limit = min(int(0.90 * cap), max(2 * est, 32 * 1024 * 1024))

    kernel = functools.partial(transformer_kernel, d_model=D, seq=S, tb=tb,
                               ffn_chunk=chunk)

    def build(single_buffer_weights):
        # Weights have constant index_maps; single-buffer them to halve their
        # VMEM footprint (the review's key v7x fix).
        wkw = (dict(pipeline_mode=pl.Buffered(1))
               if single_buffer_weights else {})

        def wspec(shape):
            return pl.BlockSpec(shape, lambda b: (0,) * len(shape), **wkw)

        return pl.pallas_call(
            kernel,
            out_shape=jax.ShapeDtypeStruct((G, tb, O), jnp.float32),
            grid_spec=pltpu.PrefetchScalarGridSpec(
                num_scalar_prefetch=0,
                grid=(G,),
                in_specs=[
                    pl.BlockSpec((tb, S, D), lambda b: (b, 0, 0)),  # x (bf16)
                    wspec((2, D, 3 * D)),      # fused QKV W
                    wspec((D, 2 * D)),         # cross K|V W
                    wspec((4, D, D)),          # out-proj / cross-Q W
                    wspec((28, D)),            # biases / LN params
                    wspec((2, D, F)),          # FFN linear1 W
                    wspec((2, F)),             # FFN linear1 b
                    wspec((2, F, D)),          # FFN linear2 W
                    wspec((D, O)),             # fc W
                    wspec((1, O)),             # fc b
                ],
                out_specs=pl.BlockSpec((1, tb, O), lambda b: (b, 0, 0)),
            ),
            compiler_params=pltpu.CompilerParams(
                dimension_semantics=("parallel",),   # batch tiles independent
                vmem_limit_bytes=vmem_limit,
            ),
        )

    args = (x_bf, params["qkv_w"], params["ckv_w"], params["proj_w"],
            params["vecs"], params["ffn_w1"], params["ffn_b1"],
            params["ffn_w2"], params["fc_w"], params["fc_b"])
    try:
        out = build(True)(*args)
    except Exception:
        # Fallback for Pallas builds where pipeline_mode=pl.Buffered(1) on
        # pallas_call in_specs is unsupported: weights revert to the default
        # double-buffered (but never re-DMA'd) constant-index path.
        out = build(False)(*args)
    return out.reshape(Bp, O)[:B]


def init_params(key, d_model, output_dim, dim_ff=2048):
    """Deterministic synthetic init. Weight matrices are stored transposed for
    right-multiplication (x @ W) and in bf16; biases / LN params stay f32.
    The 1/sqrt(D) attention scale is folded into the Q weights/biases."""
    D = d_model
    k = jax.random.split(key, 9)
    inv_sqrt_d = 1.0 / math.sqrt(D)

    def nrm(kk, shape, scale=0.02):
        return scale * jax.random.normal(kk, shape, dtype=jnp.float32)

    # Fused QKV for [encoder self-attn, decoder self-attn]: (D, 3D) each.
    qkv_w = nrm(k[0], (2, D, 3 * D))
    qkv_w = qkv_w.at[:, :, :D].multiply(inv_sqrt_d)          # fold scale into Q
    # Decoder cross-attention fused K|V: (D, 2D).
    ckv_w = nrm(k[1], (D, 2 * D))
    # (D, D) mats: [enc out-proj, dec-self out-proj, dec-cross Q, dec-cross out-proj].
    proj_w = nrm(k[2], (4, D, D))
    proj_w = proj_w.at[2].multiply(inv_sqrt_d)               # cross-attn Q

    # 28 (D,) vectors: attention biases, FFN linear2 biases, LayerNorm params.
    #  enc self {bq,bk,bv,bo}=0..3, enc-ffn2 b=4, enc norm1=5,6, norm2=7,8,
    #  encoder.norm=9,10, dec self {..}=11..14, dec cross {..}=15..18,
    #  dec-ffn2 b=19, dec norm1=20,21, norm2=22,23, norm3=24,25, decoder.norm=26,27
    vecs = jnp.zeros((28, D), jnp.float32)
    vecs = vecs.at[jnp.array([5, 7, 9, 20, 22, 24, 26])].set(1.0)
    vecs = vecs.at[jnp.array([4, 19])].set(
        0.01 * jax.random.normal(k[3], (2, D), dtype=jnp.float32))
    vecs = vecs.at[jnp.array([0, 11, 15])].multiply(inv_sqrt_d)  # q biases pre-scaled

    ffn_w1 = nrm(k[4], (2, D, dim_ff)).astype(jnp.bfloat16)      # [enc, dec] (D, F)
    ffn_b1 = 0.01 * jax.random.normal(k[5], (2, dim_ff), dtype=jnp.float32)
    ffn_w2 = nrm(k[6], (2, dim_ff, D)).astype(jnp.bfloat16)      # [enc, dec] (F, D)

    fc_w = nrm(k[7], (D, output_dim)).astype(jnp.bfloat16)
    fc_b = 0.01 * jax.random.normal(k[8], (1, output_dim), dtype=jnp.float32)

    return dict(qkv_w=qkv_w.astype(jnp.bfloat16),
                ckv_w=ckv_w.astype(jnp.bfloat16),
                proj_w=proj_w.astype(jnp.bfloat16),
                vecs=vecs, ffn_w1=ffn_w1, ffn_b1=ffn_b1, ffn_w2=ffn_w2,
                fc_w=fc_w, fc_b=fc_b)


if __name__ == "__main__":
    B, S, D, O = 8, 8, 32, 16     # batch, seq, input_dim (d_model), output_dim
    key = jax.random.PRNGKey(0)
    kx, kp = jax.random.split(key)
    x = jax.random.normal(kx, (B, S, D), dtype=jnp.float32)
    params = init_params(kp, D, O)

    out = transformer_forward(x, params)    # tb auto-derived (tb=4, G=2 here)
    out = jax.block_until_ready(out)
    assert out.shape == (B, O), out.shape
    assert bool(jnp.all(jnp.isfinite(out)))
    print("KERNEL_OK")
</pallas_src>

<mosaic_0001>
module attributes {stable_mosaic.version = 11 : i64} {
  func.func @transformer_kernel(%arg0: i32, %arg1: memref<4x8x32xbf16, #tpu.memory_space<vmem>>, %arg2: memref<2x32x96xbf16, #tpu.memory_space<vmem>>, %arg3: memref<32x64xbf16, #tpu.memory_space<vmem>>, %arg4: memref<4x32x32xbf16, #tpu.memory_space<vmem>>, %arg5: memref<28x32xf32, #tpu.memory_space<vmem>>, %arg6: memref<2x32x2048xbf16, #tpu.memory_space<vmem>>, %arg7: memref<2x2048xf32, #tpu.memory_space<vmem>>, %arg8: memref<2x2048x32xbf16, #tpu.memory_space<vmem>>, %arg9: memref<32x16xbf16, #tpu.memory_space<vmem>>, %arg10: memref<1x16xf32, #tpu.memory_space<vmem>>, %arg11: memref<1x4x16xf32, #tpu.memory_space<vmem>>) attributes {dimension_semantics = [#tpu.dimension_semantics<parallel>], iteration_bounds = array<i64: 2>, scalar_prefetch = 0 : i64, scratch_operands = 0 : i64, tpu.core_type = #tpu.core_type<tc>, window_params = [{transform_indices = @transform_0, window_bounds = array<i64: 4, 8, 32>}, {pipeline_mode = #tpu.pipeline_mode<synchronous>, transform_indices = @transform_1, window_bounds = array<i64: 2, 32, 96>}, {pipeline_mode = #tpu.pipeline_mode<synchronous>, transform_indices = @transform_2, window_bounds = array<i64: 32, 64>}, {pipeline_mode = #tpu.pipeline_mode<synchronous>, transform_indices = @transform_3, window_bounds = array<i64: 4, 32, 32>}, {pipeline_mode = #tpu.pipeline_mode<synchronous>, transform_indices = @transform_4, window_bounds = array<i64: 28, 32>}, {pipeline_mode = #tpu.pipeline_mode<synchronous>, transform_indices = @transform_5, window_bounds = array<i64: 2, 32, 2048>}, {pipeline_mode = #tpu.pipeline_mode<synchronous>, transform_indices = @transform_6, window_bounds = array<i64: 2, 2048>}, {pipeline_mode = #tpu.pipeline_mode<synchronous>, transform_indices = @transform_7, window_bounds = array<i64: 2, 2048, 32>}, {pipeline_mode = #tpu.pipeline_mode<synchronous>, transform_indices = @transform_8, window_bounds = array<i64: 32, 16>}, {pipeline_mode = #tpu.pipeline_mode<synchronous>, transform_indices = @transform_9, window_bounds = array<i64: 1, 16>}, {transform_indices = @transform_10, window_bounds = array<i64: 1, 4, 16>}]} {
    %c0 = arith.constant 0 : index
    %c0_0 = arith.constant 0 : index
    %c0_1 = arith.constant 0 : index
    %0 = vector.load %arg1[%c0, %c0_0, %c0_1] : memref<4x8x32xbf16, #tpu.memory_space<vmem>>, vector<4x8x32xbf16>
    %1 = vector.shape_cast %0 : vector<4x8x32xbf16> to vector<32x32xbf16>
    %2 = arith.extf %1 : vector<32x32xbf16> to vector<32x32xf32>
    %c0_2 = arith.constant 0 : index
    %c0_3 = arith.constant 0 : index
    %c0_4 = arith.constant 0 : index
    %3 = vector.load %arg2[%c0_2, %c0_3, %c0_4] : memref<2x32x96xbf16, #tpu.memory_space<vmem>>, vector<1x32x96xbf16>
    %4 = vector.shape_cast %3 : vector<1x32x96xbf16> to vector<32x96xbf16>
    %c0_5 = arith.constant 0 : index
    %c0_6 = arith.constant 0 : index
    %c0_7 = arith.constant 0 : index
    %5 = vector.load %arg4[%c0_5, %c0_6, %c0_7] : memref<4x32x32xbf16, #tpu.memory_space<vmem>>, vector<1x32x32xbf16>
    %6 = vector.shape_cast %5 : vector<1x32x32xbf16> to vector<32x32xbf16>
    %c0_8 = arith.constant 0 : index
    %c0_9 = arith.constant 0 : index
    %7 = vector.load %arg5[%c0_8, %c0_9] : memref<28x32xf32, #tpu.memory_space<vmem>>, vector<1x32xf32>
    %c1 = arith.constant 1 : index
    %c0_10 = arith.constant 0 : index
    %8 = vector.load %arg5[%c1, %c0_10] : memref<28x32xf32, #tpu.memory_space<vmem>>, vector<1x32xf32>
    %c2 = arith.constant 2 : index
    %c0_11 = arith.constant 0 : index
    %9 = vector.load %arg5[%c2, %c0_11] : memref<28x32xf32, #tpu.memory_space<vmem>>, vector<1x32xf32>
    %c3 = arith.constant 3 : index
    %c0_12 = arith.constant 0 : index
    %10 = vector.load %arg5[%c3, %c0_12] : memref<28x32xf32, #tpu.memory_space<vmem>>, vector<1x32xf32>
    %cst = arith.constant dense<0.000000e+00> : vector<32x96xf32>
    %11 = tpu.matmul %1, %4, %cst {dimension_numbers = #tpu.dot_dimension_numbers<[1], [0], [0], [1], [0, 0, 1, 1], [], []>} : vector<32x32xbf16>, vector<32x96xbf16>, vector<32x96xf32> -> vector<32x96xf32>
    %12 = vector.extract_strided_slice %11 {offsets = [0, 0], sizes = [32, 32], strides = [1, 1]} : vector<32x96xf32> to vector<32x32xf32>
    %13 = vector.broadcast %7 : vector<1x32xf32> to vector<32x32xf32>
    %14 = arith.addf %12, %13 : vector<32x32xf32>
    %15 = vector.extract_strided_slice %11 {offsets = [0, 32], sizes = [32, 32], strides = [1, 1]} : vector<32x96xf32> to vector<32x32xf32>
    %16 = vector.broadcast %8 : vector<1x32xf32> to vector<32x32xf32>
    %17 = arith.addf %15, %16 : vector<32x32xf32>
    %18 = vector.extract_strided_slice %11 {offsets = [0, 64], sizes = [32, 32], strides = [1, 1]} : vector<32x96xf32> to vector<32x32xf32>
    %19 = vector.broadcast %9 : vector<1x32xf32> to vector<32x32xf32>
    %20 = arith.addf %18, %19 : vector<32x32xf32>
    %21 = arith.truncf %14 : vector<32x32xf32> to vector<32x32xbf16>
    %22 = vector.shape_cast %21 : vector<32x32xbf16> to vector<4x8x32xbf16>
    %23 = arith.truncf %17 : vector<32x32xf32> to vector<32x32xbf16>
    %24 = vector.shape_cast %23 : vector<32x32xbf16> to vector<4x8x32xbf16>
    %25 = arith.truncf %20 : vector<32x32xf32> to vector<32x32xbf16>
    %26 = vector.shape_cast %25 : vector<32x32xbf16> to vector<4x8x32xbf16>
    "tpu.trace_start"() <{level = 10 : i32, message = "bqd,bkd->bqk"}> : () -> ()
    %cst_13 = arith.constant dense<0.000000e+00> : vector<4x8x8xf32>
    %27 = tpu.matmul %22, %24, %cst_13 {dimension_numbers = #tpu.dot_dimension_numbers<[2], [2], [1], [1], [0, 0, 0, 1, 1, 1], [0], [0]>} : vector<4x8x32xbf16>, vector<4x8x32xbf16>, vector<4x8x8xf32> -> vector<4x8x8xf32>
    "tpu.trace_stop"() : () -> ()
    %cst_14 = arith.constant dense<0xFF800000> : vector<4x8xf32>
    %28 = vector.multi_reduction <maximumf>, %27, %cst_14 [2] : vector<4x8x8xf32> to vector<4x8xf32>
    %29 = vector.shape_cast %28 : vector<4x8xf32> to vector<4x8x1xf32>
    %30 = vector.broadcast %29 : vector<4x8x1xf32> to vector<4x8x8xf32>
    %31 = arith.subf %27, %30 : vector<4x8x8xf32>
    %32 = math.exp %31 : vector<4x8x8xf32>
    %cst_15 = arith.constant dense<0.000000e+00> : vector<4x8xf32>
    %33 = vector.multi_reduction <add>, %32, %cst_15 [2] : vector<4x8x8xf32> to vector<4x8xf32>
    %34 = vector.shape_cast %33 : vector<4x8xf32> to vector<4x8x1xf32>
    %35 = tpu.reciprocal %34 {approx = true} : vector<4x8x1xf32> -> vector<4x8x1xf32>
    %36 = vector.broadcast %35 : vector<4x8x1xf32> to vector<4x8x8xf32>
    %37 = arith.mulf %32, %36 : vector<4x8x8xf32>
    %38 = arith.truncf %37 : vector<4x8x8xf32> to vector<4x8x8xbf16>
    "tpu.trace_start"() <{level = 10 : i32, message = "bqk,bkd->bqd"}> : () -> ()
    %cst_16 = arith.constant dense<0.000000e+00> : vector<4x8x32xf32>
    %39 = tpu.matmul %38, %26, %cst_16 {dimension_numbers = #tpu.dot_dimension_numbers<[2], [1], [1], [2], [0, 0, 0, 1, 1, 2], [0], [0]>} : vector<4x8x8xbf16>, vector<4x8x32xbf16>, vector<4x8x32xf32> -> vector<4x8x32xf32>
    "tpu.trace_stop"() : () -> ()
    %40 = vector.shape_cast %39 : vector<4x8x32xf32> to vector<32x32xf32>
    %41 = arith.truncf %40 : vector<32x32xf32> to vector<32x32xbf16>
    %cst_17 = arith.constant dense<0.000000e+00> : vector<32x32xf32>
    %42 = tpu.matmul %41, %6, %cst_17 {dimension_numbers = #tpu.dot_dimension_numbers<[1], [0], [0], [1], [0, 0, 1, 1], [], []>} : vector<32x32xbf16>, vector<32x32xbf16>, vector<32x32xf32> -> vector<32x32xf32>
    %43 = vector.broadcast %10 : vector<1x32xf32> to vector<32x32xf32>
    %44 = arith.addf %42, %43 : vector<32x32xf32>
    %45 = arith.addf %2, %44 : vector<32x32xf32>
    %c5 = arith.constant 5 : index
    %c0_18 = arith.constant 0 : index
    %46 = vector.load %arg5[%c5, %c0_18] : memref<28x32xf32, #tpu.memory_space<vmem>>, vector<1x32xf32>
    %c6 = arith.constant 6 : index
    %c0_19 = arith.constant 0 : index
    %47 = vector.load %arg5[%c6, %c0_19] : memref<28x32xf32, #tpu.memory_space<vmem>>, vector<1x32xf32>
    %cst_20 = arith.constant dense<0.000000e+00> : vector<32xf32>
    %48 = vector.multi_reduction <add>, %45, %cst_20 [1] : vector<32x32xf32> to vector<32xf32>
    %49 = vector.shape_cast %48 : vector<32xf32> to vector<32x1xf32>
    %cst_21 = arith.constant 3.200000e+01 : f32
    %50 = vector.broadcast %cst_21 : f32 to vector<32x1xf32>
    %51 = arith.divf %49, %50 : vector<32x1xf32>
    %52 = vector.broadcast %51 : vector<32x1xf32> to vector<32x32xf32>
    %53 = arith.subf %45, %52 : vector<32x32xf32>
    %54 = arith.mulf %53, %53 : vector<32x32xf32>
    %cst_22 = arith.constant dense<0.000000e+00> : vector<32xf32>
    %55 = vector.multi_reduction <add>, %54, %cst_22 [1] : vector<32x32xf32> to vector<32xf32>
    %56 = vector.shape_cast %55 : vector<32xf32> to vector<32x1xf32>
    %cst_23 = arith.constant 3.200000e+01 : f32
    %57 = vector.broadcast %cst_23 : f32 to vector<32x1xf32>
    %58 = arith.divf %56, %57 : vector<32x1xf32>
    %59 = vector.broadcast %51 : vector<32x1xf32> to vector<32x32xf32>
    %60 = arith.subf %45, %59 : vector<32x32xf32>
    %cst_24 = arith.constant 9.99999974E-6 : f32
    %61 = vector.broadcast %cst_24 : f32 to vector<32x1xf32>
    %62 = arith.addf %58, %61 : vector<32x1xf32>
    %63 = math.rsqrt %62 : vector<32x1xf32>
    %64 = vector.broadcast %63 : vector<32x1xf32> to vector<32x32xf32>
    %65 = arith.mulf %60, %64 : vector<32x32xf32>
    %66 = vector.broadcast %46 : vector<1x32xf32> to vector<32x32xf32>
    %67 = arith.mulf %65, %66 : vector<32x32xf32>
    %68 = vector.broadcast %47 : vector<1x32xf32> to vector<32x32xf32>
    %69 = arith.addf %67, %68 : vector<32x32xf32>
    %70 = arith.truncf %69 : vector<32x32xf32> to vector<32x32xbf16>
    %cst_25 = arith.constant 0.000000e+00 : f32
    %71 = vector.broadcast %cst_25 : f32 to vector<32x32xf32>
    %c0_26 = arith.constant 0 : index
    %c0_27 = arith.constant 0 : index
    %c0_28 = arith.constant 0 : index
    %72 = vector.load %arg6[%c0_26, %c0_27, %c0_28] : memref<2x32x2048xbf16, #tpu.memory_space<vmem>>, vector<1x32x512xbf16>
    %73 = vector.shape_cast %72 : vector<1x32x512xbf16> to vector<32x512xbf16>
    %cst_29 = arith.constant dense<0.000000e+00> : vector<32x512xf32>
    %74 = tpu.matmul %70, %73, %cst_29 {dimension_numbers = #tpu.dot_dimension_numbers<[1], [0], [0], [1], [0, 0, 1, 1], [], []>} : vector<32x32xbf16>, vector<32x512xbf16>, vector<32x512xf32> -> vector<32x512xf32>
    %c0_30 = arith.constant 0 : index
    %c0_31 = arith.constant 0 : index
    %75 = vector.load %arg7[%c0_30, %c0_31] : memref<2x2048xf32, #tpu.memory_space<vmem>>, vector<1x512xf32>
    %76 = vector.broadcast %75 : vector<1x512xf32> to vector<32x512xf32>
    %77 = arith.addf %74, %76 : vector<32x512xf32>
    %cst_32 = arith.constant 0.000000e+00 : f32
    %78 = vector.broadcast %cst_32 : f32 to vector<32x512xf32>
    %79 = arith.maximumf %77, %78 : vector<32x512xf32>
    %80 = arith.truncf %79 : vector<32x512xf32> to vector<32x512xbf16>
    %c0_33 = arith.constant 0 : index
    %c0_34 = arith.constant 0 : index
    %c0_35 = arith.constant 0 : index
    %81 = vector.load %arg8[%c0_33, %c0_34, %c0_35] : memref<2x2048x32xbf16, #tpu.memory_space<vmem>>, vector<1x512x32xbf16>
    %82 = vector.shape_cast %81 : vector<1x512x32xbf16> to vector<512x32xbf16>
    %cst_36 = arith.constant dense<0.000000e+00> : vector<32x32xf32>
    %83 = tpu.matmul %80, %82, %cst_36 {dimension_numbers = #tpu.dot_dimension_numbers<[1], [0], [0], [1], [0, 0, 1, 1], [], []>} : vector<32x512xbf16>, vector<512x32xbf16>, vector<32x32xf32> -> vector<32x32xf32>
    %84 = arith.addf %71, %83 : vector<32x32xf32>
    %c0_37 = arith.constant 0 : index
    %c0_38 = arith.constant 0 : index
    %c512 = arith.constant 512 : index
    %85 = vector.load %arg6[%c0_37, %c0_38, %c512] : memref<2x32x2048xbf16, #tpu.memory_space<vmem>>, vector<1x32x512xbf16>
    %86 = vector.shape_cast %85 : vector<1x32x512xbf16> to vector<32x512xbf16>
    %cst_39 = arith.constant dense<0.000000e+00> : vector<32x512xf32>
    %87 = tpu.matmul %70, %86, %cst_39 {dimension_numbers = #tpu.dot_dimension_numbers<[1], [0], [0], [1], [0, 0, 1, 1], [], []>} : vector<32x32xbf16>, vector<32x512xbf16>, vector<32x512xf32> -> vector<32x512xf32>
    %c0_40 = arith.constant 0 : index
    %c512_41 = arith.constant 512 : index
    %88 = vector.load %arg7[%c0_40, %c512_41] : memref<2x2048xf32, #tpu.memory_space<vmem>>, vector<1x512xf32>
    %89 = vector.broadcast %88 : vector<1x512xf32> to vector<32x512xf32>
    %90 = arith.addf %87, %89 : vector<32x512xf32>
    %cst_42 = arith.constant 0.000000e+00 : f32
    %91 = vector.broadcast %cst_42 : f32 to vector<32x512xf32>
    %92 = arith.maximumf %90, %91 : vector<32x512xf32>
    %93 = arith.truncf %92 : vector<32x512xf32> to vector<32x512xbf16>
    %c0_43 = arith.constant 0 : index
    %c512_44 = arith.constant 512 : index
    %c0_45 = arith.constant 0 : index
    %94 = vector.load %arg8[%c0_43, %c512_44, %c0_45] : memref<2x2048x32xbf16, #tpu.memory_space<vmem>>, vector<1x512x32xbf16>
    %95 = vector.shape_cast %94 : vector<1x512x32xbf16> to vector<512x32xbf16>
    %cst_46 = arith.constant dense<0.000000e+00> : vector<32x32xf32>
    %96 = tpu.matmul %93, %95, %cst_46 {dimension_numbers = #tpu.dot_dimension_numbers<[1], [0], [0], [1], [0, 0, 1, 1], [], []>} : vector<32x512xbf16>, vector<512x32xbf16>, vector<32x32xf32> -> vector<32x32xf32>
    %97 = arith.addf %84, %96 : vector<32x32xf32>
    %c0_47 = arith.constant 0 : index
    %c0_48 = arith.constant 0 : index
    %c1024 = arith.constant 1024 : index
    %98 = vector.load %arg6[%c0_47, %c0_48, %c1024] : memref<2x32x2048xbf16, #tpu.memory_space<vmem>>, vector<1x32x512xbf16>
    %99 = vector.shape_cast %98 : vector<1x32x512xbf16> to vector<32x512xbf16>
    %cst_49 = arith.constant dense<0.000000e+00> : vector<32x512xf32>
    %100 = tpu.matmul %70, %99, %cst_49 {dimension_numbers = #tpu.dot_dimension_numbers<[1], [0], [0], [1], [0, 0, 1, 1], [], []>} : vector<32x32xbf16>, vector<32x512xbf16>, vector<32x512xf32> -> vector<32x512xf32>
    %c0_50 = arith.constant 0 : index
    %c1024_51 = arith.constant 1024 : index
    %101 = vector.load %arg7[%c0_50, %c1024_51] : memref<2x2048xf32, #tpu.memory_space<vmem>>, vector<1x512xf32>
    %102 = vector.broadcast %101 : vector<1x512xf32> to vector<32x512xf32>
    %103 = arith.addf %100, %102 : vector<32x512xf32>
    %cst_52 = arith.constant 0.000000e+00 : f32
    %104 = vector.broadcast %cst_52 : f32 to vector<32x512xf32>
    %105 = arith.maximumf %103, %104 : vector<32x512xf32>
    %106 = arith.truncf %105 : vector<32x512xf32> to vector<32x512xbf16>
    %c0_53 = arith.constant 0 : index
    %c1024_54 = arith.constant 1024 : index
    %c0_55 = arith.constant 0 : index
    %107 = vector.load %arg8[%c0_53, %c1024_54, %c0_55] : memref<2x2048x32xbf16, #tpu.memory_space<vmem>>, vector<1x512x32xbf16>
    %108 = vector.shape_cast %107 : vector<1x512x32xbf16> to vector<512x32xbf16>
    %cst_56 = arith.constant dense<0.000000e+00> : vector<32x32xf32>
    %109 = tpu.matmul %106, %108, %cst_56 {dimension_numbers = #tpu.dot_dimension_numbers<[1], [0], [0], [1], [0, 0, 1, 1], [], []>} : vector<32x512xbf16>, vector<512x32xbf16>, vector<32x32xf32> -> vector<32x32xf32>
    %110 = arith.addf %97, %109 : vector<32x32xf32>
    %c0_57 = arith.constant 0 : index
    %c0_58 = arith.constant 0 : index
    %c1536 = arith.constant 1536 : index
    %111 = vector.load %arg6[%c0_57, %c0_58, %c1536] : memref<2x32x2048xbf16, #tpu.memory_space<vmem>>, vector<1x32x512xbf16>
    %112 = vector.shape_cast %111 : vector<1x32x512xbf16> to vector<32x512xbf16>
    %cst_59 = arith.constant dense<0.000000e+00> : vector<32x512xf32>
    %113 = tpu.matmul %70, %112, %cst_59 {dimension_numbers = #tpu.dot_dimension_numbers<[1], [0], [0], [1], [0, 0, 1, 1], [], []>} : vector<32x32xbf16>, vector<32x512xbf16>, vector<32x512xf32> -> vector<32x512xf32>
    %c0_60 = arith.constant 0 : index
    %c1536_61 = arith.constant 1536 : index
    %114 = vector.load %arg7[%c0_60, %c1536_61] : memref<2x2048xf32, #tpu.memory_space<vmem>>, vector<1x512xf32>
    %115 = vector.broadcast %114 : vector<1x512xf32> to vector<32x512xf32>
    %116 = arith.addf %113, %115 : vector<32x512xf32>
    %cst_62 = arith.constant 0.000000e+00 : f32
    %117 = vector.broadcast %cst_62 : f32 to vector<32x512xf32>
    %118 = arith.maximumf %116, %117 : vector<32x512xf32>
    %119 = arith.truncf %118 : vector<32x512xf32> to vector<32x512xbf16>
    %c0_63 = arith.constant 0 : index
    %c1536_64 = arith.constant 1536 : index
    %c0_65 = arith.constant 0 : index
    %120 = vector.load %arg8[%c0_63, %c1536_64, %c0_65] : memref<2x2048x32xbf16, #tpu.memory_space<vmem>>, vector<1x512x32xbf16>
    %121 = vector.shape_cast %120 : vector<1x512x32xbf16> to vector<512x32xbf16>
    %cst_66 = arith.constant dense<0.000000e+00> : vector<32x32xf32>
    %122 = tpu.matmul %119, %121, %cst_66 {dimension_numbers = #tpu.dot_dimension_numbers<[1], [0], [0], [1], [0, 0, 1, 1], [], []>} : vector<32x512xbf16>, vector<512x32xbf16>, vector<32x32xf32> -> vector<32x32xf32>
    %123 = arith.addf %110, %122 : vector<32x32xf32>
    %124 = arith.addf %69, %123 : vector<32x32xf32>
    %c4 = arith.constant 4 : index
    %c0_67 = arith.constant 0 : index
    %125 = vector.load %arg5[%c4, %c0_67] : memref<28x32xf32, #tpu.memory_space<vmem>>, vector<1x32xf32>
    %126 = vector.broadcast %125 : vector<1x32xf32> to vector<32x32xf32>
    %127 = arith.addf %124, %126 : vector<32x32xf32>
    %c7 = arith.constant 7 : index
    %c0_68 = arith.constant 0 : index
    %128 = vector.load %arg5[%c7, %c0_68] : memref<28x32xf32, #tpu.memory_space<vmem>>, vector<1x32xf32>
    %c8 = arith.constant 8 : index
    %c0_69 = arith.constant 0 : index
    %129 = vector.load %arg5[%c8, %c0_69] : memref<28x32xf32, #tpu.memory_space<vmem>>, vector<1x32xf32>
    %cst_70 = arith.constant dense<0.000000e+00> : vector<32xf32>
    %130 = vector.multi_reduction <add>, %127, %cst_70 [1] : vector<32x32xf32> to vector<32xf32>
    %131 = vector.shape_cast %130 : vector<32xf32> to vector<32x1xf32>
    %cst_71 = arith.constant 3.200000e+01 : f32
    %132 = vector.broadcast %cst_71 : f32 to vector<32x1xf32>
    %133 = arith.divf %131, %132 : vector<32x1xf32>
    %134 = vector.broadcast %133 : vector<32x1xf32> to vector<32x32xf32>
    %135 = arith.subf %127, %134 : vector<32x32xf32>
    %136 = arith.mulf %135, %135 : vector<32x32xf32>
    %cst_72 = arith.constant dense<0.000000e+00> : vector<32xf32>
    %137 = vector.multi_reduction <add>, %136, %cst_72 [1] : vector<32x32xf32> to vector<32xf32>
    %138 = vector.shape_cast %137 : vector<32xf32> to vector<32x1xf32>
    %cst_73 = arith.constant 3.200000e+01 : f32
    %139 = vector.broadcast %cst_73 : f32 to vector<32x1xf32>
    %140 = arith.divf %138, %139 : vector<32x1xf32>
    %141 = vector.broadcast %133 : vector<32x1xf32> to vector<32x32xf32>
    %142 = arith.subf %127, %141 : vector<32x32xf32>
    %cst_74 = arith.constant 9.99999974E-6 : f32
    %143 = vector.broadcast %cst_74 : f32 to vector<32x1xf32>
    %144 = arith.addf %140, %143 : vector<32x1xf32>
    %145 = math.rsqrt %144 : vector<32x1xf32>
    %146 = vector.broadcast %145 : vector<32x1xf32> to vector<32x32xf32>
    %147 = arith.mulf %142, %146 : vector<32x32xf32>
    %148 = vector.broadcast %128 : vector<1x32xf32> to vector<32x32xf32>
    %149 = arith.mulf %147, %148 : vector<32x32xf32>
    %150 = vector.broadcast %129 : vector<1x32xf32> to vector<32x32xf32>
    %151 = arith.addf %149, %150 : vector<32x32xf32>
    %c9 = arith.constant 9 : index
    %c0_75 = arith.constant 0 : index
    %152 = vector.load %arg5[%c9, %c0_75] : memref<28x32xf32, #tpu.memory_space<vmem>>, vector<1x32xf32>
    %c10 = arith.constant 10 : index
    %c0_76 = arith.constant 0 : index
    %153 = vector.load %arg5[%c10, %c0_76] : memref<28x32xf32, #tpu.memory_space<vmem>>, vector<1x32xf32>
    %cst_77 = arith.constant dense<0.000000e+00> : vector<32xf32>
    %154 = vector.multi_reduction <add>, %151, %cst_77 [1] : vector<32x32xf32> to vector<32xf32>
    %155 = vector.shape_cast %154 : vector<32xf32> to vector<32x1xf32>
    %cst_78 = arith.constant 3.200000e+01 : f32
    %156 = vector.broadcast %cst_78 : f32 to vector<32x1xf32>
    %157 = arith.divf %155, %156 : vector<32x1xf32>
    %158 = vector.broadcast %157 : vector<32x1xf32> to vector<32x32xf32>
    %159 = arith.subf %151, %158 : vector<32x32xf32>
    %160 = arith.mulf %159, %159 : vector<32x32xf32>
    %cst_79 = arith.constant dense<0.000000e+00> : vector<32xf32>
    %161 = vector.multi_reduction <add>, %160, %cst_79 [1] : vector<32x32xf32> to vector<32xf32>
    %162 = vector.shape_cast %161 : vector<32xf32> to vector<32x1xf32>
    %cst_80 = arith.constant 3.200000e+01 : f32
    %163 = vector.broadcast %cst_80 : f32 to vector<32x1xf32>
    %164 = arith.divf %162, %163 : vector<32x1xf32>
    %165 = vector.broadcast %157 : vector<32x1xf32> to vector<32x32xf32>
    %166 = arith.subf %151, %165 : vector<32x32xf32>
    %cst_81 = arith.constant 9.99999974E-6 : f32
    %167 = vector.broadcast %cst_81 : f32 to vector<32x1xf32>
    %168 = arith.addf %164, %167 : vector<32x1xf32>
    %169 = math.rsqrt %168 : vector<32x1xf32>
    %170 = vector.broadcast %169 : vector<32x1xf32> to vector<32x32xf32>
    %171 = arith.mulf %166, %170 : vector<32x32xf32>
    %172 = vector.broadcast %152 : vector<1x32xf32> to vector<32x32xf32>
    %173 = arith.mulf %171, %172 : vector<32x32xf32>
    %174 = vector.broadcast %153 : vector<1x32xf32> to vector<32x32xf32>
    %175 = arith.addf %173, %174 : vector<32x32xf32>
    %176 = arith.truncf %175 : vector<32x32xf32> to vector<32x32xbf16>
    %c1_82 = arith.constant 1 : index
    %c0_83 = arith.constant 0 : index
    %c0_84 = arith.constant 0 : index
    %177 = vector.load %arg2[%c1_82, %c0_83, %c0_84] : memref<2x32x96xbf16, #tpu.memory_space<vmem>>, vector<1x32x96xbf16>
    %178 = vector.shape_cast %177 : vector<1x32x96xbf16> to vector<32x96xbf16>
    %c1_85 = arith.constant 1 : index
    %c0_86 = arith.constant 0 : index
    %c0_87 = arith.constant 0 : index
    %179 = vector.load %arg4[%c1_85, %c0_86, %c0_87] : memref<4x32x32xbf16, #tpu.memory_space<vmem>>, vector<1x32x32xbf16>
    %180 = vector.shape_cast %179 : vector<1x32x32xbf16> to vector<32x32xbf16>
    %c11 = arith.constant 11 : index
    %c0_88 = arith.constant 0 : index
    %181 = vector.load %arg5[%c11, %c0_88] : memref<28x32xf32, #tpu.memory_space<vmem>>, vector<1x32xf32>
    %c12 = arith.constant 12 : index
    %c0_89 = arith.constant 0 : index
    %182 = vector.load %arg5[%c12, %c0_89] : memref<28x32xf32, #tpu.memory_space<vmem>>, vector<1x32xf32>
    %c13 = arith.constant 13 : index
    %c0_90 = arith.constant 0 : index
    %183 = vector.load %arg5[%c13, %c0_90] : memref<28x32xf32, #tpu.memory_space<vmem>>, vector<1x32xf32>
    %c14 = arith.constant 14 : index
    %c0_91 = arith.constant 0 : index
    %184 = vector.load %arg5[%c14, %c0_91] : memref<28x32xf32, #tpu.memory_space<vmem>>, vector<1x32xf32>
    %cst_92 = arith.constant dense<0.000000e+00> : vector<32x96xf32>
    %185 = tpu.matmul %1, %178, %cst_92 {dimension_numbers = #tpu.dot_dimension_numbers<[1], [0], [0], [1], [0, 0, 1, 1], [], []>} : vector<32x32xbf16>, vector<32x96xbf16>, vector<32x96xf32> -> vector<32x96xf32>
    %186 = vector.extract_strided_slice %185 {offsets = [0, 0], sizes = [32, 32], strides = [1, 1]} : vector<32x96xf32> to vector<32x32xf32>
    %187 = vector.broadcast %181 : vector<1x32xf32> to vector<32x32xf32>
    %188 = arith.addf %186, %187 : vector<32x32xf32>
    %189 = vector.extract_strided_slice %185 {offsets = [0, 32], sizes = [32, 32], strides = [1, 1]} : vector<32x96xf32> to vector<32x32xf32>
    %190 = vector.broadcast %182 : vector<1x32xf32> to vector<32x32xf32>
    %191 = arith.addf %189, %190 : vector<32x32xf32>
    %192 = vector.extract_strided_slice %185 {offsets = [0, 64], sizes = [32, 32], strides = [1, 1]} : vector<32x96xf32> to vector<32x32xf32>
    %193 = vector.broadcast %183 : vector<1x32xf32> to vector<32x32xf32>
    %194 = arith.addf %192, %193 : vector<32x32xf32>
    %195 = arith.truncf %188 : vector<32x32xf32> to vector<32x32xbf16>
    %196 = vector.shape_cast %195 : vector<32x32xbf16> to vector<4x8x32xbf16>
    %197 = arith.truncf %191 : vector<32x32xf32> to vector<32x32xbf16>
    %198 = vector.shape_cast %197 : vector<32x32xbf16> to vector<4x8x32xbf16>
    %199 = arith.truncf %194 : vector<32x32xf32> to vector<32x32xbf16>
    %200 = vector.shape_cast %199 : vector<32x32xbf16> to vector<4x8x32xbf16>
    "tpu.trace_start"() <{level = 10 : i32, message = "bqd,bkd->bqk"}> : () -> ()
    %cst_93 = arith.constant dense<0.000000e+00> : vector<4x8x8xf32>
    %201 = tpu.matmul %196, %198, %cst_93 {dimension_numbers = #tpu.dot_dimension_numbers<[2], [2], [1], [1], [0, 0, 0, 1, 1, 1], [0], [0]>} : vector<4x8x32xbf16>, vector<4x8x32xbf16>, vector<4x8x8xf32> -> vector<4x8x8xf32>
    "tpu.trace_stop"() : () -> ()
    %cst_94 = arith.constant dense<0xFF800000> : vector<4x8xf32>
    %202 = vector.multi_reduction <maximumf>, %201, %cst_94 [2] : vector<4x8x8xf32> to vector<4x8xf32>
    %203 = vector.shape_cast %202 : vector<4x8xf32> to vector<4x8x1xf32>
    %204 = vector.broadcast %203 : vector<4x8x1xf32> to vector<4x8x8xf32>
    %205 = arith.subf %201, %204 : vector<4x8x8xf32>
    %206 = math.exp %205 : vector<4x8x8xf32>
    %cst_95 = arith.constant dense<0.000000e+00> : vector<4x8xf32>
    %207 = vector.multi_reduction <add>, %206, %cst_95 [2] : vector<4x8x8xf32> to vector<4x8xf32>
    %208 = vector.shape_cast %207 : vector<4x8xf32> to vector<4x8x1xf32>
    %209 = tpu.reciprocal %208 {approx = true} : vector<4x8x1xf32> -> vector<4x8x1xf32>
    %210 = vector.broadcast %209 : vector<4x8x1xf32> to vector<4x8x8xf32>
    %211 = arith.mulf %206, %210 : vector<4x8x8xf32>
    %212 = arith.truncf %211 : vector<4x8x8xf32> to vector<4x8x8xbf16>
    "tpu.trace_start"() <{level = 10 : i32, message = "bqk,bkd->bqd"}> : () -> ()
    %cst_96 = arith.constant dense<0.000000e+00> : vector<4x8x32xf32>
    %213 = tpu.matmul %212, %200, %cst_96 {dimension_numbers = #tpu.dot_dimension_numbers<[2], [1], [1], [2], [0, 0, 0, 1, 1, 2], [0], [0]>} : vector<4x8x8xbf16>, vector<4x8x32xbf16>, vector<4x8x32xf32> -> vector<4x8x32xf32>
    "tpu.trace_stop"() : () -> ()
    %214 = vector.shape_cast %213 : vector<4x8x32xf32> to vector<32x32xf32>
    %215 = arith.truncf %214 : vector<32x32xf32> to vector<32x32xbf16>
    %cst_97 = arith.constant dense<0.000000e+00> : vector<32x32xf32>
    %216 = tpu.matmul %215, %180, %cst_97 {dimension_numbers = #tpu.dot_dimension_numbers<[1], [0], [0], [1], [0, 0, 1, 1], [], []>} : vector<32x32xbf16>, vector<32x32xbf16>, vector<32x32xf32> -> vector<32x32xf32>
    %217 = vector.broadcast %184 : vector<1x32xf32> to vector<32x32xf32>
    %218 = arith.addf %216, %217 : vector<32x32xf32>
    %219 = arith.addf %2, %218 : vector<32x32xf32>
    %c20 = arith.constant 20 : index
    %c0_98 = arith.constant 0 : index
    %220 = vector.load %arg5[%c20, %c0_98] : memref<28x32xf32, #tpu.memory_space<vmem>>, vector<1x32xf32>
    %c21 = arith.constant 21 : index
    %c0_99 = arith.constant 0 : index
    %221 = vector.load %arg5[%c21, %c0_99] : memref<28x32xf32, #tpu.memory_space<vmem>>, vector<1x32xf32>
    %cst_100 = arith.constant dense<0.000000e+00> : vector<32xf32>
    %222 = vector.multi_reduction <add>, %219, %cst_100 [1] : vector<32x32xf32> to vector<32xf32>
    %223 = vector.shape_cast %222 : vector<32xf32> to vector<32x1xf32>
    %cst_101 = arith.constant 3.200000e+01 : f32
    %224 = vector.broadcast %cst_101 : f32 to vector<32x1xf32>
    %225 = arith.divf %223, %224 : vector<32x1xf32>
    %226 = vector.broadcast %225 : vector<32x1xf32> to vector<32x32xf32>
    %227 = arith.subf %219, %226 : vector<32x32xf32>
    %228 = arith.mulf %227, %227 : vector<32x32xf32>
    %cst_102 = arith.constant dense<0.000000e+00> : vector<32xf32>
    %229 = vector.multi_reduction <add>, %228, %cst_102 [1] : vector<32x32xf32> to vector<32xf32>
    %230 = vector.shape_cast %229 : vector<32xf32> to vector<32x1xf32>
    %cst_103 = arith.constant 3.200000e+01 : f32
    %231 = vector.broadcast %cst_103 : f32 to vector<32x1xf32>
    %232 = arith.divf %230, %231 : vector<32x1xf32>
    %233 = vector.broadcast %225 : vector<32x1xf32> to vector<32x32xf32>
    %234 = arith.subf %219, %233 : vector<32x32xf32>
    %cst_104 = arith.constant 9.99999974E-6 : f32
    %235 = vector.broadcast %cst_104 : f32 to vector<32x1xf32>
    %236 = arith.addf %232, %235 : vector<32x1xf32>
    %237 = math.rsqrt %236 : vector<32x1xf32>
    %238 = vector.broadcast %237 : vector<32x1xf32> to vector<32x32xf32>
    %239 = arith.mulf %234, %238 : vector<32x32xf32>
    %240 = vector.broadcast %220 : vector<1x32xf32> to vector<32x32xf32>
    %241 = arith.mulf %239, %240 : vector<32x32xf32>
    %242 = vector.broadcast %221 : vector<1x32xf32> to vector<32x32xf32>
    %243 = arith.addf %241, %242 : vector<32x32xf32>
    %244 = arith.truncf %243 : vector<32x32xf32> to vector<32x32xbf16>
    %c2_105 = arith.constant 2 : index
    %c0_106 = arith.constant 0 : index
    %c0_107 = arith.constant 0 : index
    %245 = vector.load %arg4[%c2_105, %c0_106, %c0_107] : memref<4x32x32xbf16, #tpu.memory_space<vmem>>, vector<1x32x32xbf16>
    %246 = vector.shape_cast %245 : vector<1x32x32xbf16> to vector<32x32xbf16>
    %c0_108 = arith.constant 0 : index
    %c0_109 = arith.constant 0 : index
    %247 = vector.load %arg3[%c0_108, %c0_109] : memref<32x64xbf16, #tpu.memory_space<vmem>>, vector<32x64xbf16>
    %c3_110 = arith.constant 3 : index
    %c0_111 = arith.constant 0 : index
    %c0_112 = arith.constant 0 : index
    %248 = vector.load %arg4[%c3_110, %c0_111, %c0_112] : memref<4x32x32xbf16, #tpu.memory_space<vmem>>, vector<1x32x32xbf16>
    %249 = vector.shape_cast %248 : vector<1x32x32xbf16> to vector<32x32xbf16>
    %c15 = arith.constant 15 : index
    %c0_113 = arith.constant 0 : index
    %250 = vector.load %arg5[%c15, %c0_113] : memref<28x32xf32, #tpu.memory_space<vmem>>, vector<1x32xf32>
    %c16 = arith.constant 16 : index
    %c0_114 = arith.constant 0 : index
    %251 = vector.load %arg5[%c16, %c0_114] : memref<28x32xf32, #tpu.memory_space<vmem>>, vector<1x32xf32>
    %c17 = arith.constant 17 : index
    %c0_115 = arith.constant 0 : index
    %252 = vector.load %arg5[%c17, %c0_115] : memref<28x32xf32, #tpu.memory_space<vmem>>, vector<1x32xf32>
    %c18 = arith.constant 18 : index
    %c0_116 = arith.constant 0 : index
    %253 = vector.load %arg5[%c18, %c0_116] : memref<28x32xf32, #tpu.memory_space<vmem>>, vector<1x32xf32>
    %cst_117 = arith.constant dense<0.000000e+00> : vector<32x32xf32>
    %254 = tpu.matmul %244, %246, %cst_117 {dimension_numbers = #tpu.dot_dimension_numbers<[1], [0], [0], [1], [0, 0, 1, 1], [], []>} : vector<32x32xbf16>, vector<32x32xbf16>, vector<32x32xf32> -> vector<32x32xf32>
    %255 = vector.broadcast %250 : vector<1x32xf32> to vector<32x32xf32>
    %256 = arith.addf %254, %255 : vector<32x32xf32>
    %cst_118 = arith.constant dense<0.000000e+00> : vector<32x64xf32>
    %257 = tpu.matmul %176, %247, %cst_118 {dimension_numbers = #tpu.dot_dimension_numbers<[1], [0], [0], [1], [0, 0, 1, 1], [], []>} : vector<32x32xbf16>, vector<32x64xbf16>, vector<32x64xf32> -> vector<32x64xf32>
    %258 = vector.extract_strided_slice %257 {offsets = [0, 0], sizes = [32, 32], strides = [1, 1]} : vector<32x64xf32> to vector<32x32xf32>
    %259 = vector.broadcast %251 : vector<1x32xf32> to vector<32x32xf32>
    %260 = arith.addf %258, %259 : vector<32x32xf32>
    %261 = vector.extract_strided_slice %257 {offsets = [0, 32], sizes = [32, 32], strides = [1, 1]} : vector<32x64xf32> to vector<32x32xf32>
    %262 = vector.broadcast %252 : vector<1x32xf32> to vector<32x32xf32>
    %263 = arith.addf %261, %262 : vector<32x32xf32>
    %264 = arith.truncf %256 : vector<32x32xf32> to vector<32x32xbf16>
    %265 = vector.shape_cast %264 : vector<32x32xbf16> to vector<4x8x32xbf16>
    %266 = arith.truncf %260 : vector<32x32xf32> to vector<32x32xbf16>
    %267 = vector.shape_cast %266 : vector<32x32xbf16> to vector<4x8x32xbf16>
    %268 = arith.truncf %263 : vector<32x32xf32> to vector<32x32xbf16>
    %269 = vector.shape_cast %268 : vector<32x32xbf16> to vector<4x8x32xbf16>
    "tpu.trace_start"() <{level = 10 : i32, message = "bqd,bkd->bqk"}> : () -> ()
    %cst_119 = arith.constant dense<0.000000e+00> : vector<4x8x8xf32>
    %270 = tpu.matmul %265, %267, %cst_119 {dimension_numbers = #tpu.dot_dimension_numbers<[2], [2], [1], [1], [0, 0, 0, 1, 1, 1], [0], [0]>} : vector<4x8x32xbf16>, vector<4x8x32xbf16>, vector<4x8x8xf32> -> vector<4x8x8xf32>
    "tpu.trace_stop"() : () -> ()
    %cst_120 = arith.constant dense<0xFF800000> : vector<4x8xf32>
    %271 = vector.multi_reduction <maximumf>, %270, %cst_120 [2] : vector<4x8x8xf32> to vector<4x8xf32>
    %272 = vector.shape_cast %271 : vector<4x8xf32> to vector<4x8x1xf32>
    %273 = vector.broadcast %272 : vector<4x8x1xf32> to vector<4x8x8xf32>
    %274 = arith.subf %270, %273 : vector<4x8x8xf32>
    %275 = math.exp %274 : vector<4x8x8xf32>
    %cst_121 = arith.constant dense<0.000000e+00> : vector<4x8xf32>
    %276 = vector.multi_reduction <add>, %275, %cst_121 [2] : vector<4x8x8xf32> to vector<4x8xf32>
    %277 = vector.shape_cast %276 : vector<4x8xf32> to vector<4x8x1xf32>
    %278 = tpu.reciprocal %277 {approx = true} : vector<4x8x1xf32> -> vector<4x8x1xf32>
    %279 = vector.broadcast %278 : vector<4x8x1xf32> to vector<4x8x8xf32>
    %280 = arith.mulf %275, %279 : vector<4x8x8xf32>
    %281 = arith.truncf %280 : vector<4x8x8xf32> to vector<4x8x8xbf16>
    "tpu.trace_start"() <{level = 10 : i32, message = "bqk,bkd->bqd"}> : () -> ()
    %cst_122 = arith.constant dense<0.000000e+00> : vector<4x8x32xf32>
    %282 = tpu.matmul %281, %269, %cst_122 {dimension_numbers = #tpu.dot_dimension_numbers<[2], [1], [1], [2], [0, 0, 0, 1, 1, 2], [0], [0]>} : vector<4x8x8xbf16>, vector<4x8x32xbf16>, vector<4x8x32xf32> -> vector<4x8x32xf32>
    "tpu.trace_stop"() : () -> ()
    %283 = vector.shape_cast %282 : vector<4x8x32xf32> to vector<32x32xf32>
    %284 = arith.truncf %283 : vector<32x32xf32> to vector<32x32xbf16>
    %cst_123 = arith.constant dense<0.000000e+00> : vector<32x32xf32>
    %285 = tpu.matmul %284, %249, %cst_123 {dimension_numbers = #tpu.dot_dimension_numbers<[1], [0], [0], [1], [0, 0, 1, 1], [], []>} : vector<32x32xbf16>, vector<32x32xbf16>, vector<32x32xf32> -> vector<32x32xf32>
    %286 = vector.broadcast %253 : vector<1x32xf32> to vector<32x32xf32>
    %287 = arith.addf %285, %286 : vector<32x32xf32>
    %288 = arith.addf %243, %287 : vector<32x32xf32>
    %c22 = arith.constant 22 : index
    %c0_124 = arith.constant 0 : index
    %289 = vector.load %arg5[%c22, %c0_124] : memref<28x32xf32, #tpu.memory_space<vmem>>, vector<1x32xf32>
    %c23 = arith.constant 23 : index
    %c0_125 = arith.constant 0 : index
    %290 = vector.load %arg5[%c23, %c0_125] : memref<28x32xf32, #tpu.memory_space<vmem>>, vector<1x32xf32>
    %cst_126 = arith.constant dense<0.000000e+00> : vector<32xf32>
    %291 = vector.multi_reduction <add>, %288, %cst_126 [1] : vector<32x32xf32> to vector<32xf32>
    %292 = vector.shape_cast %291 : vector<32xf32> to vector<32x1xf32>
    %cst_127 = arith.constant 3.200000e+01 : f32
    %293 = vector.broadcast %cst_127 : f32 to vector<32x1xf32>
    %294 = arith.divf %292, %293 : vector<32x1xf32>
    %295 = vector.broadcast %294 : vector<32x1xf32> to vector<32x32xf32>
    %296 = arith.subf %288, %295 : vector<32x32xf32>
    %297 = arith.mulf %296, %296 : vector<32x32xf32>
    %cst_128 = arith.constant dense<0.000000e+00> : vector<32xf32>
    %298 = vector.multi_reduction <add>, %297, %cst_128 [1] : vector<32x32xf32> to vector<32xf32>
    %299 = vector.shape_cast %298 : vector<32xf32> to vector<32x1xf32>
    %cst_129 = arith.constant 3.200000e+01 : f32
    %300 = vector.broadcast %cst_129 : f32 to vector<32x1xf32>
    %301 = arith.divf %299, %300 : vector<32x1xf32>
    %302 = vector.broadcast %294 : vector<32x1xf32> to vector<32x32xf32>
    %303 = arith.subf %288, %302 : vector<32x32xf32>
    %cst_130 = arith.constant 9.99999974E-6 : f32
    %304 = vector.broadcast %cst_130 : f32 to vector<32x1xf32>
    %305 = arith.addf %301, %304 : vector<32x1xf32>
    %306 = math.rsqrt %305 : vector<32x1xf32>
    %307 = vector.broadcast %306 : vector<32x1xf32> to vector<32x32xf32>
    %308 = arith.mulf %303, %307 : vector<32x32xf32>
    %309 = vector.broadcast %289 : vector<1x32xf32> to vector<32x32xf32>
    %310 = arith.mulf %308, %309 : vector<32x32xf32>
    %311 = vector.broadcast %290 : vector<1x32xf32> to vector<32x32xf32>
    %312 = arith.addf %310, %311 : vector<32x32xf32>
    %313 = arith.truncf %312 : vector<32x32xf32> to vector<32x32xbf16>
    %cst_131 = arith.constant 0.000000e+00 : f32
    %314 = vector.broadcast %cst_131 : f32 to vector<32x32xf32>
    %c1_132 = arith.constant 1 : index
    %c0_133 = arith.constant 0 : index
    %c0_134 = arith.constant 0 : index
    %315 = vector.load %arg6[%c1_132, %c0_133, %c0_134] : memref<2x32x2048xbf16, #tpu.memory_space<vmem>>, vector<1x32x512xbf16>
    %316 = vector.shape_cast %315 : vector<1x32x512xbf16> to vector<32x512xbf16>
    %cst_135 = arith.constant dense<0.000000e+00> : vector<32x512xf32>
    %317 = tpu.matmul %313, %316, %cst_135 {dimension_numbers = #tpu.dot_dimension_numbers<[1], [0], [0], [1], [0, 0, 1, 1], [], []>} : vector<32x32xbf16>, vector<32x512xbf16>, vector<32x512xf32> -> vector<32x512xf32>
    %c1_136 = arith.constant 1 : index
    %c0_137 = arith.constant 0 : index
    %318 = vector.load %arg7[%c1_136, %c0_137] : memref<2x2048xf32, #tpu.memory_space<vmem>>, vector<1x512xf32>
    %319 = vector.broadcast %318 : vector<1x512xf32> to vector<32x512xf32>
    %320 = arith.addf %317, %319 : vector<32x512xf32>
    %cst_138 = arith.constant 0.000000e+00 : f32
    %321 = vector.broadcast %cst_138 : f32 to vector<32x512xf32>
    %322 = arith.maximumf %320, %321 : vector<32x512xf32>
    %323 = arith.truncf %322 : vector<32x512xf32> to vector<32x512xbf16>
    %c1_139 = arith.constant 1 : index
    %c0_140 = arith.constant 0 : index
    %c0_141 = arith.constant 0 : index
    %324 = vector.load %arg8[%c1_139, %c0_140, %c0_141] : memref<2x2048x32xbf16, #tpu.memory_space<vmem>>, vector<1x512x32xbf16>
    %325 = vector.shape_cast %324 : vector<1x512x32xbf16> to vector<512x32xbf16>
    %cst_142 = arith.constant dense<0.000000e+00> : vector<32x32xf32>
    %326 = tpu.matmul %323, %325, %cst_142 {dimension_numbers = #tpu.dot_dimension_numbers<[1], [0], [0], [1], [0, 0, 1, 1], [], []>} : vector<32x512xbf16>, vector<512x32xbf16>, vector<32x32xf32> -> vector<32x32xf32>
    %327 = arith.addf %314, %326 : vector<32x32xf32>
    %c1_143 = arith.constant 1 : index
    %c0_144 = arith.constant 0 : index
    %c512_145 = arith.constant 512 : index
    %328 = vector.load %arg6[%c1_143, %c0_144, %c512_145] : memref<2x32x2048xbf16, #tpu.memory_space<vmem>>, vector<1x32x512xbf16>
    %329 = vector.shape_cast %328 : vector<1x32x512xbf16> to vector<32x512xbf16>
    %cst_146 = arith.constant dense<0.000000e+00> : vector<32x512xf32>
    %330 = tpu.matmul %313, %329, %cst_146 {dimension_numbers = #tpu.dot_dimension_numbers<[1], [0], [0], [1], [0, 0, 1, 1], [], []>} : vector<32x32xbf16>, vector<32x512xbf16>, vector<32x512xf32> -> vector<32x512xf32>
    %c1_147 = arith.constant 1 : index
    %c512_148 = arith.constant 512 : index
    %331 = vector.load %arg7[%c1_147, %c512_148] : memref<2x2048xf32, #tpu.memory_space<vmem>>, vector<1x512xf32>
    %332 = vector.broadcast %331 : vector<1x512xf32> to vector<32x512xf32>
    %333 = arith.addf %330, %332 : vector<32x512xf32>
    %cst_149 = arith.constant 0.000000e+00 : f32
    %334 = vector.broadcast %cst_149 : f32 to vector<32x512xf32>
    %335 = arith.maximumf %333, %334 : vector<32x512xf32>
    %336 = arith.truncf %335 : vector<32x512xf32> to vector<32x512xbf16>
    %c1_150 = arith.constant 1 : index
    %c512_151 = arith.constant 512 : index
    %c0_152 = arith.constant 0 : index
    %337 = vector.load %arg8[%c1_150, %c512_151, %c0_152] : memref<2x2048x32xbf16, #tpu.memory_space<vmem>>, vector<1x512x32xbf16>
    %338 = vector.shape_cast %337 : vector<1x512x32xbf16> to vector<512x32xbf16>
    %cst_153 = arith.constant dense<0.000000e+00> : vector<32x32xf32>
    %339 = tpu.matmul %336, %338, %cst_153 {dimension_numbers = #tpu.dot_dimension_numbers<[1], [0], [0], [1], [0, 0, 1, 1], [], []>} : vector<32x512xbf16>, vector<512x32xbf16>, vector<32x32xf32> -> vector<32x32xf32>
    %340 = arith.addf %327, %339 : vector<32x32xf32>
    %c1_154 = arith.constant 1 : index
    %c0_155 = arith.constant 0 : index
    %c1024_156 = arith.constant 1024 : index
    %341 = vector.load %arg6[%c1_154, %c0_155, %c1024_156] : memref<2x32x2048xbf16, #tpu.memory_space<vmem>>, vector<1x32x512xbf16>
    %342 = vector.shape_cast %341 : vector<1x32x512xbf16> to vector<32x512xbf16>
    %cst_157 = arith.constant dense<0.000000e+00> : vector<32x512xf32>
    %343 = tpu.matmul %313, %342, %cst_157 {dimension_numbers = #tpu.dot_dimension_numbers<[1], [0], [0], [1], [0, 0, 1, 1], [], []>} : vector<32x32xbf16>, vector<32x512xbf16>, vector<32x512xf32> -> vector<32x512xf32>
    %c1_158 = arith.constant 1 : index
    %c1024_159 = arith.constant 1024 : index
    %344 = vector.load %arg7[%c1_158, %c1024_159] : memref<2x2048xf32, #tpu.memory_space<vmem>>, vector<1x512xf32>
    %345 = vector.broadcast %344 : vector<1x512xf32> to vector<32x512xf32>
    %346 = arith.addf %343, %345 : vector<32x512xf32>
    %cst_160 = arith.constant 0.000000e+00 : f32
    %347 = vector.broadcast %cst_160 : f32 to vector<32x512xf32>
    %348 = arith.maximumf %346, %347 : vector<32x512xf32>
    %349 = arith.truncf %348 : vector<32x512xf32> to vector<32x512xbf16>
    %c1_161 = arith.constant 1 : index
    %c1024_162 = arith.constant 1024 : index
    %c0_163 = arith.constant 0 : index
    %350 = vector.load %arg8[%c1_161, %c1024_162, %c0_163] : memref<2x2048x32xbf16, #tpu.memory_space<vmem>>, vector<1x512x32xbf16>
    %351 = vector.shape_cast %350 : vector<1x512x32xbf16> to vector<512x32xbf16>
    %cst_164 = arith.constant dense<0.000000e+00> : vector<32x32xf32>
    %352 = tpu.matmul %349, %351, %cst_164 {dimension_numbers = #tpu.dot_dimension_numbers<[1], [0], [0], [1], [0, 0, 1, 1], [], []>} : vector<32x512xbf16>, vector<512x32xbf16>, vector<32x32xf32> -> vector<32x32xf32>
    %353 = arith.addf %340, %352 : vector<32x32xf32>
    %c1_165 = arith.constant 1 : index
    %c0_166 = arith.constant 0 : index
    %c1536_167 = arith.constant 1536 : index
    %354 = vector.load %arg6[%c1_165, %c0_166, %c1536_167] : memref<2x32x2048xbf16, #tpu.memory_space<vmem>>, vector<1x32x512xbf16>
    %355 = vector.shape_cast %354 : vector<1x32x512xbf16> to vector<32x512xbf16>
    %cst_168 = arith.constant dense<0.000000e+00> : vector<32x512xf32>
    %356 = tpu.matmul %313, %355, %cst_168 {dimension_numbers = #tpu.dot_dimension_numbers<[1], [0], [0], [1], [0, 0, 1, 1], [], []>} : vector<32x32xbf16>, vector<32x512xbf16>, vector<32x512xf32> -> vector<32x512xf32>
    %c1_169 = arith.constant 1 : index
    %c1536_170 = arith.constant 1536 : index
    %357 = vector.load %arg7[%c1_169, %c1536_170] : memref<2x2048xf32, #tpu.memory_space<vmem>>, vector<1x512xf32>
    %358 = vector.broadcast %357 : vector<1x512xf32> to vector<32x512xf32>
    %359 = arith.addf %356, %358 : vector<32x512xf32>
    %cst_171 = arith.constant 0.000000e+00 : f32
    %360 = vector.broadcast %cst_171 : f32 to vector<32x512xf32>
    %361 = arith.maximumf %359, %360 : vector<32x512xf32>
    %362 = arith.truncf %361 : vector<32x512xf32> to vector<32x512xbf16>
    %c1_172 = arith.constant 1 : index
    %c1536_173 = arith.constant 1536 : index
    %c0_174 = arith.constant 0 : index
    %363 = vector.load %arg8[%c1_172, %c1536_173, %c0_174] : memref<2x2048x32xbf16, #tpu.memory_space<vmem>>, vector<1x512x32xbf16>
    %364 = vector.shape_cast %363 : vector<1x512x32xbf16> to vector<512x32xbf16>
    %cst_175 = arith.constant dense<0.000000e+00> : vector<32x32xf32>
    %365 = tpu.matmul %362, %364, %cst_175 {dimension_numbers = #tpu.dot_dimension_numbers<[1], [0], [0], [1], [0, 0, 1, 1], [], []>} : vector<32x512xbf16>, vector<512x32xbf16>, vector<32x32xf32> -> vector<32x32xf32>
    %366 = arith.addf %353, %365 : vector<32x32xf32>
    %367 = arith.addf %312, %366 : vector<32x32xf32>
    %c19 = arith.constant 19 : index
    %c0_176 = arith.constant 0 : index
    %368 = vector.load %arg5[%c19, %c0_176] : memref<28x32xf32, #tpu.memory_space<vmem>>, vector<1x32xf32>
    %369 = vector.broadcast %368 : vector<1x32xf32> to vector<32x32xf32>
    %370 = arith.addf %367, %369 : vector<32x32xf32>
    %c24 = arith.constant 24 : index
    %c0_177 = arith.constant 0 : index
    %371 = vector.load %arg5[%c24, %c0_177] : memref<28x32xf32, #tpu.memory_space<vmem>>, vector<1x32xf32>
    %c25 = arith.constant 25 : index
    %c0_178 = arith.constant 0 : index
    %372 = vector.load %arg5[%c25, %c0_178] : memref<28x32xf32, #tpu.memory_space<vmem>>, vector<1x32xf32>
    %cst_179 = arith.constant dense<0.000000e+00> : vector<32xf32>
    %373 = vector.multi_reduction <add>, %370, %cst_179 [1] : vector<32x32xf32> to vector<32xf32>
    %374 = vector.shape_cast %373 : vector<32xf32> to vector<32x1xf32>
    %cst_180 = arith.constant 3.200000e+01 : f32
    %375 = vector.broadcast %cst_180 : f32 to vector<32x1xf32>
    %376 = arith.divf %374, %375 : vector<32x1xf32>
    %377 = vector.broadcast %376 : vector<32x1xf32> to vector<32x32xf32>
    %378 = arith.subf %370, %377 : vector<32x32xf32>
    %379 = arith.mulf %378, %378 : vector<32x32xf32>
    %cst_181 = arith.constant dense<0.000000e+00> : vector<32xf32>
    %380 = vector.multi_reduction <add>, %379, %cst_181 [1] : vector<32x32xf32> to vector<32xf32>
    %381 = vector.shape_cast %380 : vector<32xf32> to vector<32x1xf32>
    %cst_182 = arith.constant 3.200000e+01 : f32
    %382 = vector.broadcast %cst_182 : f32 to vector<32x1xf32>
    %383 = arith.divf %381, %382 : vector<32x1xf32>
    %384 = vector.broadcast %376 : vector<32x1xf32> to vector<32x32xf32>
    %385 = arith.subf %370, %384 : vector<32x32xf32>
    %cst_183 = arith.constant 9.99999974E-6 : f32
    %386 = vector.broadcast %cst_183 : f32 to vector<32x1xf32>
    %387 = arith.addf %383, %386 : vector<32x1xf32>
    %388 = math.rsqrt %387 : vector<32x1xf32>
    %389 = vector.broadcast %388 : vector<32x1xf32> to vector<32x32xf32>
    %390 = arith.mulf %385, %389 : vector<32x32xf32>
    %391 = vector.broadcast %371 : vector<1x32xf32> to vector<32x32xf32>
    %392 = arith.mulf %390, %391 : vector<32x32xf32>
    %393 = vector.broadcast %372 : vector<1x32xf32> to vector<32x32xf32>
    %394 = arith.addf %392, %393 : vector<32x32xf32>
    %c26 = arith.constant 26 : index
    %c0_184 = arith.constant 0 : index
    %395 = vector.load %arg5[%c26, %c0_184] : memref<28x32xf32, #tpu.memory_space<vmem>>, vector<1x32xf32>
    %c27 = arith.constant 27 : index
    %c0_185 = arith.constant 0 : index
    %396 = vector.load %arg5[%c27, %c0_185] : memref<28x32xf32, #tpu.memory_space<vmem>>, vector<1x32xf32>
    %cst_186 = arith.constant dense<0.000000e+00> : vector<32xf32>
    %397 = vector.multi_reduction <add>, %394, %cst_186 [1] : vector<32x32xf32> to vector<32xf32>
    %398 = vector.shape_cast %397 : vector<32xf32> to vector<32x1xf32>
    %cst_187 = arith.constant 3.200000e+01 : f32
    %399 = vector.broadcast %cst_187 : f32 to vector<32x1xf32>
    %400 = arith.divf %398, %399 : vector<32x1xf32>
    %401 = vector.broadcast %400 : vector<32x1xf32> to vector<32x32xf32>
    %402 = arith.subf %394, %401 : vector<32x32xf32>
    %403 = arith.mulf %402, %402 : vector<32x32xf32>
    %cst_188 = arith.constant dense<0.000000e+00> : vector<32xf32>
    %404 = vector.multi_reduction <add>, %403, %cst_188 [1] : vector<32x32xf32> to vector<32xf32>
    %405 = vector.shape_cast %404 : vector<32xf32> to vector<32x1xf32>
    %cst_189 = arith.constant 3.200000e+01 : f32
    %406 = vector.broadcast %cst_189 : f32 to vector<32x1xf32>
    %407 = arith.divf %405, %406 : vector<32x1xf32>
    %408 = vector.broadcast %400 : vector<32x1xf32> to vector<32x32xf32>
    %409 = arith.subf %394, %408 : vector<32x32xf32>
    %cst_190 = arith.constant 9.99999974E-6 : f32
    %410 = vector.broadcast %cst_190 : f32 to vector<32x1xf32>
    %411 = arith.addf %407, %410 : vector<32x1xf32>
    %412 = math.rsqrt %411 : vector<32x1xf32>
    %413 = vector.broadcast %412 : vector<32x1xf32> to vector<32x32xf32>
    %414 = arith.mulf %409, %413 : vector<32x32xf32>
    %415 = vector.broadcast %395 : vector<1x32xf32> to vector<32x32xf32>
    %416 = arith.mulf %414, %415 : vector<32x32xf32>
    %417 = vector.broadcast %396 : vector<1x32xf32> to vector<32x32xf32>
    %418 = arith.addf %416, %417 : vector<32x32xf32>
    %419 = vector.shape_cast %418 : vector<32x32xf32> to vector<4x8x32xf32>
    %cst_191 = arith.constant dense<0.000000e+00> : vector<4x32xf32>
    %420 = vector.multi_reduction <add>, %419, %cst_191 [1] : vector<4x8x32xf32> to vector<4x32xf32>
    %cst_192 = arith.constant 1.250000e-01 : f32
    %421 = vector.broadcast %cst_192 : f32 to vector<4x32xf32>
    %422 = arith.mulf %420, %421 : vector<4x32xf32>
    %423 = arith.truncf %422 : vector<4x32xf32> to vector<4x32xbf16>
    %c0_193 = arith.constant 0 : index
    %c0_194 = arith.constant 0 : index
    %424 = vector.load %arg9[%c0_193, %c0_194] : memref<32x16xbf16, #tpu.memory_space<vmem>>, vector<32x16xbf16>
    %cst_195 = arith.constant dense<0.000000e+00> : vector<4x16xf32>
    %425 = tpu.matmul %423, %424, %cst_195 {dimension_numbers = #tpu.dot_dimension_numbers<[1], [0], [0], [1], [0, 0, 1, 1], [], []>} : vector<4x32xbf16>, vector<32x16xbf16>, vector<4x16xf32> -> vector<4x16xf32>
    %c0_196 = arith.constant 0 : index
    %c0_197 = arith.constant 0 : index
    %426 = vector.load %arg10[%c0_196, %c0_197] : memref<1x16xf32, #tpu.memory_space<vmem>>, vector<1x16xf32>
    %427 = vector.broadcast %426 : vector<1x16xf32> to vector<4x16xf32>
    %428 = arith.addf %425, %427 : vector<4x16xf32>
    %c0_198 = arith.constant 0 : index
    %c0_199 = arith.constant 0 : index
    %c0_200 = arith.constant 0 : index
    %429 = vector.load %arg11[%c0_198, %c0_199, %c0_200] : memref<1x4x16xf32, #tpu.memory_space<vmem>>, vector<1x4x16xf32>
    %430 = vector.shape_cast %429 : vector<1x4x16xf32> to vector<4x16xf32>
    %431 = vector.shape_cast %428 : vector<4x16xf32> to vector<1x4x16xf32>
    tpu.vector_store %arg11[%c0_198, %c0_199, %c0_200], %431 {strides = array<i32>} : memref<1x4x16xf32, #tpu.memory_space<vmem>>, vector<1x4x16xf32>,
    return
  }
  func.func @transform_0(%arg0: i32) -> (i32, i32, i32) {
    %c0_i32 = arith.constant 0 : i32
    %c0_i32_0 = arith.constant 0 : i32
    %c0_i32_1 = arith.constant 0 : i32
    return %arg0, %c0_i32, %c0_i32_0 : i32, i32, i32
  }
  func.func @transform_1(%arg0: i32) -> (i32, i32, i32) {
    %c0_i32 = arith.constant 0 : i32
    %c0_i32_0 = arith.constant 0 : i32
    %c0_i32_1 = arith.constant 0 : i32
    %c0_i32_2 = arith.constant 0 : i32
    return %c0_i32, %c0_i32_0, %c0_i32_1 : i32, i32, i32
  }
  func.func @transform_2(%arg0: i32) -> (i32, i32) {
    %c0_i32 = arith.constant 0 : i32
    %c0_i32_0 = arith.constant 0 : i32
    %c0_i32_1 = arith.constant 0 : i32
    return %c0_i32, %c0_i32_0 : i32, i32
  }
  func.func @transform_3(%arg0: i32) -> (i32, i32, i32) {
    %c0_i32 = arith.constant 0 : i32
    %c0_i32_0 = arith.constant 0 : i32
    %c0_i32_1 = arith.constant 0 : i32
    %c0_i32_2 = arith.constant 0 : i32
    return %c0_i32, %c0_i32_0, %c0_i32_1 : i32, i32, i32
  }
  func.func @transform_4(%arg0: i32) -> (i32, i32) {
    %c0_i32 = arith.constant 0 : i32
    %c0_i32_0 = arith.constant 0 : i32
    %c0_i32_1 = arith.constant 0 : i32
    return %c0_i32, %c0_i32_0 : i32, i32
  }
  func.func @transform_5(%arg0: i32) -> (i32, i32, i32) {
    %c0_i32 = arith.constant 0 : i32
    %c0_i32_0 = arith.constant 0 : i32
    %c0_i32_1 = arith.constant 0 : i32
    %c0_i32_2 = arith.constant 0 : i32
    return %c0_i32, %c0_i32_0, %c0_i32_1 : i32, i32, i32
  }
  func.func @transform_6(%arg0: i32) -> (i32, i32) {
    %c0_i32 = arith.constant 0 : i32
    %c0_i32_0 = arith.constant 0 : i32
    %c0_i32_1 = arith.constant 0 : i32
    return %c0_i32, %c0_i32_0 : i32, i32
  }
  func.func @transform_7(%arg0: i32) -> (i32, i32, i32) {
    %c0_i32 = arith.constant 0 : i32
    %c0_i32_0 = arith.constant 0 : i32
    %c0_i32_1 = arith.constant 0 : i32
    %c0_i32_2 = arith.constant 0 : i32
    return %c0_i32, %c0_i32_0, %c0_i32_1 : i32, i32, i32
  }
  func.func @transform_8(%arg0: i32) -> (i32, i32) {
    %c0_i32 = arith.constant 0 : i32
    %c0_i32_0 = arith.constant 0 : i32
    %c0_i32_1 = arith.constant 0 : i32
    return %c0_i32, %c0_i32_0 : i32, i32
  }
  func.func @transform_9(%arg0: i32) -> (i32, i32) {
    %c0_i32 = arith.constant 0 : i32
    %c0_i32_0 = arith.constant 0 : i32
    %c0_i32_1 = arith.constant 0 : i32
    return %c0_i32, %c0_i32_0 : i32, i32
  }
  func.func @transform_10(%arg0: i32) -> (i32, i32, i32) {
    %c0_i32 = arith.constant 0 : i32
    %c0_i32_0 = arith.constant 0 : i32
    %c0_i32_1 = arith.constant 0 : i32
    return %arg0, %c0_i32, %c0_i32_0 : i32, i32, i32
  }
}

module attributes {stable_mosaic.version = 11 : i64} {
  func.func @transformer_kernel(%arg0: i32, %arg1: memref<4x8x32xbf16, #tpu.memory_space<vmem>>, %arg2: memref<2x32x96xbf16, #tpu.memory_space<vmem>>, %arg3: memref<32x64xbf16, #tpu.memory_space<vmem>>, %arg4: memref<4x32x32xbf16, #tpu.memory_space<vmem>>, %arg5: memref<28x32xf32, #tpu.memory_space<vmem>>, %arg6: memref<2x32x2048xbf16, #tpu.memory_space<vmem>>, %arg7: memref<2x2048xf32, #tpu.memory_space<vmem>>, %arg8: memref<2x2048x32xbf16, #tpu.memory_space<vmem>>, %arg9: memref<32x16xbf16, #tpu.memory_space<vmem>>, %arg10: memref<1x16xf32, #tpu.memory_space<vmem>>, %arg11: memref<1x4x16xf32, #tpu.memory_space<vmem>>) attributes {dimension_semantics = [#tpu.dimension_semantics<parallel>], iteration_bounds = array<i64: 2>, scalar_prefetch = 0 : i64, scratch_operands = 0 : i64, tpu.core_type = #tpu.core_type<tc>, window_params = [{transform_indices = @transform_0, window_bounds = array<i64: 4, 8, 32>}, {pipeline_mode = #tpu.pipeline_mode<synchronous>, transform_indices = @transform_1, window_bounds = array<i64: 2, 32, 96>}, {pipeline_mode = #tpu.pipeline_mode<synchronous>, transform_indices = @transform_2, window_bounds = array<i64: 32, 64>}, {pipeline_mode = #tpu.pipeline_mode<synchronous>, transform_indices = @transform_3, window_bounds = array<i64: 4, 32, 32>}, {pipeline_mode = #tpu.pipeline_mode<synchronous>, transform_indices = @transform_4, window_bounds = array<i64: 28, 32>}, {pipeline_mode = #tpu.pipeline_mode<synchronous>, transform_indices = @transform_5, window_bounds = array<i64: 2, 32, 2048>}, {pipeline_mode = #tpu.pipeline_mode<synchronous>, transform_indices = @transform_6, window_bounds = array<i64: 2, 2048>}, {pipeline_mode = #tpu.pipeline_mode<synchronous>, transform_indices = @transform_7, window_bounds = array<i64: 2, 2048, 32>}, {pipeline_mode = #tpu.pipeline_mode<synchronous>, transform_indices = @transform_8, window_bounds = array<i64: 32, 16>}, {pipeline_mode = #tpu.pipeline_mode<synchronous>, transform_indices = @transform_9, window_bounds = array<i64: 1, 16>}, {transform_indices = @transform_10, window_bounds = array<i64: 1, 4, 16>}]} {
    %c0 = arith.constant 0 : index
    %c0_0 = arith.constant 0 : index
    %c0_1 = arith.constant 0 : index
    %0 = vector.load %arg1[%c0, %c0_0, %c0_1] : memref<4x8x32xbf16, #tpu.memory_space<vmem>>, vector<4x8x32xbf16>
    %1 = vector.shape_cast %0 : vector<4x8x32xbf16> to vector<32x32xbf16>
    %2 = arith.extf %1 : vector<32x32xbf16> to vector<32x32xf32>
    %c0_2 = arith.constant 0 : index
    %c0_3 = arith.constant 0 : index
    %c0_4 = arith.constant 0 : index
    %3 = vector.load %arg2[%c0_2, %c0_3, %c0_4] : memref<2x32x96xbf16, #tpu.memory_space<vmem>>, vector<1x32x96xbf16>
    %4 = vector.shape_cast %3 : vector<1x32x96xbf16> to vector<32x96xbf16>
    %c0_5 = arith.constant 0 : index
    %c0_6 = arith.constant 0 : index
    %c0_7 = arith.constant 0 : index
    %5 = vector.load %arg4[%c0_5, %c0_6, %c0_7] : memref<4x32x32xbf16, #tpu.memory_space<vmem>>, vector<1x32x32xbf16>
    %6 = vector.shape_cast %5 : vector<1x32x32xbf16> to vector<32x32xbf16>
    %c0_8 = arith.constant 0 : index
    %c0_9 = arith.constant 0 : index
    %7 = vector.load %arg5[%c0_8, %c0_9] : memref<28x32xf32, #tpu.memory_space<vmem>>, vector<1x32xf32>
    %c1 = arith.constant 1 : index
    %c0_10 = arith.constant 0 : index
    %8 = vector.load %arg5[%c1, %c0_10] : memref<28x32xf32, #tpu.memory_space<vmem>>, vector<1x32xf32>
    %c2 = arith.constant 2 : index
    %c0_11 = arith.constant 0 : index
    %9 = vector.load %arg5[%c2, %c0_11] : memref<28x32xf32, #tpu.memory_space<vmem>>, vector<1x32xf32>
    %c3 = arith.constant 3 : index
    %c0_12 = arith.constant 0 : index
    %10 = vector.load %arg5[%c3, %c0_12] : memref<28x32xf32, #tpu.memory_space<vmem>>, vector<1x32xf32>
    %cst = arith.constant dense<0.000000e+00> : vector<32x96xf32>
    %11 = tpu.matmul %1, %4, %cst {dimension_numbers = #tpu.dot_dimension_numbers<[1], [0], [0], [1], [0, 0, 1, 1], [], []>} : vector<32x32xbf16>, vector<32x96xbf16>, vector<32x96xf32> -> vector<32x96xf32>
    %12 = vector.extract_strided_slice %11 {offsets = [0, 0], sizes = [32, 32], strides = [1, 1]} : vector<32x96xf32> to vector<32x32xf32>
    %13 = vector.broadcast %7 : vector<1x32xf32> to vector<32x32xf32>
    %14 = arith.addf %12, %13 : vector<32x32xf32>
    %15 = vector.extract_strided_slice %11 {offsets = [0, 32], sizes = [32, 32], strides = [1, 1]} : vector<32x96xf32> to vector<32x32xf32>
    %16 = vector.broadcast %8 : vector<1x32xf32> to vector<32x32xf32>
    %17 = arith.addf %15, %16 : vector<32x32xf32>
    %18 = vector.extract_strided_slice %11 {offsets = [0, 64], sizes = [32, 32], strides = [1, 1]} : vector<32x96xf32> to vector<32x32xf32>
    %19 = vector.broadcast %9 : vector<1x32xf32> to vector<32x32xf32>
    %20 = arith.addf %18, %19 : vector<32x32xf32>
    %21 = arith.truncf %14 : vector<32x32xf32> to vector<32x32xbf16>
    %22 = vector.shape_cast %21 : vector<32x32xbf16> to vector<4x8x32xbf16>
    %23 = arith.truncf %17 : vector<32x32xf32> to vector<32x32xbf16>
    %24 = vector.shape_cast %23 : vector<32x32xbf16> to vector<4x8x32xbf16>
    %25 = arith.truncf %20 : vector<32x32xf32> to vector<32x32xbf16>
    %26 = vector.shape_cast %25 : vector<32x32xbf16> to vector<4x8x32xbf16>
    "tpu.trace_start"() <{level = 10 : i32, message = "bqd,bkd->bqk"}> : () -> ()
    %cst_13 = arith.constant dense<0.000000e+00> : vector<4x8x8xf32>
    %27 = tpu.matmul %22, %24, %cst_13 {dimension_numbers = #tpu.dot_dimension_numbers<[2], [2], [1], [1], [0, 0, 0, 1, 1, 1], [0], [0]>} : vector<4x8x32xbf16>, vector<4x8x32xbf16>, vector<4x8x8xf32> -> vector<4x8x8xf32>
    "tpu.trace_stop"() : () -> ()
    %cst_14 = arith.constant dense<0xFF800000> : vector<4x8xf32>
    %28 = vector.multi_reduction <maximumf>, %27, %cst_14 [2] : vector<4x8x8xf32> to vector<4x8xf32>
    %29 = vector.shape_cast %28 : vector<4x8xf32> to vector<4x8x1xf32>
    %30 = vector.broadcast %29 : vector<4x8x1xf32> to vector<4x8x8xf32>
    %31 = arith.subf %27, %30 : vector<4x8x8xf32>
    %32 = math.exp %31 : vector<4x8x8xf32>
    %cst_15 = arith.constant dense<0.000000e+00> : vector<4x8xf32>
    %33 = vector.multi_reduction <add>, %32, %cst_15 [2] : vector<4x8x8xf32> to vector<4x8xf32>
    %34 = vector.shape_cast %33 : vector<4x8xf32> to vector<4x8x1xf32>
    %35 = tpu.reciprocal %34 {approx = true} : vector<4x8x1xf32> -> vector<4x8x1xf32>
    %36 = vector.broadcast %35 : vector<4x8x1xf32> to vector<4x8x8xf32>
    %37 = arith.mulf %32, %36 : vector<4x8x8xf32>
    %38 = arith.truncf %37 : vector<4x8x8xf32> to vector<4x8x8xbf16>
    "tpu.trace_start"() <{level = 10 : i32, message = "bqk,bkd->bqd"}> : () -> ()
    %cst_16 = arith.constant dense<0.000000e+00> : vector<4x8x32xf32>
    %39 = tpu.matmul %38, %26, %cst_16 {dimension_numbers = #tpu.dot_dimension_numbers<[2], [1], [1], [2], [0, 0, 0, 1, 1, 2], [0], [0]>} : vector<4x8x8xbf16>, vector<4x8x32xbf16>, vector<4x8x32xf32> -> vector<4x8x32xf32>
    "tpu.trace_stop"() : () -> ()
    %40 = vector.shape_cast %39 : vector<4x8x32xf32> to vector<32x32xf32>
    %41 = arith.truncf %40 : vector<32x32xf32> to vector<32x32xbf16>
    %cst_17 = arith.constant dense<0.000000e+00> : vector<32x32xf32>
    %42 = tpu.matmul %41, %6, %cst_17 {dimension_numbers = #tpu.dot_dimension_numbers<[1], [0], [0], [1], [0, 0, 1, 1], [], []>} : vector<32x32xbf16>, vector<32x32xbf16>, vector<32x32xf32> -> vector<32x32xf32>
    %43 = vector.broadcast %10 : vector<1x32xf32> to vector<32x32xf32>
    %44 = arith.addf %42, %43 : vector<32x32xf32>
    %45 = arith.addf %2, %44 : vector<32x32xf32>
    %c5 = arith.constant 5 : index
    %c0_18 = arith.constant 0 : index
    %46 = vector.load %arg5[%c5, %c0_18] : memref<28x32xf32, #tpu.memory_space<vmem>>, vector<1x32xf32>
    %c6 = arith.constant 6 : index
    %c0_19 = arith.constant 0 : index
    %47 = vector.load %arg5[%c6, %c0_19] : memref<28x32xf32, #tpu.memory_space<vmem>>, vector<1x32xf32>
    %cst_20 = arith.constant dense<0.000000e+00> : vector<32xf32>
    %48 = vector.multi_reduction <add>, %45, %cst_20 [1] : vector<32x32xf32> to vector<32xf32>
    %49 = vector.shape_cast %48 : vector<32xf32> to vector<32x1xf32>
    %cst_21 = arith.constant 3.200000e+01 : f32
    %50 = vector.broadcast %cst_21 : f32 to vector<32x1xf32>
    %51 = arith.divf %49, %50 : vector<32x1xf32>
    %52 = vector.broadcast %51 : vector<32x1xf32> to vector<32x32xf32>
    %53 = arith.subf %45, %52 : vector<32x32xf32>
    %54 = arith.mulf %53, %53 : vector<32x32xf32>
    %cst_22 = arith.constant dense<0.000000e+00> : vector<32xf32>
    %55 = vector.multi_reduction <add>, %54, %cst_22 [1] : vector<32x32xf32> to vector<32xf32>
    %56 = vector.shape_cast %55 : vector<32xf32> to vector<32x1xf32>
    %cst_23 = arith.constant 3.200000e+01 : f32
    %57 = vector.broadcast %cst_23 : f32 to vector<32x1xf32>
    %58 = arith.divf %56, %57 : vector<32x1xf32>
    %59 = vector.broadcast %51 : vector<32x1xf32> to vector<32x32xf32>
    %60 = arith.subf %45, %59 : vector<32x32xf32>
    %cst_24 = arith.constant 9.99999974E-6 : f32
    %61 = vector.broadcast %cst_24 : f32 to vector<32x1xf32>
    %62 = arith.addf %58, %61 : vector<32x1xf32>
    %63 = math.rsqrt %62 : vector<32x1xf32>
    %64 = vector.broadcast %63 : vector<32x1xf32> to vector<32x32xf32>
    %65 = arith.mulf %60, %64 : vector<32x32xf32>
    %66 = vector.broadcast %46 : vector<1x32xf32> to vector<32x32xf32>
    %67 = arith.mulf %65, %66 : vector<32x32xf32>
    %68 = vector.broadcast %47 : vector<1x32xf32> to vector<32x32xf32>
    %69 = arith.addf %67, %68 : vector<32x32xf32>
    %70 = arith.truncf %69 : vector<32x32xf32> to vector<32x32xbf16>
    %cst_25 = arith.constant 0.000000e+00 : f32
    %71 = vector.broadcast %cst_25 : f32 to vector<32x32xf32>
    %c0_26 = arith.constant 0 : index
    %c0_27 = arith.constant 0 : index
    %c0_28 = arith.constant 0 : index
    %72 = vector.load %arg6[%c0_26, %c0_27, %c0_28] : memref<2x32x2048xbf16, #tpu.memory_space<vmem>>, vector<1x32x512xbf16>
    %73 = vector.shape_cast %72 : vector<1x32x512xbf16> to vector<32x512xbf16>
    %cst_29 = arith.constant dense<0.000000e+00> : vector<32x512xf32>
    %74 = tpu.matmul %70, %73, %cst_29 {dimension_numbers = #tpu.dot_dimension_numbers<[1], [0], [0], [1], [0, 0, 1, 1], [], []>} : vector<32x32xbf16>, vector<32x512xbf16>, vector<32x512xf32> -> vector<32x512xf32>
    %c0_30 = arith.constant 0 : index
    %c0_31 = arith.constant 0 : index
    %75 = vector.load %arg7[%c0_30, %c0_31] : memref<2x2048xf32, #tpu.memory_space<vmem>>, vector<1x512xf32>
    %76 = vector.broadcast %75 : vector<1x512xf32> to vector<32x512xf32>
    %77 = arith.addf %74, %76 : vector<32x512xf32>
    %cst_32 = arith.constant 0.000000e+00 : f32
    %78 = vector.broadcast %cst_32 : f32 to vector<32x512xf32>
    %79 = arith.maximumf %77, %78 : vector<32x512xf32>
    %80 = arith.truncf %79 : vector<32x512xf32> to vector<32x512xbf16>
    %c0_33 = arith.constant 0 : index
    %c0_34 = arith.constant 0 : index
    %c0_35 = arith.constant 0 : index
    %81 = vector.load %arg8[%c0_33, %c0_34, %c0_35] : memref<2x2048x32xbf16, #tpu.memory_space<vmem>>, vector<1x512x32xbf16>
    %82 = vector.shape_cast %81 : vector<1x512x32xbf16> to vector<512x32xbf16>
    %cst_36 = arith.constant dense<0.000000e+00> : vector<32x32xf32>
    %83 = tpu.matmul %80, %82, %cst_36 {dimension_numbers = #tpu.dot_dimension_numbers<[1], [0], [0], [1], [0, 0, 1, 1], [], []>} : vector<32x512xbf16>, vector<512x32xbf16>, vector<32x32xf32> -> vector<32x32xf32>
    %84 = arith.addf %71, %83 : vector<32x32xf32>
    %c0_37 = arith.constant 0 : index
    %c0_38 = arith.constant 0 : index
    %c512 = arith.constant 512 : index
    %85 = vector.load %arg6[%c0_37, %c0_38, %c512] : memref<2x32x2048xbf16, #tpu.memory_space<vmem>>, vector<1x32x512xbf16>
    %86 = vector.shape_cast %85 : vector<1x32x512xbf16> to vector<32x512xbf16>
    %cst_39 = arith.constant dense<0.000000e+00> : vector<32x512xf32>
    %87 = tpu.matmul %70, %86, %cst_39 {dimension_numbers = #tpu.dot_dimension_numbers<[1], [0], [0], [1], [0, 0, 1, 1], [], []>} : vector<32x32xbf16>, vector<32x512xbf16>, vector<32x512xf32> -> vector<32x512xf32>
    %c0_40 = arith.constant 0 : index
    %c512_41 = arith.constant 512 : index
    %88 = vector.load %arg7[%c0_40, %c512_41] : memref<2x2048xf32, #tpu.memory_space<vmem>>, vector<1x512xf32>
    %89 = vector.broadcast %88 : vector<1x512xf32> to vector<32x512xf32>
    %90 = arith.addf %87, %89 : vector<32x512xf32>
    %cst_42 = arith.constant 0.000000e+00 : f32
    %91 = vector.broadcast %cst_42 : f32 to vector<32x512xf32>
    %92 = arith.maximumf %90, %91 : vector<32x512xf32>
    %93 = arith.truncf %92 : vector<32x512xf32> to vector<32x512xbf16>
    %c0_43 = arith.constant 0 : index
    %c512_44 = arith.constant 512 : index
    %c0_45 = arith.constant 0 : index
    %94 = vector.load %arg8[%c0_43, %c512_44, %c0_45] : memref<2x2048x32xbf16, #tpu.memory_space<vmem>>, vector<1x512x32xbf16>
    %95 = vector.shape_cast %94 : vector<1x512x32xbf16> to vector<512x32xbf16>
    %cst_46 = arith.constant dense<0.000000e+00> : vector<32x32xf32>
    %96 = tpu.matmul %93, %95, %cst_46 {dimension_numbers = #tpu.dot_dimension_numbers<[1], [0], [0], [1], [0, 0, 1, 1], [], []>} : vector<32x512xbf16>, vector<512x32xbf16>, vector<32x32xf32> -> vector<32x32xf32>
    %97 = arith.addf %84, %96 : vector<32x32xf32>
    %c0_47 = arith.constant 0 : index
    %c0_48 = arith.constant 0 : index
    %c1024 = arith.constant 1024 : index
    %98 = vector.load %arg6[%c0_47, %c0_48, %c1024] : memref<2x32x2048xbf16, #tpu.memory_space<vmem>>, vector<1x32x512xbf16>
    %99 = vector.shape_cast %98 : vector<1x32x512xbf16> to vector<32x512xbf16>
    %cst_49 = arith.constant dense<0.000000e+00> : vector<32x512xf32>
    %100 = tpu.matmul %70, %99, %cst_49 {dimension_numbers = #tpu.dot_dimension_numbers<[1], [0], [0], [1], [0, 0, 1, 1], [], []>} : vector<32x32xbf16>, vector<32x512xbf16>, vector<32x512xf32> -> vector<32x512xf32>
    %c0_50 = arith.constant 0 : index
    %c1024_51 = arith.constant 1024 : index
    %101 = vector.load %arg7[%c0_50, %c1024_51] : memref<2x2048xf32, #tpu.memory_space<vmem>>, vector<1x512xf32>
    %102 = vector.broadcast %101 : vector<1x512xf32> to vector<32x512xf32>
    %103 = arith.addf %100, %102 : vector<32x512xf32>
    %cst_52 = arith.constant 0.000000e+00 : f32
    %104 = vector.broadcast %cst_52 : f32 to vector<32x512xf32>
    %105 = arith.maximumf %103, %104 : vector<32x512xf32>
    %106 = arith.truncf %105 : vector<32x512xf32> to vector<32x512xbf16>
    %c0_53 = arith.constant 0 : index
    %c1024_54 = arith.constant 1024 : index
    %c0_55 = arith.constant 0 : index
    %107 = vector.load %arg8[%c0_53, %c1024_54, %c0_55] : memref<2x2048x32xbf16, #tpu.memory_space<vmem>>, vector<1x512x32xbf16>
    %108 = vector.shape_cast %107 : vector<1x512x32xbf16> to vector<512x32xbf16>
    %cst_56 = arith.constant dense<0.000000e+00> : vector<32x32xf32>
    %109 = tpu.matmul %106, %108, %cst_56 {dimension_numbers = #tpu.dot_dimension_numbers<[1], [0], [0], [1], [0, 0, 1, 1], [], []>} : vector<32x512xbf16>, vector<512x32xbf16>, vector<32x32xf32> -> vector<32x32xf32>
    %110 = arith.addf %97, %109 : vector<32x32xf32>
    %c0_57 = arith.constant 0 : index
    %c0_58 = arith.constant 0 : index
    %c1536 = arith.constant 1536 : index
    %111 = vector.load %arg6[%c0_57, %c0_58, %c1536] : memref<2x32x2048xbf16, #tpu.memory_space<vmem>>, vector<1x32x512xbf16>
    %112 = vector.shape_cast %111 : vector<1x32x512xbf16> to vector<32x512xbf16>
    %cst_59 = arith.constant dense<0.000000e+00> : vector<32x512xf32>
    %113 = tpu.matmul %70, %112, %cst_59 {dimension_numbers = #tpu.dot_dimension_numbers<[1], [0], [0], [1], [0, 0, 1, 1], [], []>} : vector<32x32xbf16>, vector<32x512xbf16>, vector<32x512xf32> -> vector<32x512xf32>
    %c0_60 = arith.constant 0 : index
    %c1536_61 = arith.constant 1536 : index
    %114 = vector.load %arg7[%c0_60, %c1536_61] : memref<2x2048xf32, #tpu.memory_space<vmem>>, vector<1x512xf32>
    %115 = vector.broadcast %114 : vector<1x512xf32> to vector<32x512xf32>
    %116 = arith.addf %113, %115 : vector<32x512xf32>
    %cst_62 = arith.constant 0.000000e+00 : f32
    %117 = vector.broadcast %cst_62 : f32 to vector<32x512xf32>
    %118 = arith.maximumf %116, %117 : vector<32x512xf32>
    %119 = arith.truncf %118 : vector<32x512xf32> to vector<32x512xbf16>
    %c0_63 = arith.constant 0 : index
    %c1536_64 = arith.constant 1536 : index
    %c0_65 = arith.constant 0 : index
    %120 = vector.load %arg8[%c0_63, %c1536_64, %c0_65] : memref<2x2048x32xbf16, #tpu.memory_space<vmem>>, vector<1x512x32xbf16>
    %121 = vector.shape_cast %120 : vector<1x512x32xbf16> to vector<512x32xbf16>
    %cst_66 = arith.constant dense<0.000000e+00> : vector<32x32xf32>
    %122 = tpu.matmul %119, %121, %cst_66 {dimension_numbers = #tpu.dot_dimension_numbers<[1], [0], [0], [1], [0, 0, 1, 1], [], []>} : vector<32x512xbf16>, vector<512x32xbf16>, vector<32x32xf32> -> vector<32x32xf32>
    %123 = arith.addf %110, %122 : vector<32x32xf32>
    %124 = arith.addf %69, %123 : vector<32x32xf32>
    %c4 = arith.constant 4 : index
    %c0_67 = arith.constant 0 : index
    %125 = vector.load %arg5[%c4, %c0_67] : memref<28x32xf32, #tpu.memory_space<vmem>>, vector<1x32xf32>
    %126 = vector.broadcast %125 : vector<1x32xf32> to vector<32x32xf32>
    %127 = arith.addf %124, %126 : vector<32x32xf32>
    %c7 = arith.constant 7 : index
    %c0_68 = arith.constant 0 : index
    %128 = vector.load %arg5[%c7, %c0_68] : memref<28x32xf32, #tpu.memory_space<vmem>>, vector<1x32xf32>
    %c8 = arith.constant 8 : index
    %c0_69 = arith.constant 0 : index
    %129 = vector.load %arg5[%c8, %c0_69] : memref<28x32xf32, #tpu.memory_space<vmem>>, vector<1x32xf32>
    %cst_70 = arith.constant dense<0.000000e+00> : vector<32xf32>
    %130 = vector.multi_reduction <add>, %127, %cst_70 [1] : vector<32x32xf32> to vector<32xf32>
    %131 = vector.shape_cast %130 : vector<32xf32> to vector<32x1xf32>
    %cst_71 = arith.constant 3.200000e+01 : f32
    %132 = vector.broadcast %cst_71 : f32 to vector<32x1xf32>
    %133 = arith.divf %131, %132 : vector<32x1xf32>
    %134 = vector.broadcast %133 : vector<32x1xf32> to vector<32x32xf32>
    %135 = arith.subf %127, %134 : vector<32x32xf32>
    %136 = arith.mulf %135, %135 : vector<32x32xf32>
    %cst_72 = arith.constant dense<0.000000e+00> : vector<32xf32>
    %137 = vector.multi_reduction <add>, %136, %cst_72 [1] : vector<32x32xf32> to vector<32xf32>
    %138 = vector.shape_cast %137 : vector<32xf32> to vector<32x1xf32>
    %cst_73 = arith.constant 3.200000e+01 : f32
    %139 = vector.broadcast %cst_73 : f32 to vector<32x1xf32>
    %140 = arith.divf %138, %139 : vector<32x1xf32>
    %141 = vector.broadcast %133 : vector<32x1xf32> to vector<32x32xf32>
    %142 = arith.subf %127, %141 : vector<32x32xf32>
    %cst_74 = arith.constant 9.99999974E-6 : f32
    %143 = vector.broadcast %cst_74 : f32 to vector<32x1xf32>
    %144 = arith.addf %140, %143 : vector<32x1xf32>
    %145 = math.rsqrt %144 : vector<32x1xf32>
    %146 = vector.broadcast %145 : vector<32x1xf32> to vector<32x32xf32>
    %147 = arith.mulf %142, %146 : vector<32x32xf32>
    %148 = vector.broadcast %128 : vector<1x32xf32> to vector<32x32xf32>
    %149 = arith.mulf %147, %148 : vector<32x32xf32>
    %150 = vector.broadcast %129 : vector<1x32xf32> to vector<32x32xf32>
    %151 = arith.addf %149, %150 : vector<32x32xf32>
    %c9 = arith.constant 9 : index
    %c0_75 = arith.constant 0 : index
    %152 = vector.load %arg5[%c9, %c0_75] : memref<28x32xf32, #tpu.memory_space<vmem>>, vector<1x32xf32>
    %c10 = arith.constant 10 : index
    %c0_76 = arith.constant 0 : index
    %153 = vector.load %arg5[%c10, %c0_76] : memref<28x32xf32, #tpu.memory_space<vmem>>, vector<1x32xf32>
    %cst_77 = arith.constant dense<0.000000e+00> : vector<32xf32>
    %154 = vector.multi_reduction <add>, %151, %cst_77 [1] : vector<32x32xf32> to vector<32xf32>
    %155 = vector.shape_cast %154 : vector<32xf32> to vector<32x1xf32>
    %cst_78 = arith.constant 3.200000e+01 : f32
    %156 = vector.broadcast %cst_78 : f32 to vector<32x1xf32>
    %157 = arith.divf %155, %156 : vector<32x1xf32>
    %158 = vector.broadcast %157 : vector<32x1xf32> to vector<32x32xf32>
    %159 = arith.subf %151, %158 : vector<32x32xf32>
    %160 = arith.mulf %159, %159 : vector<32x32xf32>
    %cst_79 = arith.constant dense<0.000000e+00> : vector<32xf32>
    %161 = vector.multi_reduction <add>, %160, %cst_79 [1] : vector<32x32xf32> to vector<32xf32>
    %162 = vector.shape_cast %161 : vector<32xf32> to vector<32x1xf32>
    %cst_80 = arith.constant 3.200000e+01 : f32
    %163 = vector.broadcast %cst_80 : f32 to vector<32x1xf32>
    %164 = arith.divf %162, %163 : vector<32x1xf32>
    %165 = vector.broadcast %157 : vector<32x1xf32> to vector<32x32xf32>
    %166 = arith.subf %151, %165 : vector<32x32xf32>
    %cst_81 = arith.constant 9.99999974E-6 : f32
    %167 = vector.broadcast %cst_81 : f32 to vector<32x1xf32>
    %168 = arith.addf %164, %167 : vector<32x1xf32>
    %169 = math.rsqrt %168 : vector<32x1xf32>
    %170 = vector.broadcast %169 : vector<32x1xf32> to vector<32x32xf32>
    %171 = arith.mulf %166, %170 : vector<32x32xf32>
    %172 = vector.broadcast %152 : vector<1x32xf32> to vector<32x32xf32>
    %173 = arith.mulf %171, %172 : vector<32x32xf32>
    %174 = vector.broadcast %153 : vector<1x32xf32> to vector<32x32xf32>
    %175 = arith.addf %173, %174 : vector<32x32xf32>
    %176 = arith.truncf %175 : vector<32x32xf32> to vector<32x32xbf16>
    %c1_82 = arith.constant 1 : index
    %c0_83 = arith.constant 0 : index
    %c0_84 = arith.constant 0 : index
    %177 = vector.load %arg2[%c1_82, %c0_83, %c0_84] : memref<2x32x96xbf16, #tpu.memory_space<vmem>>, vector<1x32x96xbf16>
    %178 = vector.shape_cast %177 : vector<1x32x96xbf16> to vector<32x96xbf16>
    %c1_85 = arith.constant 1 : index
    %c0_86 = arith.constant 0 : index
    %c0_87 = arith.constant 0 : index
    %179 = vector.load %arg4[%c1_85, %c0_86, %c0_87] : memref<4x32x32xbf16, #tpu.memory_space<vmem>>, vector<1x32x32xbf16>
    %180 = vector.shape_cast %179 : vector<1x32x32xbf16> to vector<32x32xbf16>
    %c11 = arith.constant 11 : index
    %c0_88 = arith.constant 0 : index
    %181 = vector.load %arg5[%c11, %c0_88] : memref<28x32xf32, #tpu.memory_space<vmem>>, vector<1x32xf32>
    %c12 = arith.constant 12 : index
    %c0_89 = arith.constant 0 : index
    %182 = vector.load %arg5[%c12, %c0_89] : memref<28x32xf32, #tpu.memory_space<vmem>>, vector<1x32xf32>
    %c13 = arith.constant 13 : index
    %c0_90 = arith.constant 0 : index
    %183 = vector.load %arg5[%c13, %c0_90] : memref<28x32xf32, #tpu.memory_space<vmem>>, vector<1x32xf32>
    %c14 = arith.constant 14 : index
    %c0_91 = arith.constant 0 : index
    %184 = vector.load %arg5[%c14, %c0_91] : memref<28x32xf32, #tpu.memory_space<vmem>>, vector<1x32xf32>
    %cst_92 = arith.constant dense<0.000000e+00> : vector<32x96xf32>
    %185 = tpu.matmul %1, %178, %cst_92 {dimension_numbers = #tpu.dot_dimension_numbers<[1], [0], [0], [1], [0, 0, 1, 1], [], []>} : vector<32x32xbf16>, vector<32x96xbf16>, vector<32x96xf32> -> vector<32x96xf32>
    %186 = vector.extract_strided_slice %185 {offsets = [0, 0], sizes = [32, 32], strides = [1, 1]} : vector<32x96xf32> to vector<32x32xf32>
    %187 = vector.broadcast %181 : vector<1x32xf32> to vector<32x32xf32>
    %188 = arith.addf %186, %187 : vector<32x32xf32>
    %189 = vector.extract_strided_slice %185 {offsets = [0, 32], sizes = [32, 32], strides = [1, 1]} : vector<32x96xf32> to vector<32x32xf32>
    %190 = vector.broadcast %182 : vector<1x32xf32> to vector<32x32xf32>
    %191 = arith.addf %189, %190 : vector<32x32xf32>
    %192 = vector.extract_strided_slice %185 {offsets = [0, 64], sizes = [32, 32], strides = [1, 1]} : vector<32x96xf32> to vector<32x32xf32>
    %193 = vector.broadcast %183 : vector<1x32xf32> to vector<32x32xf32>
    %194 = arith.addf %192, %193 : vector<32x32xf32>
    %195 = arith.truncf %188 : vector<32x32xf32> to vector<32x32xbf16>
    %196 = vector.shape_cast %195 : vector<32x32xbf16> to vector<4x8x32xbf16>
    %197 = arith.truncf %191 : vector<32x32xf32> to vector<32x32xbf16>
    %198 = vector.shape_cast %197 : vector<32x32xbf16> to vector<4x8x32xbf16>
    %199 = arith.truncf %194 : vector<32x32xf32> to vector<32x32xbf16>
    %200 = vector.shape_cast %199 : vector<32x32xbf16> to vector<4x8x32xbf16>
    "tpu.trace_start"() <{level = 10 : i32, message = "bqd,bkd->bqk"}> : () -> ()
    %cst_93 = arith.constant dense<0.000000e+00> : vector<4x8x8xf32>
    %201 = tpu.matmul %196, %198, %cst_93 {dimension_numbers = #tpu.dot_dimension_numbers<[2], [2], [1], [1], [0, 0, 0, 1, 1, 1], [0], [0]>} : vector<4x8x32xbf16>, vector<4x8x32xbf16>, vector<4x8x8xf32> -> vector<4x8x8xf32>
    "tpu.trace_stop"() : () -> ()
    %cst_94 = arith.constant dense<0xFF800000> : vector<4x8xf32>
    %202 = vector.multi_reduction <maximumf>, %201, %cst_94 [2] : vector<4x8x8xf32> to vector<4x8xf32>
    %203 = vector.shape_cast %202 : vector<4x8xf32> to vector<4x8x1xf32>
    %204 = vector.broadcast %203 : vector<4x8x1xf32> to vector<4x8x8xf32>
    %205 = arith.subf %201, %204 : vector<4x8x8xf32>
    %206 = math.exp %205 : vector<4x8x8xf32>
    %cst_95 = arith.constant dense<0.000000e+00> : vector<4x8xf32>
    %207 = vector.multi_reduction <add>, %206, %cst_95 [2] : vector<4x8x8xf32> to vector<4x8xf32>
    %208 = vector.shape_cast %207 : vector<4x8xf32> to vector<4x8x1xf32>
    %209 = tpu.reciprocal %208 {approx = true} : vector<4x8x1xf32> -> vector<4x8x1xf32>
    %210 = vector.broadcast %209 : vector<4x8x1xf32> to vector<4x8x8xf32>
    %211 = arith.mulf %206, %210 : vector<4x8x8xf32>
    %212 = arith.truncf %211 : vector<4x8x8xf32> to vector<4x8x8xbf16>
    "tpu.trace_start"() <{level = 10 : i32, message = "bqk,bkd->bqd"}> : () -> ()
    %cst_96 = arith.constant dense<0.000000e+00> : vector<4x8x32xf32>
    %213 = tpu.matmul %212, %200, %cst_96 {dimension_numbers = #tpu.dot_dimension_numbers<[2], [1], [1], [2], [0, 0, 0, 1, 1, 2], [0], [0]>} : vector<4x8x8xbf16>, vector<4x8x32xbf16>, vector<4x8x32xf32> -> vector<4x8x32xf32>
    "tpu.trace_stop"() : () -> ()
    %214 = vector.shape_cast %213 : vector<4x8x32xf32> to vector<32x32xf32>
    %215 = arith.truncf %214 : vector<32x32xf32> to vector<32x32xbf16>
    %cst_97 = arith.constant dense<0.000000e+00> : vector<32x32xf32>
    %216 = tpu.matmul %215, %180, %cst_97 {dimension_numbers = #tpu.dot_dimension_numbers<[1], [0], [0], [1], [0, 0, 1, 1], [], []>} : vector<32x32xbf16>, vector<32x32xbf16>, vector<32x32xf32> -> vector<32x32xf32>
    %217 = vector.broadcast %184 : vector<1x32xf32> to vector<32x32xf32>
    %218 = arith.addf %216, %217 : vector<32x32xf32>
    %219 = arith.addf %2, %218 : vector<32x32xf32>
    %c20 = arith.constant 20 : index
    %c0_98 = arith.constant 0 : index
    %220 = vector.load %arg5[%c20, %c0_98] : memref<28x32xf32, #tpu.memory_space<vmem>>, vector<1x32xf32>
    %c21 = arith.constant 21 : index
    %c0_99 = arith.constant 0 : index
    %221 = vector.load %arg5[%c21, %c0_99] : memref<28x32xf32, #tpu.memory_space<vmem>>, vector<1x32xf32>
    %cst_100 = arith.constant dense<0.000000e+00> : vector<32xf32>
    %222 = vector.multi_reduction <add>, %219, %cst_100 [1] : vector<32x32xf32> to vector<32xf32>
    %223 = vector.shape_cast %222 : vector<32xf32> to vector<32x1xf32>
    %cst_101 = arith.constant 3.200000e+01 : f32
    %224 = vector.broadcast %cst_101 : f32 to vector<32x1xf32>
    %225 = arith.divf %223, %224 : vector<32x1xf32>
    %226 = vector.broadcast %225 : vector<32x1xf32> to vector<32x32xf32>
    %227 = arith.subf %219, %226 : vector<32x32xf32>
    %228 = arith.mulf %227, %227 : vector<32x32xf32>
    %cst_102 = arith.constant dense<0.000000e+00> : vector<32xf32>
    %229 = vector.multi_reduction <add>, %228, %cst_102 [1] : vector<32x32xf32> to vector<32xf32>
    %230 = vector.shape_cast %229 : vector<32xf32> to vector<32x1xf32>
    %cst_103 = arith.constant 3.200000e+01 : f32
    %231 = vector.broadcast %cst_103 : f32 to vector<32x1xf32>
    %232 = arith.divf %230, %231 : vector<32x1xf32>
    %233 = vector.broadcast %225 : vector<32x1xf32> to vector<32x32xf32>
    %234 = arith.subf %219, %233 : vector<32x32xf32>
    %cst_104 = arith.constant 9.99999974E-6 : f32
    %235 = vector.broadcast %cst_104 : f32 to vector<32x1xf32>
    %236 = arith.addf %232, %235 : vector<32x1xf32>
    %237 = math.rsqrt %236 : vector<32x1xf32>
    %238 = vector.broadcast %237 : vector<32x1xf32> to vector<32x32xf32>
    %239 = arith.mulf %234, %238 : vector<32x32xf32>
    %240 = vector.broadcast %220 : vector<1x32xf32> to vector<32x32xf32>
    %241 = arith.mulf %239, %240 : vector<32x32xf32>
    %242 = vector.broadcast %221 : vector<1x32xf32> to vector<32x32xf32>
    %243 = arith.addf %241, %242 : vector<32x32xf32>
    %244 = arith.truncf %243 : vector<32x32xf32> to vector<32x32xbf16>
    %c2_105 = arith.constant 2 : index
    %c0_106 = arith.constant 0 : index
    %c0_107 = arith.constant 0 : index
    %245 = vector.load %arg4[%c2_105, %c0_106, %c0_107] : memref<4x32x32xbf16, #tpu.memory_space<vmem>>, vector<1x32x32xbf16>
    %246 = vector.shape_cast %245 : vector<1x32x32xbf16> to vector<32x32xbf16>
    %c0_108 = arith.constant 0 : index
    %c0_109 = arith.constant 0 : index
    %247 = vector.load %arg3[%c0_108, %c0_109] : memref<32x64xbf16, #tpu.memory_space<vmem>>, vector<32x64xbf16>
    %c3_110 = arith.constant 3 : index
    %c0_111 = arith.constant 0 : index
    %c0_112 = arith.constant 0 : index
    %248 = vector.load %arg4[%c3_110, %c0_111, %c0_112] : memref<4x32x32xbf16, #tpu.memory_space<vmem>>, vector<1x32x32xbf16>
    %249 = vector.shape_cast %248 : vector<1x32x32xbf16> to vector<32x32xbf16>
    %c15 = arith.constant 15 : index
    %c0_113 = arith.constant 0 : index
    %250 = vector.load %arg5[%c15, %c0_113] : memref<28x32xf32, #tpu.memory_space<vmem>>, vector<1x32xf32>
    %c16 = arith.constant 16 : index
    %c0_114 = arith.constant 0 : index
    %251 = vector.load %arg5[%c16, %c0_114] : memref<28x32xf32, #tpu.memory_space<vmem>>, vector<1x32xf32>
    %c17 = arith.constant 17 : index
    %c0_115 = arith.constant 0 : index
    %252 = vector.load %arg5[%c17, %c0_115] : memref<28x32xf32, #tpu.memory_space<vmem>>, vector<1x32xf32>
    %c18 = arith.constant 18 : index
    %c0_116 = arith.constant 0 : index
    %253 = vector.load %arg5[%c18, %c0_116] : memref<28x32xf32, #tpu.memory_space<vmem>>, vector<1x32xf32>
    %cst_117 = arith.constant dense<0.000000e+00> : vector<32x32xf32>
    %254 = tpu.matmul %244, %246, %cst_117 {dimension_numbers = #tpu.dot_dimension_numbers<[1], [0], [0], [1], [0, 0, 1, 1], [], []>} : vector<32x32xbf16>, vector<32x32xbf16>, vector<32x32xf32> -> vector<32x32xf32>
    %255 = vector.broadcast %250 : vector<1x32xf32> to vector<32x32xf32>
    %256 = arith.addf %254, %255 : vector<32x32xf32>
    %cst_118 = arith.constant dense<0.000000e+00> : vector<32x64xf32>
    %257 = tpu.matmul %176, %247, %cst_118 {dimension_numbers = #tpu.dot_dimension_numbers<[1], [0], [0], [1], [0, 0, 1, 1], [], []>} : vector<32x32xbf16>, vector<32x64xbf16>, vector<32x64xf32> -> vector<32x64xf32>
    %258 = vector.extract_strided_slice %257 {offsets = [0, 0], sizes = [32, 32], strides = [1, 1]} : vector<32x64xf32> to vector<32x32xf32>
    %259 = vector.broadcast %251 : vector<1x32xf32> to vector<32x32xf32>
    %260 = arith.addf %258, %259 : vector<32x32xf32>
    %261 = vector.extract_strided_slice %257 {offsets = [0, 32], sizes = [32, 32], strides = [1, 1]} : vector<32x64xf32> to vector<32x32xf32>
    %262 = vector.broadcast %252 : vector<1x32xf32> to vector<32x32xf32>
    %263 = arith.addf %261, %262 : vector<32x32xf32>
    %264 = arith.truncf %256 : vector<32x32xf32> to vector<32x32xbf16>
    %265 = vector.shape_cast %264 : vector<32x32xbf16> to vector<4x8x32xbf16>
    %266 = arith.truncf %260 : vector<32x32xf32> to vector<32x32xbf16>
    %267 = vector.shape_cast %266 : vector<32x32xbf16> to vector<4x8x32xbf16>
    %268 = arith.truncf %263 : vector<32x32xf32> to vector<32x32xbf16>
    %269 = vector.shape_cast %268 : vector<32x32xbf16> to vector<4x8x32xbf16>
    "tpu.trace_start"() <{level = 10 : i32, message = "bqd,bkd->bqk"}> : () -> ()
    %cst_119 = arith.constant dense<0.000000e+00> : vector<4x8x8xf32>
    %270 = tpu.matmul %265, %267, %cst_119 {dimension_numbers = #tpu.dot_dimension_numbers<[2], [2], [1], [1], [0, 0, 0, 1, 1, 1], [0], [0]>} : vector<4x8x32xbf16>, vector<4x8x32xbf16>, vector<4x8x8xf32> -> vector<4x8x8xf32>
    "tpu.trace_stop"() : () -> ()
    %cst_120 = arith.constant dense<0xFF800000> : vector<4x8xf32>
    %271 = vector.multi_reduction <maximumf>, %270, %cst_120 [2] : vector<4x8x8xf32> to vector<4x8xf32>
    %272 = vector.shape_cast %271 : vector<4x8xf32> to vector<4x8x1xf32>
    %273 = vector.broadcast %272 : vector<4x8x1xf32> to vector<4x8x8xf32>
    %274 = arith.subf %270, %273 : vector<4x8x8xf32>
    %275 = math.exp %274 : vector<4x8x8xf32>
    %cst_121 = arith.constant dense<0.000000e+00> : vector<4x8xf32>
    %276 = vector.multi_reduction <add>, %275, %cst_121 [2] : vector<4x8x8xf32> to vector<4x8xf32>
    %277 = vector.shape_cast %276 : vector<4x8xf32> to vector<4x8x1xf32>
    %278 = tpu.reciprocal %277 {approx = true} : vector<4x8x1xf32> -> vector<4x8x1xf32>
    %279 = vector.broadcast %278 : vector<4x8x1xf32> to vector<4x8x8xf32>
    %280 = arith.mulf %275, %279 : vector<4x8x8xf32>
    %281 = arith.truncf %280 : vector<4x8x8xf32> to vector<4x8x8xbf16>
    "tpu.trace_start"() <{level = 10 : i32, message = "bqk,bkd->bqd"}> : () -> ()
    %cst_122 = arith.constant dense<0.000000e+00> : vector<4x8x32xf32>
    %282 = tpu.matmul %281, %269, %cst_122 {dimension_numbers = #tpu.dot_dimension_numbers<[2], [1], [1], [2], [0, 0, 0, 1, 1, 2], [0], [0]>} : vector<4x8x8xbf16>, vector<4x8x32xbf16>, vector<4x8x32xf32> -> vector<4x8x32xf32>
    "tpu.trace_stop"() : () -> ()
    %283 = vector.shape_cast %282 : vector<4x8x32xf32> to vector<32x32xf32>
    %284 = arith.truncf %283 : vector<32x32xf32> to vector<32x32xbf16>
    %cst_123 = arith.constant dense<0.000000e+00> : vector<32x32xf32>
    %285 = tpu.matmul %284, %249, %cst_123 {dimension_numbers = #tpu.dot_dimension_numbers<[1], [0], [0], [1], [0, 0, 1, 1], [], []>} : vector<32x32xbf16>, vector<32x32xbf16>, vector<32x32xf32> -> vector<32x32xf32>
    %286 = vector.broadcast %253 : vector<1x32xf32> to vector<32x32xf32>
    %287 = arith.addf %285, %286 : vector<32x32xf32>
    %288 = arith.addf %243, %287 : vector<32x32xf32>
    %c22 = arith.constant 22 : index
    %c0_124 = arith.constant 0 : index
    %289 = vector.load %arg5[%c22, %c0_124] : memref<28x32xf32, #tpu.memory_space<vmem>>, vector<1x32xf32>
    %c23 = arith.constant 23 : index
    %c0_125 = arith.constant 0 : index
    %290 = vector.load %arg5[%c23, %c0_125] : memref<28x32xf32, #tpu.memory_space<vmem>>, vector<1x32xf32>
    %cst_126 = arith.constant dense<0.000000e+00> : vector<32xf32>
    %291 = vector.multi_reduction <add>, %288, %cst_126 [1] : vector<32x32xf32> to vector<32xf32>
    %292 = vector.shape_cast %291 : vector<32xf32> to vector<32x1xf32>
    %cst_127 = arith.constant 3.200000e+01 : f32
    %293 = vector.broadcast %cst_127 : f32 to vector<32x1xf32>
    %294 = arith.divf %292, %293 : vector<32x1xf32>
    %295 = vector.broadcast %294 : vector<32x1xf32> to vector<32x32xf32>
    %296 = arith.subf %288, %295 : vector<32x32xf32>
    %297 = arith.mulf %296, %296 : vector<32x32xf32>
    %cst_128 = arith.constant dense<0.000000e+00> : vector<32xf32>
    %298 = vector.multi_reduction <add>, %297, %cst_128 [1] : vector<32x32xf32> to vector<32xf32>
    %299 = vector.shape_cast %298 : vector<32xf32> to vector<32x1xf32>
    %cst_129 = arith.constant 3.200000e+01 : f32
    %300 = vector.broadcast %cst_129 : f32 to vector<32x1xf32>
    %301 = arith.divf %299, %300 : vector<32x1xf32>
    %302 = vector.broadcast %294 : vector<32x1xf32> to vector<32x32xf32>
    %303 = arith.subf %288, %302 : vector<32x32xf32>
    %cst_130 = arith.constant 9.99999974E-6 : f32
    %304 = vector.broadcast %cst_130 : f32 to vector<32x1xf32>
    %305 = arith.addf %301, %304 : vector<32x1xf32>
    %306 = math.rsqrt %305 : vector<32x1xf32>
    %307 = vector.broadcast %306 : vector<32x1xf32> to vector<32x32xf32>
    %308 = arith.mulf %303, %307 : vector<32x32xf32>
    %309 = vector.broadcast %289 : vector<1x32xf32> to vector<32x32xf32>
    %310 = arith.mulf %308, %309 : vector<32x32xf32>
    %311 = vector.broadcast %290 : vector<1x32xf32> to vector<32x32xf32>
    %312 = arith.addf %310, %311 : vector<32x32xf32>
    %313 = arith.truncf %312 : vector<32x32xf32> to vector<32x32xbf16>
    %cst_131 = arith.constant 0.000000e+00 : f32
    %314 = vector.broadcast %cst_131 : f32 to vector<32x32xf32>
    %c1_132 = arith.constant 1 : index
    %c0_133 = arith.constant 0 : index
    %c0_134 = arith.constant 0 : index
    %315 = vector.load %arg6[%c1_132, %c0_133, %c0_134] : memref<2x32x2048xbf16, #tpu.memory_space<vmem>>, vector<1x32x512xbf16>
    %316 = vector.shape_cast %315 : vector<1x32x512xbf16> to vector<32x512xbf16>
    %cst_135 = arith.constant dense<0.000000e+00> : vector<32x512xf32>
    %317 = tpu.matmul %313, %316, %cst_135 {dimension_numbers = #tpu.dot_dimension_numbers<[1], [0], [0], [1], [0, 0, 1, 1], [], []>} : vector<32x32xbf16>, vector<32x512xbf16>, vector<32x512xf32> -> vector<32x512xf32>
    %c1_136 = arith.constant 1 : index
    %c0_137 = arith.constant 0 : index
    %318 = vector.load %arg7[%c1_136, %c0_137] : memref<2x2048xf32, #tpu.memory_space<vmem>>, vector<1x512xf32>
    %319 = vector.broadcast %318 : vector<1x512xf32> to vector<32x512xf32>
    %320 = arith.addf %317, %319 : vector<32x512xf32>
    %cst_138 = arith.constant 0.000000e+00 : f32
    %321 = vector.broadcast %cst_138 : f32 to vector<32x512xf32>
    %322 = arith.maximumf %320, %321 : vector<32x512xf32>
    %323 = arith.truncf %322 : vector<32x512xf32> to vector<32x512xbf16>
    %c1_139 = arith.constant 1 : index
    %c0_140 = arith.constant 0 : index
    %c0_141 = arith.constant 0 : index
    %324 = vector.load %arg8[%c1_139, %c0_140, %c0_141] : memref<2x2048x32xbf16, #tpu.memory_space<vmem>>, vector<1x512x32xbf16>
    %325 = vector.shape_cast %324 : vector<1x512x32xbf16> to vector<512x32xbf16>
    %cst_142 = arith.constant dense<0.000000e+00> : vector<32x32xf32>
    %326 = tpu.matmul %323, %325, %cst_142 {dimension_numbers = #tpu.dot_dimension_numbers<[1], [0], [0], [1], [0, 0, 1, 1], [], []>} : vector<32x512xbf16>, vector<512x32xbf16>, vector<32x32xf32> -> vector<32x32xf32>
    %327 = arith.addf %314, %326 : vector<32x32xf32>
    %c1_143 = arith.constant 1 : index
    %c0_144 = arith.constant 0 : index
    %c512_145 = arith.constant 512 : index
    %328 = vector.load %arg6[%c1_143, %c0_144, %c512_145] : memref<2x32x2048xbf16, #tpu.memory_space<vmem>>, vector<1x32x512xbf16>
    %329 = vector.shape_cast %328 : vector<1x32x512xbf16> to vector<32x512xbf16>
    %cst_146 = arith.constant dense<0.000000e+00> : vector<32x512xf32>
    %330 = tpu.matmul %313, %329, %cst_146 {dimension_numbers = #tpu.dot_dimension_numbers<[1], [0], [0], [1], [0, 0, 1, 1], [], []>} : vector<32x32xbf16>, vector<32x512xbf16>, vector<32x512xf32> -> vector<32x512xf32>
    %c1_147 = arith.constant 1 : index
    %c512_148 = arith.constant 512 : index
    %331 = vector.load %arg7[%c1_147, %c512_148] : memref<2x2048xf32, #tpu.memory_space<vmem>>, vector<1x512xf32>
    %332 = vector.broadcast %331 : vector<1x512xf32> to vector<32x512xf32>
    %333 = arith.addf %330, %332 : vector<32x512xf32>
    %cst_149 = arith.constant 0.000000e+00 : f32
    %334 = vector.broadcast %cst_149 : f32 to vector<32x512xf32>
    %335 = arith.maximumf %333, %334 : vector<32x512xf32>
    %336 = arith.truncf %335 : vector<32x512xf32> to vector<32x512xbf16>
    %c1_150 = arith.constant 1 : index
    %c512_151 = arith.constant 512 : index
    %c0_152 = arith.constant 0 : index
    %337 = vector.load %arg8[%c1_150, %c512_151, %c0_152] : memref<2x2048x32xbf16, #tpu.memory_space<vmem>>, vector<1x512x32xbf16>
    %338 = vector.shape_cast %337 : vector<1x512x32xbf16> to vector<512x32xbf16>
    %cst_153 = arith.constant dense<0.000000e+00> : vector<32x32xf32>
    %339 = tpu.matmul %336, %338, %cst_153 {dimension_numbers = #tpu.dot_dimension_numbers<[1], [0], [0], [1], [0, 0, 1, 1], [], []>} : vector<32x512xbf16>, vector<512x32xbf16>, vector<32x32xf32> -> vector<32x32xf32>
    %340 = arith.addf %327, %339 : vector<32x32xf32>
    %c1_154 = arith.constant 1 : index
    %c0_155 = arith.constant 0 : index
    %c1024_156 = arith.constant 1024 : index
    %341 = vector.load %arg6[%c1_154, %c0_155, %c1024_156] : memref<2x32x2048xbf16, #tpu.memory_space<vmem>>, vector<1x32x512xbf16>
    %342 = vector.shape_cast %341 : vector<1x32x512xbf16> to vector<32x512xbf16>
    %cst_157 = arith.constant dense<0.000000e+00> : vector<32x512xf32>
    %343 = tpu.matmul %313, %342, %cst_157 {dimension_numbers = #tpu.dot_dimension_numbers<[1], [0], [0], [1], [0, 0, 1, 1], [], []>} : vector<32x32xbf16>, vector<32x512xbf16>, vector<32x512xf32> -> vector<32x512xf32>
    %c1_158 = arith.constant 1 : index
    %c1024_159 = arith.constant 1024 : index
    %344 = vector.load %arg7[%c1_158, %c1024_159] : memref<2x2048xf32, #tpu.memory_space<vmem>>, vector<1x512xf32>
    %345 = vector.broadcast %344 : vector<1x512xf32> to vector<32x512xf32>
    %346 = arith.addf %343, %345 : vector<32x512xf32>
    %cst_160 = arith.constant 0.000000e+00 : f32
    %347 = vector.broadcast %cst_160 : f32 to vector<32x512xf32>
    %348 = arith.maximumf %346, %347 : vector<32x512xf32>
    %349 = arith.truncf %348 : vector<32x512xf32> to vector<32x512xbf16>
    %c1_161 = arith.constant 1 : index
    %c1024_162 = arith.constant 1024 : index
    %c0_163 = arith.constant 0 : index
    %350 = vector.load %arg8[%c1_161, %c1024_162, %c0_163] : memref<2x2048x32xbf16, #tpu.memory_space<vmem>>, vector<1x512x32xbf16>
    %351 = vector.shape_cast %350 : vector<1x512x32xbf16> to vector<512x32xbf16>
    %cst_164 = arith.constant dense<0.000000e+00> : vector<32x32xf32>
    %352 = tpu.matmul %349, %351, %cst_164 {dimension_numbers = #tpu.dot_dimension_numbers<[1], [0], [0], [1], [0, 0, 1, 1], [], []>} : vector<32x512xbf16>, vector<512x32xbf16>, vector<32x32xf32> -> vector<32x32xf32>
    %353 = arith.addf %340, %352 : vector<32x32xf32>
    %c1_165 = arith.constant 1 : index
    %c0_166 = arith.constant 0 : index
    %c1536_167 = arith.constant 1536 : index
    %354 = vector.load %arg6[%c1_165, %c0_166, %c1536_167] : memref<2x32x2048xbf16, #tpu.memory_space<vmem>>, vector<1x32x512xbf16>
    %355 = vector.shape_cast %354 : vector<1x32x512xbf16> to vector<32x512xbf16>
    %cst_168 = arith.constant dense<0.000000e+00> : vector<32x512xf32>
    %356 = tpu.matmul %313, %355, %cst_168 {dimension_numbers = #tpu.dot_dimension_numbers<[1], [0], [0], [1], [0, 0, 1, 1], [], []>} : vector<32x32xbf16>, vector<32x512xbf16>, vector<32x512xf32> -> vector<32x512xf32>
    %c1_169 = arith.constant 1 : index
    %c1536_170 = arith.constant 1536 : index
    %357 = vector.load %arg7[%c1_169, %c1536_170] : memref<2x2048xf32, #tpu.memory_space<vmem>>, vector<1x512xf32>
    %358 = vector.broadcast %357 : vector<1x512xf32> to vector<32x512xf32>
    %359 = arith.addf %356, %358 : vector<32x512xf32>
    %cst_171 = arith.constant 0.000000e+00 : f32
    %360 = vector.broadcast %cst_171 : f32 to vector<32x512xf32>
    %361 = arith.maximumf %359, %360 : vector<32x512xf32>
    %362 = arith.truncf %361 : vector<32x512xf32> to vector<32x512xbf16>
    %c1_172 = arith.constant 1 : index
    %c1536_173 = arith.constant 1536 : index
    %c0_174 = arith.constant 0 : index
    %363 = vector.load %arg8[%c1_172, %c1536_173, %c0_174] : memref<2x2048x32xbf16, #tpu.memory_space<vmem>>, vector<1x512x32xbf16>
    %364 = vector.shape_cast %363 : vector<1x512x32xbf16> to vector<512x32xbf16>
    %cst_175 = arith.constant dense<0.000000e+00> : vector<32x32xf32>
    %365 = tpu.matmul %362, %364, %cst_175 {dimension_numbers = #tpu.dot_dimension_numbers<[1], [0], [0], [1], [0, 0, 1, 1], [], []>} : vector<32x512xbf16>, vector<512x32xbf16>, vector<32x32xf32> -> vector<32x32xf32>
    %366 = arith.addf %353, %365 : vector<32x32xf32>
    %367 = arith.addf %312, %366 : vector<32x32xf32>
    %c19 = arith.constant 19 : index
    %c0_176 = arith.constant 0 : index
    %368 = vector.load %arg5[%c19, %c0_176] : memref<28x32xf32, #tpu.memory_space<vmem>>, vector<1x32xf32>
    %369 = vector.broadcast %368 : vector<1x32xf32> to vector<32x32xf32>
    %370 = arith.addf %367, %369 : vector<32x32xf32>
    %c24 = arith.constant 24 : index
    %c0_177 = arith.constant 0 : index
    %371 = vector.load %arg5[%c24, %c0_177] : memref<28x32xf32, #tpu.memory_space<vmem>>, vector<1x32xf32>
    %c25 = arith.constant 25 : index
    %c0_178 = arith.constant 0 : index
    %372 = vector.load %arg5[%c25, %c0_178] : memref<28x32xf32, #tpu.memory_space<vmem>>, vector<1x32xf32>
    %cst_179 = arith.constant dense<0.000000e+00> : vector<32xf32>
    %373 = vector.multi_reduction <add>, %370, %cst_179 [1] : vector<32x32xf32> to vector<32xf32>
    %374 = vector.shape_cast %373 : vector<32xf32> to vector<32x1xf32>
    %cst_180 = arith.constant 3.200000e+01 : f32
    %375 = vector.broadcast %cst_180 : f32 to vector<32x1xf32>
    %376 = arith.divf %374, %375 : vector<32x1xf32>
    %377 = vector.broadcast %376 : vector<32x1xf32> to vector<32x32xf32>
    %378 = arith.subf %370, %377 : vector<32x32xf32>
    %379 = arith.mulf %378, %378 : vector<32x32xf32>
    %cst_181 = arith.constant dense<0.000000e+00> : vector<32xf32>
    %380 = vector.multi_reduction <add>, %379, %cst_181 [1] : vector<32x32xf32> to vector<32xf32>
    %381 = vector.shape_cast %380 : vector<32xf32> to vector<32x1xf32>
    %cst_182 = arith.constant 3.200000e+01 : f32
    %382 = vector.broadcast %cst_182 : f32 to vector<32x1xf32>
    %383 = arith.divf %381, %382 : vector<32x1xf32>
    %384 = vector.broadcast %376 : vector<32x1xf32> to vector<32x32xf32>
    %385 = arith.subf %370, %384 : vector<32x32xf32>
    %cst_183 = arith.constant 9.99999974E-6 : f32
    %386 = vector.broadcast %cst_183 : f32 to vector<32x1xf32>
    %387 = arith.addf %383, %386 : vector<32x1xf32>
    %388 = math.rsqrt %387 : vector<32x1xf32>
    %389 = vector.broadcast %388 : vector<32x1xf32> to vector<32x32xf32>
    %390 = arith.mulf %385, %389 : vector<32x32xf32>
    %391 = vector.broadcast %371 : vector<1x32xf32> to vector<32x32xf32>
    %392 = arith.mulf %390, %391 : vector<32x32xf32>
    %393 = vector.broadcast %372 : vector<1x32xf32> to vector<32x32xf32>
    %394 = arith.addf %392, %393 : vector<32x32xf32>
    %c26 = arith.constant 26 : index
    %c0_184 = arith.constant 0 : index
    %395 = vector.load %arg5[%c26, %c0_184] : memref<28x32xf32, #tpu.memory_space<vmem>>, vector<1x32xf32>
    %c27 = arith.constant 27 : index
    %c0_185 = arith.constant 0 : index
    %396 = vector.load %arg5[%c27, %c0_185] : memref<28x32xf32, #tpu.memory_space<vmem>>, vector<1x32xf32>
    %cst_186 = arith.constant dense<0.000000e+00> : vector<32xf32>
    %397 = vector.multi_reduction <add>, %394, %cst_186 [1] : vector<32x32xf32> to vector<32xf32>
    %398 = vector.shape_cast %397 : vector<32xf32> to vector<32x1xf32>
    %cst_187 = arith.constant 3.200000e+01 : f32
    %399 = vector.broadcast %cst_187 : f32 to vector<32x1xf32>
    %400 = arith.divf %398, %399 : vector<32x1xf32>
    %401 = vector.broadcast %400 : vector<32x1xf32> to vector<32x32xf32>
    %402 = arith.subf %394, %401 : vector<32x32xf32>
    %403 = arith.mulf %402, %402 : vector<32x32xf32>
    %cst_188 = arith.constant dense<0.000000e+00> : vector<32xf32>
    %404 = vector.multi_reduction <add>, %403, %cst_188 [1] : vector<32x32xf32> to vector<32xf32>
    %405 = vector.shape_cast %404 : vector<32xf32> to vector<32x1xf32>
    %cst_189 = arith.constant 3.200000e+01 : f32
    %406 = vector.broadcast %cst_189 : f32 to vector<32x1xf32>
    %407 = arith.divf %405, %406 : vector<32x1xf32>
    %408 = vector.broadcast %400 : vector<32x1xf32> to vector<32x32xf32>
    %409 = arith.subf %394, %408 : vector<32x32xf32>
    %cst_190 = arith.constant 9.99999974E-6 : f32
    %410 = vector.broadcast %cst_190 : f32 to vector<32x1xf32>
    %411 = arith.addf %407, %410 : vector<32x1xf32>
    %412 = math.rsqrt %411 : vector<32x1xf32>
    %413 = vector.broadcast %412 : vector<32x1xf32> to vector<32x32xf32>
    %414 = arith.mulf %409, %413 : vector<32x32xf32>
    %415 = vector.broadcast %395 : vector<1x32xf32> to vector<32x32xf32>
    %416 = arith.mulf %414, %415 : vector<32x32xf32>
    %417 = vector.broadcast %396 : vector<1x32xf32> to vector<32x32xf32>
    %418 = arith.addf %416, %417 : vector<32x32xf32>
    %419 = vector.shape_cast %418 : vector<32x32xf32> to vector<4x8x32xf32>
    %cst_191 = arith.constant dense<0.000000e+00> : vector<4x32xf32>
    %420 = vector.multi_reduction <add>, %419, %cst_191 [1] : vector<4x8x32xf32> to vector<4x32xf32>
    %cst_192 = arith.constant 1.250000e-01 : f32
    %421 = vector.broadcast %cst_192 : f32 to vector<4x32xf32>
    %422 = arith.mulf %420, %421 : vector<4x32xf32>
    %423 = arith.truncf %422 : vector<4x32xf32> to vector<4x32xbf16>
    %c0_193 = arith.constant 0 : index
    %c0_194 = arith.constant 0 : index
    %424 = vector.load %arg9[%c0_193, %c0_194] : memref<32x16xbf16, #tpu.memory_space<vmem>>, vector<32x16xbf16>
    %cst_195 = arith.constant dense<0.000000e+00> : vector<4x16xf32>
    %425 = tpu.matmul %423, %424, %cst_195 {dimension_numbers = #tpu.dot_dimension_numbers<[1], [0], [0], [1], [0, 0, 1, 1], [], []>} : vector<4x32xbf16>, vector<32x16xbf16>, vector<4x16xf32> -> vector<4x16xf32>
    %c0_196 = arith.constant 0 : index
    %c0_197 = arith.constant 0 : index
    %426 = vector.load %arg10[%c0_196, %c0_197] : memref<1x16xf32, #tpu.memory_space<vmem>>, vector<1x16xf32>
    %427 = vector.broadcast %426 : vector<1x16xf32> to vector<4x16xf32>
    %428 = arith.addf %425, %427 : vector<4x16xf32>
    %c0_198 = arith.constant 0 : index
    %c0_199 = arith.constant 0 : index
    %c0_200 = arith.constant 0 : index
    %429 = vector.load %arg11[%c0_198, %c0_199, %c0_200] : memref<1x4x16xf32, #tpu.memory_space<vmem>>, vector<1x4x16xf32>
    %430 = vector.shape_cast %429 : vector<1x4x16xf32> to vector<4x16xf32>
    %431 = vector.shape_cast %428 : vector<4x16xf32> to vector<1x4x16xf32>
    tpu.vector_store %arg11[%c0_198, %c0_199, %c0_200], %431 {strides = array<i32>} : memref<1x4x16xf32, #tpu.memory_space<vmem>>, vector<1x4x16xf32>,
    return
  }
  func.func @transform_0(%arg0: i32) -> (i32, i32, i32) {
    %c0_i32 = arith.constant 0 : i32
    %c0_i32_0 = arith.constant 0 : i32
    %c0_i32_1 = arith.constant 0 : i32
    return %arg0, %c0_i32, %c0_i32_0 : i32, i32, i32
  }
  func.func @transform_1(%arg0: i32) -> (i32, i32, i32) {
    %c0_i32 = arith.constant 0 : i32
    %c0_i32_0 = arith.constant 0 : i32
    %c0_i32_1 = arith.constant 0 : i32
    %c0_i32_2 = arith.constant 0 : i32
    return %c0_i32, %c0_i32_0, %c0_i32_1 : i32, i32, i32
  }
  func.func @transform_2(%arg0: i32) -> (i32, i32) {
    %c0_i32 = arith.constant 0 : i32
    %c0_i32_0 = arith.constant 0 : i32
    %c0_i32_1 = arith.constant 0 : i32
    return %c0_i32, %c0_i32_0 : i32, i32
  }
  func.func @transform_3(%arg0: i32) -> (i32, i32, i32) {
    %c0_i32 = arith.constant 0 : i32
    %c0_i32_0 = arith.constant 0 : i32
    %c0_i32_1 = arith.constant 0 : i32
    %c0_i32_2 = arith.constant 0 : i32
    return %c0_i32, %c0_i32_0, %c0_i32_1 : i32, i32, i32
  }
  func.func @transform_4(%arg0: i32) -> (i32, i32) {
    %c0_i32 = arith.constant 0 : i32
    %c0_i32_0 = arith.constant 0 : i32
    %c0_i32_1 = arith.constant 0 : i32
    return %c0_i32, %c0_i32_0 : i32, i32
  }
  func.func @transform_5(%arg0: i32) -> (i32, i32, i32) {
    %c0_i32 = arith.constant 0 : i32
    %c0_i32_0 = arith.constant 0 : i32
    %c0_i32_1 = arith.constant 0 : i32
    %c0_i32_2 = arith.constant 0 : i32
    return %c0_i32, %c0_i32_0, %c0_i32_1 : i32, i32, i32
  }
  func.func @transform_6(%arg0: i32) -> (i32, i32) {
    %c0_i32 = arith.constant 0 : i32
    %c0_i32_0 = arith.constant 0 : i32
    %c0_i32_1 = arith.constant 0 : i32
    return %c0_i32, %c0_i32_0 : i32, i32
  }
  func.func @transform_7(%arg0: i32) -> (i32, i32, i32) {
    %c0_i32 = arith.constant 0 : i32
    %c0_i32_0 = arith.constant 0 : i32
    %c0_i32_1 = arith.constant 0 : i32
    %c0_i32_2 = arith.constant 0 : i32
    return %c0_i32, %c0_i32_0, %c0_i32_1 : i32, i32, i32
  }
  func.func @transform_8(%arg0: i32) -> (i32, i32) {
    %c0_i32 = arith.constant 0 : i32
    %c0_i32_0 = arith.constant 0 : i32
    %c0_i32_1 = arith.constant 0 : i32
    return %c0_i32, %c0_i32_0 : i32, i32
  }
  func.func @transform_9(%arg0: i32) -> (i32, i32) {
    %c0_i32 = arith.constant 0 : i32
    %c0_i32_0 = arith.constant 0 : i32
    %c0_i32_1 = arith.constant 0 : i32
    return %c0_i32, %c0_i32_0 : i32, i32
  }
  func.func @transform_10(%arg0: i32) -> (i32, i32, i32) {
    %c0_i32 = arith.constant 0 : i32
    %c0_i32_0 = arith.constant 0 : i32
    %c0_i32_1 = arith.constant 0 : i32
    return %arg0, %c0_i32, %c0_i32_0 : i32, i32, i32
  }
}

</mosaic_0001>

<bundles_post_ra>
// kernel: tpu_custom_call.1
= control target key start
LH: loop header
LB: loop body
LE: loop exit
PB: predicated region body
PF: predicated region fallthrough
CT: control target
= control target key end

     0   :  { %15 = vsyncpa [#allocation3], 0  ;;  %s11787_s0 = inlined_call_operand.vmem [shape: bf16[8,8,32], index: 0, kind: input, shape index: {}]   ;;  %s11788_s1 = inlined_call_operand.vmem [shape: bf16[2,32,96], index: 1, kind: input, shape index: {}]   ;;  %s11789_s2 = inlined_call_operand.vmem [shape: bf16[32,64], index: 2, kind: input, shape index: {}]   ;;  %s11790_s3 = inlined_call_operand.vmem [shape: bf16[4,32,32], index: 3, kind: input, shape index: {}]   ;;  %s11791_s4 = inlined_call_operand.vmem [shape: f32[28,32], index: 4, kind: input, shape index: {}]   ;;  %s11792_s5 = inlined_call_operand.vmem [shape: bf16[2,32,2048], index: 5, kind: input, shape index: {}]   ;;  %s11793_s6 = inlined_call_operand.vmem [shape: f32[2,2048], index: 6, kind: input, shape index: {}]   ;;  %s11794_s7 = inlined_call_operand.vmem [shape: bf16[2,2048,32], index: 7, kind: input, shape index: {}]   ;;  %s11795_s8 = inlined_call_operand.vmem [shape: bf16[32,16], index: 8, kind: input, shape index: {}]   ;;  %s11796_s9 = inlined_call_operand.vmem [shape: f32[1,16], index: 9, kind: input, shape index: {}]   ;;  %s11797_s10 = inlined_call_operand.hbm [shape: f32[2,4,16], index: 10, kind: output, shape index: {}]  }
   0x1   :  { %17 = vsyncpa [#allocation3 + $0x1], 0  ;;  %s9707_s13 = smov 0   ;;  %s9709_s14 = smov 0  }
   0x2   :  { %s9711_s15 = smov 0   ;;  %s9713_s16 = smov 0  }
   0x3 LB: > { %s9728_s17 = sadd.s32 4294967295, %s9643_s16   ;;  %s7589_s18 = sadd.s32 4294967294, %s9643_s16   ;;  %s9643_s16 = sphi %s9713_s16, %s11815_s16   ;;  %s9639_s15 = sphi %s9711_s15, %s11814_s15   ;;  %s9635_s14 = sphi %s9709_s14, %s11813_s14   ;;  %s9631_s13 = sphi %s9707_s13, %s11812_s13  }
   0x4   : > { %s9732_s19 = sadd.s32 1, %s9643_s16   ;;  %s245_s20 = sadd.s32 1, %s9639_s15 }
   0x5   : > { %s242_s21 = ssub.s32 %s9643_s16, %s9732_s19  ;;  %p255_p0 = scmp.ne.s32.totalorder %s9639_s15, %s9635_s14 }
   0x6   : > { %p243_p1 = scmp.eq.s32.totalorder %s242_s21, 0  ;;  %p256_p2 = scmp.eq.s32.totalorder %s9728_s17, 1 }
   0x7   : > { %p261_p3 = scmp.ne.s32.totalorder %s9635_s14, %s9631_s13  ;;  %p262_p4 = scmp.eq.s32.totalorder %s7589_s18, 1 }
   0x8   : > { %s9743_s22 = scalar_select %p243_p1, %s9639_s15, %s245_s20  }
   0x9   : > { %p9745_p5 = por %p256_p2, %p255_p0  ;;  %p9749_p6 = por %p262_p4, %p261_p3 }
   0xa   : > { %p7592_p7 = scmp.ge.s32.totalorder %s9643_s16, 1  ;;  %p316_p8 = scmp.lt.s32.totalorder %s9643_s16, 3 }
   0xc   : > { %p317_p9 = pnand %p7592_p7, %p316_p8 }
   0xd   : > { %s7594_s27 = sshll.u32 (!%p317_p9), %s9728_s17, 2  ;;  %s9645_s12 = smov (!%p317_p9), 32  }
   0xe   : > { %320 = sbr.rel (%p317_p9) target bundleno = 7032 (0x1b78), region = 60  ;;  %p355_p10 = scmp.lt.s32.totalorder (!%p317_p9), %s7594_s27, 7 }
   0xf   : > { %s11800_s26 = smov (!%p317_p9), 96   ;;  %s11798_s11 = smov (!%p317_p9), 64  }
  0x10   : > { %s8382_s21 = sshll.u32 (!%p317_p9), %s9728_s17, 6 }
  0x13   : > { %v9201_v0 = vld [vmem:[%s11788_s1 + $0x8] sm:$0xff]   ;;  %v9202_v1 = vld [vmem:[%s11788_s1] sm:$0xff]   ;;  %s11817_s27 = smov (!%p355_p10, %s7594_s27), 7  ;;  %vm403_vm0 = vcmask 261120   ;;  %v9646_v5 = vmov 0.0   ;;  %vm9647_vm1 = vmmov 0  }
  0x14   : > { %8948 = vmatprep.subr.bf16.mxu0 %v9201_v0  ;;  %v7603_v2 = vld [vmem:[%s11791_s4 + $0x1] ss:$0 sm:$0xff]  ;;  %s7595_s18 = sshll.u32 %s11817_s27, 2  ;;  %8956 = vmatprep.subr.bf16.mxu1 %v9646_v5  ;;  %v7602_v21 = vld [vmem:[%s11791_s4] ss:$0 sm:$0xff]  ;;  %vm715_vm2 = vcmask 64512  }
  0x15   : > { %8949 = vmatpush3.bf16.msra.mxu0 %v9201_v0  ;;  %472 = vrot.lane.b32.xlu0 %v7603_v2, %s9645_s12  ;;  %s9769_s25 = scalar_lea.vmem %s11787_s0, %s7595_s18  ;;  %v7604_v56 = vld [vmem:[%s11791_s4 + $0x2] ss:$0 sm:$0xff]  ;;  %vm770_vm3 = vcmask 1043456   ;;  %vm7452_vm4 = vcmask 1041409   ;;  %vm7454_vm5 = vcmask 1042434   ;;  %vm7456_vm6 = vcmask 1043459   ;;  %s11746_s18 = scalar_lea.hbm %s11797_s10, %s8382_s21 }
  0x16   : > { %8950 = vmatprep.subr.bf16.mxu0 %v9202_v1  ;;  %v9772_v3 = vld [vmem:[%s9769_s25] sm:$0xff]   ;;  %v9775_v4 = vld [vmem:[%s9769_s25 + $0x8] sm:$0xff]   ;;  %8958 = vmatprep.mubr.msk.bf16.mxu1 %vm9647_vm1, %v9646_v5  ;;  %vm7514_vm7 = vcmask 125952  }
  0x17   : > { %8952 = vmatprep.mubr.msk.bf16.mxu0 %vm403_vm0, %v9772_v3 }
  0x19   : > { %8951 = vmatpush3.bf16.msra.mxu0 %v9202_v1 }
  0x1a   : > { %8962 = vmatprep.subr.bf16.mxu0 %v9646_v5 }
  0x1c   : > { %8953 = vmatmul.mubr.msk.bf16.vlgmr.msra.gmra.mxu0 %vm403_vm0, %v9775_v4 }
  0x1d   : > { %8964 = vmatprep.mubr.msk.bf16.mxu0 %vm9647_vm1, %v9646_v5 }
  0x87   : > { %v473_v7 = vpop.permute.xlu0 %472 }
  0xdc   : > { %v9783_v6 = vpop.f32.mrf.mxu0 }
  0xdd   : > { %v477_v15 = vadd.f32 %v9783_v6, %v473_v7  ;;  %v465_v30 = vadd.f32 %v9783_v6, %v7602_v21 }
  0xde   : > { %v9789_v8 = vpop.f32.mrf.mxu0 }
  0xdf   : > { %v475_v9 = vadd.f32 %v473_v7, %v9789_v8  ;;  %v8391_v18 = vpack.c.bf16 %v477_v15, %v477_v15  ;;  %v463_v22 = vadd.f32 %v7602_v21, %v9789_v8  ;;  %v8387_v33 = vpack.c.bf16 %v465_v30, %v465_v30 }
  0xe0   : > { %v9792_v10 = vpop.f32.mrf.mxu0 }
  0xe1   : > { %v478_v11 = vadd.f32 %v9792_v10, %v473_v7  ;;  %v8389_v12 = vpack.c.bf16 %v475_v9, %v475_v9  ;;  %v8385_v25 = vpack.c.bf16 %v463_v22, %v463_v22  ;;  %v466_v34 = vadd.f32 %v9792_v10, %v7602_v21 }
  0xe2   : > { %v9795_v13 = vpop.f32.mrf.mxu0 }
  0xe3   : > { %520 = vrot.lane.b32.xlu0 %v8389_v12, %s11800_s26  ;;  %v476_v14 = vadd.f32 %v473_v7, %v9795_v13  ;;  %v8392_v16 = vpack.c.bf16 %v478_v11, %v478_v11  ;;  %v464_v26 = vadd.f32 %v7602_v21, %v9795_v13  ;;  %v8388_v35 = vpack.c.bf16 %v466_v34, %v466_v34 }
  0xe5   : > { %v8390_v17 = vpack.c.bf16 %v476_v14, %v476_v14  ;;  %v8386_v31 = vpack.c.bf16 %v464_v26, %v464_v26 }
  0xe7   : > { %667 = vrot.lane.b32.xlu0 %v8392_v16, %s11800_s26  ;;  %569 = vrot.lane.b32.xlu1 %v8390_v17, %s11800_s26 }
  0xeb   : > { %618 = vrot.lane.b32.xlu1 %v8391_v18, %s11800_s26 }
 0x155   : > { %v521_v19 = vpop.permute.xlu0 %520 }
 0x156   : > { %v526_v20 = vsel %vm403_vm0, %v521_v19, 0 }
 0x157   : > { %8957 = vmatpush3.bf16.xpose.msra.mxu1 %v526_v20 }
 0x158   : > { %8968 = vmatprep.subr.bf16.mxu1 %v9646_v5 }
 0x159   : > { %v570_v23 = vpop.permute.xlu1 %569  ;;  %v668_v29 = vpop.permute.xlu0 %667 }
 0x15a   : > { %v575_v24 = vsel %vm403_vm0, %v570_v23, 0  ;;  %v673_v32 = vsel %vm403_vm0, %v668_v29, 0 }
 0x15b   : > { %8963 = vmatpush3.bf16.xpose.msra.mxu0 %v575_v24 }
 0x15c   : > { %8974 = vmatprep.subr.bf16.mxu0 %v9646_v5 }
 0x15d   : > { %v619_v27 = vpop.permute.xlu1 %618 }
 0x15e   : > { %v624_v28 = vsel %vm403_vm0, %v619_v27, 0  ;;  %8959 = vmatmul.mubr.msk.bf16.vlgmr.msra.gmra.mxu1 %vm403_vm0, %v8385_v25 }
 0x15f   : > { %8969 = vmatpush3.bf16.xpose.msra.mxu1 %v624_v28  ;;  %8970 = vmatprep.mubr.msk.bf16.mxu1 %vm9647_vm1, %v9646_v5 }
 0x160   : > { %8980 = vmatprep.subr.bf16.mxu1 %v9646_v5 }
 0x162   : > { %8965 = vmatmul.mubr.msk.bf16.vlgmr.msra.gmra.mxu0 %vm403_vm0, %v8386_v31 }
 0x163   : > { %8975 = vmatpush3.bf16.xpose.msra.mxu0 %v673_v32  ;;  %8976 = vmatprep.mubr.msk.bf16.mxu0 %vm9647_vm1, %v9646_v5 }
 0x164   : > { %8986 = vmatprep.subr.bf16.mxu0 %v9646_v5 }
 0x166   : > { %8971 = vmatmul.mubr.msk.bf16.vlgmr.msra.gmra.mxu1 %vm403_vm0, %v8387_v33 }
 0x167   : > { %8982 = vmatprep.mubr.msk.bf16.mxu1 %vm9647_vm1, %v9646_v5 }
 0x16a   : > { %8977 = vmatmul.mubr.msk.bf16.vlgmr.msra.gmra.mxu0 %vm403_vm0, %v8388_v35 }
 0x16b   : > { %8988 = vmatprep.mubr.msk.bf16.mxu0 %vm9647_vm1, %v9646_v5 }
 0x21e   : > { %v562_v36 = vpop.f32.mrf.mxu1 }
 0x21f   : > { %v716_v37 = vsel %vm715_vm2, %v562_v36, -inf }
 0x220   : > { %v8960_v38 = vpop.f32.mrf.mxu1  ;;  %717 = vmax.xlane.f32.xlu1 %v716_v37 }
 0x222   : > { %v565_v39 = vpop.f32.mrf.mxu1  ;;  %v611_v40 = vpop.f32.mrf.mxu0 }
 0x223   : > { %v719_v41 = vsel %vm715_vm2, %v611_v40, -inf }
 0x224   : > { %v8961_v42 = vpop.f32.mrf.mxu1  ;;  %720 = vmax.xlane.f32.xlu0 %v719_v41  ;;  %v8966_v43 = vpop.f32.mrf.mxu0 }
 0x226   : > { %v614_v44 = vpop.f32.mrf.mxu0  ;;  %v660_v45 = vpop.f32.mrf.mxu1 }
 0x227   : > { %v722_v46 = vsel %vm715_vm2, %v660_v45, -inf }
 0x228   : > { %v8972_v47 = vpop.f32.mrf.mxu1  ;;  %723 = vmax.xlane.f32.xlu0 %v722_v46  ;;  %v8967_v48 = vpop.f32.mrf.mxu0 }
 0x22a   : > { %v663_v49 = vpop.f32.mrf.mxu1  ;;  %v709_v50 = vpop.f32.mrf.mxu0 }
 0x22b   : > { %v725_v51 = vsel %vm715_vm2, %v709_v50, -inf  ;;  %v9205_v49 = vld [vmem:[%s11790_s3 + $0x8] sm:$0xff]  }
 0x22c   : > { %v8973_v52 = vpop.f32.mrf.mxu1  ;;  %726 = vmax.xlane.f32.xlu1 %v725_v51  ;;  %v8978_v53 = vpop.f32.mrf.mxu0 }
 0x22e   : > { %v712_v54 = vpop.f32.mrf.mxu0 }
 0x230   : > { %v8979_v55 = vpop.f32.mrf.mxu0 }
 0x23e   : > { %484 = vrot.lane.b32.xlu0 %v7604_v56, %s11798_s11 }
 0x2a9   : > { %v718_v57 = vpop.xlane.xlu1 %717 }
 0x2aa   : > { %v728_v58 = vsub.f32 %v562_v36, %v718_v57 }
 0x2ac   : > { %v732_v59 = vmul.f32 1.442695, %v728_v58 }
 0x2ad   : > { %v721_v60 = vpop.xlane.xlu0 %720 }
 0x2ae   : > { %9477 = vpow2.f32 %v732_v59  ;;  %v729_v61 = vsub.f32 %v611_v40, %v721_v60 }
 0x2b0   : > { %v734_v62 = vmul.f32 1.442695, %v729_v61 }
 0x2b1   : > { %v724_v63 = vpop.xlane.xlu0 %723 }
 0x2b2   : > { %9479 = vpow2.f32 %v734_v62  ;;  %v730_v0 = vsub.f32 %v660_v45, %v724_v63 }
 0x2b4   : > { %v736_v1 = vmul.f32 1.442695, %v730_v0 }
 0x2b5   : > { %v485_v2 = vpop.permute.xlu0 %484  ;;  %v727_v7 = vpop.xlane.xlu1 %726 }
 0x2b6   : > { %9481 = vpow2.f32 %v736_v1  ;;  %v731_v9 = vsub.f32 %v709_v50, %v727_v7  ;;  %v488_v11 = vadd.f32 %v485_v2, %v9795_v13  ;;  %v489_v15 = vadd.f32 %v9783_v6, %v485_v2  ;;  %v9206_v50 = vld [vmem:[%s11790_s3] sm:$0xff]  }
 0x2b7   : > { %v490_v19 = vadd.f32 %v9792_v10, %v485_v2  ;;  %v487_v10 = vadd.f32 %v485_v2, %v9789_v8 }
 0x2b8   : > { %v738_v12 = vmul.f32 1.442695, %v731_v9  ;;  %v8394_v14 = vpack.c.bf16 %v488_v11, %v488_v11  ;;  %v8395_v18 = vpack.c.bf16 %v489_v15, %v489_v15 }
 0x2b9   : > { %v8396_v13 = vpack.c.bf16 %v490_v19, %v490_v19  ;;  %v8393_v25 = vpack.c.bf16 %v487_v10, %v487_v10  ;;  %v9880_v19 = vld [vmem:[%s9769_s25 + $0x8] sm:$0xff]  }
 0x2ba   : > { %9483 = vpow2.f32 %v738_v12  ;;  %815 = vrot.lane.b32.xlu0 %v8394_v14, %s11798_s11  ;;  %v7625_v12 = vld [vmem:[%s11791_s4 + $0x3] ss:$0 sm:$0xff] }
 0x2bb   : > { %v9478_v16 = vpop.eup %9477  ;;  %v9876_v14 = vld [vmem:[%s9769_s25] sm:$0xff]   ;;  %s11807_s25 = smov 96  }
 0x2bc   : > { %v740_v17 = vsel %vm715_vm2, %v9478_v16, 0.0  ;;  %v365_v15 = vunpack.c.l.bf16 %v9876_v14 }
 0x2bd   : > { %741 = vadd.xlane.f32.xlu1 %v740_v17 }
 0x2be   : > { %864 = vrot.lane.b32.xlu0 %v8395_v18, %s11798_s11 }
 0x2bf   : > { %v9480_v20 = vpop.eup %9479 }
 0x2c0   : > { %v743_v21 = vsel %vm715_vm2, %v9480_v20, 0.0 }
 0x2c1   : > { %744 = vadd.xlane.f32.xlu1 %v743_v21 }
 0x2c2   : > { %913 = vrot.lane.b32.xlu0 %v8396_v13, %s11798_s11  ;;  %v11803_v13 = vunpack.c.h.bf16 %v9876_v14 }
 0x2c3   : > { %v9482_v6 = vpop.eup %9481 }
 0x2c4   : > { %v746_v22 = vsel %vm715_vm2, %v9482_v6, 0.0 }
 0x2c5   : > { %747 = vadd.xlane.f32.xlu1 %v746_v22 }
 0x2c7   : > { %v9484_v23 = vpop.eup %9483 }
 0x2c8   : > { %v749_v24 = vsel %vm715_vm2, %v9484_v23, 0.0 }
 0x2c9   : > { %750 = vadd.xlane.f32.xlu1 %v749_v24 }
 0x2da   : > { %765 = vrot.lane.b32.xlu1 %v8393_v25, %s11798_s11  ;;  %s11808_s11 = smov 64  }
 0x32c   : > { %v816_v26 = vpop.permute.xlu0 %815 }
 0x32d   : > { %v821_v27 = vsel %vm770_vm3, %v816_v26, 0 }
 0x32e   : > { %8987 = vmatpush3.bf16.msra.mxu0 %v821_v27 }
 0x32f   : > { %8998 = vmatprep.subr.bf16.mxu0 %v9646_v5 }
 0x330   : > { %v865_v8 = vpop.permute.xlu0 %864 }
 0x331   : > { %v870_v40 = vsel %vm770_vm3, %v865_v8, 0 }
 0x334   : > { %v914_v39 = vpop.permute.xlu0 %913 }
 0x335   : > { %v919_v43 = vsel %vm770_vm3, %v914_v39, 0 }
 0x346   : > { %v742_v28 = vpop.xlane.xlu1 %741 }
 0x347   : > { %9485 = vrcp.f32 %v742_v28 }
 0x34a   : > { %v745_v29 = vpop.xlane.xlu1 %744 }
 0x34b   : > { %9487 = vrcp.f32 %v745_v29 }
 0x34e   : > { %v748_v30 = vpop.xlane.xlu1 %747 }
 0x34f   : > { %9489 = vrcp.f32 %v748_v30 }
 0x352   : > { %v751_v31 = vpop.xlane.xlu1 %750 }
 0x353   : > { %9491 = vrcp.f32 %v751_v31 }
 0x354   : > { %v9486_v32 = vpop.eup %9485 }
 0x355   : > { %v756_v33 = vmul.f32 %v9486_v32, %v9478_v16 }
 0x356   : > { %v766_v34 = vpop.permute.xlu1 %765 }
 0x357   : > { %v772_v35 = vsel %vm770_vm3, %v766_v34, 0  ;;  %v760_v37 = vpack.c.bf16 %v756_v33, %v756_v33 }
 0x358   : > { %v9488_v36 = vpop.eup %9487  ;;  %8981 = vmatpush3.bf16.msra.mxu1 %v772_v35 }
 0x359   : > { %8992 = vmatprep.subr.bf16.mxu1 %v9646_v5  ;;  %v757_v38 = vmul.f32 %v9488_v36, %v9480_v20  ;;  %v11804_v20 = vunpack.c.l.bf16 %v9880_v19 }
 0x35b   : > { %8983 = vmatmul.mubr.msk.bf16.vlgmr.msra.gmra.mxu1 %vm715_vm2, %v760_v37  ;;  %v761_v41 = vpack.c.bf16 %v757_v38, %v757_v38 }
 0x35c   : > { %v9490_v42 = vpop.eup %9489  ;;  %8993 = vmatpush3.bf16.msra.mxu1 %v870_v40  ;;  %8994 = vmatprep.mubr.msk.bf16.mxu1 %vm9647_vm1, %v9646_v5 }
 0x35d   : > { %8989 = vmatmul.mubr.msk.bf16.vlgmr.msra.gmra.mxu0 %vm715_vm2, %v761_v41  ;;  %v758_v44 = vmul.f32 %v9490_v42, %v9482_v6  ;;  %9004 = vmatprep.subr.bf16.mxu1 %v9205_v49 }
 0x35e   : > { %8999 = vmatpush3.bf16.msra.mxu0 %v919_v43  ;;  %9000 = vmatprep.mubr.msk.bf16.mxu0 %vm9647_vm1, %v9646_v5 }
 0x35f   : > { %v762_v46 = vpack.c.bf16 %v758_v44, %v758_v44 }
 0x360   : > { %v9492_v45 = vpop.eup %9491 }
 0x361   : > { %v759_v47 = vmul.f32 %v9492_v45, %v9484_v23  ;;  %v11802_v23 = vunpack.c.h.bf16 %v9880_v19 }
 0x363   : > { %8995 = vmatmul.mubr.msk.bf16.vlgmr.msra.gmra.mxu1 %vm715_vm2, %v762_v46  ;;  %v763_v48 = vpack.c.bf16 %v759_v47, %v759_v47 }
 0x364   : > { %9005 = vmatpush3.bf16.msra.mxu1 %v9205_v49 }
 0x365   : > { %9001 = vmatmul.mubr.msk.bf16.vlgmr.msra.gmra.mxu0 %vm715_vm2, %v763_v48  ;;  %9006 = vmatprep.subr.bf16.mxu1 %v9206_v50 }
 0x368   : > { %9007 = vmatpush3.bf16.msra.mxu1 %v9206_v50 }
 0x41b   : > { %v808_v51 = vpop.f32.mrf.mxu1 }
 0x41d   : > { %v8984_v52 = vpop.f32.mrf.mxu1  ;;  %v857_v53 = vpop.f32.mrf.mxu0 }
 0x41e   : > { %v961_v54 = vpack.c.bf16 %v857_v53, %v808_v51  ;;  %v1115_v51 = vld [vmem:[%s11792_s5 + $0x80] sm:$0xff]  ;;  %v1116_v53 = vld [vmem:[%s11792_s5 + $0x88] sm:$0xff] }
 0x41f   : > { %v811_v55 = vpop.f32.mrf.mxu1  ;;  %v8990_v56 = vpop.f32.mrf.mxu0  ;;  %v1117_v52 = vld [vmem:[%s11792_s5 + $0xc0] sm:$0xff] }
 0x420   : > { %9008 = vmatprep.mubr.msk.bf16.mxu1 %vm403_vm0, %v961_v54  ;;  %v7637_v54 = vcombine.high %v1115_v51, %v1117_v52  ;;  %v1118_v55 = vld [vmem:[%s11792_s5 + $0xc8] sm:$0xff]  ;;  %v7636_v56 = vcombine.low %v1115_v51, %v1117_v52  ;;  %v1382_v51 = vld [vmem:[%s11792_s5 + $0x18] sm:$0xff] }
 0x421   : > { %v8985_v57 = vpop.f32.mrf.mxu1  ;;  %v860_v58 = vpop.f32.mrf.mxu0 }
 0x422   : > { %v7638_v57 = vcombine.low %v1116_v53, %v1118_v55  ;;  %v7639_v58 = vcombine.high %v1116_v53, %v1118_v55  ;;  %1199 = vmatprep.subr.bf16.mxu0 %v7637_v54 }
 0x423   : > { %v8991_v59 = vpop.f32.mrf.mxu0  ;;  %v906_v60 = vpop.f32.mrf.mxu1  ;;  %1200 = vmatpush1.bf16.msra.mxu0 %v7636_v56 }
 0x424   : > { %1252 = vmatprep.subr.bf16.mxu1 %v7639_v58  ;;  %v1111_v59 = vld [vmem:[%s11792_s5] sm:$0xff] }
 0x425   : > { %v8996_v61 = vpop.f32.mrf.mxu1  ;;  %v955_v62 = vpop.f32.mrf.mxu0 }
 0x426   : > { %v962_v63 = vpack.c.bf16 %v955_v62, %v906_v60  ;;  %v1113_v60 = vld [vmem:[%s11792_s5 + $0x40] sm:$0xff]  ;;  %v1112_v61 = vld [vmem:[%s11792_s5 + $0x8] sm:$0xff] }
 0x427   : > { %v909_v0 = vpop.f32.mrf.mxu1  ;;  %v9002_v1 = vpop.f32.mrf.mxu0  ;;  %v7633_v62 = vcombine.high %v1111_v59, %v1113_v60 }
 0x428   : > { %9009 = vmatmul.mubr.msk.bf16.vlgmr.msra.gmra.mxu1 %vm403_vm0, %v962_v63  ;;  %v1114_v63 = vld [vmem:[%s11792_s5 + $0x48] sm:$0xff]  ;;  %v7632_v0 = vcombine.low %v1111_v59, %v1113_v60  ;;  %v9207_v59 = vld [vmem:[%s11794_s7 + $0x178] sm:$0xff]  }
 0x429   : > { %v8997_v2 = vpop.f32.mrf.mxu1  ;;  %v958_v7 = vpop.f32.mrf.mxu0  ;;  %1253 = vmatpush1.bf16.msra.mxu1 %v7638_v57  ;;  %v7634_v1 = vcombine.low %v1112_v61, %v1114_v63  ;;  %1201 = vmatprep.subr.bf16.mxu0 %v7633_v62  ;;  %v9208_v60 = vld [vmem:[%s11794_s7 + $0x1f8] sm:$0xff]  }
 0x42a   : > { %v7635_v2 = vcombine.high %v1112_v61, %v1114_v63  ;;  %1202 = vmatpush1.bf16.msra.mxu0 %v7632_v0  ;;  %v9650_v7 = vmov 0   ;;  %v9209_v63 = vld [vmem:[%s11794_s7 + $0x138] sm:$0xff]  }
 0x42b   : > { %v9003_v9 = vpop.f32.mrf.mxu0  ;;  %1219 = vmatprep.mubr.bf16.mxu0 %v9650_v7  ;;  %1272 = vmatprep.mubr.bf16.mxu1 %v9650_v7  ;;  %v9210_v0 = vld [vmem:[%s11794_s7 + $0x1b8] sm:$0xff]  }
 0x42c   : > { %1254 = vmatprep.subr.bf16.mxu1 %v7635_v2  ;;  %v1385_v9 = vld [vmem:[%s11792_s5 + $0x90] sm:$0xff] }
 0x42d   : > { %1255 = vmatpush1.bf16.msra.mxu1 %v7634_v1  ;;  %v9211_v1 = vld [vmem:[%s11794_s7 + $0x170] sm:$0xff]  }
 0x42e   : > { %v9212_v2 = vld [vmem:[%s11794_s7 + $0x1f0] sm:$0xff]  }
 0x4e8   : > { %v9010_v11 = vpop.f32.mrf.mxu1 }
 0x4e9   : > { %v1028_v17 = vadd.f32 %v9010_v11, %v7625_v12  ;;  %v1387_v11 = vld [vmem:[%s11792_s5 + $0xd0] sm:$0xff] }
 0x4ea   : > { %v1019_v16 = vpop.f32.mrf.mxu1 }
 0x4eb   : > { %v1020_v18 = vadd.f32 %v7625_v12, %v1019_v16  ;;  %v1036_v26 = vadd.f32 %v1028_v17, %v11804_v20  ;;  %v7650_v16 = vcombine.high %v1385_v9, %v1387_v11  ;;  %v1388_v17 = vld [vmem:[%s11792_s5 + $0xd8] sm:$0xff] }
 0x4ec   : > { %v9011_v21 = vpop.f32.mrf.mxu1 }
 0x4ed   : > { %v1034_v6 = vadd.f32 %v1020_v18, %v365_v15  ;;  %v1031_v24 = vadd.f32 %v9011_v21, %v7625_v12  ;;  %v1046_v29 = vsel %vm403_vm0, %v1036_v26, 0.0  ;;  %v7649_v18 = vcombine.low %v1385_v9, %v1387_v11  ;;  %1464 = vmatprep.subr.bf16.mxu0 %v7650_v16  ;;  %v9213_v9 = vld [vmem:[%s11794_s7 + $0x130] sm:$0xff]   ;;  %v9216_v16 = vld [vmem:[%s11794_s7 + $0x1e8] sm:$0xff]  }
 0x4ee   : > { %v1022_v22 = vpop.f32.mrf.mxu1  ;;  %v9214_v11 = vld [vmem:[%s11794_s7 + $0x1b0] sm:$0xff]  }
 0x4ef   : > { %v1023_v10 = vadd.f32 %v7625_v12, %v1022_v22  ;;  %v1040_v25 = vsel %vm403_vm0, %v1034_v6, 0.0  ;;  %v1037_v30 = vadd.f32 %v1031_v24, %v11802_v23  ;;  %v1386_v12 = vld [vmem:[%s11792_s5 + $0x98] sm:$0xff] }
 0x4f0   : > { %1041 = vadd.xlane.f32.xlu0 %v1040_v25  ;;  %v7651_v21 = vcombine.low %v1386_v12, %v1388_v17 }
 0x4f1   : > { %v1035_v27 = vadd.f32 %v1023_v10, %v11803_v13  ;;  %v1049_v31 = vsel %vm403_vm0, %v1037_v30, 0.0 }
 0x4f3   : > { %v1043_v28 = vsel %vm403_vm0, %v1035_v27, 0.0 }
 0x4f4   : > { %1044 = vadd.xlane.f32.xlu1 %v1043_v28  ;;  %1047 = vadd.xlane.f32.xlu0 %v1046_v29 }
 0x4f8   : > { %1050 = vadd.xlane.f32.xlu0 %v1049_v31 }
 0x579   : > { %v1042_v32 = vpop.xlane.xlu0 %1041 }
 0x57a   : > { %v1053_v8 = vmul.f32 0.03125, %v1042_v32 }
 0x57c   : > { %v9897_v33 = vsub.f32 %v1034_v6, %v1053_v8  ;;  %v7652_v6 = vcombine.high %v1386_v12, %v1388_v17  ;;  %v9215_v12 = vld [vmem:[%s11794_s7 + $0x168] sm:$0xff]  }
 0x57d   : > { %v1045_v34 = vpop.xlane.xlu1 %1044  ;;  %v1048_v35 = vpop.xlane.xlu0 %1047  ;;  %v9217_v17 = vld [vmem:[%s11794_s7 + $0x128] sm:$0xff]  }
 0x57e   : > { %v1054_v36 = vmul.f32 0.03125, %v1045_v34  ;;  %v1055_v37 = vmul.f32 0.03125, %v1048_v35  ;;  %v1061_v38 = vmul.f32 %v9897_v33, %v9897_v33  ;;  %1517 = vmatprep.subr.bf16.mxu1 %v7652_v6  ;;  %v9220_v6 = vld [vmem:[%s11794_s7 + $0x1e0] sm:$0xff]  }
 0x580   : > { %v9901_v39 = vsub.f32 %v1035_v27, %v1054_v36  ;;  %v9903_v40 = vsub.f32 %v1036_v26, %v1055_v37  ;;  %v1065_v41 = vsel %vm403_vm0, %v1061_v38, 0.0  ;;  %v7630_v36 = vld [vmem:[%s11791_s4 + $0x5] ss:$0 sm:$0xff] }
 0x581   : > { %1066 = vadd.xlane.f32.xlu1 %v1065_v41  ;;  %v1051_v42 = vpop.xlane.xlu0 %1050 }
 0x582   : > { %v1056_v43 = vmul.f32 0.03125, %v1051_v42  ;;  %v1062_v44 = vmul.f32 %v9901_v39, %v9901_v39  ;;  %v1063_v45 = vmul.f32 %v9903_v40, %v9903_v40 }
 0x584   : > { %v9910_v46 = vsub.f32 %v1037_v30, %v1056_v43  ;;  %v1068_v47 = vsel %vm403_vm0, %v1062_v44, 0.0  ;;  %v1071_v48 = vsel %vm403_vm0, %v1063_v45, 0.0  ;;  %v7631_v43 = vld [vmem:[%s11791_s4 + $0x6] ss:$0 sm:$0xff] }
 0x585   : > { %1069 = vadd.xlane.f32.xlu0 %v1068_v47  ;;  %1072 = vadd.xlane.f32.xlu1 %v1071_v48 }
 0x586   : > { %v1064_v49 = vmul.f32 %v9910_v46, %v9910_v46 }
 0x588   : > { %v1074_v50 = vsel %vm403_vm0, %v1064_v49, 0.0 }
 0x589   : > { %1075 = vadd.xlane.f32.xlu0 %v1074_v50 }
 0x60a   : > { %v1067_v22 = vpop.xlane.xlu1 %1066 }
 0x60b   : > { %v1077_v24 = vmul.f32 0.03125, %v1067_v22  ;;  %v9221_v22 = vld [vmem:[%s11794_s7 + $0x120] sm:$0xff]  }
 0x60d   : > { %v1081_v10 = vadd.f32 1e-05, %v1077_v24  ;;  %v9222_v24 = vld [vmem:[%s11794_s7 + $0x1a0] sm:$0xff]  }
 0x60e   : > { %v1073_v25 = vpop.xlane.xlu1 %1072  ;;  %v1070_v26 = vpop.xlane.xlu0 %1069 }
 0x60f   : > { %9493 = vrsqrt.f32 %v1081_v10  ;;  %v1079_v27 = vmul.f32 0.03125, %v1073_v25  ;;  %v1078_v28 = vmul.f32 0.03125, %v1070_v26  ;;  %v9223_v10 = vld [vmem:[%s11794_s7 + $0x158] sm:$0xff]  }
 0x610   : > { %v9224_v25 = vld [vmem:[%s11794_s7 + $0x1d8] sm:$0xff]  }
 0x611   : > { %v1082_v29 = vadd.f32 1e-05, %v1078_v28  ;;  %v1083_v30 = vadd.f32 1e-05, %v1079_v27  ;;  %v9225_v26 = vld [vmem:[%s11794_s7 + $0x118] sm:$0xff]   ;;  %v9227_v28 = vld [vmem:[%s11794_s7 + $0x150] sm:$0xff]  }
 0x612   : > { %v1076_v31 = vpop.xlane.xlu0 %1075  ;;  %v9226_v27 = vld [vmem:[%s11794_s7 + $0x198] sm:$0xff]  }
 0x613   : > { %v1080_v32 = vmul.f32 0.03125, %v1076_v31  ;;  %9495 = vrsqrt.f32 %v1082_v29  ;;  %v9228_v29 = vld [vmem:[%s11794_s7 + $0x1d0] sm:$0xff]  }
 0x614   : > { %9497 = vrsqrt.f32 %v1083_v30  ;;  %v9229_v30 = vld [vmem:[%s11794_s7 + $0x110] sm:$0xff]  }
 0x615   : > { %v1084_v8 = vadd.f32 1e-05, %v1080_v32  ;;  %v9230_v31 = vld [vmem:[%s11794_s7 + $0x190] sm:$0xff]   ;;  %v9231_v32 = vld [vmem:[%s11794_s7 + $0x148] sm:$0xff]  }
 0x617   : > { %9499 = vrsqrt.f32 %v1084_v8  ;;  %v9232_v8 = vld [vmem:[%s11794_s7 + $0x1c8] sm:$0xff]  }
 0x61c   : > { %v9494_v34 = vpop.eup %9493 }
 0x61d   : > { %v1089_v35 = vmul.f32 %v9494_v34, %v9897_v33  ;;  %v1381_v33 = vld [vmem:[%s11792_s5 + $0x10] sm:$0xff]  ;;  %v9233_v34 = vld [vmem:[%s11794_s7 + $0x108] sm:$0xff]  }
 0x61f   : > { %v1097_v38 = vmul.f32 %v7630_v36, %v1089_v35  ;;  %v9234_v35 = vld [vmem:[%s11794_s7 + $0x188] sm:$0xff]  }
 0x620   : > { %v9496_v37 = vpop.eup %9495 }
 0x621   : > { %v1090_v41 = vmul.f32 %v9496_v37, %v9901_v39  ;;  %v9498_v42 = vpop.eup %9497  ;;  %v9967_v48 = vadd.f32 %v7631_v43, %v1097_v38  ;;  %v1383_v39 = vld [vmem:[%s11792_s5 + $0x50] sm:$0xff]  ;;  %v9236_v37 = vld [vmem:[%s11794_s7 + $0x1c0] sm:$0xff]  }
 0x622   : > { %v1091_v49 = vmul.f32 %v9498_v42, %v9903_v40  ;;  %v7646_v40 = vcombine.high %v1381_v33, %v1383_v39  ;;  %v7645_v57 = vcombine.low %v1381_v33, %v1383_v39  ;;  %v9237_v38 = vld [vmem:[%s11794_s7 + $0x100] sm:$0xff]   ;;  %v9239_v42 = vld [vmem:[%s11794_s7 + $0x78] sm:$0xff]  }
 0x623   : > { %v1098_v45 = vmul.f32 %v7630_v36, %v1090_v41  ;;  %v9238_v41 = vld [vmem:[%s11794_s7 + $0x180] sm:$0xff]  }
 0x624   : > { %v9500_v44 = vpop.eup %9499  ;;  %v1099_v55 = vmul.f32 %v7630_v36, %v1091_v49 }
 0x625   : > { %v1092_v47 = vmul.f32 %v9500_v44, %v9910_v46  ;;  %v9970_v50 = vadd.f32 %v7631_v43, %v1098_v45  ;;  %v1384_v46 = vld [vmem:[%s11792_s5 + $0x58] sm:$0xff] }
 0x626   : > { %v7648_v54 = vcombine.high %v1382_v51, %v1384_v46  ;;  %v7647_v58 = vcombine.low %v1382_v51, %v1384_v46  ;;  %v9999_v61 = vadd.f32 %v7631_v43, %v1099_v55 }
 0x627   : > { %v9983_v52 = vpack.c.bf16 %v9970_v50, %v9967_v48  ;;  %v1100_v53 = vmul.f32 %v7630_v36, %v1092_v47  ;;  %v9235_v36 = vld [vmem:[%s11794_s7 + $0x140] sm:$0xff]  }
 0x629   : > { %7640 = vmatmul.mubr.msk.bf16.vlgmr.msra.gmra.mxu0 %vm403_vm0, %v9983_v52  ;;  %7642 = vmatmul.mubr.msk.bf16.vlgmr.msra.gmra.mxu1 %vm403_vm0, %v9983_v52  ;;  %v9991_v56 = vadd.f32 %v7631_v43, %v1100_v53  ;;  %v9240_v43 = vld [vmem:[%s11794_s7 + $0xf8] sm:$0xff]   ;;  %v1121_v53 = vlaneseq }
 0x62a   : > { %1229 = vmatprep.mubr.bf16.mxu0 %v9650_v7  ;;  %1282 = vmatprep.mubr.bf16.mxu1 %v9650_v7 }
 0x62b   : > { %1465 = vmatpush1.bf16.msra.mxu0 %v7649_v18  ;;  %1518 = vmatpush1.bf16.msra.mxu1 %v7651_v21  ;;  %v10003_v62 = vpack.c.bf16 %v9991_v56, %v9999_v61  ;;  %v9218_v18 = vld [vmem:[%s11794_s7 + $0x1a8] sm:$0xff]   ;;  %v9219_v21 = vld [vmem:[%s11794_s7 + $0x160] sm:$0xff]  }
 0x62c   : > { %1466 = vmatprep.subr.bf16.mxu0 %v7646_v40  ;;  %1519 = vmatprep.subr.bf16.mxu1 %v7648_v54 }
 0x62f   : > { %1467 = vmatpush1.bf16.msra.mxu0 %v7645_v57  ;;  %1520 = vmatpush1.bf16.msra.mxu1 %v7647_v58  ;;  %v1122_v58 = vshrl.u32 %v1121_v53, 7 }
 0x630   : > { %8445 = vmatprep.subr.bf16.mxu0 %v9207_v59  ;;  %8473 = vmatprep.subr.bf16.mxu1 %v9208_v60 }
 0x631   : > { %7641 = vmatmul.mubr.msk.bf16.gmra.mxu0 %vm403_vm0, %v10003_v62  ;;  %7643 = vmatmul.mubr.msk.bf16.gmra.mxu1 %vm403_vm0, %v10003_v62 }
 0x632   : > { %1484 = vmatprep.mubr.bf16.mxu0 %v9650_v7  ;;  %1537 = vmatprep.mubr.bf16.mxu1 %v9650_v7 }
 0x639   : > { %7653 = vmatmul.mubr.msk.bf16.vlgmr.msra.gmra.mxu0 %vm403_vm0, %v9983_v52  ;;  %7655 = vmatmul.mubr.msk.bf16.vlgmr.msra.gmra.mxu1 %vm403_vm0, %v9983_v52 }
 0x63a   : > { %1494 = vmatprep.mubr.bf16.mxu0 %v9650_v7  ;;  %1547 = vmatprep.mubr.bf16.mxu1 %v9650_v7 }
 0x63b   : > { %8446 = vmatpush3.bf16.msra.mxu0 %v9209_v63  ;;  %8474 = vmatpush3.bf16.msra.mxu1 %v9210_v0 }
 0x63c   : > { %8447 = vmatprep.subr.bf16.mxu0 %v9211_v1  ;;  %8475 = vmatprep.subr.bf16.mxu1 %v9212_v2  ;;  %v10147_v1 = vsub.s32 1, %v1122_v58  ;;  %v10149_v2 = vsub.s32 3, %v1122_v58 }
 0x63f   : > { %8448 = vmatpush3.bf16.msra.mxu0 %v9213_v9  ;;  %8476 = vmatpush3.bf16.msra.mxu1 %v9214_v11  ;;  %v7644_v9 = vld [vmem:[%s11793_s6 + $0x8] ss:$2 sm:$0xf]  ;;  %v10154_v11 = vsub.s32 0, %v1122_v58 }
 0x640   : > { %8449 = vmatprep.subr.bf16.mxu0 %v9215_v12  ;;  %8477 = vmatprep.subr.bf16.mxu1 %v9216_v16  ;;  %v10156_v12 = vsub.s32 2, %v1122_v58 }
 0x641   : > { %7654 = vmatmul.mubr.msk.bf16.gmra.mxu0 %vm403_vm0, %v10003_v62  ;;  %7656 = vmatmul.mubr.msk.bf16.gmra.mxu1 %vm403_vm0, %v10003_v62 }
 0x643   : > { %8450 = vmatpush3.bf16.msra.mxu0 %v9217_v17  ;;  %8478 = vmatpush3.bf16.msra.mxu1 %v9218_v18  ;;  %v1399_v18 = vrot.slane %v7644_v9, %v10147_v1 }
 0x644   : > { %8451 = vmatprep.subr.bf16.mxu0 %v9219_v21  ;;  %8479 = vmatprep.subr.bf16.mxu1 %v9220_v6  ;;  %v1407_v21 = vrot.slane %v7644_v9, %v10149_v2  ;;  %v1395_v6 = vrot.slane %v7644_v9, %v10154_v11 }
 0x647   : > { %8452 = vmatpush3.bf16.msra.mxu0 %v9221_v22  ;;  %8480 = vmatpush3.bf16.msra.mxu1 %v9222_v24  ;;  %v1403_v22 = vrot.slane %v7644_v9, %v10156_v12 }
 0x648   : > { %8453 = vmatprep.subr.bf16.mxu0 %v9223_v10  ;;  %8481 = vmatprep.subr.bf16.mxu1 %v9224_v25 }
 0x64b   : > { %8454 = vmatpush3.bf16.msra.mxu0 %v9225_v26  ;;  %8482 = vmatpush3.bf16.msra.mxu1 %v9226_v27 }
 0x64c   : > { %8455 = vmatprep.subr.bf16.mxu0 %v9227_v28  ;;  %8483 = vmatprep.subr.bf16.mxu1 %v9228_v29 }
 0x64f   : > { %8456 = vmatpush3.bf16.msra.mxu0 %v9229_v30  ;;  %8484 = vmatpush3.bf16.msra.mxu1 %v9230_v31 }
 0x650   : > { %8457 = vmatprep.subr.bf16.mxu0 %v9231_v32  ;;  %8485 = vmatprep.subr.bf16.mxu1 %v9232_v8 }
 0x653   : > { %8458 = vmatpush3.bf16.msra.mxu0 %v9233_v34  ;;  %8486 = vmatpush3.bf16.msra.mxu1 %v9234_v35 }
 0x654   : > { %8459 = vmatprep.subr.bf16.mxu0 %v9235_v36  ;;  %8487 = vmatprep.subr.bf16.mxu1 %v9236_v37  ;;  %v10165_v37 = vld [vmem:[%s11793_s6] ss:$2 sm:$0xf] }
 0x657   : > { %8460 = vmatpush3.bf16.msra.mxu0 %v9237_v38  ;;  %8488 = vmatpush3.bf16.msra.mxu1 %v9238_v41 }
 0x658   : > { %8501 = vmatprep.subr.bf16.mxu0 %v9239_v42  ;;  %8529 = vmatprep.subr.bf16.mxu1 %v9240_v43 }
 0x6e9   : > { %v10117_v44 = vpop.f32.mrf.mxu0  ;;  %v10119_v45 = vpop.f32.mrf.mxu1 }
 0x6eb   : > { %v10121_v47 = vpop.f32.mrf.mxu0  ;;  %v10123_v33 = vpop.f32.mrf.mxu1 }
 0x6ed   : > { %v10125_v49 = vpop.f32.mrf.mxu0  ;;  %v10127_v39 = vpop.f32.mrf.mxu1 }
 0x6ef   : > { %v1227_v51 = vpop.f32.mrf.mxu0  ;;  %v10129_v46 = vpop.f32.mrf.mxu1 }
 0x6f1   : > { %v10131_v40 = vpop.f32.mrf.mxu0  ;;  %v10133_v54 = vpop.f32.mrf.mxu1 }
 0x6f3   : > { %v10135_v55 = vpop.f32.mrf.mxu0  ;;  %v10137_v57 = vpop.f32.mrf.mxu1 }
 0x6f5   : > { %v10139_v59 = vpop.f32.mrf.mxu0  ;;  %v10141_v60 = vpop.f32.mrf.mxu1 }
 0x6f7   : > { %v10143_v63 = vpop.f32.mrf.mxu0  ;;  %v10145_v0 = vpop.f32.mrf.mxu1 }
 0x6f9   : > { %v1486_v16 = vpop.f32.mrf.mxu0  ;;  %v1539_v17 = vpop.f32.mrf.mxu1 }
 0x6fa   : > { %v1487_v31 = vadd.f32 %v1486_v16, %v1395_v6  ;;  %v1540_v32 = vadd.f32 %v1539_v17, %v1403_v22  ;;  %v10169_v16 = vrot.slane %v10165_v37, %v10147_v1 }
 0x6fb   : > { %v1488_v24 = vpop.f32.mrf.mxu0  ;;  %v1541_v10 = vpop.f32.mrf.mxu1 }
 0x6fc   : > { %v1489_v27 = vadd.f32 %v1488_v24, %v1399_v18  ;;  %v1542_v28 = vadd.f32 %v1541_v10, %v1407_v21  ;;  %v1558_v17 = vmax.f32 %v1487_v31, 0.0  ;;  %v1560_v10 = vmax.f32 %v1540_v32, 0.0 }
 0x6fd   : > { %v1490_v25 = vpop.f32.mrf.mxu0  ;;  %v1543_v26 = vpop.f32.mrf.mxu1 }
 0x6fe   : > { %v1491_v29 = vadd.f32 %v1490_v25, %v1395_v6  ;;  %v1544_v30 = vadd.f32 %v1543_v26, %v1403_v22  ;;  %v1559_v53 = vmax.f32 %v1489_v27, 0.0  ;;  %v1561_v58 = vmax.f32 %v1542_v28, 0.0  ;;  %v9241_v27 = vld [vmem:[%s11794_s7 + $0x38] sm:$0xff]  }
 0x6ff   : > { %v1492_v8 = vpop.f32.mrf.mxu0  ;;  %v1545_v34 = vpop.f32.mrf.mxu1  ;;  %v9242_v28 = vld [vmem:[%s11794_s7 + $0xb8] sm:$0xff]  }
 0x700   : > { %v1493_v35 = vadd.f32 %v1492_v8, %v1399_v18  ;;  %v1546_v36 = vadd.f32 %v1545_v34, %v1407_v21  ;;  %v1562_v38 = vmax.f32 %v1491_v29, 0.0  ;;  %v1564_v41 = vmax.f32 %v1544_v30, 0.0 }
 0x701   : > { %v1496_v42 = vpop.f32.mrf.mxu0  ;;  %v1549_v43 = vpop.f32.mrf.mxu1  ;;  %v10173_v8 = vrot.slane %v10165_v37, %v10149_v2  ;;  %v1228_v34 = vadd.f32 %v1227_v51, %v10169_v16 }
 0x702   : > { %v1563_v9 = vmax.f32 %v1493_v35, 0.0  ;;  %v1565_v24 = vmax.f32 %v1546_v36, 0.0  ;;  %v1574_v31 = vpack.c.bf16 %v1562_v38, %v1558_v17  ;;  %v1576_v32 = vpack.c.bf16 %v1564_v41, %v1560_v10 }
 0x703   : > { %v1498_v25 = vpop.f32.mrf.mxu0  ;;  %v1551_v26 = vpop.f32.mrf.mxu1  ;;  %v1281_v51 = vadd.f32 %v10129_v46, %v10173_v8  ;;  %v1497_v38 = vadd.f32 %v1496_v42, %v1395_v6  ;;  %v1550_v41 = vadd.f32 %v1549_v43, %v1403_v22  ;;  %v1224_v46 = vadd.f32 %v10121_v47, %v10169_v16 }
 0x704   : > { %v1575_v29 = vpack.c.bf16 %v1563_v9, %v1559_v53  ;;  %v1577_v30 = vpack.c.bf16 %v1565_v24, %v1561_v58  ;;  %v1499_v35 = vadd.f32 %v1498_v25, %v1399_v18  ;;  %v9243_v53 = vld [vmem:[%s11794_s7 + $0x70] sm:$0xff]   ;;  %v1552_v9 = vadd.f32 %v1551_v26, %v1407_v21 }
 0x705   : > { %v1500_v36 = vpop.f32.mrf.mxu0  ;;  %v1553_v23 = vpop.f32.mrf.mxu1  ;;  %v9244_v58 = vld [vmem:[%s11794_s7 + $0xf0] sm:$0xff]   ;;  %v1298_v47 = vmax.f32 %v1228_v34, 0.0  ;;  %v9251_v34 = vld [vmem:[%s11794_s7 + $0x60] sm:$0xff]  }
 0x706   : > { %v1501_v24 = vadd.f32 %v1500_v36, %v1395_v6  ;;  %v1554_v13 = vadd.f32 %v1553_v23, %v1403_v22  ;;  %1870 = vmatprep.mubr.bf16.mxu0 %v1575_v29  ;;  %1919 = vmatprep.mubr.bf16.mxu1 %v1577_v30  ;;  %v9245_v26 = vld [vmem:[%s11794_s7 + $0x30] sm:$0xff]   ;;  %v1277_v6 = vadd.f32 %v10123_v33, %v10173_v8  ;;  %v1567_v43 = vmax.f32 %v1499_v35, 0.0  ;;  %v9249_v36 = vld [vmem:[%s11794_s7 + $0x28] sm:$0xff]  }
 0x707   : > { %v1502_v17 = vpop.f32.mrf.mxu0  ;;  %v1555_v10 = vpop.f32.mrf.mxu1  ;;  %1871 = vmatmul.mubr.bf16.vlgmr.msra.gmra.mxu0 %v1574_v31  ;;  %1920 = vmatmul.mubr.bf16.vlgmr.msra.gmra.mxu1 %v1576_v32  ;;  %v9246_v23 = vld [vmem:[%s11794_s7 + $0xb0] sm:$0xff]   ;;  %v1569_v29 = vmax.f32 %v1552_v9, 0.0  ;;  %v1566_v31 = vmax.f32 %v1497_v38, 0.0  ;;  %v1568_v33 = vmax.f32 %v1550_v41, 0.0  ;;  %v1294_v35 = vmax.f32 %v1224_v46, 0.0  ;;  %v9253_v41 = vld [vmem:[%s11794_s7 + $0x20] sm:$0xff]  }
 0x708   : > { %v1503_v25 = vadd.f32 %v1502_v17, %v1399_v18  ;;  %v1556_v20 = vadd.f32 %v1555_v10, %v1407_v21  ;;  %8502 = vmatpush3.bf16.msra.mxu0 %v9241_v27  ;;  %8530 = vmatpush3.bf16.msra.mxu1 %v9242_v28  ;;  %v1570_v22 = vmax.f32 %v1501_v24, 0.0  ;;  %v1572_v42 = vmax.f32 %v1554_v13, 0.0  ;;  %v9247_v18 = vld [vmem:[%s11794_s7 + $0x68] sm:$0xff]   ;;  %v9252_v24 = vld [vmem:[%s11794_s7 + $0xe0] sm:$0xff]   ;;  %v9255_v10 = vld [vmem:[%s11794_s7 + $0x58] sm:$0xff]  }
 0x709   : > { %8503 = vmatprep.subr.bf16.mxu0 %v9243_v53  ;;  %8531 = vmatprep.subr.bf16.mxu1 %v9244_v58  ;;  %v9248_v21 = vld [vmem:[%s11794_s7 + $0xe8] sm:$0xff]   ;;  %v1300_v28 = vmax.f32 %v1281_v51, 0.0  ;;  %v1296_v58 = vmax.f32 %v1277_v6, 0.0  ;;  %v1310_v51 = vpack.c.bf16 %v1298_v47, %v1294_v35  ;;  %v9254_v17 = vld [vmem:[%s11794_s7 + $0xa0] sm:$0xff]   ;;  %v9259_v46 = vld [vmem:[%s11794_s7 + $0x50] sm:$0xff]  }
 0x70a   : > { %v1571_v30 = vmax.f32 %v1503_v25, 0.0  ;;  %v1573_v27 = vmax.f32 %v1556_v20, 0.0  ;;  %v9250_v53 = vld [vmem:[%s11794_s7 + $0xa8] sm:$0xff]   ;;  %v1578_v9 = vpack.c.bf16 %v1570_v22, %v1566_v31  ;;  %v1580_v20 = vpack.c.bf16 %v1572_v42, %v1568_v33  ;;  %v9256_v25 = vld [vmem:[%s11794_s7 + $0xd8] sm:$0xff]   ;;  %v9260_v6 = vld [vmem:[%s11794_s7 + $0xd0] sm:$0xff]  }
 0x70b   : > { %v1312_v38 = vpack.c.bf16 %v1300_v28, %v1296_v58  ;;  %v9261_v22 = vld [vmem:[%s11794_s7 + $0x10] sm:$0xff]   ;;  %v9266_v47 = vld [vmem:[%s11794_s7 + $0x88] sm:$0xff]   ;;  %v2230_v31 = vld [vmem:[%s11792_s5 + $0xa0] sm:$0xff] }
 0x70c   : > { %8504 = vmatpush3.bf16.msra.mxu0 %v9245_v26  ;;  %8532 = vmatpush3.bf16.msra.mxu1 %v9246_v23  ;;  %v1579_v13 = vpack.c.bf16 %v1571_v30, %v1567_v43  ;;  %v1581_v32 = vpack.c.bf16 %v1573_v27, %v1569_v29  ;;  %v9257_v26 = vld [vmem:[%s11794_s7 + $0x18] sm:$0xff]   ;;  %v9262_v42 = vld [vmem:[%s11794_s7 + $0x90] sm:$0xff]   ;;  %v1124_v43 = vrot.slane %v10165_v37, %v10154_v11  ;;  %v9265_v27 = vld [vmem:[%s11794_s7 + $0x8] sm:$0xff]  }
 0x70d   : > { %8505 = vmatprep.subr.bf16.mxu0 %v9247_v18  ;;  %8533 = vmatprep.subr.bf16.mxu1 %v9248_v21  ;;  %v9258_v23 = vld [vmem:[%s11794_s7 + $0x98] sm:$0xff]   ;;  %v9263_v18 = vld [vmem:[%s11794_s7 + $0x48] sm:$0xff]   ;;  %v1132_v29 = vrot.slane %v10165_v37, %v10156_v12  ;;  %v9267_v37 = vld [vmem:[%s11794_s7 + $0x40] sm:$0xff]  }
 0x70e   : > { %1878 = vmatprep.mubr.bf16.mxu0 %v1579_v13  ;;  %1927 = vmatprep.mubr.bf16.mxu1 %v1581_v32  ;;  %v9264_v21 = vld [vmem:[%s11794_s7 + $0xc8] sm:$0xff]   ;;  %v1226_v30 = vadd.f32 %v10125_v49, %v1124_v43  ;;  %v9268_v49 = vld [vmem:[%s11794_s7 + $0xc0] sm:$0xff]   ;;  %v1222_v33 = vadd.f32 %v10117_v44, %v1124_v43  ;;  %v1238_v13 = vadd.f32 %v10143_v63, %v10169_v16 }
 0x70f   : > { %1879 = vmatmul.mubr.bf16.gmra.mxu0 %v1578_v9  ;;  %1928 = vmatmul.mubr.bf16.gmra.mxu1 %v1580_v20  ;;  %v1279_v28 = vadd.f32 %v10127_v39, %v1132_v29  ;;  %v1291_v39 = vadd.f32 %v10145_v0, %v10173_v8  ;;  %v2232_v32 = vld [vmem:[%s11792_s5 + $0xe0] sm:$0xff]  ;;  %v1275_v44 = vadd.f32 %v10119_v45, %v1132_v29 }
 0x710   : > { %8506 = vmatpush3.bf16.msra.mxu0 %v9249_v36  ;;  %8534 = vmatpush3.bf16.msra.mxu1 %v9250_v53  ;;  %v2231_v36 = vld [vmem:[%s11792_s5 + $0xa8] sm:$0xff]  ;;  %v1297_v35 = vmax.f32 %v1226_v30, 0.0  ;;  %v1234_v63 = vadd.f32 %v10135_v55, %v10169_v16  ;;  %v1287_v0 = vadd.f32 %v10137_v57, %v10173_v8  ;;  %v9269_v58 = vld [vmem:[%s11794_s7] sm:$0xff]   ;;  %v7727_v45 = vcombine.high %v2230_v31, %v2232_v32 }
 0x711   : > { %2160 = vmatprep.mubr.bf16.mxu0 %v1310_v51  ;;  %2209 = vmatprep.mubr.bf16.mxu1 %v1312_v38  ;;  %v2233_v53 = vld [vmem:[%s11792_s5 + $0xe8] sm:$0xff]  ;;  %v9270_v9 = vld [vmem:[%s11794_s7 + $0x80] sm:$0xff]   ;;  %v1299_v20 = vmax.f32 %v1279_v28, 0.0  ;;  %v1306_v55 = vmax.f32 %v1238_v13, 0.0  ;;  %v1308_v16 = vmax.f32 %v1291_v39, 0.0  ;;  %v1295_v8 = vmax.f32 %v1275_v44, 0.0 }
 0x712   : > { %8507 = vmatprep.subr.bf16.mxu0 %v9251_v34  ;;  %8535 = vmatprep.subr.bf16.mxu1 %v9252_v24  ;;  %v7729_v34 = vcombine.high %v2231_v36, %v2233_v53  ;;  %v1293_v24 = vmax.f32 %v1222_v33, 0.0  ;;  %v2226_v57 = vld [vmem:[%s11792_s5 + $0x20] sm:$0xff]  ;;  %v7726_v51 = vcombine.low %v2230_v31, %v2232_v32  ;;  %v9275_v39 = vld [vmem:[%s11794_s7 + $0x270] sm:$0xff]   ;;  %v9279_v44 = vld [vmem:[%s11794_s7 + $0x268] sm:$0xff]  }
 0x713   : > { %v2228_v38 = vld [vmem:[%s11792_s5 + $0x60] sm:$0xff]  ;;  %v9276_v32 = vld [vmem:[%s11794_s7 + $0x2f0] sm:$0xff]  }
 0x714   : > { %8508 = vmatpush3.bf16.msra.mxu0 %v9253_v41  ;;  %8536 = vmatpush3.bf16.msra.mxu1 %v9254_v17  ;;  %v2227_v41 = vld [vmem:[%s11792_s5 + $0x28] sm:$0xff] }
 0x715   : > { %8509 = vmatprep.subr.bf16.mxu0 %v9255_v10  ;;  %8537 = vmatprep.subr.bf16.mxu1 %v9256_v25  ;;  %v2229_v17 = vld [vmem:[%s11792_s5 + $0x68] sm:$0xff]  ;;  %v1309_v10 = vpack.c.bf16 %v1297_v35, %v1293_v24  ;;  %v1302_v25 = vmax.f32 %v1234_v63, 0.0  ;;  %v9288_v24 = vld [vmem:[%s11794_s7 + $0x2d8] sm:$0xff]  }
 0x716   : > { %v7725_v30 = vcombine.high %v2227_v41, %v2229_v17  ;;  %v9280_v35 = vld [vmem:[%s11794_s7 + $0x2e8] sm:$0xff]  }
 0x717   : > { %v9281_v63 = vld [vmem:[%s11794_s7 + $0x228] sm:$0xff]  }
 0x718   : > { %8510 = vmatpush3.bf16.msra.mxu0 %v9257_v26  ;;  %8538 = vmatpush3.bf16.msra.mxu1 %v9258_v23  ;;  %v1304_v26 = vmax.f32 %v1287_v0, 0.0  ;;  %v7728_v23 = vcombine.low %v2231_v36, %v2233_v53  ;;  %v9277_v36 = vld [vmem:[%s11794_s7 + $0x230] sm:$0xff]   ;;  %v9282_v0 = vld [vmem:[%s11794_s7 + $0x2a8] sm:$0xff]  }
 0x719   : > { %8511 = vmatprep.subr.bf16.mxu0 %v9259_v46  ;;  %8539 = vmatprep.subr.bf16.mxu1 %v9260_v6  ;;  %v1311_v46 = vpack.c.bf16 %v1299_v20, %v1295_v8  ;;  %v1236_v6 = vadd.f32 %v10139_v59, %v1124_v43  ;;  %v7722_v59 = vcombine.low %v2226_v57, %v2228_v38  ;;  %v9278_v53 = vld [vmem:[%s11794_s7 + $0x2b0] sm:$0xff]   ;;  %v9285_v20 = vld [vmem:[%s11794_s7 + $0x220] sm:$0xff]  }
 0x71a   : > { %v9292_v8 = vld [vmem:[%s11794_s7 + $0x2d0] sm:$0xff]  }
 0x71b   : > { %v1305_v28 = vmax.f32 %v1236_v6, 0.0  ;;  %v9302_v6 = vld [vmem:[%s11794_s7 + $0x280] sm:$0xff]  }
 0x71c   : > { %8512 = vmatpush3.bf16.msra.mxu0 %v9261_v22  ;;  %8540 = vmatpush3.bf16.msra.mxu1 %v9262_v42  ;;  %v1289_v22 = vadd.f32 %v10141_v60, %v1132_v29  ;;  %v1314_v42 = vpack.c.bf16 %v1306_v55, %v1302_v25  ;;  %v7724_v60 = vcombine.low %v2227_v41, %v2229_v17  ;;  %v9289_v55 = vld [vmem:[%s11794_s7 + $0x218] sm:$0xff]   ;;  %v9295_v41 = vld [vmem:[%s11794_s7 + $0x248] sm:$0xff]  }
 0x71d   : > { %8513 = vmatprep.subr.bf16.mxu0 %v9263_v18  ;;  %8541 = vmatprep.subr.bf16.mxu1 %v9264_v21  ;;  %v1316_v18 = vpack.c.bf16 %v1308_v16, %v1304_v26  ;;  %v7723_v21 = vcombine.high %v2226_v57, %v2228_v38  ;;  %v9290_v16 = vld [vmem:[%s11794_s7 + $0x298] sm:$0xff]   ;;  %v9291_v57 = vld [vmem:[%s11794_s7 + $0x250] sm:$0xff]   ;;  %v9296_v17 = vld [vmem:[%s11794_s7 + $0x2c8] sm:$0xff]  }
 0x71e   : > { %v9294_v38 = vld [vmem:[%s11794_s7 + $0x290] sm:$0xff]   ;;  %v9298_v25 = vld [vmem:[%s11794_s7 + $0x288] sm:$0xff]   ;;  %v9299_v26 = vld [vmem:[%s11794_s7 + $0x240] sm:$0xff]  }
 0x720   : > { %8514 = vmatpush3.bf16.msra.mxu0 %v9265_v27  ;;  %8542 = vmatpush3.bf16.msra.mxu1 %v9266_v47  ;;  %v1232_v27 = vadd.f32 %v10131_v40, %v1124_v43  ;;  %v1285_v47 = vadd.f32 %v10133_v54, %v1132_v29  ;;  %v9271_v40 = vld [vmem:[%s11794_s7 + $0x278] sm:$0xff]  }
 0x721   : > { %8515 = vmatprep.subr.bf16.mxu0 %v9267_v37  ;;  %8543 = vmatprep.subr.bf16.mxu1 %v9268_v49  ;;  %v1307_v37 = vmax.f32 %v1289_v22, 0.0  ;;  %v9272_v54 = vld [vmem:[%s11794_s7 + $0x2f8] sm:$0xff]   ;;  %v10427_v22 = vld [vmem:[%s11792_s5 + $0xb0] sm:$0xff] }
 0x722   : > { %v1301_v49 = vmax.f32 %v1232_v27, 0.0  ;;  %v1303_v31 = vmax.f32 %v1285_v47, 0.0  ;;  %v9273_v43 = vld [vmem:[%s11794_s7 + $0x238] sm:$0xff]  }
 0x723   : > { %v9274_v29 = vld [vmem:[%s11794_s7 + $0x2b8] sm:$0xff]  }
 0x724   : > { %8516 = vmatpush3.bf16.msra.mxu0 %v9269_v58  ;;  %8544 = vmatpush3.bf16.msra.mxu1 %v9270_v9  ;;  %v1313_v33 = vpack.c.bf16 %v1305_v28, %v1301_v49  ;;  %v1315_v13 = vpack.c.bf16 %v1307_v37, %v1303_v31  ;;  %v9283_v58 = vld [vmem:[%s11794_s7 + $0x260] sm:$0xff]  }
 0x725   : > { %2309 = vmatprep.subr.bf16.mxu0 %v7727_v45  ;;  %2362 = vmatprep.subr.bf16.mxu1 %v7729_v34  ;;  %v9284_v9 = vld [vmem:[%s11794_s7 + $0x2e0] sm:$0xff]   ;;  %v9287_v34 = vld [vmem:[%s11794_s7 + $0x258] sm:$0xff]  }
 0x726   : > { %v9286_v45 = vld [vmem:[%s11794_s7 + $0x2a0] sm:$0xff]  }
 0x727   : > { %2161 = vmatmul.mubr.bf16.vlgmr.msra.gmra.mxu0 %v1309_v10  ;;  %2210 = vmatmul.mubr.bf16.vlgmr.msra.gmra.mxu1 %v1311_v46  ;;  %v9297_v10 = vld [vmem:[%s11794_s7 + $0x208] sm:$0xff]   ;;  %v9301_v46 = vld [vmem:[%s11794_s7 + $0x200] sm:$0xff]  }
 0x728   : > { %2168 = vmatprep.mubr.bf16.mxu0 %v1314_v42  ;;  %2217 = vmatprep.mubr.bf16.mxu1 %v1316_v18  ;;  %v10432_v42 = vld [vmem:[%s11792_s5 + $0xf0] sm:$0xff]  ;;  %v10437_v18 = vld [vmem:[%s11792_s5 + $0xb8] sm:$0xff] }
 0x729   : > { %2310 = vmatpush1.bf16.msra.mxu0 %v7726_v51  ;;  %2363 = vmatpush1.bf16.msra.mxu1 %v7728_v23  ;;  %v9293_v51 = vld [vmem:[%s11794_s7 + $0x210] sm:$0xff]   ;;  %v9300_v23 = vld [vmem:[%s11794_s7 + $0x2c0] sm:$0xff]   ;;  %v7771_v27 = vcombine.low %v10427_v22, %v10432_v42 }
 0x72a   : > { %2311 = vmatprep.subr.bf16.mxu0 %v7723_v21  ;;  %2364 = vmatprep.subr.bf16.mxu1 %v7725_v30  ;;  %v7772_v21 = vcombine.high %v10427_v22, %v10432_v42  ;;  %v10444_v30 = vld [vmem:[%s11792_s5 + $0xf8] sm:$0xff] }
 0x72b   : > { %v7773_v47 = vcombine.low %v10437_v18, %v10444_v30  ;;  %v7774_v28 = vcombine.high %v10437_v18, %v10444_v30 }
 0x72d   : > { %2312 = vmatpush1.bf16.msra.mxu0 %v7722_v59  ;;  %2365 = vmatpush1.bf16.msra.mxu1 %v7724_v60 }
 0x72e   : > { %8557 = vmatprep.subr.bf16.mxu0 %v9271_v40  ;;  %8585 = vmatprep.subr.bf16.mxu1 %v9272_v54 }
 0x72f   : > { %2169 = vmatmul.mubr.bf16.gmra.mxu0 %v1313_v33  ;;  %2218 = vmatmul.mubr.bf16.gmra.mxu1 %v1315_v13 }
 0x730   : > { %2329 = vmatprep.mubr.bf16.mxu0 %v9650_v7  ;;  %2382 = vmatprep.mubr.bf16.mxu1 %v9650_v7 }
 0x737   : > { %7730 = vmatmul.mubr.msk.bf16.vlgmr.msra.gmra.mxu0 %vm403_vm0, %v9983_v52  ;;  %7732 = vmatmul.mubr.msk.bf16.vlgmr.msra.gmra.mxu1 %vm403_vm0, %v9983_v52 }
 0x738   : > { %2339 = vmatprep.mubr.bf16.mxu0 %v9650_v7  ;;  %2392 = vmatprep.mubr.bf16.mxu1 %v9650_v7 }
 0x739   : > { %8558 = vmatpush3.bf16.msra.mxu0 %v9273_v43  ;;  %8586 = vmatpush3.bf16.msra.mxu1 %v9274_v29 }
 0x73a   : > { %8559 = vmatprep.subr.bf16.mxu0 %v9275_v39  ;;  %8587 = vmatprep.subr.bf16.mxu1 %v9276_v32 }
 0x73d   : > { %8560 = vmatpush3.bf16.msra.mxu0 %v9277_v36  ;;  %8588 = vmatpush3.bf16.msra.mxu1 %v9278_v53 }
 0x73e   : > { %8561 = vmatprep.subr.bf16.mxu0 %v9279_v44  ;;  %8589 = vmatprep.subr.bf16.mxu1 %v9280_v35 }
 0x73f   : > { %7731 = vmatmul.mubr.msk.bf16.gmra.mxu0 %vm403_vm0, %v10003_v62  ;;  %7733 = vmatmul.mubr.msk.bf16.gmra.mxu1 %vm403_vm0, %v10003_v62 }
 0x741   : > { %8562 = vmatpush3.bf16.msra.mxu0 %v9281_v63  ;;  %8590 = vmatpush3.bf16.msra.mxu1 %v9282_v0 }
 0x742   : > { %8563 = vmatprep.subr.bf16.mxu0 %v9283_v58  ;;  %8591 = vmatprep.subr.bf16.mxu1 %v9284_v9 }
 0x745   : > { %8564 = vmatpush3.bf16.msra.mxu0 %v9285_v20  ;;  %8592 = vmatpush3.bf16.msra.mxu1 %v9286_v45 }
 0x746   : > { %8565 = vmatprep.subr.bf16.mxu0 %v9287_v34  ;;  %8593 = vmatprep.subr.bf16.mxu1 %v9288_v24 }
 0x749   : > { %8566 = vmatpush3.bf16.msra.mxu0 %v9289_v55  ;;  %8594 = vmatpush3.bf16.msra.mxu1 %v9290_v16 }
 0x74a   : > { %8567 = vmatprep.subr.bf16.mxu0 %v9291_v57  ;;  %8595 = vmatprep.subr.bf16.mxu1 %v9292_v8 }
 0x74d   : > { %8568 = vmatpush3.bf16.msra.mxu0 %v9293_v51  ;;  %8596 = vmatpush3.bf16.msra.mxu1 %v9294_v38 }
 0x74e   : > { %8569 = vmatprep.subr.bf16.mxu0 %v9295_v41  ;;  %8597 = vmatprep.subr.bf16.mxu1 %v9296_v17 }
 0x751   : > { %8570 = vmatpush3.bf16.msra.mxu0 %v9297_v10  ;;  %8598 = vmatpush3.bf16.msra.mxu1 %v9298_v25 }
 0x752   : > { %8571 = vmatprep.subr.bf16.mxu0 %v9299_v26  ;;  %8599 = vmatprep.subr.bf16.mxu1 %v9300_v23 }
 0x755   : > { %8572 = vmatpush3.bf16.msra.mxu0 %v9301_v46  ;;  %8600 = vmatpush3.bf16.msra.mxu1 %v9302_v6 }
 0x756   : > { %2868 = vmatprep.subr.bf16.mxu0 %v7772_v21  ;;  %2921 = vmatprep.subr.bf16.mxu1 %v7774_v28 }
 0x7c7   : > { %v8461_v37 = vpop.f32.mrf.mxu0  ;;  %v8489_v59 = vpop.f32.mrf.mxu1 }
 0x7c9   : > { %v8462_v60 = vpop.f32.mrf.mxu0  ;;  %v8490_v49 = vpop.f32.mrf.mxu1 }
 0x7ca   : > { %v8463_v31 = vadd.f32 %v8462_v60, %v8461_v37  ;;  %v8491_v33 = vadd.f32 %v8490_v49, %v8489_v59 }
 0x7cb   : > { %v8464_v13 = vpop.f32.mrf.mxu0  ;;  %v8492_v40 = vpop.f32.mrf.mxu1 }
 0x7cc   : > { %v1922_v54 = vadd.f32 %v8491_v33, %v8463_v31 }
 0x7cd   : > { %v8465_v43 = vpop.f32.mrf.mxu0  ;;  %v8493_v29 = vpop.f32.mrf.mxu1 }
 0x7ce   : > { %v8466_v39 = vadd.f32 %v8465_v43, %v8464_v13  ;;  %v8494_v32 = vadd.f32 %v8493_v29, %v8492_v40 }
 0x7cf   : > { %v8467_v36 = vpop.f32.mrf.mxu0  ;;  %v8495_v53 = vpop.f32.mrf.mxu1 }
 0x7d0   : > { %v1925_v44 = vadd.f32 %v8494_v32, %v8466_v39 }
 0x7d1   : > { %v8468_v35 = vpop.f32.mrf.mxu0  ;;  %v8496_v63 = vpop.f32.mrf.mxu1 }
 0x7d2   : > { %v8469_v0 = vadd.f32 %v8468_v35, %v8467_v36  ;;  %v8497_v58 = vadd.f32 %v8496_v63, %v8495_v53  ;;  %v7721_v63 = vld [vmem:[%s11793_s6 + $0x10] ss:$2 sm:$0xf] }
 0x7d3   : > { %v8470_v9 = vpop.f32.mrf.mxu0  ;;  %v8498_v20 = vpop.f32.mrf.mxu1 }
 0x7d4   : > { %v1930_v45 = vadd.f32 %v8497_v58, %v8469_v0 }
 0x7d5   : > { %v8471_v34 = vpop.f32.mrf.mxu0  ;;  %v8499_v24 = vpop.f32.mrf.mxu1 }
 0x7d6   : > { %v8472_v55 = vadd.f32 %v8471_v34, %v8470_v9  ;;  %v8500_v16 = vadd.f32 %v8499_v24, %v8498_v20  ;;  %v2244_v20 = vrot.slane %v7721_v63, %v10147_v1  ;;  %v2252_v34 = vrot.slane %v7721_v63, %v10149_v2 }
 0x7d7   : > { %v2240_v24 = vrot.slane %v7721_v63, %v10154_v11 }
 0x7d8   : > { %v1933_v57 = vadd.f32 %v8500_v16, %v8472_v55 }
 0x7e7   : > { %v8517_v8 = vpop.f32.mrf.mxu0  ;;  %v8545_v51 = vpop.f32.mrf.mxu1 }
 0x7e9   : > { %v8518_v38 = vpop.f32.mrf.mxu0  ;;  %v8546_v41 = vpop.f32.mrf.mxu1 }
 0x7ea   : > { %v8519_v17 = vadd.f32 %v8518_v38, %v8517_v8  ;;  %v8547_v10 = vadd.f32 %v8546_v41, %v8545_v51 }
 0x7eb   : > { %v8520_v25 = vpop.f32.mrf.mxu0  ;;  %v8548_v26 = vpop.f32.mrf.mxu1 }
 0x7ec   : > { %v2163_v23 = vadd.f32 %v8519_v17, %v1922_v54 }
 0x7ed   : > { %v8521_v46 = vpop.f32.mrf.mxu0  ;;  %v8549_v6 = vpop.f32.mrf.mxu1 }
 0x7ee   : > { %v10452_v21 = vadd.f32 %v8547_v10, %v2163_v23  ;;  %v8522_v28 = vadd.f32 %v8521_v46, %v8520_v25  ;;  %v8550_v49 = vadd.f32 %v8549_v6, %v8548_v26 }
 0x7ef   : > { %v8523_v37 = vpop.f32.mrf.mxu0  ;;  %v8551_v59 = vpop.f32.mrf.mxu1 }
 0x7f0   : > { %v2166_v60 = vadd.f32 %v8522_v28, %v1925_v44 }
 0x7f1   : > { %v8524_v31 = vpop.f32.mrf.mxu0  ;;  %v8552_v33 = vpop.f32.mrf.mxu1 }
 0x7f2   : > { %v10454_v13 = vadd.f32 %v8550_v49, %v2166_v60  ;;  %v8525_v40 = vadd.f32 %v8524_v31, %v8523_v37  ;;  %v8553_v43 = vadd.f32 %v8552_v33, %v8551_v59  ;;  %v2785_v31 = vld [vmem:[%s11792_s5 + $0x30] sm:$0xff] }
 0x7f3   : > { %v8526_v29 = vpop.f32.mrf.mxu0  ;;  %v8554_v39 = vpop.f32.mrf.mxu1  ;;  %v2787_v33 = vld [vmem:[%s11792_s5 + $0x70] sm:$0xff] }
 0x7f4   : > { %v2171_v32 = vadd.f32 %v8525_v40, %v1930_v45  ;;  %v2248_v45 = vrot.slane %v7721_v63, %v10156_v12 }
 0x7f5   : > { %v8527_v36 = vpop.f32.mrf.mxu0  ;;  %v8555_v54 = vpop.f32.mrf.mxu1 }
 0x7f6   : > { %v10456_v53 = vadd.f32 %v8553_v43, %v2171_v32  ;;  %v8528_v35 = vadd.f32 %v8527_v36, %v8526_v29  ;;  %v8556_v9 = vadd.f32 %v8555_v54, %v8554_v39  ;;  %v2786_v32 = vld [vmem:[%s11792_s5 + $0x38] sm:$0xff] }
 0x7f7   : > { %v2331_v44 = vpop.f32.mrf.mxu0  ;;  %v2384_v0 = vpop.f32.mrf.mxu1  ;;  %v2788_v36 = vld [vmem:[%s11792_s5 + $0x78] sm:$0xff] }
 0x7f8   : > { %v2174_v58 = vadd.f32 %v8528_v35, %v1933_v57  ;;  %v2332_v57 = vadd.f32 %v2331_v44, %v2240_v24  ;;  %v2385_v26 = vadd.f32 %v2384_v0, %v2248_v45 }
 0x7f9   : > { %v2333_v55 = vpop.f32.mrf.mxu0  ;;  %v2386_v16 = vpop.f32.mrf.mxu1 }
 0x7fa   : > { %v10465_v8 = vadd.f32 %v8556_v9, %v2174_v58  ;;  %v2334_v41 = vadd.f32 %v2333_v55, %v2244_v20  ;;  %v2387_v17 = vadd.f32 %v2386_v16, %v2252_v34  ;;  %v2403_v54 = vmax.f32 %v2332_v57, 0.0 }
 0x7fb   : > { %v2335_v51 = vpop.f32.mrf.mxu0  ;;  %v2388_v38 = vpop.f32.mrf.mxu1  ;;  %v2405_v35 = vmax.f32 %v2385_v26, 0.0  ;;  %v7768_v9 = vcombine.high %v2785_v31, %v2787_v33 }
 0x7fc   : > { %v2336_v10 = vadd.f32 %v2335_v51, %v2240_v24  ;;  %v2389_v25 = vadd.f32 %v2388_v38, %v2248_v45  ;;  %v2404_v40 = vmax.f32 %v2334_v41, 0.0  ;;  %v2406_v43 = vmax.f32 %v2387_v17, 0.0 }
 0x7fd   : > { %v2337_v23 = vpop.f32.mrf.mxu0  ;;  %v2390_v46 = vpop.f32.mrf.mxu1  ;;  %v7770_v17 = vcombine.high %v2786_v32, %v2788_v36 }
 0x7fe   : > { %v2338_v6 = vadd.f32 %v2337_v23, %v2244_v20  ;;  %v2391_v28 = vadd.f32 %v2390_v46, %v2252_v34  ;;  %v2407_v37 = vmax.f32 %v2336_v10, 0.0  ;;  %v2409_v59 = vmax.f32 %v2389_v25, 0.0 }
 0x7ff   : > { %v2341_v60 = vpop.f32.mrf.mxu0  ;;  %v2394_v49 = vpop.f32.mrf.mxu1 }
 0x800   : > { %v2408_v29 = vmax.f32 %v2338_v6, 0.0  ;;  %v2410_v39 = vmax.f32 %v2391_v28, 0.0  ;;  %v2419_v55 = vpack.c.bf16 %v2407_v37, %v2403_v54  ;;  %v2421_v16 = vpack.c.bf16 %v2409_v59, %v2405_v35  ;;  %v9312_v54 = vld [vmem:[%s11794_s7 + $0x3e8] sm:$0xff]  }
 0x801   : > { %v2343_v63 = vpop.f32.mrf.mxu0  ;;  %v2396_v44 = vpop.f32.mrf.mxu1  ;;  %v2342_v46 = vadd.f32 %v2341_v60, %v2240_v24  ;;  %v2395_v6 = vadd.f32 %v2394_v49, %v2248_v45  ;;  %v7767_v28 = vcombine.low %v2785_v31, %v2787_v33  ;;  %v7769_v37 = vcombine.low %v2786_v32, %v2788_v36  ;;  %v9305_v31 = vld [vmem:[%s11794_s7 + $0x338] sm:$0xff]   ;;  %v9309_v32 = vld [vmem:[%s11794_s7 + $0x330] sm:$0xff]   ;;  %v9313_v35 = vld [vmem:[%s11794_s7 + $0x328] sm:$0xff]  }
 0x802   : > { %v2420_v0 = vpack.c.bf16 %v2408_v29, %v2404_v40  ;;  %v2422_v58 = vpack.c.bf16 %v2410_v39, %v2406_v43  ;;  %v2344_v51 = vadd.f32 %v2343_v63, %v2244_v20  ;;  %v2397_v10 = vadd.f32 %v2396_v44, %v2252_v34  ;;  %v9306_v33 = vld [vmem:[%s11794_s7 + $0x3b8] sm:$0xff]   ;;  %v9307_v39 = vld [vmem:[%s11794_s7 + $0x370] sm:$0xff]   ;;  %v9314_v63 = vld [vmem:[%s11794_s7 + $0x3a8] sm:$0xff]  }
 0x803   : > { %v2345_v38 = vpop.f32.mrf.mxu0  ;;  %v2398_v41 = vpop.f32.mrf.mxu1  ;;  %v2413_v18 = vmax.f32 %v2395_v6, 0.0  ;;  %v9310_v36 = vld [vmem:[%s11794_s7 + $0x3b0] sm:$0xff]   ;;  %v9315_v44 = vld [vmem:[%s11794_s7 + $0x360] sm:$0xff]   ;;  %v9329_v6 = vld [vmem:[%s11794_s7 + $0x308] sm:$0xff]  }
 0x804   : > { %v2346_v25 = vadd.f32 %v2345_v38, %v2240_v24  ;;  %v2399_v23 = vadd.f32 %v2398_v41, %v2248_v45  ;;  %2715 = vmatprep.mubr.bf16.mxu0 %v2420_v0  ;;  %2764 = vmatprep.mubr.bf16.mxu1 %v2422_v58  ;;  %v9303_v24 = vld [vmem:[%s11794_s7 + $0x378] sm:$0xff]   ;;  %v2414_v22 = vmax.f32 %v2397_v10, 0.0  ;;  %v2411_v45 = vmax.f32 %v2342_v46, 0.0  ;;  %v9316_v0 = vld [vmem:[%s11794_s7 + $0x3e0] sm:$0xff]   ;;  %v9323_v41 = vld [vmem:[%s11794_s7 + $0x350] sm:$0xff]  }
 0x805   : > { %v2347_v57 = vpop.f32.mrf.mxu0  ;;  %v2400_v26 = vpop.f32.mrf.mxu1  ;;  %2716 = vmatmul.mubr.bf16.vlgmr.msra.gmra.mxu0 %v2419_v55  ;;  %2765 = vmatmul.mubr.bf16.vlgmr.msra.gmra.mxu1 %v2421_v16  ;;  %v9317_v58 = vld [vmem:[%s11794_s7 + $0x320] sm:$0xff]   ;;  %v9319_v55 = vld [vmem:[%s11794_s7 + $0x358] sm:$0xff]   ;;  %v9325_v10 = vld [vmem:[%s11794_s7 + $0x310] sm:$0xff]  }
 0x806   : > { %v2348_v40 = vadd.f32 %v2347_v57, %v2244_v20  ;;  %v2401_v43 = vadd.f32 %v2400_v26, %v2252_v34  ;;  %2869 = vmatpush1.bf16.msra.mxu0 %v7771_v27  ;;  %2922 = vmatpush1.bf16.msra.mxu1 %v7773_v47  ;;  %v2415_v59 = vmax.f32 %v2346_v25, 0.0  ;;  %v2417_v29 = vmax.f32 %v2399_v23, 0.0  ;;  %v9304_v20 = vld [vmem:[%s11794_s7 + $0x3f8] sm:$0xff]   ;;  %v9326_v25 = vld [vmem:[%s11794_s7 + $0x390] sm:$0xff]   ;;  %v9327_v23 = vld [vmem:[%s11794_s7 + $0x348] sm:$0xff]  }
 0x807   : > { %2870 = vmatprep.subr.bf16.mxu0 %v7768_v9  ;;  %2923 = vmatprep.subr.bf16.mxu1 %v7770_v17  ;;  %v2412_v34 = vmax.f32 %v2344_v51, 0.0  ;;  %v9318_v9 = vld [vmem:[%s11794_s7 + $0x3a0] sm:$0xff]   ;;  %v9320_v16 = vld [vmem:[%s11794_s7 + $0x3d8] sm:$0xff]   ;;  %v9324_v17 = vld [vmem:[%s11794_s7 + $0x3d0] sm:$0xff]  }
 0x808   : > { %v2416_v42 = vmax.f32 %v2348_v40, 0.0  ;;  %v2418_v27 = vmax.f32 %v2401_v43, 0.0  ;;  %v2423_v60 = vpack.c.bf16 %v2415_v59, %v2411_v45  ;;  %v2425_v49 = vpack.c.bf16 %v2417_v29, %v2413_v18  ;;  %v9321_v51 = vld [vmem:[%s11794_s7 + $0x318] sm:$0xff]   ;;  %v9328_v46 = vld [vmem:[%s11794_s7 + $0x3c8] sm:$0xff]   ;;  %v9331_v26 = vld [vmem:[%s11794_s7 + $0x340] sm:$0xff]  }
 0x809   : > { %v9322_v38 = vld [vmem:[%s11794_s7 + $0x398] sm:$0xff]   ;;  %v9330_v57 = vld [vmem:[%s11794_s7 + $0x388] sm:$0xff]   ;;  %v9333_v40 = vld [vmem:[%s11794_s7 + $0x300] sm:$0xff]  }
 0x80a   : > { %v2424_v30 = vpack.c.bf16 %v2416_v42, %v2412_v34  ;;  %v2426_v47 = vpack.c.bf16 %v2418_v27, %v2414_v22  ;;  %2871 = vmatpush1.bf16.msra.mxu0 %v7767_v28  ;;  %2924 = vmatpush1.bf16.msra.mxu1 %v7769_v37  ;;  %v9332_v28 = vld [vmem:[%s11794_s7 + $0x3c0] sm:$0xff]   ;;  %v10597_v37 = vld [vmem:[%s11788_s1 + $0x18] sm:$0xff]   ;;  %v7829_v59 = vld [vmem:[%s11791_s4 + $0xc] ss:$0 sm:$0xff] }
 0x80b   : > { %8613 = vmatprep.subr.bf16.mxu0 %v9303_v24  ;;  %8641 = vmatprep.subr.bf16.mxu1 %v9304_v20  ;;  %v9334_v43 = vld [vmem:[%s11794_s7 + $0x380] sm:$0xff]  }
 0x80c   : > { %2723 = vmatprep.mubr.bf16.mxu0 %v2424_v30  ;;  %2772 = vmatprep.mubr.bf16.mxu1 %v2426_v47 }
 0x80d   : > { %2724 = vmatmul.mubr.bf16.gmra.mxu0 %v2423_v60  ;;  %2773 = vmatmul.mubr.bf16.gmra.mxu1 %v2425_v49 }
 0x80e   : > { %2888 = vmatprep.mubr.bf16.mxu0 %v9650_v7  ;;  %2941 = vmatprep.mubr.bf16.mxu1 %v9650_v7 }
 0x80f   : > { %3587 = vrot.lane.b32.xlu1 %v7829_v59, %s9645_s12 }
 0x815   : > { %7775 = vmatmul.mubr.msk.bf16.vlgmr.msra.gmra.mxu0 %vm403_vm0, %v9983_v52  ;;  %7777 = vmatmul.mubr.msk.bf16.vlgmr.msra.gmra.mxu1 %vm403_vm0, %v9983_v52  ;;  %v9308_v52 = vld [vmem:[%s11794_s7 + $0x3f0] sm:$0xff]  }
 0x816   : > { %2898 = vmatprep.mubr.bf16.mxu0 %v9650_v7  ;;  %2951 = vmatprep.mubr.bf16.mxu1 %v9650_v7 }
 0x817   : > { %8614 = vmatpush3.bf16.msra.mxu0 %v9305_v31  ;;  %8642 = vmatpush3.bf16.msra.mxu1 %v9306_v33 }
 0x818   : > { %8615 = vmatprep.subr.bf16.mxu0 %v9307_v39  ;;  %8643 = vmatprep.subr.bf16.mxu1 %v9308_v52 }
 0x81b   : > { %8616 = vmatpush3.bf16.msra.mxu0 %v9309_v32  ;;  %8644 = vmatpush3.bf16.msra.mxu1 %v9310_v36 }
 0x81c   : > { %8645 = vmatprep.subr.bf16.mxu1 %v9312_v54 }
 0x81d   : > { %7776 = vmatmul.mubr.msk.bf16.gmra.mxu0 %vm403_vm0, %v10003_v62  ;;  %7778 = vmatmul.mubr.msk.bf16.gmra.mxu1 %vm403_vm0, %v10003_v62  ;;  %v9311_v62 = vld [vmem:[%s11794_s7 + $0x368] sm:$0xff]  }
 0x81e   : > { %8617 = vmatprep.subr.bf16.mxu0 %v9311_v62 }
 0x81f   : > { %8618 = vmatpush3.bf16.msra.mxu0 %v9313_v35  ;;  %8646 = vmatpush3.bf16.msra.mxu1 %v9314_v63 }
 0x820   : > { %8619 = vmatprep.subr.bf16.mxu0 %v9315_v44  ;;  %8647 = vmatprep.subr.bf16.mxu1 %v9316_v0 }
 0x823   : > { %8620 = vmatpush3.bf16.msra.mxu0 %v9317_v58  ;;  %8648 = vmatpush3.bf16.msra.mxu1 %v9318_v9 }
 0x824   : > { %8621 = vmatprep.subr.bf16.mxu0 %v9319_v55  ;;  %8649 = vmatprep.subr.bf16.mxu1 %v9320_v16 }
 0x827   : > { %8622 = vmatpush3.bf16.msra.mxu0 %v9321_v51  ;;  %8650 = vmatpush3.bf16.msra.mxu1 %v9322_v38  ;;  %v7766_v51 = vld [vmem:[%s11793_s6 + $0x18] ss:$2 sm:$0xf] }
 0x828   : > { %8623 = vmatprep.subr.bf16.mxu0 %v9323_v41  ;;  %8651 = vmatprep.subr.bf16.mxu1 %v9324_v17  ;;  %v2803_v17 = vrot.slane %v7766_v51, %v10147_v1 }
 0x82b   : > { %8624 = vmatpush3.bf16.msra.mxu0 %v9325_v10  ;;  %8652 = vmatpush3.bf16.msra.mxu1 %v9326_v25  ;;  %v2811_v10 = vrot.slane %v7766_v51, %v10149_v2  ;;  %v2799_v25 = vrot.slane %v7766_v51, %v10154_v11 }
 0x82c   : > { %8625 = vmatprep.subr.bf16.mxu0 %v9327_v23  ;;  %8653 = vmatprep.subr.bf16.mxu1 %v9328_v46  ;;  %v2807_v23 = vrot.slane %v7766_v51, %v10156_v12 }
 0x82f   : > { %8626 = vmatpush3.bf16.msra.mxu0 %v9329_v6  ;;  %8654 = vmatpush3.bf16.msra.mxu1 %v9330_v57 }
 0x830   : > { %8627 = vmatprep.subr.bf16.mxu0 %v9331_v26  ;;  %8655 = vmatprep.subr.bf16.mxu1 %v9332_v28 }
 0x833   : > { %8628 = vmatpush3.bf16.msra.mxu0 %v9333_v40  ;;  %8656 = vmatpush3.bf16.msra.mxu1 %v9334_v43 }
 0x834   : > { %9020 = vmatprep.subr.bf16.mxu1 %v9646_v5  ;;  %9012 = vmatprep.subr.bf16.mxu0 %v10597_v37 }
 0x8c5   : > { %v8573_v29 = vpop.f32.mrf.mxu0  ;;  %v8601_v24 = vpop.f32.mrf.mxu1 }
 0x8c7   : > { %v8574_v20 = vpop.f32.mrf.mxu0  ;;  %v8602_v34 = vpop.f32.mrf.mxu1 }
 0x8c8   : > { %v8575_v22 = vadd.f32 %v8574_v20, %v8573_v29  ;;  %v8603_v42 = vadd.f32 %v8602_v34, %v8601_v24 }
 0x8c9   : > { %v8576_v27 = vpop.f32.mrf.mxu0  ;;  %v8604_v45 = vpop.f32.mrf.mxu1 }
 0x8ca   : > { %v2767_v18 = vadd.f32 %v8603_v42, %v8575_v22 }
 0x8cb   : > { %v8577_v30 = vpop.f32.mrf.mxu0  ;;  %v8605_v47 = vpop.f32.mrf.mxu1 }
 0x8cc   : > { %v10605_v60 = vadd.f32 %v2767_v18, %v10452_v21  ;;  %v8578_v49 = vadd.f32 %v8577_v30, %v8576_v27  ;;  %v8606_v31 = vadd.f32 %v8605_v47, %v8604_v45 }
 0x8cd   : > { %v8579_v33 = vpop.f32.mrf.mxu0  ;;  %v8607_v39 = vpop.f32.mrf.mxu1 }
 0x8ce   : > { %v2770_v52 = vadd.f32 %v8606_v31, %v8578_v49 }
 0x8cf   : > { %v8580_v32 = vpop.f32.mrf.mxu0  ;;  %v8608_v36 = vpop.f32.mrf.mxu1 }
 0x8d0   : > { %v10608_v62 = vadd.f32 %v2770_v52, %v10454_v13  ;;  %v8581_v54 = vadd.f32 %v8580_v32, %v8579_v33  ;;  %v8609_v35 = vadd.f32 %v8608_v36, %v8607_v39 }
 0x8d1   : > { %v8582_v63 = vpop.f32.mrf.mxu0  ;;  %v8610_v44 = vpop.f32.mrf.mxu1 }
 0x8d2   : > { %v2775_v0 = vadd.f32 %v8609_v35, %v8581_v54 }
 0x8d3   : > { %v8583_v58 = vpop.f32.mrf.mxu0  ;;  %v8611_v9 = vpop.f32.mrf.mxu1 }
 0x8d4   : > { %v10611_v21 = vadd.f32 %v2775_v0, %v10456_v53  ;;  %v8584_v55 = vadd.f32 %v8583_v58, %v8582_v63  ;;  %v8612_v16 = vadd.f32 %v8611_v9, %v8610_v44  ;;  %v9336_v9 = vld [vmem:[%s11788_s1 + $0x10] sm:$0xff]  }
 0x8d5   : > { %v2890_v38 = vpop.f32.mrf.mxu0  ;;  %v2943_v41 = vpop.f32.mrf.mxu1 }
 0x8d6   : > { %v2778_v13 = vadd.f32 %v8612_v16, %v8584_v55  ;;  %v2891_v29 = vadd.f32 %v2890_v38, %v2799_v25  ;;  %v2944_v24 = vadd.f32 %v2943_v41, %v2807_v23 }
 0x8d7   : > { %v2892_v46 = vpop.f32.mrf.mxu0  ;;  %v2945_v53 = vpop.f32.mrf.mxu1 }
 0x8d8   : > { %v10621_v6 = vadd.f32 %v2778_v13, %v10465_v8  ;;  %v2893_v28 = vadd.f32 %v2892_v46, %v2803_v17  ;;  %v2946_v40 = vadd.f32 %v2945_v53, %v2811_v10  ;;  %v2962_v33 = vmax.f32 %v2891_v29, 0.0 }
 0x8d9   : > { %v2894_v57 = vpop.f32.mrf.mxu0  ;;  %v2947_v26 = vpop.f32.mrf.mxu1  ;;  %v2964_v39 = vmax.f32 %v2944_v24, 0.0 }
 0x8da   : > { %v2895_v43 = vadd.f32 %v2894_v57, %v2799_v25  ;;  %v2948_v59 = vadd.f32 %v2947_v26, %v2807_v23  ;;  %v2963_v47 = vmax.f32 %v2893_v28, 0.0  ;;  %v2965_v49 = vmax.f32 %v2946_v40, 0.0 }
 0x8db   : > { %v2896_v20 = vpop.f32.mrf.mxu0  ;;  %v2949_v34 = vpop.f32.mrf.mxu1 }
 0x8dc   : > { %v2897_v22 = vadd.f32 %v2896_v20, %v2803_v17  ;;  %v2950_v42 = vadd.f32 %v2949_v34, %v2811_v10  ;;  %v2966_v27 = vmax.f32 %v2895_v43, 0.0  ;;  %v2968_v45 = vmax.f32 %v2948_v59, 0.0 }
 0x8dd   : > { %v2900_v18 = vpop.f32.mrf.mxu0  ;;  %v2953_v30 = vpop.f32.mrf.mxu1 }
 0x8de   : > { %v2967_v8 = vmax.f32 %v2897_v22, 0.0  ;;  %v2969_v31 = vmax.f32 %v2950_v42, 0.0  ;;  %v2978_v35 = vpack.c.bf16 %v2966_v27, %v2962_v33  ;;  %v2980_v63 = vpack.c.bf16 %v2968_v45, %v2964_v39 }
 0x8df   : > { %v2902_v52 = vpop.f32.mrf.mxu0  ;;  %v2955_v32 = vpop.f32.mrf.mxu1  ;;  %v2901_v38 = vadd.f32 %v2900_v18, %v2799_v25  ;;  %v2954_v41 = vadd.f32 %v2953_v30, %v2807_v23 }
 0x8e0   : > { %v2979_v36 = vpack.c.bf16 %v2967_v8, %v2963_v47  ;;  %v2981_v54 = vpack.c.bf16 %v2969_v31, %v2965_v49  ;;  %v2903_v44 = vadd.f32 %v2902_v52, %v2803_v17  ;;  %v2956_v55 = vadd.f32 %v2955_v32, %v2811_v10 }
 0x8e1   : > { %v2904_v0 = vpop.f32.mrf.mxu0  ;;  %v2957_v58 = vpop.f32.mrf.mxu1  ;;  %v2970_v24 = vmax.f32 %v2901_v38, 0.0  ;;  %v2972_v20 = vmax.f32 %v2954_v41, 0.0 }
 0x8e2   : > { %v2905_v16 = vadd.f32 %v2904_v0, %v2799_v25  ;;  %v2958_v51 = vadd.f32 %v2957_v58, %v2807_v23  ;;  %3274 = vmatprep.mubr.bf16.mxu0 %v2979_v36  ;;  %3323 = vmatprep.mubr.bf16.mxu1 %v2981_v54  ;;  %v2971_v40 = vmax.f32 %v2903_v44, 0.0  ;;  %v2973_v43 = vmax.f32 %v2956_v55, 0.0 }
 0x8e3   : > { %v2906_v13 = vpop.f32.mrf.mxu0  ;;  %v2959_v46 = vpop.f32.mrf.mxu1  ;;  %3275 = vmatmul.mubr.bf16.vlgmr.msra.gmra.mxu0 %v2978_v35  ;;  %3324 = vmatmul.mubr.bf16.vlgmr.msra.gmra.mxu1 %v2980_v63 }
 0x8e4   : > { %v2907_v53 = vadd.f32 %v2906_v13, %v2803_v17  ;;  %v2960_v57 = vadd.f32 %v2959_v46, %v2811_v10  ;;  %9013 = vmatpush3.bf16.msra.mxu0 %v10597_v37  ;;  %v2974_v26 = vmax.f32 %v2905_v16, 0.0  ;;  %v2976_v28 = vmax.f32 %v2958_v51, 0.0  ;;  %v3588_v13 = vpop.permute.xlu1 %3587 }
 0x8e5   : > { %9014 = vmatprep.subr.bf16.mxu0 %v9336_v9 }
 0x8e6   : > { %v2975_v59 = vmax.f32 %v2907_v53, 0.0  ;;  %v2977_v29 = vmax.f32 %v2960_v57, 0.0  ;;  %v2982_v23 = vpack.c.bf16 %v2974_v26, %v2970_v24  ;;  %v2984_v22 = vpack.c.bf16 %v2976_v28, %v2972_v20 }
 0x8e8   : > { %v2983_v34 = vpack.c.bf16 %v2975_v59, %v2971_v40  ;;  %v2985_v25 = vpack.c.bf16 %v2977_v29, %v2973_v43  ;;  %9015 = vmatpush3.bf16.msra.mxu0 %v9336_v9 }
 0x8e9   : > { %9026 = vmatprep.subr.bf16.mxu0 %v9646_v5 }
 0x8ea   : > { %3282 = vmatprep.mubr.bf16.mxu0 %v2983_v34  ;;  %3331 = vmatprep.mubr.bf16.mxu1 %v2985_v25  ;;  %v7828_v34 = vld [vmem:[%s11791_s4 + $0xb] ss:$0 sm:$0xff] }
 0x8eb   : > { %3283 = vmatmul.mubr.bf16.gmra.mxu0 %v2982_v23  ;;  %3332 = vmatmul.mubr.bf16.gmra.mxu1 %v2984_v22 }
 0x8ec   : > { %9016 = vmatprep.mubr.msk.bf16.mxu0 %vm403_vm0, %v9772_v3  ;;  %9022 = vmatprep.mubr.msk.bf16.mxu1 %vm9647_vm1, %v9646_v5 }
 0x8f3   : > { %9017 = vmatmul.mubr.msk.bf16.vlgmr.msra.gmra.mxu0 %vm403_vm0, %v9775_v4 }
 0x8f4   : > { %9028 = vmatprep.mubr.msk.bf16.mxu0 %vm9647_vm1, %v9646_v5 }
 0x9a3   : > { %v8629_v37 = vpop.f32.mrf.mxu0  ;;  %v8657_v17 = vpop.f32.mrf.mxu1 }
 0x9a5   : > { %v8630_v10 = vpop.f32.mrf.mxu0  ;;  %v8658_v42 = vpop.f32.mrf.mxu1 }
 0x9a6   : > { %v8631_v27 = vadd.f32 %v8630_v10, %v8629_v37  ;;  %v8659_v45 = vadd.f32 %v8658_v42, %v8657_v17 }
 0x9a7   : > { %v8632_v18 = vpop.f32.mrf.mxu0  ;;  %v8660_v30 = vpop.f32.mrf.mxu1 }
 0x9a8   : > { %v3326_v47 = vadd.f32 %v8659_v45, %v8631_v27 }
 0x9a9   : > { %v8633_v49 = vpop.f32.mrf.mxu0  ;;  %v8661_v3 = vpop.f32.mrf.mxu1 }
 0x9aa   : > { %v10637_v8 = vadd.f32 %v3326_v47, %v10605_v60  ;;  %v8634_v31 = vadd.f32 %v8633_v49, %v8632_v18  ;;  %v8662_v33 = vadd.f32 %v8661_v3, %v8660_v30 }
 0x9ab   : > { %v8635_v4 = vpop.f32.mrf.mxu0  ;;  %v8663_v39 = vpop.f32.mrf.mxu1 }
 0x9ac   : > { %v3329_v52 = vadd.f32 %v8662_v33, %v8634_v31 }
 0x9ad   : > { %v8636_v32 = vpop.f32.mrf.mxu0  ;;  %v8664_v36 = vpop.f32.mrf.mxu1 }
 0x9ae   : > { %v10640_v54 = vadd.f32 %v3329_v52, %v10608_v62  ;;  %v8637_v35 = vadd.f32 %v8636_v32, %v8635_v4  ;;  %v8665_v63 = vadd.f32 %v8664_v36, %v8663_v39 }
 0x9af   : > { %v8638_v44 = vpop.f32.mrf.mxu0  ;;  %v8666_v0 = vpop.f32.mrf.mxu1 }
 0x9b0   : > { %v3334_v58 = vadd.f32 %v8665_v63, %v8637_v35 }
 0x9b1   : > { %v8639_v9 = vpop.f32.mrf.mxu0  ;;  %v8667_v55 = vpop.f32.mrf.mxu1 }
 0x9b2   : > { %v10643_v60 = vadd.f32 %v3334_v58, %v10611_v21  ;;  %v8640_v16 = vadd.f32 %v8639_v9, %v8638_v44  ;;  %v8668_v51 = vadd.f32 %v8667_v55, %v8666_v0 }
 0x9b3   : > { %v10645_v38 = vpop.f32.mrf.mxu0 }
 0x9b4   : > { %v3337_v41 = vadd.f32 %v8668_v51, %v8640_v16  ;;  %v3592_v43 = vadd.f32 %v10645_v38, %v3588_v13  ;;  %v3580_v45 = vadd.f32 %v10645_v38, %v7828_v34 }
 0x9b5   : > { %v10647_v46 = vpop.f32.mrf.mxu0 }
 0x9b6   : > { %v10650_v62 = vadd.f32 %v3337_v41, %v10621_v6  ;;  %v3590_v53 = vadd.f32 %v3588_v13, %v10647_v46  ;;  %v8403_v6 = vpack.c.bf16 %v3592_v43, %v3592_v43  ;;  %v3578_v25 = vadd.f32 %v7828_v34, %v10647_v46 }
 0x9b7   : > { %v10653_v57 = vpop.f32.mrf.mxu0  ;;  %v8399_v47 = vpack.c.bf16 %v3580_v45, %v3580_v45 }
 0x9b8   : > { %v3593_v26 = vadd.f32 %v10653_v57, %v3588_v13  ;;  %v8401_v28 = vpack.c.bf16 %v3590_v53, %v3590_v53  ;;  %v8397_v37 = vpack.c.bf16 %v3578_v25, %v3578_v25  ;;  %v3581_v49 = vadd.f32 %v10653_v57, %v7828_v34 }
 0x9b9   : > { %v10656_v21 = vpop.f32.mrf.mxu0 }
 0x9ba   : > { %v3591_v40 = vadd.f32 %v3588_v13, %v10656_v21  ;;  %3635 = vrot.lane.b32.xlu0 %v8401_v28, %s11807_s25  ;;  %v8404_v59 = vpack.c.bf16 %v3593_v26, %v3593_v26  ;;  %v3579_v17 = vadd.f32 %v7828_v34, %v10656_v21  ;;  %v8400_v3 = vpack.c.bf16 %v3581_v49, %v3581_v49  ;;  %v7830_v28 = vld [vmem:[%s11791_s4 + $0xd] ss:$0 sm:$0xff] }
 0x9bc   : > { %v8402_v29 = vpack.c.bf16 %v3591_v40, %v3591_v40  ;;  %v8398_v18 = vpack.c.bf16 %v3579_v17, %v3579_v17 }
 0x9be   : > { %3782 = vrot.lane.b32.xlu0 %v8404_v59, %s11807_s25  ;;  %3684 = vrot.lane.b32.xlu1 %v8402_v29, %s11807_s25 }
 0x9c2   : > { %3733 = vrot.lane.b32.xlu1 %v8403_v6, %s11807_s25 }
 0xa2c   : > { %v3636_v24 = vpop.permute.xlu0 %3635 }
 0xa2d   : > { %v3641_v20 = vsel %vm403_vm0, %v3636_v24, 0 }
 0xa2e   : > { %9021 = vmatpush3.bf16.xpose.msra.mxu1 %v3641_v20 }
 0xa2f   : > { %9032 = vmatprep.subr.bf16.mxu1 %v9646_v5 }
 0xa30   : > { %v3685_v23 = vpop.permute.xlu1 %3684  ;;  %v3783_v27 = vpop.permute.xlu0 %3782 }
 0xa31   : > { %v3690_v22 = vsel %vm403_vm0, %v3685_v23, 0  ;;  %v3788_v30 = vsel %vm403_vm0, %v3783_v27, 0 }
 0xa32   : > { %9027 = vmatpush3.bf16.xpose.msra.mxu0 %v3690_v22 }
 0xa33   : > { %9038 = vmatprep.subr.bf16.mxu0 %v9646_v5 }
 0xa34   : > { %v3734_v10 = vpop.permute.xlu1 %3733 }
 0xa35   : > { %v3739_v42 = vsel %vm403_vm0, %v3734_v10, 0  ;;  %9023 = vmatmul.mubr.msk.bf16.vlgmr.msra.gmra.mxu1 %vm403_vm0, %v8397_v37 }
 0xa36   : > { %9033 = vmatpush3.bf16.xpose.msra.mxu1 %v3739_v42  ;;  %9034 = vmatprep.mubr.msk.bf16.mxu1 %vm9647_vm1, %v9646_v5 }
 0xa37   : > { %9044 = vmatprep.subr.bf16.mxu1 %v9646_v5 }
 0xa39   : > { %9029 = vmatmul.mubr.msk.bf16.vlgmr.msra.gmra.mxu0 %vm403_vm0, %v8398_v18 }
 0xa3a   : > { %9039 = vmatpush3.bf16.xpose.msra.mxu0 %v3788_v30  ;;  %9040 = vmatprep.mubr.msk.bf16.mxu0 %vm9647_vm1, %v9646_v5 }
 0xa3b   : > { %9050 = vmatprep.subr.bf16.mxu0 %v9646_v5 }
 0xa3d   : > { %9035 = vmatmul.mubr.msk.bf16.vlgmr.msra.gmra.mxu1 %vm403_vm0, %v8399_v47 }
 0xa3e   : > { %9046 = vmatprep.mubr.msk.bf16.mxu1 %vm9647_vm1, %v9646_v5 }
 0xa41   : > { %9041 = vmatmul.mubr.msk.bf16.vlgmr.msra.gmra.mxu0 %vm403_vm0, %v8400_v3 }
 0xa42   : > { %9052 = vmatprep.mubr.msk.bf16.mxu0 %vm9647_vm1, %v9646_v5 }
 0xaf5   : > { %v3677_v31 = vpop.f32.mrf.mxu1 }
 0xaf6   : > { %v3830_v33 = vsel %vm715_vm2, %v3677_v31, -inf }
 0xaf7   : > { %v9024_v4 = vpop.f32.mrf.mxu1  ;;  %3831 = vmax.xlane.f32.xlu1 %v3830_v33 }
 0xaf9   : > { %v3680_v39 = vpop.f32.mrf.mxu1  ;;  %v3726_v52 = vpop.f32.mrf.mxu0 }
 0xafa   : > { %v3833_v32 = vsel %vm715_vm2, %v3726_v52, -inf }
 0xafb   : > { %v9025_v36 = vpop.f32.mrf.mxu1  ;;  %3834 = vmax.xlane.f32.xlu0 %v3833_v32  ;;  %v9030_v35 = vpop.f32.mrf.mxu0  ;;  %v7811_v32 = vld [vmem:[%s11791_s4 + $0x4] ss:$0 sm:$0xff] }
 0xafc   : > { %v3346_v35 = vadd.f32 %v10643_v60, %v9999_v61 }
 0xafd   : > { %v3729_v63 = vpop.f32.mrf.mxu0  ;;  %v3775_v44 = vpop.f32.mrf.mxu1 }
 0xafe   : > { %v3836_v0 = vsel %vm715_vm2, %v3775_v44, -inf }
 0xaff   : > { %v9036_v58 = vpop.f32.mrf.mxu1  ;;  %3837 = vmax.xlane.f32.xlu0 %v3836_v0  ;;  %v9031_v9 = vpop.f32.mrf.mxu0 }
 0xb00   : > { %v3345_v58 = vadd.f32 %v10640_v54, %v9970_v50 }
 0xb01   : > { %v3778_v55 = vpop.f32.mrf.mxu1  ;;  %v3824_v16 = vpop.f32.mrf.mxu0 }
 0xb02   : > { %v3839_v51 = vsel %vm715_vm2, %v3824_v16, -inf  ;;  %v3354_v61 = vadd.f32 %v7811_v32, %v3345_v58 }
 0xb03   : > { %v9037_v41 = vpop.f32.mrf.mxu1  ;;  %3840 = vmax.xlane.f32.xlu1 %v3839_v51  ;;  %v9042_v13 = vpop.f32.mrf.mxu0 }
 0xb04   : > { %v3362_v60 = vsel %vm403_vm0, %v3354_v61, 0.0 }
 0xb05   : > { %v3827_v53 = vpop.f32.mrf.mxu0 }
 0xb07   : > { %v9043_v26 = vpop.f32.mrf.mxu0 }
 0xb15   : > { %3599 = vrot.lane.b32.xlu0 %v7830_v28, %s11808_s11 }
 0xb80   : > { %v3832_v40 = vpop.xlane.xlu1 %3831 }
 0xb81   : > { %v3842_v43 = vsub.f32 %v3677_v31, %v3832_v40 }
 0xb83   : > { %v3846_v59 = vmul.f32 1.442695, %v3842_v43 }
 0xb84   : > { %v3835_v29 = vpop.xlane.xlu0 %3834 }
 0xb85   : > { %9501 = vpow2.f32 %v3846_v59  ;;  %v3843_v6 = vsub.f32 %v3726_v52, %v3835_v29  ;;  %v3344_v52 = vadd.f32 %v10637_v8, %v9967_v48 }
 0xb87   : > { %v3848_v24 = vmul.f32 1.442695, %v3843_v6  ;;  %v3353_v36 = vadd.f32 %v7811_v32, %v3344_v52 }
 0xb88   : > { %v3838_v20 = vpop.xlane.xlu0 %3837 }
 0xb89   : > { %9503 = vpow2.f32 %v3848_v24  ;;  %v3844_v34 = vsub.f32 %v3775_v44, %v3838_v20  ;;  %v3359_v63 = vsel %vm403_vm0, %v3353_v36, 0.0  ;;  %v3355_v44 = vadd.f32 %v7811_v32, %v3346_v35  ;;  %v9338_v35 = vld [vmem:[%s11790_s3 + $0x10] sm:$0xff]  }
 0xb8b   : > { %v3850_v25 = vmul.f32 1.442695, %v3844_v34  ;;  %v3365_v0 = vsel %vm403_vm0, %v3355_v44, 0.0 }
 0xb8c   : > { %v3600_v23 = vpop.permute.xlu0 %3599  ;;  %v3841_v22 = vpop.xlane.xlu1 %3840 }
 0xb8d   : > { %9505 = vpow2.f32 %v3850_v25  ;;  %v3845_v37 = vsub.f32 %v3824_v16, %v3841_v22  ;;  %v3603_v17 = vadd.f32 %v3600_v23, %v10656_v21  ;;  %v3604_v27 = vadd.f32 %v10645_v38, %v3600_v23 }
 0xb8e   : > { %v3605_v47 = vadd.f32 %v10653_v57, %v3600_v23  ;;  %v3602_v57 = vadd.f32 %v3600_v23, %v10647_v46  ;;  %v3347_v46 = vadd.f32 %v10650_v62, %v9991_v56 }
 0xb8f   : > { %v3852_v10 = vmul.f32 1.442695, %v3845_v37  ;;  %v8406_v42 = vpack.c.bf16 %v3603_v17, %v3603_v17  ;;  %v8407_v30 = vpack.c.bf16 %v3604_v27, %v3604_v27 }
 0xb90   : > { %v8408_v21 = vpack.c.bf16 %v3605_v47, %v3605_v47  ;;  %v8405_v39 = vpack.c.bf16 %v3602_v57, %v3602_v57  ;;  %v10722_v48 = vadd.f32 %v7811_v32, %v3347_v46 }
 0xb91   : > { %9507 = vpow2.f32 %v3852_v10  ;;  %3928 = vrot.lane.b32.xlu0 %v8406_v42, %s11808_s11 }
 0xb92   : > { %v9502_v45 = vpop.eup %9501  ;;  %v3368_v8 = vsel %vm403_vm0, %v10722_v48, 0.0 }
 0xb93   : > { %v3854_v18 = vsel %vm715_vm2, %v9502_v45, 0.0 }
 0xb94   : > { %3855 = vadd.xlane.f32.xlu1 %v3854_v18 }
 0xb95   : > { %3977 = vrot.lane.b32.xlu0 %v8407_v30, %s11808_s11 }
 0xb96   : > { %v9504_v49 = vpop.eup %9503 }
 0xb97   : > { %v3857_v3 = vsel %vm715_vm2, %v9504_v49, 0.0 }
 0xb98   : > { %3858 = vadd.xlane.f32.xlu1 %v3857_v3 }
 0xb99   : > { %4026 = vrot.lane.b32.xlu0 %v8408_v21, %s11808_s11 }
 0xb9a   : > { %v9506_v38 = vpop.eup %9505 }
 0xb9b   : > { %v3860_v31 = vsel %vm715_vm2, %v9506_v38, 0.0 }
 0xb9c   : > { %3861 = vadd.xlane.f32.xlu1 %v3860_v31 }
 0xb9e   : > { %v9508_v33 = vpop.eup %9507 }
 0xb9f   : > { %v3863_v4 = vsel %vm715_vm2, %v9508_v33, 0.0 }
 0xba0   : > { %3864 = vadd.xlane.f32.xlu1 %v3863_v4 }
 0xbb1   : > { %3879 = vrot.lane.b32.xlu1 %v8405_v39, %s11808_s11 }
 0xbb8   : > { %3360 = vadd.xlane.f32.xlu0 %v3359_v63 }
 0xbbc   : > { %3366 = vadd.xlane.f32.xlu0 %v3365_v0 }
 0xbc0   : > { %3369 = vadd.xlane.f32.xlu0 %v3368_v8 }
 0xbd5   : > { %3363 = vadd.xlane.f32.xlu1 %v3362_v60 }
 0xc03   : > { %v3929_v9 = vpop.permute.xlu0 %3928 }
 0xc04   : > { %v3934_v56 = vsel %vm770_vm3, %v3929_v9, 0  ;;  %v7813_v9 = vld [vmem:[%s11791_s4 + $0x8] ss:$0 sm:$0xff] }
 0xc05   : > { %9051 = vmatpush3.bf16.msra.mxu0 %v3934_v56 }
 0xc06   : > { %9062 = vmatprep.subr.bf16.mxu0 %v9646_v5 }
 0xc07   : > { %v3978_v50 = vpop.permute.xlu0 %3977 }
 0xc08   : > { %v3983_v59 = vsel %vm770_vm3, %v3978_v50, 0 }
 0xc0b   : > { %v4027_v43 = vpop.permute.xlu0 %4026 }
 0xc0c   : > { %v4032_v24 = vsel %vm770_vm3, %v4027_v43, 0 }
 0xc1d   : > { %v3856_v62 = vpop.xlane.xlu1 %3855 }
 0xc1e   : > { %9509 = vrcp.f32 %v3856_v62 }
 0xc21   : > { %v3859_v55 = vpop.xlane.xlu1 %3858 }
 0xc22   : > { %9511 = vrcp.f32 %v3859_v55 }
 0xc25   : > { %v3862_v16 = vpop.xlane.xlu1 %3861 }
 0xc26   : > { %9513 = vrcp.f32 %v3862_v16 }
 0xc29   : > { %v3865_v51 = vpop.xlane.xlu1 %3864 }
 0xc2a   : > { %9515 = vrcp.f32 %v3865_v51 }
 0xc2b   : > { %v9510_v41 = vpop.eup %9509 }
 0xc2c   : > { %v3870_v54 = vmul.f32 %v9510_v41, %v9502_v45 }
 0xc2d   : > { %v3880_v13 = vpop.permute.xlu1 %3879 }
 0xc2e   : > { %v3885_v53 = vsel %vm770_vm3, %v3880_v13, 0  ;;  %v3874_v28 = vpack.c.bf16 %v3870_v54, %v3870_v54 }
 0xc2f   : > { %v9512_v26 = vpop.eup %9511  ;;  %9045 = vmatpush3.bf16.msra.mxu1 %v3885_v53 }
 0xc30   : > { %9056 = vmatprep.subr.bf16.mxu1 %v9646_v5  ;;  %v3871_v40 = vmul.f32 %v9512_v26, %v9504_v49 }
 0xc32   : > { %9047 = vmatmul.mubr.msk.bf16.vlgmr.msra.gmra.mxu1 %vm715_vm2, %v3874_v28  ;;  %v3875_v29 = vpack.c.bf16 %v3871_v40, %v3871_v40 }
 0xc33   : > { %v9514_v6 = vpop.eup %9513  ;;  %9057 = vmatpush3.bf16.msra.mxu1 %v3983_v59  ;;  %9058 = vmatprep.mubr.msk.bf16.mxu1 %vm9647_vm1, %v9646_v5 }
 0xc34   : > { %9053 = vmatmul.mubr.msk.bf16.vlgmr.msra.gmra.mxu0 %vm715_vm2, %v3875_v29  ;;  %v3872_v20 = vmul.f32 %v9514_v6, %v9506_v38 }
 0xc35   : > { %9063 = vmatpush3.bf16.msra.mxu0 %v4032_v24  ;;  %9064 = vmatprep.mubr.msk.bf16.mxu0 %vm9647_vm1, %v9646_v5 }
 0xc36   : > { %v3876_v25 = vpack.c.bf16 %v3872_v20, %v3872_v20 }
 0xc37   : > { %v9516_v34 = vpop.eup %9515 }
 0xc38   : > { %v3873_v23 = vmul.f32 %v9516_v34, %v9508_v33 }
 0xc3a   : > { %9059 = vmatmul.mubr.msk.bf16.vlgmr.msra.gmra.mxu1 %vm715_vm2, %v3876_v25  ;;  %v3877_v22 = vpack.c.bf16 %v3873_v23, %v3873_v23 }
 0xc3c   : > { %9065 = vmatmul.mubr.msk.bf16.vlgmr.msra.gmra.mxu0 %vm715_vm2, %v3877_v22 }
 0xc41   : > { %v3361_v37 = vpop.xlane.xlu0 %3360 }
 0xc42   : > { %v3371_v17 = vmul.f32 0.03125, %v3361_v37 }
 0xc44   : > { %v3375_v10 = vsub.f32 %v3353_v36, %v3371_v17  ;;  %v9337_v36 = vld [vmem:[%s11790_s3 + $0x18] sm:$0xff]  }
 0xc45   : > { %v3367_v42 = vpop.xlane.xlu0 %3366  ;;  %9068 = vmatprep.subr.bf16.mxu1 %v9337_v36 }
 0xc46   : > { %v3373_v27 = vmul.f32 0.03125, %v3367_v42  ;;  %v3379_v45 = vmul.f32 %v3375_v10, %v3375_v10  ;;  %9069 = vmatpush3.bf16.msra.mxu1 %v9337_v36 }
 0xc47   : > { %9070 = vmatprep.subr.bf16.mxu1 %v9338_v35 }
 0xc48   : > { %v3377_v18 = vsub.f32 %v3355_v44, %v3373_v27  ;;  %v3383_v30 = vsel %vm403_vm0, %v3379_v45, 0.0 }
 0xc49   : > { %3384 = vadd.xlane.f32.xlu1 %v3383_v30  ;;  %v3370_v3 = vpop.xlane.xlu0 %3369 }
 0xc4a   : > { %v3381_v47 = vmul.f32 %v3377_v18, %v3377_v18  ;;  %v3374_v21 = vmul.f32 0.03125, %v3370_v3  ;;  %9071 = vmatpush3.bf16.msra.mxu1 %v9338_v35 }
 0xc4c   : > { %v3389_v49 = vsel %vm403_vm0, %v3381_v47, 0.0  ;;  %v10746_v33 = vsub.f32 %v10722_v48, %v3374_v21 }
 0xc4d   : > { %3390 = vadd.xlane.f32.xlu1 %v3389_v49 }
 0xc4e   : > { %v3382_v52 = vmul.f32 %v10746_v33, %v10746_v33 }
 0xc50   : > { %v3392_v32 = vsel %vm403_vm0, %v3382_v52, 0.0 }
 0xc5e   : > { %v3364_v38 = vpop.xlane.xlu1 %3363 }
 0xc5f   : > { %v3372_v31 = vmul.f32 0.03125, %v3364_v38 }
 0xc61   : > { %v10748_v4 = vsub.f32 %v3354_v61, %v3372_v31  ;;  %v7812_v61 = vld [vmem:[%s11791_s4 + $0x7] ss:$0 sm:$0xff] }
 0xc63   : > { %v3380_v57 = vmul.f32 %v10748_v4, %v10748_v4 }
 0xc65   : > { %v3386_v39 = vsel %vm403_vm0, %v3380_v57, 0.0 }
 0xc66   : > { %3387 = vadd.xlane.f32.xlu0 %v3386_v39 }
 0xc6a   : > { %3393 = vadd.xlane.f32.xlu0 %v3392_v32 }
 0xcd2   : > { %v3385_v63 = vpop.xlane.xlu1 %3384 }
 0xcd3   : > { %v3395_v44 = vmul.f32 0.03125, %v3385_v63 }
 0xcd5   : > { %v3399_v46 = vadd.f32 1e-05, %v3395_v44  ;;  %v7851_v44 = vld [vmem:[%s11791_s4 + $0xe] ss:$0 sm:$0xff] }
 0xcd6   : > { %v3391_v0 = vpop.xlane.xlu1 %3390 }
 0xcd7   : > { %9517 = vrsqrt.f32 %v3399_v46  ;;  %v3397_v48 = vmul.f32 0.03125, %v3391_v0 }
 0xcd9   : > { %v3401_v8 = vadd.f32 1e-05, %v3397_v48 }
 0xcdb   : > { %9519 = vrsqrt.f32 %v3401_v8 }
 0xce4   : > { %v9518_v58 = vpop.eup %9517 }
 0xce5   : > { %v3407_v60 = vmul.f32 %v9518_v58, %v3375_v10 }
 0xce7   : > { %v3415_v56 = vmul.f32 %v7812_v61, %v3407_v60 }
 0xce8   : > { %v9520_v62 = vpop.eup %9519 }
 0xce9   : > { %v3423_v55 = vadd.f32 %v7813_v9, %v3415_v56  ;;  %v3409_v16 = vmul.f32 %v9520_v62, %v3377_v18 }
 0xceb   : > { %v3429_v51 = vsel %vm403_vm0, %v3423_v55, 0.0  ;;  %v3417_v41 = vmul.f32 %v7812_v61, %v3409_v16 }
 0xcec   : > { %3430 = vadd.xlane.f32.xlu1 %v3429_v51 }
 0xced   : > { %v10769_v50 = vadd.f32 %v7813_v9, %v3417_v41 }
 0xcef   : > { %v3388_v54 = vpop.xlane.xlu0 %3387  ;;  %v3435_v13 = vsel %vm403_vm0, %v10769_v50, 0.0 }
 0xcf0   : > { %v3396_v53 = vmul.f32 0.03125, %v3388_v54  ;;  %3436 = vadd.xlane.f32.xlu1 %v3435_v13  ;;  %v11809_v54 = vunpack.c.l.bf16 %v9880_v19 }
 0xcf2   : > { %v3400_v26 = vadd.f32 1e-05, %v3396_v53  ;;  %v3921_v28 = vpop.f32.mrf.mxu1 }
 0xcf3   : > { %v3394_v40 = vpop.xlane.xlu0 %3393 }
 0xcf4   : > { %9521 = vrsqrt.f32 %v3400_v26  ;;  %v3398_v43 = vmul.f32 0.03125, %v3394_v40  ;;  %v9048_v59 = vpop.f32.mrf.mxu1  ;;  %v3970_v29 = vpop.f32.mrf.mxu0  ;;  %v11810_v26 = vunpack.c.h.bf16 %v9876_v14 }
 0xcf5   : > { %v4074_v6 = vpack.c.bf16 %v3970_v29, %v3921_v28 }
 0xcf6   : > { %v3402_v24 = vadd.f32 1e-05, %v3398_v43  ;;  %v3924_v20 = vpop.f32.mrf.mxu1  ;;  %v9054_v34 = vpop.f32.mrf.mxu0 }
 0xcf7   : > { %9072 = vmatprep.mubr.msk.bf16.mxu1 %vm403_vm0, %v4074_v6  ;;  %v11811_v6 = vunpack.c.h.bf16 %v9880_v19 }
 0xcf8   : > { %9523 = vrsqrt.f32 %v3402_v24  ;;  %v9049_v25 = vpop.f32.mrf.mxu1  ;;  %v3973_v23 = vpop.f32.mrf.mxu0 }
 0xcfa   : > { %v9055_v22 = vpop.f32.mrf.mxu0  ;;  %v4019_v37 = vpop.f32.mrf.mxu1 }
 0xcfc   : > { %v9060_v17 = vpop.f32.mrf.mxu1  ;;  %v4068_v10 = vpop.f32.mrf.mxu0 }
 0xcfd   : > { %v4075_v42 = vpack.c.bf16 %v4068_v10, %v4019_v37  ;;  %v9339_v17 = vld [vmem:[%s11789_s2 + $0x8] sm:$0xff]   ;;  %v9340_v10 = vld [vmem:[%s11789_s2] sm:$0xff]  }
 0xcfe   : > { %v4022_v27 = vpop.f32.mrf.mxu1  ;;  %v9066_v45 = vpop.f32.mrf.mxu0  ;;  %9084 = vmatprep.subr.bf16.mxu1 %v9339_v17 }
 0xcff   : > { %9073 = vmatmul.mubr.msk.bf16.vlgmr.msra.gmra.mxu1 %vm403_vm0, %v4075_v42 }
 0xd00   : > { %v9061_v18 = vpop.f32.mrf.mxu1  ;;  %v4071_v30 = vpop.f32.mrf.mxu0  ;;  %9085 = vmatpush3.bf16.msra.mxu1 %v9339_v17 }
 0xd01   : > { %v9522_v47 = vpop.eup %9521  ;;  %9086 = vmatprep.subr.bf16.mxu1 %v9340_v10 }
 0xd02   : > { %v9067_v49 = vpop.f32.mrf.mxu0  ;;  %v3408_v3 = vmul.f32 %v9522_v47, %v10748_v4 }
 0xd04   : > { %v3416_v21 = vmul.f32 %v7812_v61, %v3408_v3  ;;  %9087 = vmatpush3.bf16.msra.mxu1 %v9340_v10 }
 0xd05   : > { %v9524_v38 = vpop.eup %9523  ;;  %9098 = vmatprep.subr.bf16.mxu1 %v9646_v5 }
 0xd06   : > { %v3424_v31 = vadd.f32 %v7813_v9, %v3416_v21  ;;  %v3410_v57 = vmul.f32 %v9524_v38, %v10746_v33 }
 0xd08   : > { %v3432_v39 = vsel %vm403_vm0, %v3424_v31, 0.0  ;;  %v3418_v52 = vmul.f32 %v7812_v61, %v3410_v57 }
 0xd09   : > { %3433 = vadd.xlane.f32.xlu0 %v3432_v39 }
 0xd0a   : > { %v3426_v32 = vadd.f32 %v7813_v9, %v3418_v52 }
 0xd0c   : > { %v3438_v36 = vsel %vm403_vm0, %v3426_v32, 0.0 }
 0xd0d   : > { %3439 = vadd.xlane.f32.xlu0 %v3438_v36 }
 0xd75   : > { %v3431_v35 = vpop.xlane.xlu1 %3430 }
 0xd76   : > { %v3441_v4 = vmul.f32 0.03125, %v3431_v35 }
 0xd78   : > { %v10784_v60 = vsub.f32 %v3423_v55, %v3441_v4 }
 0xd79   : > { %v3437_v48 = vpop.xlane.xlu1 %3436 }
 0xd7a   : > { %v3443_v9 = vmul.f32 0.03125, %v3437_v48  ;;  %v3449_v55 = vmul.f32 %v10784_v60, %v10784_v60 }
 0xd7c   : > { %v10792_v40 = vsub.f32 %v10769_v50, %v3443_v9  ;;  %v3453_v14 = vsel %vm403_vm0, %v3449_v55, 0.0 }
 0xd7e   : > { %v3451_v34 = vmul.f32 %v10792_v40, %v10792_v40 }
 0xd80   : > { %v3459_v23 = vsel %vm403_vm0, %v3451_v34, 0.0 }
 0xd92   : > { %v3434_v46 = vpop.xlane.xlu0 %3433 }
 0xd93   : > { %v3442_v56 = vmul.f32 0.03125, %v3434_v46 }
 0xd96   : > { %v3440_v53 = vpop.xlane.xlu0 %3439 }
 0xd97   : > { %v3444_v43 = vmul.f32 0.03125, %v3440_v53 }
 0xd99   : > { %v10803_v20 = vsub.f32 %v3426_v32, %v3444_v43 }
 0xd9b   : > { %v3452_v22 = vmul.f32 %v10803_v20, %v10803_v20 }
 0xd9d   : > { %v3462_v37 = vsel %vm403_vm0, %v3452_v22, 0.0 }
 0xdbf   : > { %v9074_v63 = vpop.f32.mrf.mxu1 }
 0xdc0   : > { %v4141_v8 = vadd.f32 %v9074_v63, %v7851_v44 }
 0xdc1   : > { %v4132_v0 = vpop.f32.mrf.mxu1 }
 0xdc2   : > { %v4133_v33 = vadd.f32 %v7851_v44, %v4132_v0  ;;  %v4149_v13 = vadd.f32 %v4141_v8, %v11809_v54 }
 0xdc3   : > { %v9075_v58 = vpop.f32.mrf.mxu1 }
 0xdc4   : > { %v4147_v61 = vadd.f32 %v4133_v33, %v365_v15  ;;  %v4144_v16 = vadd.f32 %v9075_v58, %v7851_v44  ;;  %v10794_v15 = vsub.f32 %v3424_v31, %v3442_v56  ;;  %v4159_v59 = vsel %vm403_vm0, %v4149_v13, 0.0 }
 0xdc5   : > { %v4135_v62 = vpop.f32.mrf.mxu1 }
 0xdc6   : > { %v4136_v51 = vadd.f32 %v7851_v44, %v4135_v62  ;;  %v4153_v41 = vsel %vm403_vm0, %v4147_v61, 0.0  ;;  %v4150_v24 = vadd.f32 %v4144_v16, %v11811_v6  ;;  %v3450_v25 = vmul.f32 %v10794_v15, %v10794_v15 }
 0xdc7   : > { %4154 = vadd.xlane.f32.xlu1 %v4153_v41 }
 0xdc8   : > { %v4148_v28 = vadd.f32 %v4136_v51, %v11810_v26  ;;  %v4162_v50 = vsel %vm403_vm0, %v4150_v24, 0.0  ;;  %v3456_v19 = vsel %vm403_vm0, %v3450_v25, 0.0 }
 0xdca   : > { %v4156_v29 = vsel %vm403_vm0, %v4148_v28, 0.0 }
 0xdcb   : > { %4160 = vadd.xlane.f32.xlu1 %v4159_v59  ;;  %4157 = vadd.xlane.f32.xlu0 %v4156_v29  ;;  %v7815_v59 = vld [vmem:[%s11791_s4 + $0xa] ss:$0 sm:$0xff] }
 0xdcf   : > { %3454 = vadd.xlane.f32.xlu1 %v3453_v14  ;;  %4163 = vadd.xlane.f32.xlu0 %v4162_v50 }
 0xdd3   : > { %3460 = vadd.xlane.f32.xlu1 %v3459_v23  ;;  %3457 = vadd.xlane.f32.xlu0 %v3456_v19 }
 0xdd7   : > { %3463 = vadd.xlane.f32.xlu0 %v3462_v37 }
 0xe50   : > { %v4155_v42 = vpop.xlane.xlu1 %4154 }
 0xe51   : > { %v4165_v27 = vmul.f32 0.03125, %v4155_v42 }
 0xe53   : > { %v10822_v45 = vsub.f32 %v4147_v61, %v4165_v27 }
 0xe54   : > { %v4161_v18 = vpop.xlane.xlu1 %4160  ;;  %v4158_v30 = vpop.xlane.xlu0 %4157 }
 0xe55   : > { %v4167_v47 = vmul.f32 0.03125, %v4161_v18  ;;  %v4166_v49 = vmul.f32 0.03125, %v4158_v30  ;;  %v4173_v3 = vmul.f32 %v10822_v45, %v10822_v45 }
 0xe57   : > { %v10826_v21 = vsub.f32 %v4149_v13, %v4167_v47  ;;  %v10828_v38 = vsub.f32 %v4148_v28, %v4166_v49  ;;  %v4177_v31 = vsel %vm403_vm0, %v4173_v3, 0.0  ;;  %v7814_v13 = vld [vmem:[%s11791_s4 + $0x9] ss:$0 sm:$0xff] }
 0xe58   : > { %4178 = vadd.xlane.f32.xlu1 %v4177_v31  ;;  %v3455_v57 = vpop.xlane.xlu1 %3454  ;;  %v4164_v39 = vpop.xlane.xlu0 %4163 }
 0xe59   : > { %v3465_v52 = vmul.f32 0.03125, %v3455_v57  ;;  %v4168_v32 = vmul.f32 0.03125, %v4164_v39  ;;  %v4175_v36 = vmul.f32 %v10826_v21, %v10826_v21  ;;  %v4174_v35 = vmul.f32 %v10828_v38, %v10828_v38 }
 0xe5b   : > { %v3469_v63 = vadd.f32 1e-05, %v3465_v52  ;;  %v10835_v44 = vsub.f32 %v4150_v24, %v4168_v32  ;;  %v4183_v4 = vsel %vm403_vm0, %v4175_v36, 0.0  ;;  %v4180_v46 = vsel %vm403_vm0, %v4174_v35, 0.0  ;;  %v7856_v52 = vld [vmem:[%s11791_s4 + $0x14] ss:$0 sm:$0xff] }
 0xe5c   : > { %4184 = vadd.xlane.f32.xlu1 %v4183_v4  ;;  %v3461_v0 = vpop.xlane.xlu1 %3460  ;;  %4181 = vadd.xlane.f32.xlu0 %v4180_v46  ;;  %v3458_v48 = vpop.xlane.xlu0 %3457  ;;  %v7857_v46 = vld [vmem:[%s11791_s4 + $0x15] ss:$0 sm:$0xff] }
 0xe5d   : > { %9525 = vrsqrt.f32 %v3469_v63  ;;  %v3467_v8 = vmul.f32 0.03125, %v3461_v0  ;;  %v3466_v33 = vmul.f32 0.03125, %v3458_v48  ;;  %v4176_v58 = vmul.f32 %v10835_v44, %v10835_v44 }
 0xe5f   : > { %v3471_v61 = vadd.f32 1e-05, %v3467_v8  ;;  %v3470_v9 = vadd.f32 1e-05, %v3466_v33  ;;  %v4186_v56 = vsel %vm403_vm0, %v4176_v58, 0.0 }
 0xe60   : > { %4187 = vadd.xlane.f32.xlu0 %v4186_v56  ;;  %v3464_v62 = vpop.xlane.xlu0 %3463 }
 0xe61   : > { %9527 = vrsqrt.f32 %v3471_v61  ;;  %v3468_v16 = vmul.f32 0.03125, %v3464_v62  ;;  %v7875_v62 = vld [vmem:[%s11791_s4 + $0x10] ss:$0 sm:$0xff] }
 0xe62   : > { %9529 = vrsqrt.f32 %v3470_v9 }
 0xe63   : > { %v3472_v51 = vadd.f32 1e-05, %v3468_v16 }
 0xe65   : > { %9531 = vrsqrt.f32 %v3472_v51 }
 0xe6a   : > { %v9526_v41 = vpop.eup %9525 }
 0xe6b   : > { %v3477_v54 = vmul.f32 %v9526_v41, %v10784_v60 }
 0xe6d   : > { %v3485_v43 = vmul.f32 %v7814_v13, %v3477_v54 }
 0xe6e   : > { %v9528_v53 = vpop.eup %9527 }
 0xe6f   : > { %v9530_v26 = vpop.eup %9529  ;;  %v3479_v28 = vmul.f32 %v9528_v53, %v10792_v40  ;;  %v3493_v14 = vadd.f32 %v7815_v59, %v3485_v43 }
 0xe70   : > { %v3478_v55 = vmul.f32 %v9530_v26, %v10794_v15  ;;  %v9341_v15 = vld [vmem:[%s11790_s3 + $0x28] sm:$0xff]  }
 0xe71   : > { %v3487_v60 = vmul.f32 %v7814_v13, %v3479_v28  ;;  %9076 = vmatprep.subr.bf16.mxu0 %v9341_v15 }
 0xe72   : > { %v9532_v29 = vpop.eup %9531  ;;  %v3486_v6 = vmul.f32 %v7814_v13, %v3478_v55  ;;  %9077 = vmatpush3.bf16.msra.mxu0 %v9341_v15 }
 0xe73   : > { %v3480_v24 = vmul.f32 %v9532_v29, %v10803_v20  ;;  %v3495_v23 = vadd.f32 %v7815_v59, %v3487_v60  ;;  %v9342_v20 = vld [vmem:[%s11790_s3 + $0x20] sm:$0xff]   ;;  %v7866_v29 = vld [vmem:[%s11791_s4 + $0xf] ss:$0 sm:$0xff] }
 0xe74   : > { %v3494_v50 = vadd.f32 %v7815_v59, %v3486_v6  ;;  %9078 = vmatprep.subr.bf16.mxu0 %v9342_v20 }
 0xe75   : > { %v3488_v34 = vmul.f32 %v7814_v13, %v3480_v24 }
 0xe76   : > { %v3497_v25 = vpack.c.bf16 %v3494_v50, %v3493_v14  ;;  %9079 = vmatpush3.bf16.msra.mxu0 %v9342_v20 }
 0xe77   : > { %v3496_v19 = vadd.f32 %v7815_v59, %v3488_v34  ;;  %9092 = vmatprep.subr.bf16.mxu0 %v9646_v5 }
 0xe78   : > { %9088 = vmatprep.mubr.msk.bf16.mxu1 %vm403_vm0, %v3497_v25 }
 0xe79   : > { %v3498_v40 = vpack.c.bf16 %v3496_v19, %v3495_v23 }
 0xe7b   : > { %9089 = vmatmul.mubr.msk.bf16.vlgmr.msra.gmra.mxu1 %vm403_vm0, %v3498_v40 }
 0xe7c   : > { %9100 = vmatprep.mubr.msk.bf16.mxu1 %vm9647_vm1, %v9646_v5 }
 0xee1   : > { %v4179_v22 = vpop.xlane.xlu1 %4178 }
 0xee2   : > { %v4189_v37 = vmul.f32 0.03125, %v4179_v22 }
 0xee4   : > { %v4193_v17 = vadd.f32 1e-05, %v4189_v37 }
 0xee5   : > { %v4185_v10 = vpop.xlane.xlu1 %4184  ;;  %v4182_v42 = vpop.xlane.xlu0 %4181 }
 0xee6   : > { %9533 = vrsqrt.f32 %v4193_v17  ;;  %v4191_v27 = vmul.f32 0.03125, %v4185_v10  ;;  %v4190_v18 = vmul.f32 0.03125, %v4182_v42 }
 0xee8   : > { %v4195_v30 = vadd.f32 1e-05, %v4191_v27  ;;  %v4194_v47 = vadd.f32 1e-05, %v4190_v18 }
 0xee9   : > { %v4188_v49 = vpop.xlane.xlu0 %4187 }
 0xeea   : > { %9535 = vrsqrt.f32 %v4195_v30  ;;  %v4192_v3 = vmul.f32 0.03125, %v4188_v49 }
 0xeeb   : > { %9537 = vrsqrt.f32 %v4194_v47 }
 0xeec   : > { %v4196_v31 = vadd.f32 1e-05, %v4192_v3 }
 0xeee   : > { %9539 = vrsqrt.f32 %v4196_v31 }
 0xef3   : > { %v9534_v57 = vpop.eup %9533 }
 0xef4   : > { %v4201_v39 = vmul.f32 %v9534_v57, %v10822_v45 }
 0xef6   : > { %v4209_v4 = vmul.f32 %v7856_v52, %v4201_v39 }
 0xef7   : > { %v9536_v32 = vpop.eup %9535 }
 0xef8   : > { %v9538_v36 = vpop.eup %9537  ;;  %v4203_v35 = vmul.f32 %v9536_v32, %v10826_v21  ;;  %v10873_v33 = vadd.f32 %v7857_v46, %v4209_v4 }
 0xef9   : > { %v4202_v63 = vmul.f32 %v9538_v36, %v10828_v38 }
 0xefa   : > { %v4211_v45 = vmul.f32 %v7856_v52, %v4203_v35 }
 0xefb   : > { %v9540_v0 = vpop.eup %9539  ;;  %v4210_v48 = vmul.f32 %v7856_v52, %v4202_v63 }
 0xefc   : > { %v4204_v8 = vmul.f32 %v9540_v0, %v10835_v44  ;;  %v10879_v9 = vadd.f32 %v7857_v46, %v4211_v45  ;;  %v7876_v45 = vld [vmem:[%s11791_s4 + $0x11] ss:$0 sm:$0xff] }
 0xefd   : > { %v10875_v58 = vadd.f32 %v7857_v46, %v4210_v48 }
 0xefe   : > { %v4212_v61 = vmul.f32 %v7856_v52, %v4204_v8 }
 0xeff   : > { %v4221_v21 = vpack.c.bf16 %v10875_v58, %v10873_v33 }
 0xf00   : > { %v10881_v38 = vadd.f32 %v7857_v46, %v4212_v61 }
 0xf01   : > { %9080 = vmatprep.mubr.msk.bf16.mxu0 %vm403_vm0, %v4221_v21 }
 0xf02   : > { %v4222_v56 = vpack.c.bf16 %v10881_v38, %v10879_v9 }
 0xf04   : > { %9081 = vmatmul.mubr.msk.bf16.vlgmr.msra.gmra.mxu0 %vm403_vm0, %v4222_v56 }
 0xf05   : > { %9094 = vmatprep.mubr.msk.bf16.mxu0 %vm9647_vm1, %v9646_v5 }
 0xf3b   : > { %v10889_v44 = vpop.f32.mrf.mxu1 }
 0xf3c   : > { %v4385_v43 = vadd.f32 %v10889_v44, %v7875_v62 }
 0xf3d   : > { %v10894_v16 = vpop.f32.mrf.mxu1 }
 0xf3e   : > { %v4383_v51 = vadd.f32 %v7875_v62, %v10894_v16  ;;  %v8415_v24 = vpack.c.bf16 %v4385_v43, %v4385_v43 }
 0xf3f   : > { %v10897_v41 = vpop.f32.mrf.mxu1 }
 0xf40   : > { %v8413_v54 = vpack.c.bf16 %v4383_v51, %v4383_v51  ;;  %v4386_v60 = vadd.f32 %v10897_v41, %v7875_v62  ;;  %v4527_v40 = vsel %vm403_vm0, %v8415_v24, 0 }
 0xf41   : > { %v10899_v13 = vpop.f32.mrf.mxu1 }
 0xf42   : > { %v4384_v53 = vadd.f32 %v7875_v62, %v10899_v13  ;;  %v4435_v26 = vsel %vm403_vm0, %v8413_v54, 0  ;;  %v8416_v23 = vpack.c.bf16 %v4386_v60, %v4386_v60 }
 0xf43   : > { %9093 = vmatpush3.bf16.xpose.msra.mxu0 %v4435_v26 }
 0xf44   : > { %v8414_v28 = vpack.c.bf16 %v4384_v53, %v4384_v53  ;;  %9104 = vmatprep.subr.bf16.mxu0 %v9646_v5  ;;  %v4573_v22 = vsel %vm403_vm0, %v8416_v23, 0 }
 0xf46   : > { %v4481_v55 = vsel %vm403_vm0, %v8414_v28, 0 }
 0xf47   : > { %9099 = vmatpush3.bf16.xpose.msra.mxu1 %v4481_v55 }
 0xf48   : > { %9110 = vmatprep.subr.bf16.mxu1 %v9646_v5 }
 0xfc4   : > { %v9082_v59 = vpop.f32.mrf.mxu0 }
 0xfc5   : > { %v4306_v15 = vadd.f32 %v9082_v59, %v7866_v29 }
 0xfc6   : > { %v4297_v6 = vpop.f32.mrf.mxu0 }
 0xfc7   : > { %v4298_v14 = vadd.f32 %v7866_v29, %v4297_v6  ;;  %v8411_v37 = vpack.c.bf16 %v4306_v15, %v4306_v15 }
 0xfc8   : > { %v9083_v50 = vpop.f32.mrf.mxu0 }
 0xfc9   : > { %v8409_v34 = vpack.c.bf16 %v4298_v14, %v4298_v14  ;;  %v4309_v17 = vadd.f32 %v9083_v50, %v7866_v29 }
 0xfca   : > { %v4300_v25 = vpop.f32.mrf.mxu0 }
 0xfcb   : > { %v4301_v19 = vadd.f32 %v7866_v29, %v4300_v25  ;;  %9095 = vmatmul.mubr.msk.bf16.vlgmr.msra.gmra.mxu0 %vm403_vm0, %v8409_v34  ;;  %v8412_v10 = vpack.c.bf16 %v4309_v17, %v4309_v17 }
 0xfcc   : > { %9105 = vmatpush3.bf16.xpose.msra.mxu0 %v4527_v40  ;;  %9106 = vmatprep.mubr.msk.bf16.mxu0 %vm9647_vm1, %v9646_v5 }
 0xfcd   : > { %v8410_v20 = vpack.c.bf16 %v4301_v19, %v4301_v19  ;;  %9116 = vmatprep.subr.bf16.mxu0 %v9646_v5 }
 0xfcf   : > { %9101 = vmatmul.mubr.msk.bf16.vlgmr.msra.gmra.mxu1 %vm403_vm0, %v8410_v20 }
 0xfd0   : > { %9111 = vmatpush3.bf16.xpose.msra.mxu1 %v4573_v22  ;;  %9112 = vmatprep.mubr.msk.bf16.mxu1 %vm9647_vm1, %v9646_v5 }
 0xfd1   : > { %9122 = vmatprep.subr.bf16.mxu1 %v9646_v5 }
 0xfd3   : > { %9107 = vmatmul.mubr.msk.bf16.vlgmr.msra.gmra.mxu0 %vm403_vm0, %v8411_v37 }
 0xfd4   : > { %9118 = vmatprep.mubr.msk.bf16.mxu0 %vm9647_vm1, %v9646_v5 }
 0xfd7   : > { %9113 = vmatmul.mubr.msk.bf16.vlgmr.msra.gmra.mxu1 %vm403_vm0, %v8412_v10 }
 0xfd8   : > { %9124 = vmatprep.mubr.msk.bf16.mxu1 %vm9647_vm1, %v9646_v5 }
0x108b   : > { %v4471_v42 = vpop.f32.mrf.mxu0 }
0x108c   : > { %v4615_v27 = vsel %vm715_vm2, %v4471_v42, -inf }
0x108d   : > { %4616 = vmax.xlane.f32.xlu1 %v4615_v27  ;;  %v9096_v18 = vpop.f32.mrf.mxu0 }
0x108f   : > { %v4474_v30 = vpop.f32.mrf.mxu0  ;;  %v4517_v47 = vpop.f32.mrf.mxu1 }
0x1090   : > { %v4618_v49 = vsel %vm715_vm2, %v4517_v47, -inf }
0x1091   : > { %4619 = vmax.xlane.f32.xlu0 %v4618_v49  ;;  %v9097_v3 = vpop.f32.mrf.mxu0  ;;  %v9102_v31 = vpop.f32.mrf.mxu1 }
0x1093   : > { %v4520_v57 = vpop.f32.mrf.mxu1  ;;  %v4563_v39 = vpop.f32.mrf.mxu0 }
0x1094   : > { %v4621_v52 = vsel %vm715_vm2, %v4563_v39, -inf }
0x1095   : > { %v9103_v32 = vpop.f32.mrf.mxu1  ;;  %4622 = vmax.xlane.f32.xlu1 %v4621_v52  ;;  %v9108_v36 = vpop.f32.mrf.mxu0 }
0x1097   : > { %v4566_v35 = vpop.f32.mrf.mxu0  ;;  %v4609_v63 = vpop.f32.mrf.mxu1 }
0x1098   : > { %v4624_v4 = vsel %vm715_vm2, %v4609_v63, -inf }
0x1099   : > { %4625 = vmax.xlane.f32.xlu0 %v4624_v4  ;;  %v9109_v46 = vpop.f32.mrf.mxu0  ;;  %v9114_v0 = vpop.f32.mrf.mxu1 }
0x109b   : > { %v4612_v48 = vpop.f32.mrf.mxu1 }
0x109d   : > { %v9115_v8 = vpop.f32.mrf.mxu1 }
0x10a6   : > { %4392 = vrot.lane.b32.xlu1 %v7876_v45, %s9645_s12  ;;  %v9343_v45 = vld [vmem:[%s11790_s3 + $0x38] sm:$0xff]   ;;  %s351_s12 = sand.u32 1, %s9635_s14  }
0x10a7   : > { %s7517_s20 = scalar_lea.sflag [#allocation3], %s351_s12 }
0x1116   : > { %v4617_v61 = vpop.xlane.xlu1 %4616 }
0x1117   : > { %v4627_v21 = vsub.f32 %v4471_v42, %v4617_v61  ;;  %v9344_v61 = vld [vmem:[%s11790_s3 + $0x30] sm:$0xff]  }
0x1119   : > { %v4631_v56 = vmul.f32 1.442695, %v4627_v21 }
0x111a   : > { %v4620_v62 = vpop.xlane.xlu0 %4619 }
0x111b   : > { %9541 = vpow2.f32 %v4631_v56  ;;  %v4628_v51 = vsub.f32 %v4517_v47, %v4620_v62 }
0x111d   : > { %v4633_v54 = vmul.f32 1.442695, %v4628_v51 }
0x111e   : > { %v4623_v53 = vpop.xlane.xlu1 %4622 }
0x111f   : > { %9543 = vpow2.f32 %v4633_v54  ;;  %v4629_v26 = vsub.f32 %v4563_v39, %v4623_v53 }
0x1121   : > { %v4635_v28 = vmul.f32 1.442695, %v4629_v26 }
0x1122   : > { %v4626_v55 = vpop.xlane.xlu0 %4625  ;;  %v4393_v43 = vpop.permute.xlu1 %4392 }
0x1123   : > { %9545 = vpow2.f32 %v4635_v28  ;;  %v4630_v59 = vsub.f32 %v4609_v63, %v4626_v55  ;;  %v4395_v29 = vadd.f32 %v4393_v43, %v10894_v16  ;;  %v4397_v60 = vadd.f32 %v10889_v44, %v4393_v43 }
0x1124   : > { %v4398_v25 = vadd.f32 %v10897_v41, %v4393_v43  ;;  %v4396_v41 = vadd.f32 %v4393_v43, %v10899_v13 }
0x1125   : > { %v4637_v6 = vmul.f32 1.442695, %v4630_v59  ;;  %v8417_v24 = vpack.c.bf16 %v4395_v29, %v4395_v29  ;;  %v8419_v34 = vpack.c.bf16 %v4397_v60, %v4397_v60 }
0x1126   : > { %v8420_v16 = vpack.c.bf16 %v4398_v25, %v4398_v25  ;;  %v8418_v22 = vpack.c.bf16 %v4396_v41, %v4396_v41 }
0x1127   : > { %9547 = vpow2.f32 %v4637_v6  ;;  %4664 = vrot.lane.b32.xlu1 %v8417_v24, %s11807_s25 }
0x1128   : > { %v9542_v14 = vpop.eup %9541 }
0x1129   : > { %v4639_v50 = vsel %vm715_vm2, %v9542_v14, 0.0 }
0x112a   : > { %4640 = vadd.xlane.f32.xlu0 %v4639_v50 }
0x112b   : > { %4762 = vrot.lane.b32.xlu1 %v8419_v34, %s11807_s25 }
0x112c   : > { %v9544_v23 = vpop.eup %9543 }
0x112d   : > { %v4642_v19 = vsel %vm715_vm2, %v9544_v23, 0.0 }
0x112e   : > { %4643 = vadd.xlane.f32.xlu0 %v4642_v19 }
0x112f   : > { %4811 = vrot.lane.b32.xlu1 %v8420_v16, %s11807_s25 }
0x1130   : > { %v9546_v44 = vpop.eup %9545 }
0x1131   : > { %v4645_v40 = vsel %vm715_vm2, %v9546_v44, 0.0 }
0x1132   : > { %4646 = vadd.xlane.f32.xlu0 %v4645_v40 }
0x1134   : > { %v9548_v15 = vpop.eup %9547 }
0x1135   : > { %v4648_v20 = vsel %vm715_vm2, %v9548_v15, 0.0 }
0x1136   : > { %4649 = vadd.xlane.f32.xlu0 %v4648_v20 }
0x114c   : > { %4713 = vrot.lane.b32.xlu0 %v8418_v22, %s11807_s25  ;;  %s7593_s25 = sshll.u32 %s351_s12, 2 }
0x114d   : > { %s353_s27 = scalar_lea.vmem [#allocation2], %s7593_s25  ;;  %s9651_s25 = smov [#allocation2]  }
0x114e   : > { %s7530_s28 = sshll.u32 %s353_s27, 4  ;;  %s9587_s26 = sshll.u32 %s9651_s25, 4  ;;  %s11748_s28 = int_to_ptr.vmem [resolvable:$true] %s7530_s28  ;;  %s9588_s26 = int_to_ptr.vmem [resolvable:$false] %s9587_s26 }
0x114f   : > { %s9583_s17 = scalar_lea.vmem %s11748_s28, 64  ;;  %s9589_s11 = scalar_lea.vmem %s9588_s26, 128 }
0x1150   : > { %p9584_p11 = scmp.ne.s32.totalorder %s11748_s28, %s9583_s17  ;;  %p9590_p0 = scmp.lt.s32.totalorder %s11748_s28, %s9588_s26 }
0x1151   : > { %p9591_p1 = scmp.lt.s32.totalorder %s9589_s11, %s9583_s17 }
0x1152   : > { %p9585_p12 = pnand %p9584_p11, %p9745_p5 }
0x1153   : > { %p9592_p2 = por %p9591_p1, %p9590_p0 }
0x1154   : > { %p9586_p13 = pneg %p9585_p12 }
0x1156   : > { %p9593_p3 = pnand %p9592_p2, %p9586_p13 }
0x1199   : > { %v4665_v37 = vpop.permute.xlu1 %4664 }
0x119a   : > { %v4670_v17 = vsel %vm770_vm3, %v4665_v37, 0 }
0x119b   : > { %9117 = vmatpush3.bf16.msra.mxu0 %v4670_v17 }
0x119c   : > { %9128 = vmatprep.subr.bf16.mxu0 %v9646_v5 }
0x119d   : > { %v4763_v47 = vpop.permute.xlu1 %4762 }
0x119e   : > { %v4768_v39 = vsel %vm770_vm3, %v4763_v47, 0 }
0x11a1   : > { %v4812_v32 = vpop.permute.xlu1 %4811 }
0x11a2   : > { %v4817_v63 = vsel %vm770_vm3, %v4812_v32, 0 }
0x11b3   : > { %v4641_v10 = vpop.xlane.xlu0 %4640 }
0x11b4   : > { %9549 = vrcp.f32 %v4641_v10 }
0x11b7   : > { %v4644_v42 = vpop.xlane.xlu0 %4643 }
0x11b8   : > { %9551 = vrcp.f32 %v4644_v42 }
0x11bb   : > { %v4647_v27 = vpop.xlane.xlu0 %4646 }
0x11bc   : > { %9553 = vrcp.f32 %v4647_v27 }
0x11bf   : > { %v4650_v18 = vpop.xlane.xlu0 %4649 }
0x11c0   : > { %9555 = vrcp.f32 %v4650_v18 }
0x11c1   : > { %v9550_v30 = vpop.eup %9549 }
0x11c2   : > { %v4655_v13 = vmul.f32 %v9550_v30, %v9542_v14 }
0x11c3   : > { %v4714_v49 = vpop.permute.xlu0 %4713 }
0x11c4   : > { %v4659_v3 = vpack.c.bf16 %v4655_v13, %v4655_v13  ;;  %v4719_v31 = vsel %vm770_vm3, %v4714_v49, 0 }
0x11c5   : > { %v9552_v57 = vpop.eup %9551  ;;  %9123 = vmatpush3.bf16.msra.mxu1 %v4719_v31 }
0x11c6   : > { %v4656_v52 = vmul.f32 %v9552_v57, %v9544_v23  ;;  %9119 = vmatmul.mubr.msk.bf16.vlgmr.msra.gmra.mxu0 %vm715_vm2, %v4659_v3  ;;  %9134 = vmatprep.subr.bf16.mxu1 %v9646_v5  ;;  %v7897_v23 = vld [vmem:[%s11791_s4 + $0x12] ss:$0 sm:$0xff] }
0x11c7   : > { %9129 = vmatpush3.bf16.msra.mxu0 %v4768_v39  ;;  %9130 = vmatprep.mubr.msk.bf16.mxu0 %vm9647_vm1, %v9646_v5 }
0x11c8   : > { %v4660_v36 = vpack.c.bf16 %v4656_v52, %v4656_v52  ;;  %9140 = vmatprep.subr.bf16.mxu0 %v9343_v45 }
0x11c9   : > { %v9554_v35 = vpop.eup %9553 }
0x11ca   : > { %v4657_v4 = vmul.f32 %v9554_v35, %v9546_v44  ;;  %9125 = vmatmul.mubr.msk.bf16.vlgmr.msra.gmra.mxu1 %vm715_vm2, %v4660_v36 }
0x11cb   : > { %9135 = vmatpush3.bf16.msra.mxu1 %v4817_v63  ;;  %9136 = vmatprep.mubr.msk.bf16.mxu1 %vm9647_vm1, %v9646_v5 }
0x11cc   : > { %v4661_v46 = vpack.c.bf16 %v4657_v4, %v4657_v4 }
0x11cd   : > { %v9556_v0 = vpop.eup %9555 }
0x11ce   : > { %v4658_v48 = vmul.f32 %v9556_v0, %v9548_v15  ;;  %9131 = vmatmul.mubr.msk.bf16.vlgmr.msra.gmra.mxu0 %vm715_vm2, %v4661_v46 }
0x11cf   : > { %9141 = vmatpush3.bf16.msra.mxu0 %v9343_v45  ;;  %v7910_v45 = vld [vmem:[%s11792_s5 + $0x1c0] sm:$0xff] }
0x11d0   : > { %v4662_v8 = vpack.c.bf16 %v4658_v48, %v4658_v48  ;;  %9142 = vmatprep.subr.bf16.mxu0 %v9344_v61 }
0x11d2   : > { %9137 = vmatmul.mubr.msk.bf16.vlgmr.msra.gmra.mxu1 %vm715_vm2, %v4662_v8  ;;  %v7908_v8 = vld [vmem:[%s11792_s5 + $0x180] sm:$0xff] }
0x11d3   : > { %5118 = vmatprep.mubr.bf16.mxu1 %v9650_v7  ;;  %9143 = vmatpush3.bf16.msra.mxu0 %v9344_v61  ;;  %v7909_v61 = vld [vmem:[%s11792_s5 + $0x188] sm:$0xff] }
0x1286   : > { %v4706_v21 = vpop.f32.mrf.mxu0 }
0x1288   : > { %v9120_v56 = vpop.f32.mrf.mxu0 }
0x1289   : > { %v7911_v56 = vld [vmem:[%s11792_s5 + $0x1c8] sm:$0xff] }
0x128a   : > { %v4709_v62 = vpop.f32.mrf.mxu0  ;;  %v4755_v51 = vpop.f32.mrf.mxu1 }
0x128b   : > { %v4859_v54 = vpack.c.bf16 %v4755_v51, %v4706_v21  ;;  %v7918_v21 = vcombine.high %v7908_v8, %v7910_v45  ;;  %v7917_v62 = vcombine.low %v7908_v8, %v7910_v45  ;;  %v7919_v51 = vcombine.low %v7909_v61, %v7911_v56 }
0x128c   : > { %v9121_v53 = vpop.f32.mrf.mxu0  ;;  %v9126_v26 = vpop.f32.mrf.mxu1 }
0x128d   : > { %9144 = vmatprep.mubr.msk.bf16.mxu0 %vm403_vm0, %v4859_v54  ;;  %v7920_v54 = vcombine.high %v7909_v61, %v7911_v56  ;;  %5098 = vmatprep.subr.bf16.mxu1 %v7918_v21  ;;  %v7904_v53 = vld [vmem:[%s11792_s5 + $0x100] sm:$0xff]  ;;  %v9345_v56 = vld [vmem:[%s11794_s7 + $0x578] sm:$0xff]  }
0x128e   : > { %v4758_v28 = vpop.f32.mrf.mxu1  ;;  %v4804_v55 = vpop.f32.mrf.mxu0  ;;  %5099 = vmatpush1.bf16.msra.mxu1 %v7917_v62  ;;  %v7906_v26 = vld [vmem:[%s11792_s5 + $0x140] sm:$0xff]  ;;  %v9346_v62 = vld [vmem:[%s11794_s7 + $0x5f8] sm:$0xff]  }
0x128f   : > { %5151 = vmatprep.subr.bf16.mxu0 %v7920_v54  ;;  %v7905_v28 = vld [vmem:[%s11792_s5 + $0x108] sm:$0xff] }
0x1290   : > { %v9127_v43 = vpop.f32.mrf.mxu1  ;;  %v9132_v59 = vpop.f32.mrf.mxu0 }
0x1291   : > { %v7907_v43 = vld [vmem:[%s11792_s5 + $0x148] sm:$0xff]  ;;  %v7913_v59 = vcombine.low %v7904_v53, %v7906_v26 }
0x1292   : > { %v4807_v29 = vpop.f32.mrf.mxu0  ;;  %v4853_v6 = vpop.f32.mrf.mxu1 }
0x1293   : > { %v4860_v24 = vpack.c.bf16 %v4853_v6, %v4804_v55  ;;  %v7914_v55 = vcombine.high %v7904_v53, %v7906_v26  ;;  %v7915_v29 = vcombine.low %v7905_v28, %v7907_v43  ;;  %v7916_v6 = vcombine.high %v7905_v28, %v7907_v43  ;;  %v9347_v53 = vld [vmem:[%s11794_s7 + $0x538] sm:$0xff]   ;;  %v9349_v28 = vld [vmem:[%s11794_s7 + $0x570] sm:$0xff]  }
0x1294   : > { %v9133_v60 = vpop.f32.mrf.mxu0  ;;  %v9138_v14 = vpop.f32.mrf.mxu1  ;;  %v9348_v26 = vld [vmem:[%s11794_s7 + $0x5b8] sm:$0xff]   ;;  %v9351_v43 = vld [vmem:[%s11794_s7 + $0x530] sm:$0xff]  }
0x1295   : > { %9145 = vmatmul.mubr.msk.bf16.vlgmr.msra.gmra.mxu0 %vm403_vm0, %v4860_v24  ;;  %5100 = vmatprep.subr.bf16.mxu1 %v7914_v55  ;;  %v7993_v24 = vld [vmem:[%s11792_s5 + $0x190] sm:$0xff]  ;;  %v7994_v14 = vld [vmem:[%s11792_s5 + $0x198] sm:$0xff] }
0x1296   : > { %v4856_v50 = vpop.f32.mrf.mxu1  ;;  %5171 = vmatprep.mubr.bf16.mxu0 %v9650_v7  ;;  %5152 = vmatpush1.bf16.msra.mxu0 %v7919_v51  ;;  %v7995_v60 = vld [vmem:[%s11792_s5 + $0x1d0] sm:$0xff] }
0x1297   : > { %5153 = vmatprep.subr.bf16.mxu0 %v7916_v6  ;;  %5101 = vmatpush1.bf16.msra.mxu1 %v7913_v59  ;;  %v8003_v50 = vcombine.high %v7993_v24, %v7995_v60  ;;  %v9350_v55 = vld [vmem:[%s11794_s7 + $0x5f0] sm:$0xff]   ;;  %v9354_v6 = vld [vmem:[%s11794_s7 + $0x5e8] sm:$0xff]  }
0x1298   : > { %v9139_v34 = vpop.f32.mrf.mxu1  ;;  %v9352_v59 = vld [vmem:[%s11794_s7 + $0x5b0] sm:$0xff]  }
0x1299   : > { %v7996_v34 = vld [vmem:[%s11792_s5 + $0x1d8] sm:$0xff]  ;;  %5364 = vmatprep.subr.bf16.mxu1 %v8003_v50  ;;  %v9358_v50 = vld [vmem:[%s11794_s7 + $0x5e0] sm:$0xff]  }
0x129a   : > { %5154 = vmatpush1.bf16.msra.mxu0 %v7915_v29  ;;  %v9353_v29 = vld [vmem:[%s11794_s7 + $0x568] sm:$0xff]  }
0x1355   : > { %v9146_v25 = vpop.f32.mrf.mxu0 }
0x1356   : > { %v4926_v16 = vadd.f32 %v9146_v25, %v7897_v23  ;;  %v8002_v25 = vcombine.low %v7993_v24, %v7995_v60  ;;  %v9355_v24 = vld [vmem:[%s11794_s7 + $0x528] sm:$0xff]  }
0x1357   : > { %v4917_v19 = vpop.f32.mrf.mxu0  ;;  %v9356_v60 = vld [vmem:[%s11794_s7 + $0x5a8] sm:$0xff]  }
0x1358   : > { %v4918_v44 = vadd.f32 %v7897_v23, %v4917_v19  ;;  %v4934_v17 = vadd.f32 %v4926_v16, %v10879_v9  ;;  %v8005_v19 = vcombine.high %v7994_v14, %v7996_v34 }
0x1359   : > { %v9147_v40 = vpop.f32.mrf.mxu0 }
0x135a   : > { %v4932_v15 = vadd.f32 %v4918_v44, %v10873_v33  ;;  %v4929_v41 = vadd.f32 %v9147_v40, %v7897_v23  ;;  %v4944_v27 = vsel %vm403_vm0, %v4934_v17, 0.0  ;;  %5417 = vmatprep.subr.bf16.mxu0 %v8005_v19  ;;  %v9362_v19 = vld [vmem:[%s11794_s7 + $0x5d8] sm:$0xff]  }
0x135b   : > { %v4920_v20 = vpop.f32.mrf.mxu0 }
0x135c   : > { %v4921_v22 = vadd.f32 %v7897_v23, %v4920_v20  ;;  %v4938_v37 = vsel %vm403_vm0, %v4932_v15, 0.0  ;;  %v4935_v18 = vadd.f32 %v4929_v41, %v10881_v38  ;;  %v8004_v23 = vcombine.low %v7994_v14, %v7996_v34  ;;  %v9357_v14 = vld [vmem:[%s11794_s7 + $0x560] sm:$0xff]  }
0x135d   : > { %4939 = vadd.xlane.f32.xlu1 %v4938_v37  ;;  %v9359_v34 = vld [vmem:[%s11794_s7 + $0x520] sm:$0xff]  }
0x135e   : > { %v4933_v10 = vadd.f32 %v4921_v22, %v10875_v58  ;;  %v4947_v33 = vsel %vm403_vm0, %v4935_v18, 0.0 }
0x1360   : > { %v4941_v42 = vsel %vm403_vm0, %v4933_v10, 0.0 }
0x1361   : > { %4942 = vadd.xlane.f32.xlu0 %v4941_v42  ;;  %4945 = vadd.xlane.f32.xlu1 %v4944_v27 }
0x1365   : > { %4948 = vadd.xlane.f32.xlu1 %v4947_v33 }
0x13e6   : > { %v4940_v30 = vpop.xlane.xlu1 %4939 }
0x13e7   : > { %v4950_v47 = vmul.f32 0.03125, %v4940_v30  ;;  %v7902_v30 = vld [vmem:[%s11791_s4 + $0x16] ss:$0 sm:$0xff] }
0x13e9   : > { %v10982_v13 = vsub.f32 %v4932_v15, %v4950_v47 }
0x13ea   : > { %v4943_v49 = vpop.xlane.xlu0 %4942  ;;  %v4946_v9 = vpop.xlane.xlu1 %4945 }
0x13eb   : > { %v4951_v3 = vmul.f32 0.03125, %v4943_v49  ;;  %v4952_v31 = vmul.f32 0.03125, %v4946_v9  ;;  %v4958_v58 = vmul.f32 %v10982_v13, %v10982_v13 }
0x13ed   : > { %v10986_v57 = vsub.f32 %v4933_v10, %v4951_v3  ;;  %v10988_v39 = vsub.f32 %v4934_v17, %v4952_v31  ;;  %v4962_v38 = vsel %vm403_vm0, %v4958_v58, 0.0  ;;  %v7903_v31 = vld [vmem:[%s11791_s4 + $0x17] ss:$0 sm:$0xff] }
0x13ee   : > { %4963 = vadd.xlane.f32.xlu0 %v4962_v38  ;;  %v4949_v52 = vpop.xlane.xlu1 %4948 }
0x13ef   : > { %v4953_v32 = vmul.f32 0.03125, %v4949_v52  ;;  %v4959_v36 = vmul.f32 %v10986_v57, %v10986_v57  ;;  %v4960_v35 = vmul.f32 %v10988_v39, %v10988_v39 }
0x13f1   : > { %v10995_v63 = vsub.f32 %v4935_v18, %v4953_v32  ;;  %v4965_v4 = vsel %vm403_vm0, %v4959_v36, 0.0  ;;  %v4968_v46 = vsel %vm403_vm0, %v4960_v35, 0.0 }
0x13f2   : > { %4966 = vadd.xlane.f32.xlu1 %v4965_v4  ;;  %4969 = vadd.xlane.f32.xlu0 %v4968_v46  ;;  %v7990_v4 = vld [vmem:[%s11792_s5 + $0x118] sm:$0xff] }
0x13f3   : > { %v4961_v0 = vmul.f32 %v10995_v63, %v10995_v63 }
0x13f5   : > { %v4971_v48 = vsel %vm403_vm0, %v4961_v0, 0.0 }
0x13f6   : > { %4972 = vadd.xlane.f32.xlu1 %v4971_v48 }
0x1477   : > { %v4964_v16 = vpop.xlane.xlu0 %4963 }
0x1478   : > { %v4974_v44 = vmul.f32 0.03125, %v4964_v16  ;;  %v9363_v16 = vld [vmem:[%s11794_s7 + $0x518] sm:$0xff]  }
0x147a   : > { %v4978_v40 = vadd.f32 1e-05, %v4974_v44  ;;  %v9364_v44 = vld [vmem:[%s11794_s7 + $0x598] sm:$0xff]  }
0x147b   : > { %v4970_v15 = vpop.xlane.xlu0 %4969  ;;  %v4967_v20 = vpop.xlane.xlu1 %4966 }
0x147c   : > { %9557 = vrsqrt.f32 %v4978_v40  ;;  %v4976_v41 = vmul.f32 0.03125, %v4970_v15  ;;  %v4975_v22 = vmul.f32 0.03125, %v4967_v20  ;;  %v9365_v40 = vld [vmem:[%s11794_s7 + $0x550] sm:$0xff]  }
0x147d   : > { %v9366_v15 = vld [vmem:[%s11794_s7 + $0x5d0] sm:$0xff]  }
0x147e   : > { %v4979_v37 = vadd.f32 1e-05, %v4975_v22  ;;  %v4980_v17 = vadd.f32 1e-05, %v4976_v41  ;;  %v9367_v20 = vld [vmem:[%s11794_s7 + $0x510] sm:$0xff]   ;;  %v9369_v22 = vld [vmem:[%s11794_s7 + $0x548] sm:$0xff]  }
0x147f   : > { %v4973_v10 = vpop.xlane.xlu1 %4972  ;;  %v9368_v41 = vld [vmem:[%s11794_s7 + $0x590] sm:$0xff]  }
0x1480   : > { %v4977_v42 = vmul.f32 0.03125, %v4973_v10  ;;  %9559 = vrsqrt.f32 %v4979_v37  ;;  %v9370_v37 = vld [vmem:[%s11794_s7 + $0x5c8] sm:$0xff]  }
0x1481   : > { %9561 = vrsqrt.f32 %v4980_v17  ;;  %v9371_v17 = vld [vmem:[%s11794_s7 + $0x508] sm:$0xff]  }
0x1482   : > { %v4981_v27 = vadd.f32 1e-05, %v4977_v42  ;;  %v9372_v10 = vld [vmem:[%s11794_s7 + $0x588] sm:$0xff]   ;;  %v9373_v42 = vld [vmem:[%s11794_s7 + $0x540] sm:$0xff]  }
0x1484   : > { %9563 = vrsqrt.f32 %v4981_v27  ;;  %v9374_v27 = vld [vmem:[%s11794_s7 + $0x5c0] sm:$0xff]  }
0x1489   : > { %v9558_v18 = vpop.eup %9557 }
0x148a   : > { %v4986_v33 = vmul.f32 %v9558_v18, %v10982_v13  ;;  %v7989_v13 = vld [vmem:[%s11792_s5 + $0x110] sm:$0xff]  ;;  %v9375_v18 = vld [vmem:[%s11794_s7 + $0x500] sm:$0xff]  }
0x148c   : > { %v4994_v49 = vmul.f32 %v7902_v30, %v4986_v33  ;;  %v9376_v33 = vld [vmem:[%s11794_s7 + $0x580] sm:$0xff]  }
0x148d   : > { %v9560_v47 = vpop.eup %9559 }
0x148e   : > { %v4987_v9 = vmul.f32 %v9560_v47, %v10986_v57  ;;  %v9562_v3 = vpop.eup %9561  ;;  %v11050_v32 = vadd.f32 %v7903_v31, %v4994_v49  ;;  %v7991_v57 = vld [vmem:[%s11792_s5 + $0x150] sm:$0xff]  ;;  %v9378_v47 = vld [vmem:[%s11794_s7 + $0x4f8] sm:$0xff]  }
0x148f   : > { %v4988_v36 = vmul.f32 %v9562_v3, %v10988_v39  ;;  %v7999_v39 = vcombine.high %v7989_v13, %v7991_v57  ;;  %v7998_v61 = vcombine.low %v7989_v13, %v7991_v57 }
0x1490   : > { %v4995_v38 = vmul.f32 %v7902_v30, %v4987_v9 }
0x1491   : > { %v9564_v58 = vpop.eup %9563  ;;  %v4996_v8 = vmul.f32 %v7902_v30, %v4988_v36 }
0x1492   : > { %v4989_v52 = vmul.f32 %v9564_v58, %v10995_v63  ;;  %v11053_v35 = vadd.f32 %v7903_v31, %v4995_v38  ;;  %v7992_v63 = vld [vmem:[%s11792_s5 + $0x158] sm:$0xff] }
0x1493   : > { %v8001_v48 = vcombine.high %v7990_v4, %v7992_v63  ;;  %v8000_v21 = vcombine.low %v7990_v4, %v7992_v63  ;;  %v11082_v51 = vadd.f32 %v7903_v31, %v4996_v8 }
0x1494   : > { %v11066_v46 = vpack.c.bf16 %v11053_v35, %v11050_v32  ;;  %v4997_v0 = vmul.f32 %v7902_v30, %v4989_v52  ;;  %v9377_v30 = vld [vmem:[%s11794_s7 + $0x478] sm:$0xff]  }
0x1496   : > { %7921 = vmatmul.mubr.msk.bf16.vlgmr.msra.gmra.mxu1 %vm403_vm0, %v11066_v46  ;;  %7923 = vmatmul.mubr.msk.bf16.vlgmr.msra.gmra.mxu0 %vm403_vm0, %v11066_v46  ;;  %v11074_v45 = vadd.f32 %v7903_v31, %v4997_v0 }
0x1497   : > { %5128 = vmatprep.mubr.bf16.mxu1 %v9650_v7  ;;  %5181 = vmatprep.mubr.bf16.mxu0 %v9650_v7 }
0x1498   : > { %5365 = vmatpush1.bf16.msra.mxu1 %v8002_v25  ;;  %5418 = vmatpush1.bf16.msra.mxu0 %v8004_v23  ;;  %v11086_v54 = vpack.c.bf16 %v11074_v45, %v11082_v51  ;;  %v9360_v25 = vld [vmem:[%s11794_s7 + $0x5a0] sm:$0xff]   ;;  %v9361_v23 = vld [vmem:[%s11794_s7 + $0x558] sm:$0xff]  }
0x1499   : > { %5366 = vmatprep.subr.bf16.mxu1 %v7999_v39  ;;  %5419 = vmatprep.subr.bf16.mxu0 %v8001_v48 }
0x149c   : > { %5367 = vmatpush1.bf16.msra.mxu1 %v7998_v61  ;;  %5420 = vmatpush1.bf16.msra.mxu0 %v8000_v21  ;;  %v7997_v61 = vld [vmem:[%s11793_s6 + $0x9] ss:$2 sm:$0xf] }
0x149d   : > { %8721 = vmatprep.subr.bf16.mxu1 %v9345_v56  ;;  %8749 = vmatprep.subr.bf16.mxu0 %v9346_v62  ;;  %v5299_v62 = vrot.slane %v7997_v61, %v10147_v1 }
0x149e   : > { %7922 = vmatmul.mubr.msk.bf16.gmra.mxu1 %vm403_vm0, %v11086_v54  ;;  %7924 = vmatmul.mubr.msk.bf16.gmra.mxu0 %vm403_vm0, %v11086_v54 }
0x149f   : > { %5384 = vmatprep.mubr.bf16.mxu1 %v9650_v7  ;;  %5437 = vmatprep.mubr.bf16.mxu0 %v9650_v7 }
0x14a6   : > { %8006 = vmatmul.mubr.msk.bf16.vlgmr.msra.gmra.mxu1 %vm403_vm0, %v11066_v46  ;;  %8008 = vmatmul.mubr.msk.bf16.vlgmr.msra.gmra.mxu0 %vm403_vm0, %v11066_v46 }
0x14a7   : > { %5394 = vmatprep.mubr.bf16.mxu1 %v9650_v7  ;;  %5447 = vmatprep.mubr.bf16.mxu0 %v9650_v7 }
0x14a8   : > { %8722 = vmatpush3.bf16.msra.mxu1 %v9347_v53  ;;  %8750 = vmatpush3.bf16.msra.mxu0 %v9348_v26  ;;  %v5307_v53 = vrot.slane %v7997_v61, %v10149_v2  ;;  %v5295_v26 = vrot.slane %v7997_v61, %v10154_v11 }
0x14a9   : > { %8723 = vmatprep.subr.bf16.mxu1 %v9349_v28  ;;  %8751 = vmatprep.subr.bf16.mxu0 %v9350_v55  ;;  %v5303_v28 = vrot.slane %v7997_v61, %v10156_v12 }
0x14ac   : > { %8724 = vmatpush3.bf16.msra.mxu1 %v9351_v43  ;;  %8752 = vmatpush3.bf16.msra.mxu0 %v9352_v59 }
0x14ad   : > { %8725 = vmatprep.subr.bf16.mxu1 %v9353_v29  ;;  %8753 = vmatprep.subr.bf16.mxu0 %v9354_v6 }
0x14ae   : > { %8007 = vmatmul.mubr.msk.bf16.gmra.mxu1 %vm403_vm0, %v11086_v54  ;;  %8009 = vmatmul.mubr.msk.bf16.gmra.mxu0 %vm403_vm0, %v11086_v54 }
0x14b0   : > { %8726 = vmatpush3.bf16.msra.mxu1 %v9355_v24  ;;  %8754 = vmatpush3.bf16.msra.mxu0 %v9356_v60 }
0x14b1   : > { %8727 = vmatprep.subr.bf16.mxu1 %v9357_v14  ;;  %8755 = vmatprep.subr.bf16.mxu0 %v9358_v50 }
0x14b4   : > { %8728 = vmatpush3.bf16.msra.mxu1 %v9359_v34  ;;  %8756 = vmatpush3.bf16.msra.mxu0 %v9360_v25 }
0x14b5   : > { %8729 = vmatprep.subr.bf16.mxu1 %v9361_v23  ;;  %8757 = vmatprep.subr.bf16.mxu0 %v9362_v19 }
0x14b8   : > { %8730 = vmatpush3.bf16.msra.mxu1 %v9363_v16  ;;  %8758 = vmatpush3.bf16.msra.mxu0 %v9364_v44  ;;  %v11238_v44 = vld [vmem:[%s11793_s6 + $0x1] ss:$2 sm:$0xf] }
0x14b9   : > { %8731 = vmatprep.subr.bf16.mxu1 %v9365_v40  ;;  %8759 = vmatprep.subr.bf16.mxu0 %v9366_v15 }
0x14bc   : > { %8732 = vmatpush3.bf16.msra.mxu1 %v9367_v20  ;;  %8760 = vmatpush3.bf16.msra.mxu0 %v9368_v41 }
0x14bd   : > { %8733 = vmatprep.subr.bf16.mxu1 %v9369_v22  ;;  %8761 = vmatprep.subr.bf16.mxu0 %v9370_v37 }
0x14c0   : > { %8734 = vmatpush3.bf16.msra.mxu1 %v9371_v17  ;;  %8762 = vmatpush3.bf16.msra.mxu0 %v9372_v10 }
0x14c1   : > { %8735 = vmatprep.subr.bf16.mxu1 %v9373_v42  ;;  %8763 = vmatprep.subr.bf16.mxu0 %v9374_v27  ;;  %v11242_v42 = vrot.slane %v11238_v44, %v10147_v1 }
0x14c4   : > { %8736 = vmatpush3.bf16.msra.mxu1 %v9375_v18  ;;  %8764 = vmatpush3.bf16.msra.mxu0 %v9376_v33 }
0x14c5   : > { %8777 = vmatprep.subr.bf16.mxu1 %v9377_v30  ;;  %8805 = vmatprep.subr.bf16.mxu0 %v9378_v47  ;;  %v11246_v47 = vrot.slane %v11238_v44, %v10149_v2 }
0x1556   : > { %v11200_v49 = vpop.f32.mrf.mxu1  ;;  %v11202_v9 = vpop.f32.mrf.mxu0 }
0x1558   : > { %v11204_v3 = vpop.f32.mrf.mxu1  ;;  %v11206_v31 = vpop.f32.mrf.mxu0 }
0x155a   : > { %v11208_v58 = vpop.f32.mrf.mxu1  ;;  %v11210_v38 = vpop.f32.mrf.mxu0 }
0x155c   : > { %v5126_v52 = vpop.f32.mrf.mxu1  ;;  %v5179_v13 = vpop.f32.mrf.mxu0 }
0x155e   : > { %v11212_v36 = vpop.f32.mrf.mxu1  ;;  %v11214_v57 = vpop.f32.mrf.mxu0 }
0x1560   : > { %v11216_v4 = vpop.f32.mrf.mxu1  ;;  %v11218_v63 = vpop.f32.mrf.mxu0 }
0x1562   : > { %v11220_v0 = vpop.f32.mrf.mxu1  ;;  %v11222_v39 = vpop.f32.mrf.mxu0 }
0x1564   : > { %v11224_v48 = vpop.f32.mrf.mxu1  ;;  %v11226_v8 = vpop.f32.mrf.mxu0 }
0x1566   : > { %v5386_v21 = vpop.f32.mrf.mxu1  ;;  %v5439_v56 = vpop.f32.mrf.mxu0 }
0x1567   : > { %v5387_v50 = vadd.f32 %v5386_v21, %v5295_v26  ;;  %v5440_v34 = vadd.f32 %v5439_v56, %v5303_v28  ;;  %v9379_v56 = vld [vmem:[%s11794_s7 + $0x438] sm:$0xff]  }
0x1568   : > { %v5388_v55 = vpop.f32.mrf.mxu1  ;;  %v5441_v43 = vpop.f32.mrf.mxu0 }
0x1569   : > { %v5389_v6 = vadd.f32 %v5388_v55, %v5299_v62  ;;  %v5442_v24 = vadd.f32 %v5441_v43, %v5307_v53  ;;  %v5458_v27 = vmax.f32 %v5387_v50, 0.0  ;;  %v5460_v18 = vmax.f32 %v5440_v34, 0.0  ;;  %v9380_v55 = vld [vmem:[%s11794_s7 + $0x4b8] sm:$0xff]   ;;  %v9382_v50 = vld [vmem:[%s11794_s7 + $0x4f0] sm:$0xff]  }
0x156a   : > { %v5390_v59 = vpop.f32.mrf.mxu1  ;;  %v5443_v29 = vpop.f32.mrf.mxu0  ;;  %v5127_v43 = vadd.f32 %v5126_v52, %v11242_v42  ;;  %v5180_v52 = vadd.f32 %v5179_v13, %v11246_v47  ;;  %v5123_v13 = vadd.f32 %v11204_v3, %v11242_v42 }
0x156b   : > { %v5391_v60 = vadd.f32 %v5390_v59, %v5295_v26  ;;  %v5444_v14 = vadd.f32 %v5443_v29, %v5303_v28  ;;  %v5459_v22 = vmax.f32 %v5389_v6, 0.0  ;;  %v5461_v37 = vmax.f32 %v5442_v24, 0.0 }
0x156c   : > { %v5392_v25 = vpop.f32.mrf.mxu1  ;;  %v5445_v23 = vpop.f32.mrf.mxu0  ;;  %v5197_v3 = vmax.f32 %v5127_v43, 0.0  ;;  %v9389_v43 = vld [vmem:[%s11794_s7 + $0x460] sm:$0xff]  }
0x156d   : > { %v5393_v19 = vadd.f32 %v5392_v25, %v5299_v62  ;;  %v5446_v16 = vadd.f32 %v5445_v23, %v5307_v53  ;;  %v5462_v40 = vmax.f32 %v5391_v60, 0.0  ;;  %v5464_v15 = vmax.f32 %v5444_v14, 0.0  ;;  %v9381_v14 = vld [vmem:[%s11794_s7 + $0x470] sm:$0xff]  }
0x156e   : > { %v5396_v20 = vpop.f32.mrf.mxu1  ;;  %v5449_v41 = vpop.f32.mrf.mxu0 }
0x156f   : > { %v5463_v17 = vmax.f32 %v5393_v19, 0.0  ;;  %v5465_v10 = vmax.f32 %v5446_v16, 0.0  ;;  %v5474_v59 = vpack.c.bf16 %v5462_v40, %v5458_v27  ;;  %v5476_v29 = vpack.c.bf16 %v5464_v15, %v5460_v18 }
0x1570   : > { %v5398_v33 = vpop.f32.mrf.mxu1  ;;  %v5451_v30 = vpop.f32.mrf.mxu0  ;;  %v5397_v19 = vadd.f32 %v5396_v20, %v5295_v26  ;;  %v5450_v16 = vadd.f32 %v5449_v41, %v5303_v28 }
0x1571   : > { %v5475_v61 = vpack.c.bf16 %v5463_v17, %v5459_v22  ;;  %v5477_v21 = vpack.c.bf16 %v5465_v10, %v5461_v37  ;;  %v5399_v6 = vadd.f32 %v5398_v33, %v5299_v62  ;;  %v5452_v34 = vadd.f32 %v5451_v30, %v5307_v53  ;;  %v9383_v17 = vld [vmem:[%s11794_s7 + $0x430] sm:$0xff]  }
0x1572   : > { %v5400_v24 = vpop.f32.mrf.mxu1  ;;  %v5453_v60 = vpop.f32.mrf.mxu0  ;;  %v9384_v10 = vld [vmem:[%s11794_s7 + $0x4b0] sm:$0xff]   ;;  %v5199_v30 = vmax.f32 %v5180_v52, 0.0  ;;  %v9393_v52 = vld [vmem:[%s11794_s7 + $0x458] sm:$0xff]  }
0x1573   : > { %v5401_v25 = vadd.f32 %v5400_v24, %v5295_v26  ;;  %v5454_v23 = vadd.f32 %v5453_v60, %v5303_v28  ;;  %5770 = vmatprep.mubr.bf16.mxu1 %v5475_v61  ;;  %5819 = vmatprep.mubr.bf16.mxu0 %v5477_v21  ;;  %v5176_v26 = vadd.f32 %v11206_v31, %v11246_v47  ;;  %v5467_v41 = vmax.f32 %v5399_v6, 0.0 }
0x1574   : > { %v5402_v40 = vpop.f32.mrf.mxu1  ;;  %v5455_v15 = vpop.f32.mrf.mxu0  ;;  %5771 = vmatmul.mubr.bf16.vlgmr.msra.gmra.mxu1 %v5474_v59  ;;  %5820 = vmatmul.mubr.bf16.vlgmr.msra.gmra.mxu0 %v5476_v29  ;;  %v5469_v27 = vmax.f32 %v5452_v34, 0.0  ;;  %v5466_v61 = vmax.f32 %v5397_v19, 0.0  ;;  %v5468_v31 = vmax.f32 %v5450_v16, 0.0  ;;  %v9388_v59 = vld [vmem:[%s11794_s7 + $0x4a8] sm:$0xff]   ;;  %v5193_v29 = vmax.f32 %v5123_v13, 0.0  ;;  %v9394_v19 = vld [vmem:[%s11794_s7 + $0x4d8] sm:$0xff]  }
0x1575   : > { %v5403_v22 = vadd.f32 %v5402_v40, %v5299_v62  ;;  %v5456_v37 = vadd.f32 %v5455_v15, %v5307_v53  ;;  %8778 = vmatpush3.bf16.msra.mxu1 %v9379_v56  ;;  %8806 = vmatpush3.bf16.msra.mxu0 %v9380_v55  ;;  %v5470_v28 = vmax.f32 %v5401_v25, 0.0  ;;  %v5472_v20 = vmax.f32 %v5454_v23, 0.0  ;;  %v9385_v62 = vld [vmem:[%s11794_s7 + $0x468] sm:$0xff]   ;;  %v9391_v25 = vld [vmem:[%s11794_s7 + $0x420] sm:$0xff]   ;;  %v9395_v16 = vld [vmem:[%s11794_s7 + $0x418] sm:$0xff]  }
0x1576   : > { %8779 = vmatprep.subr.bf16.mxu1 %v9381_v14  ;;  %8807 = vmatprep.subr.bf16.mxu0 %v9382_v50  ;;  %v9386_v53 = vld [vmem:[%s11794_s7 + $0x4e8] sm:$0xff]   ;;  %v5195_v6 = vmax.f32 %v5176_v26, 0.0  ;;  %v9390_v14 = vld [vmem:[%s11794_s7 + $0x4e0] sm:$0xff]   ;;  %v5209_v50 = vpack.c.bf16 %v5197_v3, %v5193_v29  ;;  %v9396_v40 = vld [vmem:[%s11794_s7 + $0x498] sm:$0xff]   ;;  %v5023_v26 = vrot.slane %v11238_v44, %v10154_v11 }
0x1577   : > { %v5471_v18 = vmax.f32 %v5403_v22, 0.0  ;;  %v5473_v33 = vmax.f32 %v5456_v37, 0.0  ;;  %v9387_v55 = vld [vmem:[%s11794_s7 + $0x428] sm:$0xff]   ;;  %v5478_v24 = vpack.c.bf16 %v5470_v28, %v5466_v61  ;;  %v5480_v60 = vpack.c.bf16 %v5472_v20, %v5468_v31  ;;  %v9392_v23 = vld [vmem:[%s11794_s7 + $0x4a0] sm:$0xff]   ;;  %v9397_v15 = vld [vmem:[%s11794_s7 + $0x450] sm:$0xff]  }
0x1578   : > { %v5211_v34 = vpack.c.bf16 %v5199_v30, %v5195_v6  ;;  %v9398_v22 = vld [vmem:[%s11794_s7 + $0x4d0] sm:$0xff]   ;;  %v9402_v13 = vld [vmem:[%s11794_s7 + $0x4c8] sm:$0xff]   ;;  %v5031_v28 = vrot.slane %v11238_v44, %v10156_v12  ;;  %v5125_v20 = vadd.f32 %v11208_v58, %v5023_v26  ;;  %v9405_v44 = vld [vmem:[%s11794_s7 + $0x440] sm:$0xff]  }
0x1579   : > { %v5479_v21 = vpack.c.bf16 %v5471_v18, %v5467_v41  ;;  %v5481_v56 = vpack.c.bf16 %v5473_v33, %v5469_v27  ;;  %8780 = vmatpush3.bf16.msra.mxu1 %v9383_v17  ;;  %8808 = vmatpush3.bf16.msra.mxu0 %v9384_v10  ;;  %v9399_v37 = vld [vmem:[%s11794_s7 + $0x410] sm:$0xff]   ;;  %v9401_v10 = vld [vmem:[%s11794_s7 + $0x448] sm:$0xff]   ;;  %v9406_v58 = vld [vmem:[%s11794_s7 + $0x4c0] sm:$0xff]   ;;  %v5121_v18 = vadd.f32 %v11200_v49, %v5023_v26 }
0x157a   : > { %8781 = vmatprep.subr.bf16.mxu1 %v9385_v62  ;;  %8809 = vmatprep.subr.bf16.mxu0 %v9386_v53  ;;  %v9400_v17 = vld [vmem:[%s11794_s7 + $0x490] sm:$0xff]   ;;  %v9403_v62 = vld [vmem:[%s11794_s7 + $0x408] sm:$0xff]   ;;  %v5178_v41 = vadd.f32 %v11210_v38, %v5031_v28  ;;  %v8142_v27 = vld [vmem:[%s11792_s5 + $0x1a0] sm:$0xff]  ;;  %v5137_v33 = vadd.f32 %v11224_v48, %v11242_v42  ;;  %v5190_v38 = vadd.f32 %v11226_v8, %v11246_v47  ;;  %v5196_v31 = vmax.f32 %v5125_v20, 0.0 }
0x157b   : > { %5778 = vmatprep.mubr.bf16.mxu1 %v5479_v21  ;;  %5827 = vmatprep.mubr.bf16.mxu0 %v5481_v56  ;;  %v9404_v53 = vld [vmem:[%s11794_s7 + $0x488] sm:$0xff]   ;;  %v8144_v3 = vld [vmem:[%s11792_s5 + $0x1e0] sm:$0xff]  ;;  %v5174_v49 = vadd.f32 %v11202_v9, %v5031_v28  ;;  %v5133_v48 = vadd.f32 %v11216_v4, %v11242_v42  ;;  %v5186_v8 = vadd.f32 %v11218_v63, %v11246_v47  ;;  %v5192_v29 = vmax.f32 %v5121_v18, 0.0  ;;  %v9416_v18 = vld [vmem:[%s11794_s7 + $0x6b0] sm:$0xff]  }
0x157c   : > { %5779 = vmatmul.mubr.bf16.gmra.mxu1 %v5478_v24  ;;  %5828 = vmatmul.mubr.bf16.gmra.mxu0 %v5480_v60  ;;  %v8143_v30 = vld [vmem:[%s11792_s5 + $0x1a8] sm:$0xff]  ;;  %v9407_v21 = vld [vmem:[%s11794_s7 + $0x400] sm:$0xff]   ;;  %v8152_v9 = vcombine.high %v8142_v27, %v8144_v3  ;;  %v5205_v4 = vmax.f32 %v5137_v33, 0.0  ;;  %v5207_v42 = vmax.f32 %v5190_v38, 0.0  ;;  %v8151_v6 = vcombine.low %v8142_v27, %v8144_v3  ;;  %v9415_v27 = vld [vmem:[%s11794_s7 + $0x630] sm:$0xff]  }
0x157d   : > { %8782 = vmatpush3.bf16.msra.mxu1 %v9387_v55  ;;  %8810 = vmatpush3.bf16.msra.mxu0 %v9388_v59  ;;  %v8145_v61 = vld [vmem:[%s11792_s5 + $0x1e8] sm:$0xff]  ;;  %v9408_v56 = vld [vmem:[%s11794_s7 + $0x480] sm:$0xff]   ;;  %v5198_v55 = vmax.f32 %v5178_v41, 0.0  ;;  %v5194_v47 = vmax.f32 %v5174_v49, 0.0 }
0x157e   : > { %6060 = vmatprep.mubr.bf16.mxu1 %v5209_v50  ;;  %6109 = vmatprep.mubr.bf16.mxu0 %v5211_v34  ;;  %v8154_v59 = vcombine.high %v8143_v30, %v8145_v61  ;;  %v8138_v63 = vld [vmem:[%s11792_s5 + $0x120] sm:$0xff]  ;;  %v8139_v60 = vld [vmem:[%s11792_s5 + $0x128] sm:$0xff]  ;;  %v5201_v50 = vmax.f32 %v5133_v48, 0.0  ;;  %v5203_v34 = vmax.f32 %v5186_v8, 0.0  ;;  %v9425_v8 = vld [vmem:[%s11794_s7 + $0x658] sm:$0xff]  }
0x157f   : > { %8783 = vmatprep.subr.bf16.mxu1 %v9389_v43  ;;  %8811 = vmatprep.subr.bf16.mxu0 %v9390_v14  ;;  %v8140_v24 = vld [vmem:[%s11792_s5 + $0x160] sm:$0xff]  ;;  %v8141_v43 = vld [vmem:[%s11792_s5 + $0x168] sm:$0xff]  ;;  %v5208_v14 = vpack.c.bf16 %v5196_v31, %v5192_v29  ;;  %v9431_v29 = vld [vmem:[%s11794_s7 + $0x610] sm:$0xff]  }
0x1580   : > { %v9417_v33 = vld [vmem:[%s11794_s7 + $0x668] sm:$0xff]   ;;  %v9422_v49 = vld [vmem:[%s11794_s7 + $0x6e0] sm:$0xff]  }
0x1581   : > { %8784 = vmatpush3.bf16.msra.mxu1 %v9391_v25  ;;  %8812 = vmatpush3.bf16.msra.mxu0 %v9392_v23  ;;  %v8153_v25 = vcombine.low %v8143_v30, %v8145_v61  ;;  %v5210_v23 = vpack.c.bf16 %v5198_v55, %v5194_v47  ;;  %v9418_v38 = vld [vmem:[%s11794_s7 + $0x6e8] sm:$0xff]   ;;  %v9421_v61 = vld [vmem:[%s11794_s7 + $0x660] sm:$0xff]   ;;  %v9428_v55 = vld [vmem:[%s11794_s7 + $0x698] sm:$0xff]  }
0x1582   : > { %8785 = vmatprep.subr.bf16.mxu1 %v9393_v52  ;;  %8813 = vmatprep.subr.bf16.mxu0 %v9394_v19  ;;  %v5135_v52 = vadd.f32 %v11220_v0, %v5023_v26  ;;  %v5188_v19 = vadd.f32 %v11222_v39, %v5031_v28  ;;  %v8147_v0 = vcombine.low %v8138_v63, %v8140_v24  ;;  %v9419_v3 = vld [vmem:[%s11794_s7 + $0x628] sm:$0xff]   ;;  %v9423_v31 = vld [vmem:[%s11794_s7 + $0x620] sm:$0xff]  }
0x1583   : > { %v8149_v39 = vcombine.low %v8139_v60, %v8141_v43  ;;  %v9420_v30 = vld [vmem:[%s11794_s7 + $0x6a8] sm:$0xff]   ;;  %v9424_v48 = vld [vmem:[%s11794_s7 + $0x6a0] sm:$0xff]  }
0x1584   : > { %v9435_v47 = vld [vmem:[%s11794_s7 + $0x608] sm:$0xff]  }
0x1585   : > { %8786 = vmatpush3.bf16.msra.mxu1 %v9395_v16  ;;  %8814 = vmatpush3.bf16.msra.mxu0 %v9396_v40  ;;  %v5213_v16 = vpack.c.bf16 %v5205_v4, %v5201_v50  ;;  %v5215_v40 = vpack.c.bf16 %v5207_v42, %v5203_v34  ;;  %v9432_v4 = vld [vmem:[%s11794_s7 + $0x690] sm:$0xff]   ;;  %v9433_v42 = vld [vmem:[%s11794_s7 + $0x648] sm:$0xff]  }
0x1586   : > { %8787 = vmatprep.subr.bf16.mxu1 %v9397_v15  ;;  %8815 = vmatprep.subr.bf16.mxu0 %v9398_v22  ;;  %v8148_v15 = vcombine.high %v8138_v63, %v8140_v24  ;;  %v8150_v22 = vcombine.high %v8139_v60, %v8141_v43  ;;  %v9434_v63 = vld [vmem:[%s11794_s7 + $0x6c8] sm:$0xff]   ;;  %v9437_v24 = vld [vmem:[%s11794_s7 + $0x640] sm:$0xff]   ;;  %v11499_v50 = vld [vmem:[%s11792_s5 + $0x1b0] sm:$0xff] }
0x1587   : > { %v9438_v60 = vld [vmem:[%s11794_s7 + $0x6c0] sm:$0xff]   ;;  %v11504_v34 = vld [vmem:[%s11792_s5 + $0x1f0] sm:$0xff] }
0x1588   : > { %v9439_v43 = vld [vmem:[%s11794_s7 + $0x600] sm:$0xff]  }
0x1589   : > { %8788 = vmatpush3.bf16.msra.mxu1 %v9399_v37  ;;  %8816 = vmatpush3.bf16.msra.mxu0 %v9400_v17  ;;  %v5131_v37 = vadd.f32 %v11212_v36, %v5023_v26  ;;  %v5184_v17 = vadd.f32 %v11214_v57, %v5031_v28  ;;  %v9409_v36 = vld [vmem:[%s11794_s7 + $0x678] sm:$0xff]  }
0x158a   : > { %8789 = vmatprep.subr.bf16.mxu1 %v9401_v10  ;;  %8817 = vmatprep.subr.bf16.mxu0 %v9402_v13  ;;  %v5204_v10 = vmax.f32 %v5135_v52, 0.0  ;;  %v5206_v13 = vmax.f32 %v5188_v19, 0.0  ;;  %v9410_v57 = vld [vmem:[%s11794_s7 + $0x6f8] sm:$0xff]   ;;  %v8268_v19 = vcombine.low %v11499_v50, %v11504_v34 }
0x158b   : > { %v5200_v20 = vmax.f32 %v5131_v37, 0.0  ;;  %v9411_v26 = vld [vmem:[%s11794_s7 + $0x638] sm:$0xff]  }
0x158c   : > { %v9412_v28 = vld [vmem:[%s11794_s7 + $0x6b8] sm:$0xff]  }
0x158d   : > { %8790 = vmatpush3.bf16.msra.mxu1 %v9403_v62  ;;  %8818 = vmatpush3.bf16.msra.mxu0 %v9404_v53  ;;  %v5202_v62 = vmax.f32 %v5184_v17, 0.0  ;;  %v5212_v53 = vpack.c.bf16 %v5204_v10, %v5200_v20  ;;  %v11516_v52 = vld [vmem:[%s11792_s5 + $0x1f8] sm:$0xff] }
0x158e   : > { %8791 = vmatprep.subr.bf16.mxu1 %v9405_v44  ;;  %8819 = vmatprep.subr.bf16.mxu0 %v9406_v58  ;;  %v9413_v44 = vld [vmem:[%s11794_s7 + $0x670] sm:$0xff]  }
0x158f   : > { %v5214_v41 = vpack.c.bf16 %v5206_v13, %v5202_v62  ;;  %v9414_v58 = vld [vmem:[%s11794_s7 + $0x6f0] sm:$0xff]  }
0x1591   : > { %8792 = vmatpush3.bf16.msra.mxu1 %v9407_v21  ;;  %8820 = vmatpush3.bf16.msra.mxu0 %v9408_v56  ;;  %v9426_v21 = vld [vmem:[%s11794_s7 + $0x6d8] sm:$0xff]  }
0x1592   : > { %6209 = vmatprep.subr.bf16.mxu1 %v8152_v9  ;;  %6262 = vmatprep.subr.bf16.mxu0 %v8154_v59  ;;  %v9427_v56 = vld [vmem:[%s11794_s7 + $0x618] sm:$0xff]   ;;  %v9429_v9 = vld [vmem:[%s11794_s7 + $0x650] sm:$0xff]  }
0x1593   : > { %v9430_v59 = vld [vmem:[%s11794_s7 + $0x6d0] sm:$0xff]  }
0x1594   : > { %6061 = vmatmul.mubr.bf16.vlgmr.msra.gmra.mxu1 %v5208_v14  ;;  %6110 = vmatmul.mubr.bf16.vlgmr.msra.gmra.mxu0 %v5210_v23  ;;  %v9440_v14 = vld [vmem:[%s11794_s7 + $0x680] sm:$0xff]   ;;  %v8269_v23 = vcombine.high %v11499_v50, %v11504_v34 }
0x1595   : > { %6068 = vmatprep.mubr.bf16.mxu1 %v5213_v16  ;;  %6117 = vmatprep.mubr.bf16.mxu0 %v5215_v40 }
0x1596   : > { %6210 = vmatpush1.bf16.msra.mxu1 %v8151_v6  ;;  %6263 = vmatpush1.bf16.msra.mxu0 %v8153_v25  ;;  %v9436_v6 = vld [vmem:[%s11794_s7 + $0x688] sm:$0xff]   ;;  %v11509_v25 = vld [vmem:[%s11792_s5 + $0x1b8] sm:$0xff] }
0x1597   : > { %6211 = vmatprep.subr.bf16.mxu1 %v8148_v15  ;;  %6264 = vmatprep.subr.bf16.mxu0 %v8150_v22  ;;  %v8270_v16 = vcombine.low %v11509_v25, %v11516_v52  ;;  %v8271_v40 = vcombine.high %v11509_v25, %v11516_v52 }
0x159a   : > { %6212 = vmatpush1.bf16.msra.mxu1 %v8147_v0  ;;  %6265 = vmatpush1.bf16.msra.mxu0 %v8149_v39 }
0x159b   : > { %8833 = vmatprep.subr.bf16.mxu1 %v9409_v36  ;;  %8861 = vmatprep.subr.bf16.mxu0 %v9410_v57 }
0x159c   : > { %6069 = vmatmul.mubr.bf16.gmra.mxu1 %v5212_v53  ;;  %6118 = vmatmul.mubr.bf16.gmra.mxu0 %v5214_v41 }
0x159d   : > { %6229 = vmatprep.mubr.bf16.mxu1 %v9650_v7  ;;  %6282 = vmatprep.mubr.bf16.mxu0 %v9650_v7 }
0x15a4   : > { %8155 = vmatmul.mubr.msk.bf16.vlgmr.msra.gmra.mxu1 %vm403_vm0, %v11066_v46  ;;  %8157 = vmatmul.mubr.msk.bf16.vlgmr.msra.gmra.mxu0 %vm403_vm0, %v11066_v46 }
0x15a5   : > { %6239 = vmatprep.mubr.bf16.mxu1 %v9650_v7  ;;  %6292 = vmatprep.mubr.bf16.mxu0 %v9650_v7 }
0x15a6   : > { %8834 = vmatpush3.bf16.msra.mxu1 %v9411_v26  ;;  %8862 = vmatpush3.bf16.msra.mxu0 %v9412_v28 }
0x15a7   : > { %8835 = vmatprep.subr.bf16.mxu1 %v9413_v44  ;;  %8863 = vmatprep.subr.bf16.mxu0 %v9414_v58 }
0x15aa   : > { %8836 = vmatpush3.bf16.msra.mxu1 %v9415_v27  ;;  %8864 = vmatpush3.bf16.msra.mxu0 %v9416_v18 }
0x15ab   : > { %8837 = vmatprep.subr.bf16.mxu1 %v9417_v33  ;;  %8865 = vmatprep.subr.bf16.mxu0 %v9418_v38 }
0x15ac   : > { %8156 = vmatmul.mubr.msk.bf16.gmra.mxu1 %vm403_vm0, %v11086_v54  ;;  %8158 = vmatmul.mubr.msk.bf16.gmra.mxu0 %vm403_vm0, %v11086_v54 }
0x15ae   : > { %8838 = vmatpush3.bf16.msra.mxu1 %v9419_v3  ;;  %8866 = vmatpush3.bf16.msra.mxu0 %v9420_v30 }
0x15af   : > { %8839 = vmatprep.subr.bf16.mxu1 %v9421_v61  ;;  %8867 = vmatprep.subr.bf16.mxu0 %v9422_v49 }
0x15b2   : > { %8840 = vmatpush3.bf16.msra.mxu1 %v9423_v31  ;;  %8868 = vmatpush3.bf16.msra.mxu0 %v9424_v48 }
0x15b3   : > { %8841 = vmatprep.subr.bf16.mxu1 %v9425_v8  ;;  %8869 = vmatprep.subr.bf16.mxu0 %v9426_v21 }
0x15b6   : > { %8842 = vmatpush3.bf16.msra.mxu1 %v9427_v56  ;;  %8870 = vmatpush3.bf16.msra.mxu0 %v9428_v55 }
0x15b7   : > { %8843 = vmatprep.subr.bf16.mxu1 %v9429_v9  ;;  %8871 = vmatprep.subr.bf16.mxu0 %v9430_v59 }
0x15ba   : > { %8844 = vmatpush3.bf16.msra.mxu1 %v9431_v29  ;;  %8872 = vmatpush3.bf16.msra.mxu0 %v9432_v4 }
0x15bb   : > { %8845 = vmatprep.subr.bf16.mxu1 %v9433_v42  ;;  %8873 = vmatprep.subr.bf16.mxu0 %v9434_v63 }
0x15be   : > { %8846 = vmatpush3.bf16.msra.mxu1 %v9435_v47  ;;  %8874 = vmatpush3.bf16.msra.mxu0 %v9436_v6 }
0x15bf   : > { %8847 = vmatprep.subr.bf16.mxu1 %v9437_v24  ;;  %8875 = vmatprep.subr.bf16.mxu0 %v9438_v60 }
0x15c2   : > { %8848 = vmatpush3.bf16.msra.mxu1 %v9439_v43  ;;  %8876 = vmatpush3.bf16.msra.mxu0 %v9440_v14 }
0x15c3   : > { %6768 = vmatprep.subr.bf16.mxu1 %v8269_v23  ;;  %6821 = vmatprep.subr.bf16.mxu0 %v8271_v40 }
0x1634   : > { %v8737_v15 = vpop.f32.mrf.mxu1  ;;  %v8765_v22 = vpop.f32.mrf.mxu0 }
0x1636   : > { %v8738_v37 = vpop.f32.mrf.mxu1  ;;  %v8766_v17 = vpop.f32.mrf.mxu0 }
0x1637   : > { %v8739_v10 = vadd.f32 %v8738_v37, %v8737_v15  ;;  %v8767_v13 = vadd.f32 %v8766_v17, %v8765_v22 }
0x1638   : > { %v8740_v0 = vpop.f32.mrf.mxu1  ;;  %v8768_v39 = vpop.f32.mrf.mxu0 }
0x1639   : > { %v5822_v20 = vadd.f32 %v8767_v13, %v8739_v10 }
0x163a   : > { %v8741_v62 = vpop.f32.mrf.mxu1  ;;  %v8769_v53 = vpop.f32.mrf.mxu0 }
0x163b   : > { %v8742_v41 = vadd.f32 %v8741_v62, %v8740_v0  ;;  %v8770_v36 = vadd.f32 %v8769_v53, %v8768_v39 }
0x163c   : > { %v8743_v57 = vpop.f32.mrf.mxu1  ;;  %v8771_v26 = vpop.f32.mrf.mxu0 }
0x163d   : > { %v5825_v28 = vadd.f32 %v8770_v36, %v8742_v41  ;;  %v8146_v36 = vld [vmem:[%s11793_s6 + $0x11] ss:$2 sm:$0xf] }
0x163e   : > { %v8744_v44 = vpop.f32.mrf.mxu1  ;;  %v8772_v58 = vpop.f32.mrf.mxu0 }
0x163f   : > { %v8745_v27 = vadd.f32 %v8744_v44, %v8743_v57  ;;  %v8773_v18 = vadd.f32 %v8772_v58, %v8771_v26  ;;  %v6144_v44 = vrot.slane %v8146_v36, %v10147_v1  ;;  %v6152_v58 = vrot.slane %v8146_v36, %v10149_v2 }
0x1640   : > { %v8746_v33 = vpop.f32.mrf.mxu1  ;;  %v8774_v38 = vpop.f32.mrf.mxu0 }
0x1641   : > { %v5830_v3 = vadd.f32 %v8773_v18, %v8745_v27  ;;  %v6140_v27 = vrot.slane %v8146_v36, %v10154_v11  ;;  %v6148_v18 = vrot.slane %v8146_v36, %v10156_v12 }
0x1642   : > { %v8747_v30 = vpop.f32.mrf.mxu1  ;;  %v8775_v61 = vpop.f32.mrf.mxu0 }
0x1643   : > { %v8748_v49 = vadd.f32 %v8747_v30, %v8746_v33  ;;  %v8776_v31 = vadd.f32 %v8775_v61, %v8774_v38 }
0x1645   : > { %v5833_v48 = vadd.f32 %v8776_v31, %v8748_v49 }
0x1654   : > { %v8793_v8 = vpop.f32.mrf.mxu1  ;;  %v8821_v21 = vpop.f32.mrf.mxu0 }
0x1656   : > { %v8794_v56 = vpop.f32.mrf.mxu1  ;;  %v8822_v55 = vpop.f32.mrf.mxu0 }
0x1657   : > { %v8795_v9 = vadd.f32 %v8794_v56, %v8793_v8  ;;  %v8823_v59 = vadd.f32 %v8822_v55, %v8821_v21 }
0x1658   : > { %v8796_v29 = vpop.f32.mrf.mxu1  ;;  %v8824_v4 = vpop.f32.mrf.mxu0 }
0x1659   : > { %v6063_v42 = vadd.f32 %v8795_v9, %v5822_v20 }
0x165a   : > { %v8797_v63 = vpop.f32.mrf.mxu1  ;;  %v8825_v47 = vpop.f32.mrf.mxu0 }
0x165b   : > { %v11524_v6 = vadd.f32 %v8823_v59, %v6063_v42  ;;  %v8798_v24 = vadd.f32 %v8797_v63, %v8796_v29  ;;  %v8826_v60 = vadd.f32 %v8825_v47, %v8824_v4 }
0x165c   : > { %v8799_v43 = vpop.f32.mrf.mxu1  ;;  %v8827_v14 = vpop.f32.mrf.mxu0 }
0x165d   : > { %v6066_v23 = vadd.f32 %v8798_v24, %v5825_v28  ;;  %v8255_v24 = vld [vmem:[%s11792_s5 + $0x130] sm:$0xff] }
0x165e   : > { %v8800_v40 = vpop.f32.mrf.mxu1  ;;  %v8828_v15 = vpop.f32.mrf.mxu0 }
0x165f   : > { %v11526_v22 = vadd.f32 %v8826_v60, %v6066_v23  ;;  %v8801_v37 = vadd.f32 %v8800_v40, %v8799_v43  ;;  %v8829_v17 = vadd.f32 %v8828_v15, %v8827_v14  ;;  %v8257_v60 = vld [vmem:[%s11792_s5 + $0x170] sm:$0xff]  ;;  %v8256_v15 = vld [vmem:[%s11792_s5 + $0x138] sm:$0xff] }
0x1660   : > { %v8802_v10 = vpop.f32.mrf.mxu1  ;;  %v8830_v13 = vpop.f32.mrf.mxu0 }
0x1661   : > { %v6071_v0 = vadd.f32 %v8801_v37, %v5830_v3  ;;  %v8258_v37 = vld [vmem:[%s11792_s5 + $0x178] sm:$0xff] }
0x1662   : > { %v8803_v39 = vpop.f32.mrf.mxu1  ;;  %v8831_v20 = vpop.f32.mrf.mxu0 }
0x1663   : > { %v11528_v62 = vadd.f32 %v8829_v17, %v6071_v0  ;;  %v8804_v53 = vadd.f32 %v8803_v39, %v8802_v10  ;;  %v8832_v41 = vadd.f32 %v8831_v20, %v8830_v13 }
0x1664   : > { %v6231_v57 = vpop.f32.mrf.mxu1  ;;  %v6284_v26 = vpop.f32.mrf.mxu0 }
0x1665   : > { %v6074_v28 = vadd.f32 %v8804_v53, %v5833_v48  ;;  %v6232_v56 = vadd.f32 %v6231_v57, %v6140_v27  ;;  %v6285_v48 = vadd.f32 %v6284_v26, %v6148_v18  ;;  %v8265_v53 = vcombine.high %v8255_v24, %v8257_v60 }
0x1666   : > { %v6233_v33 = vpop.f32.mrf.mxu1  ;;  %v6286_v38 = vpop.f32.mrf.mxu0 }
0x1667   : > { %v11537_v3 = vadd.f32 %v8832_v41, %v6074_v28  ;;  %v6234_v49 = vadd.f32 %v6233_v33, %v6144_v44  ;;  %v6287_v31 = vadd.f32 %v6286_v38, %v6152_v58  ;;  %v6303_v17 = vmax.f32 %v6232_v56, 0.0 }
0x1668   : > { %v6235_v30 = vpop.f32.mrf.mxu1  ;;  %v6288_v61 = vpop.f32.mrf.mxu0  ;;  %v6305_v10 = vmax.f32 %v6285_v48, 0.0  ;;  %v8267_v33 = vcombine.high %v8256_v15, %v8258_v37  ;;  %v8264_v56 = vcombine.low %v8255_v24, %v8257_v60  ;;  %v9445_v24 = vld [vmem:[%s11794_s7 + $0x770] sm:$0xff]  }
0x1669   : > { %v6236_v8 = vadd.f32 %v6235_v30, %v6140_v27  ;;  %v6289_v21 = vadd.f32 %v6288_v61, %v6148_v18  ;;  %v6304_v43 = vmax.f32 %v6234_v49, 0.0  ;;  %v6306_v14 = vmax.f32 %v6287_v31, 0.0  ;;  %v9448_v60 = vld [vmem:[%s11794_s7 + $0x7b0] sm:$0xff]  }
0x166a   : > { %v6237_v55 = vpop.f32.mrf.mxu1  ;;  %v6290_v9 = vpop.f32.mrf.mxu0 }
0x166b   : > { %v6238_v59 = vadd.f32 %v6237_v55, %v6144_v44  ;;  %v6291_v29 = vadd.f32 %v6290_v9, %v6152_v58  ;;  %v6307_v4 = vmax.f32 %v6236_v8, 0.0  ;;  %v6309_v42 = vmax.f32 %v6289_v21, 0.0 }
0x166c   : > { %v6241_v63 = vpop.f32.mrf.mxu1  ;;  %v6294_v47 = vpop.f32.mrf.mxu0  ;;  %v8266_v9 = vcombine.low %v8256_v15, %v8258_v37  ;;  %v9454_v15 = vld [vmem:[%s11794_s7 + $0x7e0] sm:$0xff]  }
0x166d   : > { %v6308_v23 = vmax.f32 %v6238_v59, 0.0  ;;  %v6310_v40 = vmax.f32 %v6291_v29, 0.0  ;;  %v6319_v41 = vpack.c.bf16 %v6307_v4, %v6303_v17  ;;  %v6321_v36 = vpack.c.bf16 %v6309_v42, %v6305_v10  ;;  %v9455_v37 = vld [vmem:[%s11794_s7 + $0x720] sm:$0xff]   ;;  %v9457_v10 = vld [vmem:[%s11794_s7 + $0x758] sm:$0xff]  }
0x166e   : > { %v6243_v13 = vpop.f32.mrf.mxu1  ;;  %v6296_v0 = vpop.f32.mrf.mxu0  ;;  %v6242_v49 = vadd.f32 %v6241_v63, %v6140_v27  ;;  %v6295_v31 = vadd.f32 %v6294_v47, %v6148_v18  ;;  %v9443_v63 = vld [vmem:[%s11794_s7 + $0x738] sm:$0xff]   ;;  %v9456_v17 = vld [vmem:[%s11794_s7 + $0x7a0] sm:$0xff]  }
0x166f   : > { %v6320_v39 = vpack.c.bf16 %v6308_v23, %v6304_v43  ;;  %v6322_v20 = vpack.c.bf16 %v6310_v40, %v6306_v14  ;;  %v6244_v57 = vadd.f32 %v6243_v13, %v6144_v44  ;;  %v6297_v38 = vadd.f32 %v6296_v0, %v6152_v58  ;;  %v9444_v47 = vld [vmem:[%s11794_s7 + $0x7b8] sm:$0xff]   ;;  %v9450_v43 = vld [vmem:[%s11794_s7 + $0x7e8] sm:$0xff]   ;;  %v9453_v40 = vld [vmem:[%s11794_s7 + $0x760] sm:$0xff]  }
0x1670   : > { %v6245_v26 = vpop.f32.mrf.mxu1  ;;  %v6298_v28 = vpop.f32.mrf.mxu0  ;;  %v6313_v25 = vmax.f32 %v6295_v31, 0.0  ;;  %v9451_v14 = vld [vmem:[%s11794_s7 + $0x728] sm:$0xff]   ;;  %v9458_v13 = vld [vmem:[%s11794_s7 + $0x7d8] sm:$0xff]  }
0x1671   : > { %v6246_v30 = vadd.f32 %v6245_v26, %v6140_v27  ;;  %v6299_v61 = vadd.f32 %v6298_v28, %v6148_v18  ;;  %6615 = vmatprep.mubr.bf16.mxu1 %v6320_v39  ;;  %6664 = vmatprep.mubr.bf16.mxu0 %v6322_v20  ;;  %v9441_v27 = vld [vmem:[%s11794_s7 + $0x778] sm:$0xff]   ;;  %v6314_v50 = vmax.f32 %v6297_v38, 0.0  ;;  %v6311_v18 = vmax.f32 %v6242_v49, 0.0  ;;  %v9452_v23 = vld [vmem:[%s11794_s7 + $0x7a8] sm:$0xff]   ;;  %v9461_v20 = vld [vmem:[%s11794_s7 + $0x750] sm:$0xff]  }
0x1672   : > { %v6247_v8 = vpop.f32.mrf.mxu1  ;;  %v6300_v21 = vpop.f32.mrf.mxu0  ;;  %6616 = vmatmul.mubr.bf16.vlgmr.msra.gmra.mxu1 %v6319_v41  ;;  %6665 = vmatmul.mubr.bf16.vlgmr.msra.gmra.mxu0 %v6321_v36  ;;  %v9459_v0 = vld [vmem:[%s11794_s7 + $0x718] sm:$0xff]   ;;  %v9463_v41 = vld [vmem:[%s11794_s7 + $0x710] sm:$0xff]   ;;  %v9466_v26 = vld [vmem:[%s11794_s7 + $0x7c8] sm:$0xff]  }
0x1673   : > { %v6248_v48 = vadd.f32 %v6247_v8, %v6144_v44  ;;  %v6301_v55 = vadd.f32 %v6300_v21, %v6152_v58  ;;  %6769 = vmatpush1.bf16.msra.mxu1 %v8268_v19  ;;  %6822 = vmatpush1.bf16.msra.mxu0 %v8270_v16  ;;  %v6315_v59 = vmax.f32 %v6246_v30, 0.0  ;;  %v6317_v29 = vmax.f32 %v6299_v61, 0.0  ;;  %v9442_v44 = vld [vmem:[%s11794_s7 + $0x7f8] sm:$0xff]   ;;  %v9464_v36 = vld [vmem:[%s11794_s7 + $0x790] sm:$0xff]   ;;  %v9467_v28 = vld [vmem:[%s11794_s7 + $0x708] sm:$0xff]  }
0x1674   : > { %6770 = vmatprep.subr.bf16.mxu1 %v8265_v53  ;;  %6823 = vmatprep.subr.bf16.mxu0 %v8267_v33  ;;  %v6312_v58 = vmax.f32 %v6244_v57, 0.0  ;;  %v9460_v39 = vld [vmem:[%s11794_s7 + $0x798] sm:$0xff]   ;;  %v9462_v53 = vld [vmem:[%s11794_s7 + $0x7d0] sm:$0xff]   ;;  %v9465_v57 = vld [vmem:[%s11794_s7 + $0x748] sm:$0xff]  }
0x1675   : > { %v6316_v34 = vmax.f32 %v6248_v48, 0.0  ;;  %v6318_v19 = vmax.f32 %v6301_v55, 0.0  ;;  %v6323_v4 = vpack.c.bf16 %v6315_v59, %v6311_v18  ;;  %v6325_v42 = vpack.c.bf16 %v6317_v29, %v6313_v25  ;;  %v9468_v33 = vld [vmem:[%s11794_s7 + $0x788] sm:$0xff]   ;;  %v9469_v38 = vld [vmem:[%s11794_s7 + $0x740] sm:$0xff]  }
0x1676   : > { %v9470_v30 = vld [vmem:[%s11794_s7 + $0x7c0] sm:$0xff]  }
0x1677   : > { %v6324_v52 = vpack.c.bf16 %v6316_v34, %v6312_v58  ;;  %v6326_v16 = vpack.c.bf16 %v6318_v19, %v6314_v50  ;;  %6771 = vmatpush1.bf16.msra.mxu1 %v8264_v56  ;;  %6824 = vmatpush1.bf16.msra.mxu0 %v8266_v9  ;;  %v9471_v61 = vld [vmem:[%s11794_s7 + $0x700] sm:$0xff]  }
0x1678   : > { %8889 = vmatprep.subr.bf16.mxu1 %v9441_v27  ;;  %8917 = vmatprep.subr.bf16.mxu0 %v9442_v44  ;;  %v9472_v49 = vld [vmem:[%s11794_s7 + $0x780] sm:$0xff]  }
0x1679   : > { %6623 = vmatprep.mubr.bf16.mxu1 %v6324_v52  ;;  %6672 = vmatprep.mubr.bf16.mxu0 %v6326_v16 }
0x167a   : > { %6624 = vmatmul.mubr.bf16.gmra.mxu1 %v6323_v4  ;;  %6673 = vmatmul.mubr.bf16.gmra.mxu0 %v6325_v42 }
0x167b   : > { %6788 = vmatprep.mubr.bf16.mxu1 %v9650_v7  ;;  %6841 = vmatprep.mubr.bf16.mxu0 %v9650_v7 }
0x1682   : > { %8272 = vmatmul.mubr.msk.bf16.vlgmr.msra.gmra.mxu1 %vm403_vm0, %v11066_v46  ;;  %8274 = vmatmul.mubr.msk.bf16.vlgmr.msra.gmra.mxu0 %vm403_vm0, %v11066_v46  ;;  %v9446_v46 = vld [vmem:[%s11794_s7 + $0x7f0] sm:$0xff]  }
0x1683   : > { %6798 = vmatprep.mubr.bf16.mxu1 %v9650_v7  ;;  %6851 = vmatprep.mubr.bf16.mxu0 %v9650_v7  ;;  %v9447_v7 = vld [vmem:[%s11794_s7 + $0x730] sm:$0xff]  }
0x1684   : > { %8890 = vmatpush3.bf16.msra.mxu1 %v9443_v63  ;;  %8918 = vmatpush3.bf16.msra.mxu0 %v9444_v47 }
0x1685   : > { %8891 = vmatprep.subr.bf16.mxu1 %v9445_v24  ;;  %8919 = vmatprep.subr.bf16.mxu0 %v9446_v46 }
0x1688   : > { %8892 = vmatpush3.bf16.msra.mxu1 %v9447_v7  ;;  %8920 = vmatpush3.bf16.msra.mxu0 %v9448_v60 }
0x1689   : > { %8921 = vmatprep.subr.bf16.mxu0 %v9450_v43 }
0x168a   : > { %8273 = vmatmul.mubr.msk.bf16.gmra.mxu1 %vm403_vm0, %v11086_v54  ;;  %8275 = vmatmul.mubr.msk.bf16.gmra.mxu0 %vm403_vm0, %v11086_v54  ;;  %v9449_v54 = vld [vmem:[%s11794_s7 + $0x768] sm:$0xff]  }
0x168b   : > { %8893 = vmatprep.subr.bf16.mxu1 %v9449_v54 }
0x168c   : > { %8894 = vmatpush3.bf16.msra.mxu1 %v9451_v14  ;;  %8922 = vmatpush3.bf16.msra.mxu0 %v9452_v23  ;;  %v8263_v14 = vld [vmem:[%s11793_s6 + $0x19] ss:$2 sm:$0xf] }
0x168d   : > { %8895 = vmatprep.subr.bf16.mxu1 %v9453_v40  ;;  %8923 = vmatprep.subr.bf16.mxu0 %v9454_v15  ;;  %v6703_v15 = vrot.slane %v8263_v14, %v10147_v1 }
0x1690   : > { %8896 = vmatpush3.bf16.msra.mxu1 %v9455_v37  ;;  %8924 = vmatpush3.bf16.msra.mxu0 %v9456_v17  ;;  %v6711_v37 = vrot.slane %v8263_v14, %v10149_v2  ;;  %v6699_v17 = vrot.slane %v8263_v14, %v10154_v11 }
0x1691   : > { %8897 = vmatprep.subr.bf16.mxu1 %v9457_v10  ;;  %8925 = vmatprep.subr.bf16.mxu0 %v9458_v13  ;;  %v6707_v10 = vrot.slane %v8263_v14, %v10156_v12 }
0x1694   : > { %8898 = vmatpush3.bf16.msra.mxu1 %v9459_v0  ;;  %8926 = vmatpush3.bf16.msra.mxu0 %v9460_v39 }
0x1695   : > { %8899 = vmatprep.subr.bf16.mxu1 %v9461_v20  ;;  %8927 = vmatprep.subr.bf16.mxu0 %v9462_v53 }
0x1698   : > { %8900 = vmatpush3.bf16.msra.mxu1 %v9463_v41  ;;  %8928 = vmatpush3.bf16.msra.mxu0 %v9464_v36 }
0x1699   : > { %8901 = vmatprep.subr.bf16.mxu1 %v9465_v57  ;;  %8929 = vmatprep.subr.bf16.mxu0 %v9466_v26 }
0x169c   : > { %8902 = vmatpush3.bf16.msra.mxu1 %v9467_v28  ;;  %8930 = vmatpush3.bf16.msra.mxu0 %v9468_v33 }
0x169d   : > { %8903 = vmatprep.subr.bf16.mxu1 %v9469_v38  ;;  %8931 = vmatprep.subr.bf16.mxu0 %v9470_v30 }
0x16a0   : > { %8904 = vmatpush3.bf16.msra.mxu1 %v9471_v61  ;;  %8932 = vmatpush3.bf16.msra.mxu0 %v9472_v49 }
0x16a1   : > { %9148 = vmatprep.subr.bf16.mxu1 %v9646_v5 }
0x1732   : > { %v8849_v31 = vpop.f32.mrf.mxu1  ;;  %v8877_v8 = vpop.f32.mrf.mxu0 }
0x1734   : > { %v8850_v21 = vpop.f32.mrf.mxu1  ;;  %v8878_v56 = vpop.f32.mrf.mxu0 }
0x1735   : > { %v8851_v48 = vadd.f32 %v8850_v21, %v8849_v31  ;;  %v8879_v55 = vadd.f32 %v8878_v56, %v8877_v8 }
0x1736   : > { %v8852_v9 = vpop.f32.mrf.mxu1  ;;  %v8880_v59 = vpop.f32.mrf.mxu0 }
0x1737   : > { %v6667_v29 = vadd.f32 %v8879_v55, %v8851_v48 }
0x1738   : > { %v8853_v27 = vpop.f32.mrf.mxu1  ;;  %v8881_v44 = vpop.f32.mrf.mxu0 }
0x1739   : > { %v11667_v58 = vadd.f32 %v6667_v29, %v11524_v6  ;;  %v8854_v50 = vadd.f32 %v8853_v27, %v8852_v9  ;;  %v8882_v34 = vadd.f32 %v8881_v44, %v8880_v59 }
0x173a   : > { %v8855_v19 = vpop.f32.mrf.mxu1  ;;  %v8883_v18 = vpop.f32.mrf.mxu0 }
0x173b   : > { %v6670_v25 = vadd.f32 %v8882_v34, %v8854_v50 }
0x173c   : > { %v8856_v52 = vpop.f32.mrf.mxu1  ;;  %v8884_v16 = vpop.f32.mrf.mxu0 }
0x173d   : > { %v11670_v4 = vadd.f32 %v6670_v25, %v11526_v22  ;;  %v8857_v42 = vadd.f32 %v8856_v52, %v8855_v19  ;;  %v8885_v63 = vadd.f32 %v8884_v16, %v8883_v18 }
0x173e   : > { %v8858_v47 = vpop.f32.mrf.mxu1  ;;  %v8886_v24 = vpop.f32.mrf.mxu0 }
0x173f   : > { %v6675_v46 = vadd.f32 %v8885_v63, %v8857_v42 }
0x1740   : > { %v8859_v7 = vpop.f32.mrf.mxu1  ;;  %v8887_v60 = vpop.f32.mrf.mxu0 }
0x1741   : > { %v11673_v6 = vadd.f32 %v6675_v46, %v11528_v62  ;;  %v8860_v54 = vadd.f32 %v8859_v7, %v8858_v47  ;;  %v8888_v43 = vadd.f32 %v8887_v60, %v8886_v24 }
0x1742   : > { %v6790_v23 = vpop.f32.mrf.mxu1  ;;  %v6843_v40 = vpop.f32.mrf.mxu0 }
0x1743   : > { %v6678_v22 = vadd.f32 %v8888_v43, %v8860_v54  ;;  %v6791_v26 = vadd.f32 %v6790_v23, %v6699_v17  ;;  %v6844_v28 = vadd.f32 %v6843_v40, %v6707_v10 }
0x1744   : > { %v6792_v13 = vpop.f32.mrf.mxu1  ;;  %v6845_v62 = vpop.f32.mrf.mxu0 }
0x1745   : > { %v11683_v0 = vadd.f32 %v6678_v22, %v11537_v3  ;;  %v6793_v53 = vadd.f32 %v6792_v13, %v6703_v15  ;;  %v6846_v41 = vadd.f32 %v6845_v62, %v6711_v37  ;;  %v6862_v21 = vmax.f32 %v6791_v26, 0.0 }
0x1746   : > { %v6794_v39 = vpop.f32.mrf.mxu1  ;;  %v6847_v20 = vpop.f32.mrf.mxu0  ;;  %v6864_v56 = vmax.f32 %v6844_v28, 0.0 }
0x1747   : > { %v6795_v36 = vadd.f32 %v6794_v39, %v6699_v17  ;;  %v6848_v57 = vadd.f32 %v6847_v20, %v6707_v10  ;;  %v6863_v49 = vmax.f32 %v6793_v53, 0.0  ;;  %v6865_v31 = vmax.f32 %v6846_v41, 0.0 }
0x1748   : > { %v6796_v1 = vpop.f32.mrf.mxu1  ;;  %v6849_v33 = vpop.f32.mrf.mxu0 }
0x1749   : > { %v6797_v2 = vadd.f32 %v6796_v1, %v6703_v15  ;;  %v6850_v38 = vadd.f32 %v6849_v33, %v6711_v37  ;;  %v6866_v11 = vmax.f32 %v6795_v36, 0.0  ;;  %v6868_v30 = vmax.f32 %v6848_v57, 0.0 }
0x174a   : > { %v6800_v12 = vpop.f32.mrf.mxu1  ;;  %v6853_v61 = vpop.f32.mrf.mxu0 }
0x174b   : > { %v6867_v3 = vmax.f32 %v6797_v2, 0.0  ;;  %v6869_v8 = vmax.f32 %v6850_v38, 0.0  ;;  %v6878_v29 = vpack.c.bf16 %v6866_v11, %v6862_v21  ;;  %v6880_v27 = vpack.c.bf16 %v6868_v30, %v6864_v56  ;;  %v8372_v30 = vld [vmem:[%s11791_s4 + $0x13] ss:$0 sm:$0xff] }
0x174c   : > { %v6802_v48 = vpop.f32.mrf.mxu1  ;;  %v6855_v55 = vpop.f32.mrf.mxu0  ;;  %v6801_v52 = vadd.f32 %v6800_v12, %v6699_v17  ;;  %v6854_v16 = vadd.f32 %v6853_v61, %v6707_v10 }
0x174d   : > { %v6879_v9 = vpack.c.bf16 %v6867_v3, %v6863_v49  ;;  %v6881_v59 = vpack.c.bf16 %v6869_v8, %v6865_v31  ;;  %v6803_v44 = vadd.f32 %v6802_v48, %v6703_v15  ;;  %v6856_v19 = vadd.f32 %v6855_v55, %v6711_v37 }
0x174e   : > { %v6804_v50 = vpop.f32.mrf.mxu1  ;;  %v6857_v34 = vpop.f32.mrf.mxu0  ;;  %v6870_v23 = vmax.f32 %v6801_v52, 0.0  ;;  %v6872_v40 = vmax.f32 %v6854_v16, 0.0 }
0x174f   : > { %v6805_v18 = vadd.f32 %v6804_v50, %v6699_v17  ;;  %v6858_v25 = vadd.f32 %v6857_v34, %v6707_v10  ;;  %7174 = vmatprep.mubr.bf16.mxu1 %v6879_v9  ;;  %7223 = vmatprep.mubr.bf16.mxu0 %v6881_v59  ;;  %v6871_v60 = vmax.f32 %v6803_v44, 0.0  ;;  %v6873_v54 = vmax.f32 %v6856_v19, 0.0 }
0x1750   : > { %v6806_v42 = vpop.f32.mrf.mxu1  ;;  %v6859_v63 = vpop.f32.mrf.mxu0  ;;  %7175 = vmatmul.mubr.bf16.vlgmr.msra.gmra.mxu1 %v6878_v29  ;;  %7224 = vmatmul.mubr.bf16.vlgmr.msra.gmra.mxu0 %v6880_v27 }
0x1751   : > { %v6807_v47 = vadd.f32 %v6806_v42, %v6703_v15  ;;  %v6860_v24 = vadd.f32 %v6859_v63, %v6711_v37  ;;  %v6874_v46 = vmax.f32 %v6805_v18, 0.0  ;;  %v6876_v7 = vmax.f32 %v6858_v25, 0.0 }
0x1753   : > { %v6875_v43 = vmax.f32 %v6807_v47, 0.0  ;;  %v6877_v14 = vmax.f32 %v6860_v24, 0.0  ;;  %v6882_v62 = vpack.c.bf16 %v6874_v46, %v6870_v23  ;;  %v6884_v39 = vpack.c.bf16 %v6876_v7, %v6872_v40 }
0x1755   : > { %v6883_v22 = vpack.c.bf16 %v6875_v43, %v6871_v60  ;;  %v6885_v13 = vpack.c.bf16 %v6877_v14, %v6873_v54 }
0x1757   : > { %7182 = vmatprep.mubr.bf16.mxu1 %v6883_v22  ;;  %7231 = vmatprep.mubr.bf16.mxu0 %v6885_v13 }
0x1758   : > { %7183 = vmatmul.mubr.bf16.gmra.mxu1 %v6882_v62  ;;  %7232 = vmatmul.mubr.bf16.gmra.mxu0 %v6884_v39 }
0x1759   : > { %9152 = vmatprep.mubr.msk.bf16.mxu1 %vm9647_vm1, %v9646_v5 }
0x1810   : > { %v8905_v15 = vpop.f32.mrf.mxu1  ;;  %v8933_v37 = vpop.f32.mrf.mxu0 }
0x1812   : > { %v8906_v17 = vpop.f32.mrf.mxu1  ;;  %v8934_v10 = vpop.f32.mrf.mxu0 }
0x1813   : > { %v8907_v20 = vadd.f32 %v8906_v17, %v8905_v15  ;;  %v8935_v53 = vadd.f32 %v8934_v10, %v8933_v37 }
0x1814   : > { %v8908_v41 = vpop.f32.mrf.mxu1  ;;  %v8936_v36 = vpop.f32.mrf.mxu0 }
0x1815   : > { %v7226_v57 = vadd.f32 %v8935_v53, %v8907_v20 }
0x1816   : > { %v8909_v26 = vpop.f32.mrf.mxu1  ;;  %v8937_v28 = vpop.f32.mrf.mxu0 }
0x1817   : > { %v7240_v1 = vadd.f32 %v7226_v57, %v11667_v58  ;;  %v8910_v33 = vadd.f32 %v8909_v26, %v8908_v41  ;;  %v8938_v2 = vadd.f32 %v8937_v28, %v8936_v36 }
0x1818   : > { %v8911_v38 = vpop.f32.mrf.mxu1  ;;  %v8939_v11 = vpop.f32.mrf.mxu0 }
0x1819   : > { %v7229_v12 = vadd.f32 %v8938_v2, %v8910_v33  ;;  %v7244_v61 = vadd.f32 %v7240_v1, %v11050_v32 }
0x181a   : > { %v8912_v49 = vpop.f32.mrf.mxu1  ;;  %v8940_v31 = vpop.f32.mrf.mxu0 }
0x181b   : > { %v7241_v3 = vadd.f32 %v7229_v12, %v11670_v4  ;;  %v8913_v8 = vadd.f32 %v8912_v49, %v8911_v38  ;;  %v8941_v21 = vadd.f32 %v8940_v31, %v8939_v11  ;;  %v7253_v56 = vadd.f32 %v8372_v30, %v7244_v61  ;;  %v8373_v11 = vld [vmem:[%s11791_s4 + $0x18] ss:$0 sm:$0xff]  ;;  %v8374_v12 = vld [vmem:[%s11791_s4 + $0x19] ss:$0 sm:$0xff] }
0x181c   : > { %v8914_v48 = vpop.f32.mrf.mxu1  ;;  %v8942_v58 = vpop.f32.mrf.mxu0 }
0x181d   : > { %v7234_v55 = vadd.f32 %v8941_v21, %v8913_v8  ;;  %v7259_v9 = vsel %vm403_vm0, %v7253_v56, 0.0  ;;  %v7245_v59 = vadd.f32 %v7241_v3, %v11053_v35 }
0x181e   : > { %v8915_v29 = vpop.f32.mrf.mxu1  ;;  %v8943_v27 = vpop.f32.mrf.mxu0  ;;  %7260 = vadd.xlane.f32.xlu0 %v7259_v9 }
0x181f   : > { %v7242_v44 = vadd.f32 %v7234_v55, %v11673_v6  ;;  %v8916_v32 = vadd.f32 %v8915_v29, %v8914_v48  ;;  %v8944_v50 = vadd.f32 %v8943_v27, %v8942_v58  ;;  %v7254_v34 = vadd.f32 %v8372_v30, %v7245_v59 }
0x1821   : > { %v7237_v19 = vadd.f32 %v8944_v50, %v8916_v32  ;;  %v7262_v4 = vsel %vm403_vm0, %v7254_v34, 0.0  ;;  %v7246_v18 = vadd.f32 %v7242_v44, %v11082_v51 }
0x1822   : > { %7263 = vadd.xlane.f32.xlu1 %v7262_v4 }
0x1823   : > { %v7243_v25 = vadd.f32 %v7237_v19, %v11683_v0  ;;  %v7255_v52 = vadd.f32 %v8372_v30, %v7246_v18 }
0x1825   : > { %v7265_v16 = vsel %vm403_vm0, %v7255_v52, 0.0  ;;  %v7247_v35 = vadd.f32 %v7243_v25, %v11074_v45 }
0x1826   : > { %7266 = vadd.xlane.f32.xlu0 %v7265_v16 }
0x1827   : > { %v7256_v42 = vadd.f32 %v8372_v30, %v7247_v35 }
0x1829   : > { %v7268_v6 = vsel %vm403_vm0, %v7256_v42, 0.0 }
0x182a   : > { %7269 = vadd.xlane.f32.xlu1 %v7268_v6 }
0x18a7   : > { %v7261_v63 = vpop.xlane.xlu0 %7260 }
0x18a8   : > { %v7271_v47 = vmul.f32 0.03125, %v7261_v63 }
0x18aa   : > { %v7275_v24 = vsub.f32 %v7253_v56, %v7271_v47 }
0x18ab   : > { %v7264_v46 = vpop.xlane.xlu1 %7263 }
0x18ac   : > { %v7272_v7 = vmul.f32 0.03125, %v7264_v46  ;;  %v7279_v60 = vmul.f32 %v7275_v24, %v7275_v24 }
0x18ae   : > { %v7276_v51 = vsub.f32 %v7254_v34, %v7272_v7  ;;  %v7283_v54 = vsel %vm403_vm0, %v7279_v60, 0.0 }
0x18af   : > { %7284 = vadd.xlane.f32.xlu0 %v7283_v54  ;;  %v7267_v0 = vpop.xlane.xlu0 %7266 }
0x18b0   : > { %v7273_v43 = vmul.f32 0.03125, %v7267_v0  ;;  %v7280_v14 = vmul.f32 %v7276_v51, %v7276_v51 }
0x18b2   : > { %v7277_v23 = vsub.f32 %v7255_v52, %v7273_v43  ;;  %v7286_v45 = vsel %vm403_vm0, %v7280_v14, 0.0 }
0x18b3   : > { %7287 = vadd.xlane.f32.xlu1 %v7286_v45  ;;  %v7270_v40 = vpop.xlane.xlu1 %7269  ;;  %v9474_v45 = vld [vmem:[%s11795_s8] sm:$0xff]  }
0x18b4   : > { %v7274_v22 = vmul.f32 0.03125, %v7270_v40  ;;  %v7281_v13 = vmul.f32 %v7277_v23, %v7277_v23 }
0x18b6   : > { %v7278_v62 = vsub.f32 %v7256_v42, %v7274_v22  ;;  %v7289_v39 = vsel %vm403_vm0, %v7281_v13, 0.0 }
0x18b7   : > { %7290 = vadd.xlane.f32.xlu0 %v7289_v39 }
0x18b8   : > { %v7282_v15 = vmul.f32 %v7278_v62, %v7278_v62 }
0x18ba   : > { %v7292_v37 = vsel %vm403_vm0, %v7282_v15, 0.0 }
0x18bb   : > { %7293 = vadd.xlane.f32.xlu1 %v7292_v37 }
0x1938   : > { %v7285_v17 = vpop.xlane.xlu0 %7284 }
0x1939   : > { %v7295_v10 = vmul.f32 0.03125, %v7285_v17 }
0x193b   : > { %v7299_v20 = vadd.f32 1e-05, %v7295_v10 }
0x193c   : > { %v7288_v53 = vpop.xlane.xlu1 %7287 }
0x193d   : > { %9565 = vrsqrt.f32 %v7299_v20  ;;  %v7296_v41 = vmul.f32 0.03125, %v7288_v53 }
0x193f   : > { %v7300_v36 = vadd.f32 1e-05, %v7296_v41 }
0x1940   : > { %v7291_v57 = vpop.xlane.xlu0 %7290 }
0x1941   : > { %9567 = vrsqrt.f32 %v7300_v36  ;;  %v7297_v26 = vmul.f32 0.03125, %v7291_v57  ;;  %v8375_v36 = vld [vmem:[%s11791_s4 + $0x1a] ss:$0 sm:$0xff] }
0x1943   : > { %v7301_v28 = vadd.f32 1e-05, %v7297_v26  ;;  %v8376_v26 = vld [vmem:[%s11791_s4 + $0x1b] ss:$0 sm:$0xff] }
0x1944   : > { %v7294_v1 = vpop.xlane.xlu1 %7293 }
0x1945   : > { %9569 = vrsqrt.f32 %v7301_v28  ;;  %v7298_v33 = vmul.f32 0.03125, %v7294_v1 }
0x1947   : > { %v7302_v2 = vadd.f32 1e-05, %v7298_v33 }
0x1949   : > { %9571 = vrsqrt.f32 %v7302_v2 }
0x194a   : > { %v9566_v38 = vpop.eup %9565 }
0x194b   : > { %v7307_v30 = vmul.f32 %v9566_v38, %v7275_v24 }
0x194d   : > { %v7315_v61 = vmul.f32 %v8373_v11, %v7307_v30 }
0x194e   : > { %v9568_v49 = vpop.eup %9567 }
0x194f   : > { %v7323_v31 = vadd.f32 %v8374_v12, %v7315_v61  ;;  %v7308_v3 = vmul.f32 %v9568_v49, %v7276_v51 }
0x1951   : > { %v7329_v8 = vsel %vm403_vm0, %v7323_v31, 0.0  ;;  %v7316_v21 = vmul.f32 %v8373_v11, %v7308_v3 }
0x1952   : > { %v9570_v56 = vpop.eup %9569  ;;  %7330 = vadd.xlane.f32.xlu0 %v7329_v8 }
0x1953   : > { %v7324_v48 = vadd.f32 %v8374_v12, %v7316_v21  ;;  %v7309_v58 = vmul.f32 %v9570_v56, %v7277_v23  ;;  %v9473_v23 = vld [vmem:[%s11795_s8 + $0x8] sm:$0xff]  }
0x1954   : > { %9149 = vmatpush3.bf16.msra.mxu1 %v9473_v23 }
0x1955   : > { %v7332_v55 = vsel %vm403_vm0, %v7324_v48, 0.0  ;;  %v7317_v9 = vmul.f32 %v8373_v11, %v7309_v58  ;;  %9150 = vmatprep.subr.bf16.mxu1 %v9646_v5 }
0x1956   : > { %v9572_v59 = vpop.eup %9571  ;;  %7333 = vadd.xlane.f32.xlu1 %v7332_v55 }
0x1957   : > { %v7325_v29 = vadd.f32 %v8374_v12, %v7317_v9  ;;  %v7310_v27 = vmul.f32 %v9572_v59, %v7278_v62 }
0x1958   : > { %9151 = vmatpush3.bf16.msra.mxu1 %v9474_v45 }
0x1959   : > { %v7335_v44 = vsel %vm403_vm0, %v7325_v29, 0.0  ;;  %v7318_v32 = vmul.f32 %v8373_v11, %v7310_v27 }
0x195a   : > { %7336 = vadd.xlane.f32.xlu0 %v7335_v44 }
0x195b   : > { %v7326_v50 = vadd.f32 %v8374_v12, %v7318_v32 }
0x195d   : > { %v7338_v34 = vsel %vm403_vm0, %v7326_v50, 0.0 }
0x195e   : > { %7339 = vadd.xlane.f32.xlu1 %v7338_v34 }
0x19db   : > { %v7331_v19 = vpop.xlane.xlu0 %7330 }
0x19dc   : > { %v7341_v4 = vmul.f32 0.03125, %v7331_v19 }
0x19de   : > { %v7345_v18 = vsub.f32 %v7323_v31, %v7341_v4 }
0x19df   : > { %v7334_v25 = vpop.xlane.xlu1 %7333 }
0x19e0   : > { %v7342_v52 = vmul.f32 0.03125, %v7334_v25  ;;  %v7349_v16 = vmul.f32 %v7345_v18, %v7345_v18 }
0x19e2   : > { %v7346_v35 = vsub.f32 %v7324_v48, %v7342_v52  ;;  %v7353_v42 = vsel %vm403_vm0, %v7349_v16, 0.0 }
0x19e3   : > { %7354 = vadd.xlane.f32.xlu0 %v7353_v42  ;;  %v7337_v6 = vpop.xlane.xlu0 %7336 }
0x19e4   : > { %v7343_v63 = vmul.f32 0.03125, %v7337_v6  ;;  %v7350_v47 = vmul.f32 %v7346_v35, %v7346_v35 }
0x19e6   : > { %v7347_v24 = vsub.f32 %v7325_v29, %v7343_v63  ;;  %v7356_v46 = vsel %vm403_vm0, %v7350_v47, 0.0 }
0x19e7   : > { %7357 = vadd.xlane.f32.xlu1 %v7356_v46  ;;  %v7340_v7 = vpop.xlane.xlu1 %7339 }
0x19e8   : > { %v7344_v60 = vmul.f32 0.03125, %v7340_v7  ;;  %v7351_v51 = vmul.f32 %v7347_v24, %v7347_v24 }
0x19ea   : > { %v7348_v54 = vsub.f32 %v7326_v50, %v7344_v60  ;;  %v7359_v0 = vsel %vm403_vm0, %v7351_v51, 0.0 }
0x19eb   : > { %7360 = vadd.xlane.f32.xlu0 %v7359_v0 }
0x19ec   : > { %v7352_v43 = vmul.f32 %v7348_v54, %v7348_v54 }
0x19ee   : > { %v7362_v14 = vsel %vm403_vm0, %v7352_v43, 0.0 }
0x19ef   : > { %7363 = vadd.xlane.f32.xlu1 %v7362_v14 }
0x1a6c   : > { %v7355_v40 = vpop.xlane.xlu0 %7354 }
0x1a6d   : > { %v7365_v22 = vmul.f32 0.03125, %v7355_v40 }
0x1a6f   : > { %v7369_v13 = vadd.f32 1e-05, %v7365_v22 }
0x1a70   : > { %v7358_v62 = vpop.xlane.xlu1 %7357 }
0x1a71   : > { %9573 = vrsqrt.f32 %v7369_v13  ;;  %v7366_v39 = vmul.f32 0.03125, %v7358_v62 }
0x1a73   : > { %v7370_v15 = vadd.f32 1e-05, %v7366_v39 }
0x1a74   : > { %v7361_v37 = vpop.xlane.xlu0 %7360 }
0x1a75   : > { %9575 = vrsqrt.f32 %v7370_v15  ;;  %v7367_v17 = vmul.f32 0.03125, %v7361_v37 }
0x1a77   : > { %v7371_v10 = vadd.f32 1e-05, %v7367_v17 }
0x1a78   : > { %v7364_v20 = vpop.xlane.xlu1 %7363 }
0x1a79   : > { %9577 = vrsqrt.f32 %v7371_v10  ;;  %v7368_v53 = vmul.f32 0.03125, %v7364_v20 }
0x1a7b   : > { %v7372_v5 = vadd.f32 1e-05, %v7368_v53  ;;  %v8377_v53 = vld [vmem:[%s11796_s9] ss:$0 sm:$0xff] }
0x1a7d   : > { %9579 = vrsqrt.f32 %v7372_v5 }
0x1a7e   : > { %v9574_v41 = vpop.eup %9573 }
0x1a7f   : > { %v7377_v57 = vmul.f32 %v9574_v41, %v7345_v18 }
0x1a81   : > { %v7385_v28 = vmul.f32 %v8375_v36, %v7377_v57 }
0x1a82   : > { %v9576_v1 = vpop.eup %9575 }
0x1a83   : > { %v7393_v33 = vadd.f32 %v8376_v26, %v7385_v28  ;;  %v7378_v2 = vmul.f32 %v9576_v1, %v7346_v35 }
0x1a85   : > { %v7397_v38 = vsel %vm403_vm0, %v7393_v33, 0.0  ;;  %v7386_v11 = vmul.f32 %v8375_v36, %v7378_v2 }
0x1a86   : > { %v9578_v30 = vpop.eup %9577  ;;  %v7398_v12 = vrot.slane %v7397_v38, 4 }
0x1a87   : > { %v7394_v61 = vadd.f32 %v8376_v26, %v7386_v11  ;;  %v7379_v49 = vmul.f32 %v9578_v30, %v7347_v24 }
0x1a88   : > { %v7399_v31 = vadd.f32 %v7398_v12, %v7397_v38 }
0x1a89   : > { %v7404_v3 = vsel %vm403_vm0, %v7394_v61, 0.0  ;;  %v7387_v8 = vmul.f32 %v8375_v36, %v7379_v49 }
0x1a8a   : > { %v9580_v21 = vpop.eup %9579  ;;  %v7400_v56 = vrot.slane %v7399_v31, 2  ;;  %v7405_v48 = vrot.slane %v7404_v3, 4 }
0x1a8b   : > { %v7395_v58 = vadd.f32 %v8376_v26, %v7387_v8  ;;  %v7380_v55 = vmul.f32 %v9580_v21, %v7348_v54 }
0x1a8c   : > { %v7401_v9 = vadd.f32 %v7400_v56, %v7399_v31  ;;  %v7406_v59 = vadd.f32 %v7405_v48, %v7404_v3 }
0x1a8d   : > { %v7411_v29 = vsel %vm403_vm0, %v7395_v58, 0.0  ;;  %v7388_v27 = vmul.f32 %v8375_v36, %v7380_v55 }
0x1a8e   : > { %v7407_v44 = vrot.slane %v7406_v59, 2  ;;  %v7412_v32 = vrot.slane %v7411_v29, 4  ;;  %v7402_v34 = vrot.slane %v7401_v9, 1 }
0x1a8f   : > { %v7396_v50 = vadd.f32 %v8376_v26, %v7388_v27 }
0x1a90   : > { %v7408_v19 = vadd.f32 %v7407_v44, %v7406_v59  ;;  %v7413_v4 = vadd.f32 %v7412_v32, %v7411_v29  ;;  %v7403_v35 = vadd.f32 %v7402_v34, %v7401_v9 }
0x1a91   : > { %v7418_v18 = vsel %vm403_vm0, %v7396_v50, 0.0 }
0x1a92   : > { %v7409_v25 = vrot.slane %v7408_v19, 1  ;;  %v7414_v52 = vrot.slane %v7413_v4, 2  ;;  %v7419_v16 = vrot.slane %v7418_v18, 4  ;;  %v7425_v7 = vmul.f32 0.125, %v7403_v35 }
0x1a94   : > { %v7410_v42 = vadd.f32 %v7409_v25, %v7408_v19  ;;  %v7415_v6 = vadd.f32 %v7414_v52, %v7413_v4  ;;  %v7420_v63 = vadd.f32 %v7419_v16, %v7418_v18  ;;  %v7429_v14 = vpack.c.bf16 %v7425_v7, %v7425_v7 }
0x1a96   : > { %v7426_v47 = vmul.f32 0.125, %v7410_v42  ;;  %v7416_v24 = vrot.slane %v7415_v6, 1  ;;  %v7421_v46 = vrot.slane %v7420_v63, 2  ;;  %v7448_v62 = vunpack.c.l.b16 %v7429_v14 }
0x1a98   : > { %v7417_v60 = vadd.f32 %v7416_v24, %v7415_v6  ;;  %v7422_v51 = vadd.f32 %v7421_v46, %v7420_v63  ;;  %v7430_v54 = vpack.c.bf16 %v7426_v47, %v7426_v47 }
0x1a9a   : > { %v7427_v0 = vmul.f32 0.125, %v7417_v60  ;;  %v7423_v43 = vrot.slane %v7422_v51, 1  ;;  %v7449_v40 = vunpack.c.l.b16 %v7430_v54 }
0x1a9c   : > { %v7431_v23 = vpack.c.bf16 %v7427_v0, %v7427_v0  ;;  %v7424_v45 = vadd.f32 %v7423_v43, %v7422_v51  ;;  %v7453_v37 = vsel %vm7452_vm4, %v7449_v40, %v7448_v62 }
0x1a9e   : > { %v7428_v22 = vmul.f32 0.125, %v7424_v45  ;;  %v7450_v13 = vunpack.c.l.b16 %v7431_v23 }
0x1aa0   : > { %v7432_v39 = vpack.c.bf16 %v7428_v22, %v7428_v22  ;;  %v7455_v17 = vsel %vm7454_vm5, %v7450_v13, %v7453_v37 }
0x1aa2   : > { %v7451_v15 = vunpack.c.l.b16 %v7432_v39 }
0x1aa4   : > { %v7457_v10 = vsel %vm7456_vm6, %v7451_v15, %v7455_v17 }
0x1aa5   : > { %v7458_v20 = vpack.c.b16 %v7457_v10, %v7457_v10 }
0x1aa7   : > { %9153 = vmatmul.mubr.msk.bf16.vlgmr.msra.gmra.mxu1 %vm403_vm0, %v7458_v20 }
0x1b67   : > { %v7508_v5 = vpop.f32.mrf.mxu1 }
0x1b68   : > { %v7509_v41 = vadd.f32 %v8377_v53, %v7508_v5 }
0x1b69   : > { %v9154_v36 = vpop.f32.mrf.mxu1 }
0x1b6a   : > { %7515 = vst.msk [vmem:[%s353_s27] sm:$0xf] %vm7514_vm7, %v7509_v41 }
0x1b6b   : > { %v7511_v57 = vpop.f32.mrf.mxu1 }
0x1b6c   : > { %9596 = shalt.err (!%p9593_p3)
}
0x1b6d   : > { %s9597_s21 = scalar_lea.hbm %s11746_s18, 64  ;;  %s9601_s29 = scalar_lea.hbm %s11797_s10, 128 }
0x1b6e   : > { %p9598_p4 = scmp.ne.s32.totalorder %s11746_s18, %s9597_s21  ;;  %p9602_p9 = scmp.lt.s32.totalorder %s11746_s18, %s11797_s10 }
0x1b6f   : > { %p9603_p10 = scmp.lt.s32.totalorder %s9601_s29, %s9597_s21 }
0x1b70   : > { %p9599_p7 = pnand %p9598_p4, %p9745_p5 }
0x1b71   : > { %p9604_p11 = por %p9603_p10, %p9602_p9 }
0x1b72   : > { %p9600_p8 = pneg %p9599_p7 }
0x1b74   : > { %p9605_p12 = pnand %p9604_p11, %p9600_p8 }
0x1b76   : > { %9608 = shalt.err (!%p9605_p12)
}
0x1b77   : > { %9156 = dma.vmem_to_hbm [thread:$0]  (%p9745_p5), %s11748_s28, 64, %s11746_s18, %s7517_s20   ;;  %v9155_v26 = vpop.f32.mrf.mxu1 }
0x1b78 PF: > { %p9162_p13 = scmp.ge.s32.totalorder %s9643_s16, 2  ;;  %s7542_s17 = sand.u32 1, %s9631_s13  }
0x1b79   : > { %s7543_s26 = scalar_lea.sflag [#allocation3], %s7542_s17 }
0x1b7a   : > { %p9159_p0 = pnand %p9162_p13, %p9749_p6 }
0x1b7c   : > { %p9160_p1 = pneg %p9159_p0 }
0x1b7e   : > { %9626 = dma.done.wait (%p9160_p1), %s7543_s26, 64  }
0x1b7f   : > { %9628 = vsyncadd (%p9160_p1), %s7543_s26, 4294967232  ;;  %p20_p2 = scmp.ge.s32.totalorder %s9732_s19, 4   ;;  %s11812_s13 = smov %s9635_s14 }
0x1b80   : > { %s11813_s14 = smov %s9639_s15  ;;  %s11814_s15 = smov %s9743_s22 }
0x1b81   : > { %s11815_s16 = smov %s9732_s19  ;;  %22 = sbr.rel (!%p20_p2) target bundleno = 3 (0x3), region = 108 }
0x1b86   :  { %7548 = vsyncpa [#allocation3], 1 }
0x1b87   :  { %7550 = vsyncpa [#allocation3 + $0x1], 1 }

// kernel: tpu_custom_call.1
= control target key start
LH: loop header
LB: loop body
LE: loop exit
PB: predicated region body
PF: predicated region fallthrough
CT: control target
= control target key end

     0   :  { %15 = vsyncpa [#allocation3], 0  ;;  %s11787_s0 = inlined_call_operand.vmem [shape: bf16[8,8,32], index: 0, kind: input, shape index: {}]   ;;  %s11788_s1 = inlined_call_operand.vmem [shape: bf16[2,32,96], index: 1, kind: input, shape index: {}]   ;;  %s11789_s2 = inlined_call_operand.vmem [shape: bf16[32,64], index: 2, kind: input, shape index: {}]   ;;  %s11790_s3 = inlined_call_operand.vmem [shape: bf16[4,32,32], index: 3, kind: input, shape index: {}]   ;;  %s11791_s4 = inlined_call_operand.vmem [shape: f32[28,32], index: 4, kind: input, shape index: {}]   ;;  %s11792_s5 = inlined_call_operand.vmem [shape: bf16[2,32,2048], index: 5, kind: input, shape index: {}]   ;;  %s11793_s6 = inlined_call_operand.vmem [shape: f32[2,2048], index: 6, kind: input, shape index: {}]   ;;  %s11794_s7 = inlined_call_operand.vmem [shape: bf16[2,2048,32], index: 7, kind: input, shape index: {}]   ;;  %s11795_s8 = inlined_call_operand.vmem [shape: bf16[32,16], index: 8, kind: input, shape index: {}]   ;;  %s11796_s9 = inlined_call_operand.vmem [shape: f32[1,16], index: 9, kind: input, shape index: {}]   ;;  %s11797_s10 = inlined_call_operand.hbm [shape: f32[2,4,16], index: 10, kind: output, shape index: {}]  }
   0x1   :  { %17 = vsyncpa [#allocation3 + $0x1], 0  ;;  %s9707_s13 = smov 0   ;;  %s9709_s14 = smov 0  }
   0x2   :  { %s9711_s15 = smov 0   ;;  %s9713_s16 = smov 0  }
   0x3 LB: > { %s9728_s17 = sadd.s32 4294967295, %s9643_s16   ;;  %s7589_s18 = sadd.s32 4294967294, %s9643_s16   ;;  %s9643_s16 = sphi %s9713_s16, %s11815_s16   ;;  %s9639_s15 = sphi %s9711_s15, %s11814_s15   ;;  %s9635_s14 = sphi %s9709_s14, %s11813_s14   ;;  %s9631_s13 = sphi %s9707_s13, %s11812_s13  }
   0x4   : > { %s9732_s19 = sadd.s32 1, %s9643_s16   ;;  %s245_s20 = sadd.s32 1, %s9639_s15 }
   0x5   : > { %s242_s21 = ssub.s32 %s9643_s16, %s9732_s19  ;;  %p255_p0 = scmp.ne.s32.totalorder %s9639_s15, %s9635_s14 }
   0x6   : > { %p243_p1 = scmp.eq.s32.totalorder %s242_s21, 0  ;;  %p256_p2 = scmp.eq.s32.totalorder %s9728_s17, 1 }
   0x7   : > { %p261_p3 = scmp.ne.s32.totalorder %s9635_s14, %s9631_s13  ;;  %p262_p4 = scmp.eq.s32.totalorder %s7589_s18, 1 }
   0x8   : > { %s9743_s22 = scalar_select %p243_p1, %s9639_s15, %s245_s20  }
   0x9   : > { %p9745_p5 = por %p256_p2, %p255_p0  ;;  %p9749_p6 = por %p262_p4, %p261_p3 }
   0xa   : > { %p7592_p7 = scmp.ge.s32.totalorder %s9643_s16, 1  ;;  %p316_p8 = scmp.lt.s32.totalorder %s9643_s16, 3 }
   0xc   : > { %p317_p9 = pnand %p7592_p7, %p316_p8 }
   0xd   : > { %s7594_s27 = sshll.u32 (!%p317_p9), %s9728_s17, 2  ;;  %s9645_s12 = smov (!%p317_p9), 32  }
   0xe   : > { %320 = sbr.rel (%p317_p9) target bundleno = 7032 (0x1b78), region = 60  ;;  %p355_p10 = scmp.lt.s32.totalorder (!%p317_p9), %s7594_s27, 7 }
   0xf   : > { %s11800_s26 = smov (!%p317_p9), 96   ;;  %s11798_s11 = smov (!%p317_p9), 64  }
  0x10   : > { %s8382_s21 = sshll.u32 (!%p317_p9), %s9728_s17, 6 }
  0x13   : > { %v9201_v0 = vld [vmem:[%s11788_s1 + $0x8] sm:$0xff]   ;;  %v9202_v1 = vld [vmem:[%s11788_s1] sm:$0xff]   ;;  %s11817_s27 = smov (!%p355_p10, %s7594_s27), 7  ;;  %vm403_vm0 = vcmask 261120   ;;  %v9646_v5 = vmov 0.0   ;;  %vm9647_vm1 = vmmov 0  }
  0x14   : > { %8948 = vmatprep.subr.bf16.mxu0 %v9201_v0  ;;  %v7603_v2 = vld [vmem:[%s11791_s4 + $0x1] ss:$0 sm:$0xff]  ;;  %s7595_s18 = sshll.u32 %s11817_s27, 2  ;;  %8956 = vmatprep.subr.bf16.mxu1 %v9646_v5  ;;  %v7602_v21 = vld [vmem:[%s11791_s4] ss:$0 sm:$0xff]  ;;  %vm715_vm2 = vcmask 64512  }
  0x15   : > { %8949 = vmatpush3.bf16.msra.mxu0 %v9201_v0  ;;  %472 = vrot.lane.b32.xlu0 %v7603_v2, %s9645_s12  ;;  %s9769_s25 = scalar_lea.vmem %s11787_s0, %s7595_s18  ;;  %v7604_v56 = vld [vmem:[%s11791_s4 + $0x2] ss:$0 sm:$0xff]  ;;  %vm770_vm3 = vcmask 1043456   ;;  %vm7452_vm4 = vcmask 1041409   ;;  %vm7454_vm5 = vcmask 1042434   ;;  %vm7456_vm6 = vcmask 1043459   ;;  %s11746_s18 = scalar_lea.hbm %s11797_s10, %s8382_s21 }
  0x16   : > { %8950 = vmatprep.subr.bf16.mxu0 %v9202_v1  ;;  %v9772_v3 = vld [vmem:[%s9769_s25] sm:$0xff]   ;;  %v9775_v4 = vld [vmem:[%s9769_s25 + $0x8] sm:$0xff]   ;;  %8958 = vmatprep.mubr.msk.bf16.mxu1 %vm9647_vm1, %v9646_v5  ;;  %vm7514_vm7 = vcmask 125952  }
  0x17   : > { %8952 = vmatprep.mubr.msk.bf16.mxu0 %vm403_vm0, %v9772_v3 }
  0x19   : > { %8951 = vmatpush3.bf16.msra.mxu0 %v9202_v1 }
  0x1a   : > { %8962 = vmatprep.subr.bf16.mxu0 %v9646_v5 }
  0x1c   : > { %8953 = vmatmul.mubr.msk.bf16.vlgmr.msra.gmra.mxu0 %vm403_vm0, %v9775_v4 }
  0x1d   : > { %8964 = vmatprep.mubr.msk.bf16.mxu0 %vm9647_vm1, %v9646_v5 }
  0x87   : > { %v473_v7 = vpop.permute.xlu0 %472 }
  0xdc   : > { %v9783_v6 = vpop.f32.mrf.mxu0 }
  0xdd   : > { %v477_v15 = vadd.f32 %v9783_v6, %v473_v7  ;;  %v465_v30 = vadd.f32 %v9783_v6, %v7602_v21 }
  0xde   : > { %v9789_v8 = vpop.f32.mrf.mxu0 }
  0xdf   : > { %v475_v9 = vadd.f32 %v473_v7, %v9789_v8  ;;  %v8391_v18 = vpack.c.bf16 %v477_v15, %v477_v15  ;;  %v463_v22 = vadd.f32 %v7602_v21, %v9789_v8  ;;  %v8387_v33 = vpack.c.bf16 %v465_v30, %v465_v30 }
  0xe0   : > { %v9792_v10 = vpop.f32.mrf.mxu0 }
  0xe1   : > { %v478_v11 = vadd.f32 %v9792_v10, %v473_v7  ;;  %v8389_v12 = vpack.c.bf16 %v475_v9, %v475_v9  ;;  %v8385_v25 = vpack.c.bf16 %v463_v22, %v463_v22  ;;  %v466_v34 = vadd.f32 %v9792_v10, %v7602_v21 }
  0xe2   : > { %v9795_v13 = vpop.f32.mrf.mxu0 }
  0xe3   : > { %520 = vrot.lane.b32.xlu0 %v8389_v12, %s11800_s26  ;;  %v476_v14 = vadd.f32 %v473_v7, %v9795_v13  ;;  %v8392_v16 = vpack.c.bf16 %v478_v11, %v478_v11  ;;  %v464_v26 = vadd.f32 %v7602_v21, %v9795_v13  ;;  %v8388_v35 = vpack.c.bf16 %v466_v34, %v466_v34 }
  0xe5   : > { %v8390_v17 = vpack.c.bf16 %v476_v14, %v476_v14  ;;  %v8386_v31 = vpack.c.bf16 %v464_v26, %v464_v26 }
  0xe7   : > { %667 = vrot.lane.b32.xlu0 %v8392_v16, %s11800_s26  ;;  %569 = vrot.lane.b32.xlu1 %v8390_v17, %s11800_s26 }
  0xeb   : > { %618 = vrot.lane.b32.xlu1 %v8391_v18, %s11800_s26 }
 0x155   : > { %v521_v19 = vpop.permute.xlu0 %520 }
 0x156   : > { %v526_v20 = vsel %vm403_vm0, %v521_v19, 0 }
 0x157   : > { %8957 = vmatpush3.bf16.xpose.msra.mxu1 %v526_v20 }
 0x158   : > { %8968 = vmatprep.subr.bf16.mxu1 %v9646_v5 }
 0x159   : > { %v570_v23 = vpop.permute.xlu1 %569  ;;  %v668_v29 = vpop.permute.xlu0 %667 }
 0x15a   : > { %v575_v24 = vsel %vm403_vm0, %v570_v23, 0  ;;  %v673_v32 = vsel %vm403_vm0, %v668_v29, 0 }
 0x15b   : > { %8963 = vmatpush3.bf16.xpose.msra.mxu0 %v575_v24 }
 0x15c   : > { %8974 = vmatprep.subr.bf16.mxu0 %v9646_v5 }
 0x15d   : > { %v619_v27 = vpop.permute.xlu1 %618 }
 0x15e   : > { %v624_v28 = vsel %vm403_vm0, %v619_v27, 0  ;;  %8959 = vmatmul.mubr.msk.bf16.vlgmr.msra.gmra.mxu1 %vm403_vm0, %v8385_v25 }
 0x15f   : > { %8969 = vmatpush3.bf16.xpose.msra.mxu1 %v624_v28  ;;  %8970 = vmatprep.mubr.msk.bf16.mxu1 %vm9647_vm1, %v9646_v5 }
 0x160   : > { %8980 = vmatprep.subr.bf16.mxu1 %v9646_v5 }
 0x162   : > { %8965 = vmatmul.mubr.msk.bf16.vlgmr.msra.gmra.mxu0 %vm403_vm0, %v8386_v31 }
 0x163   : > { %8975 = vmatpush3.bf16.xpose.msra.mxu0 %v673_v32  ;;  %8976 = vmatprep.mubr.msk.bf16.mxu0 %vm9647_vm1, %v9646_v5 }
 0x164   : > { %8986 = vmatprep.subr.bf16.mxu0 %v9646_v5 }
 0x166   : > { %8971 = vmatmul.mubr.msk.bf16.vlgmr.msra.gmra.mxu1 %vm403_vm0, %v8387_v33 }
 0x167   : > { %8982 = vmatprep.mubr.msk.bf16.mxu1 %vm9647_vm1, %v9646_v5 }
 0x16a   : > { %8977 = vmatmul.mubr.msk.bf16.vlgmr.msra.gmra.mxu0 %vm403_vm0, %v8388_v35 }
 0x16b   : > { %8988 = vmatprep.mubr.msk.bf16.mxu0 %vm9647_vm1, %v9646_v5 }
 0x21e   : > { %v562_v36 = vpop.f32.mrf.mxu1 }
 0x21f   : > { %v716_v37 = vsel %vm715_vm2, %v562_v36, -inf }
 0x220   : > { %v8960_v38 = vpop.f32.mrf.mxu1  ;;  %717 = vmax.xlane.f32.xlu1 %v716_v37 }
 0x222   : > { %v565_v39 = vpop.f32.mrf.mxu1  ;;  %v611_v40 = vpop.f32.mrf.mxu0 }
 0x223   : > { %v719_v41 = vsel %vm715_vm2, %v611_v40, -inf }
 0x224   : > { %v8961_v42 = vpop.f32.mrf.mxu1  ;;  %720 = vmax.xlane.f32.xlu0 %v719_v41  ;;  %v8966_v43 = vpop.f32.mrf.mxu0 }
 0x226   : > { %v614_v44 = vpop.f32.mrf.mxu0  ;;  %v660_v45 = vpop.f32.mrf.mxu1 }
 0x227   : > { %v722_v46 = vsel %vm715_vm2, %v660_v45, -inf }
 0x228   : > { %v8972_v47 = vpop.f32.mrf.mxu1  ;;  %723 = vmax.xlane.f32.xlu0 %v722_v46  ;;  %v8967_v48 = vpop.f32.mrf.mxu0 }
 0x22a   : > { %v663_v49 = vpop.f32.mrf.mxu1  ;;  %v709_v50 = vpop.f32.mrf.mxu0 }
 0x22b   : > { %v725_v51 = vsel %vm715_vm2, %v709_v50, -inf  ;;  %v9205_v49 = vld [vmem:[%s11790_s3 + $0x8] sm:$0xff]  }
 0x22c   : > { %v8973_v52 = vpop.f32.mrf.mxu1  ;;  %726 = vmax.xlane.f32.xlu1 %v725_v51  ;;  %v8978_v53 = vpop.f32.mrf.mxu0 }
 0x22e   : > { %v712_v54 = vpop.f32.mrf.mxu0 }
 0x230   : > { %v8979_v55 = vpop.f32.mrf.mxu0 }
 0x23e   : > { %484 = vrot.lane.b32.xlu0 %v7604_v56, %s11798_s11 }
 0x2a9   : > { %v718_v57 = vpop.xlane.xlu1 %717 }
 0x2aa   : > { %v728_v58 = vsub.f32 %v562_v36, %v718_v57 }
 0x2ac   : > { %v732_v59 = vmul.f32 1.442695, %v728_v58 }
 0x2ad   : > { %v721_v60 = vpop.xlane.xlu0 %720 }
 0x2ae   : > { %9477 = vpow2.f32 %v732_v59  ;;  %v729_v61 = vsub.f32 %v611_v40, %v721_v60 }
 0x2b0   : > { %v734_v62 = vmul.f32 1.442695, %v729_v61 }
 0x2b1   : > { %v724_v63 = vpop.xlane.xlu0 %723 }
 0x2b2   : > { %9479 = vpow2.f32 %v734_v62  ;;  %v730_v0 = vsub.f32 %v660_v45, %v724_v63 }
 0x2b4   : > { %v736_v1 = vmul.f32 1.442695, %v730_v0 }
 0x2b5   : > { %v485_v2 = vpop.permute.xlu0 %484  ;;  %v727_v7 = vpop.xlane.xlu1 %726 }
 0x2b6   : > { %9481 = vpow2.f32 %v736_v1  ;;  %v731_v9 = vsub.f32 %v709_v50, %v727_v7  ;;  %v488_v11 = vadd.f32 %v485_v2, %v9795_v13  ;;  %v489_v15 = vadd.f32 %v9783_v6, %v485_v2  ;;  %v9206_v50 = vld [vmem:[%s11790_s3] sm:$0xff]  }
 0x2b7   : > { %v490_v19 = vadd.f32 %v9792_v10, %v485_v2  ;;  %v487_v10 = vadd.f32 %v485_v2, %v9789_v8 }
 0x2b8   : > { %v738_v12 = vmul.f32 1.442695, %v731_v9  ;;  %v8394_v14 = vpack.c.bf16 %v488_v11, %v488_v11  ;;  %v8395_v18 = vpack.c.bf16 %v489_v15, %v489_v15 }
 0x2b9   : > { %v8396_v13 = vpack.c.bf16 %v490_v19, %v490_v19  ;;  %v8393_v25 = vpack.c.bf16 %v487_v10, %v487_v10  ;;  %v9880_v19 = vld [vmem:[%s9769_s25 + $0x8] sm:$0xff]  }
 0x2ba   : > { %9483 = vpow2.f32 %v738_v12  ;;  %815 = vrot.lane.b32.xlu0 %v8394_v14, %s11798_s11  ;;  %v7625_v12 = vld [vmem:[%s11791_s4 + $0x3] ss:$0 sm:$0xff] }
 0x2bb   : > { %v9478_v16 = vpop.eup %9477  ;;  %v9876_v14 = vld [vmem:[%s9769_s25] sm:$0xff]   ;;  %s11807_s25 = smov 96  }
 0x2bc   : > { %v740_v17 = vsel %vm715_vm2, %v9478_v16, 0.0  ;;  %v365_v15 = vunpack.c.l.bf16 %v9876_v14 }
 0x2bd   : > { %741 = vadd.xlane.f32.xlu1 %v740_v17 }
 0x2be   : > { %864 = vrot.lane.b32.xlu0 %v8395_v18, %s11798_s11 }
 0x2bf   : > { %v9480_v20 = vpop.eup %9479 }
 0x2c0   : > { %v743_v21 = vsel %vm715_vm2, %v9480_v20, 0.0 }
 0x2c1   : > { %744 = vadd.xlane.f32.xlu1 %v743_v21 }
 0x2c2   : > { %913 = vrot.lane.b32.xlu0 %v8396_v13, %s11798_s11  ;;  %v11803_v13 = vunpack.c.h.bf16 %v9876_v14 }
 0x2c3   : > { %v9482_v6 = vpop.eup %9481 }
 0x2c4   : > { %v746_v22 = vsel %vm715_vm2, %v9482_v6, 0.0 }
 0x2c5   : > { %747 = vadd.xlane.f32.xlu1 %v746_v22 }
 0x2c7   : > { %v9484_v23 = vpop.eup %9483 }
 0x2c8   : > { %v749_v24 = vsel %vm715_vm2, %v9484_v23, 0.0 }
 0x2c9   : > { %750 = vadd.xlane.f32.xlu1 %v749_v24 }
 0x2da   : > { %765 = vrot.lane.b32.xlu1 %v8393_v25, %s11798_s11  ;;  %s11808_s11 = smov 64  }
 0x32c   : > { %v816_v26 = vpop.permute.xlu0 %815 }
 0x32d   : > { %v821_v27 = vsel %vm770_vm3, %v816_v26, 0 }
 0x32e   : > { %8987 = vmatpush3.bf16.msra.mxu0 %v821_v27 }
 0x32f   : > { %8998 = vmatprep.subr.bf16.mxu0 %v9646_v5 }
 0x330   : > { %v865_v8 = vpop.permute.xlu0 %864 }
 0x331   : > { %v870_v40 = vsel %vm770_vm3, %v865_v8, 0 }
 0x334   : > { %v914_v39 = vpop.permute.xlu0 %913 }
 0x335   : > { %v919_v43 = vsel %vm770_vm3, %v914_v39, 0 }
 0x346   : > { %v742_v28 = vpop.xlane.xlu1 %741 }
 0x347   : > { %9485 = vrcp.f32 %v742_v28 }
 0x34a   : > { %v745_v29 = vpop.xlane.xlu1 %744 }
 0x34b   : > { %9487 = vrcp.f32 %v745_v29 }
 0x34e   : > { %v748_v30 = vpop.xlane.xlu1 %747 }
 0x34f   : > { %9489 = vrcp.f32 %v748_v30 }
 0x352   : > { %v751_v31 = vpop.xlane.xlu1 %750 }
 0x353   : > { %9491 = vrcp.f32 %v751_v31 }
 0x354   : > { %v9486_v32 = vpop.eup %9485 }
 0x355   : > { %v756_v33 = vmul.f32 %v9486_v32, %v9478_v16 }
 0x356   : > { %v766_v34 = vpop.permute.xlu1 %765 }
 0x357   : > { %v772_v35 = vsel %vm770_vm3, %v766_v34, 0  ;;  %v760_v37 = vpack.c.bf16 %v756_v33, %v756_v33 }
 0x358   : > { %v9488_v36 = vpop.eup %9487  ;;  %8981 = vmatpush3.bf16.msra.mxu1 %v772_v35 }
 0x359   : > { %8992 = vmatprep.subr.bf16.mxu1 %v9646_v5  ;;  %v757_v38 = vmul.f32 %v9488_v36, %v9480_v20  ;;  %v11804_v20 = vunpack.c.l.bf16 %v9880_v19 }
 0x35b   : > { %8983 = vmatmul.mubr.msk.bf16.vlgmr.msra.gmra.mxu1 %vm715_vm2, %v760_v37  ;;  %v761_v41 = vpack.c.bf16 %v757_v38, %v757_v38 }
 0x35c   : > { %v9490_v42 = vpop.eup %9489  ;;  %8993 = vmatpush3.bf16.msra.mxu1 %v870_v40  ;;  %8994 = vmatprep.mubr.msk.bf16.mxu1 %vm9647_vm1, %v9646_v5 }
 0x35d   : > { %8989 = vmatmul.mubr.msk.bf16.vlgmr.msra.gmra.mxu0 %vm715_vm2, %v761_v41  ;;  %v758_v44 = vmul.f32 %v9490_v42, %v9482_v6  ;;  %9004 = vmatprep.subr.bf16.mxu1 %v9205_v49 }
 0x35e   : > { %8999 = vmatpush3.bf16.msra.mxu0 %v919_v43  ;;  %9000 = vmatprep.mubr.msk.bf16.mxu0 %vm9647_vm1, %v9646_v5 }
 0x35f   : > { %v762_v46 = vpack.c.bf16 %v758_v44, %v758_v44 }
 0x360   : > { %v9492_v45 = vpop.eup %9491 }
 0x361   : > { %v759_v47 = vmul.f32 %v9492_v45, %v9484_v23  ;;  %v11802_v23 = vunpack.c.h.bf16 %v9880_v19 }
 0x363   : > { %8995 = vmatmul.mubr.msk.bf16.vlgmr.msra.gmra.mxu1 %vm715_vm2, %v762_v46  ;;  %v763_v48 = vpack.c.bf16 %v759_v47, %v759_v47 }
 0x364   : > { %9005 = vmatpush3.bf16.msra.mxu1 %v9205_v49 }
 0x365   : > { %9001 = vmatmul.mubr.msk.bf16.vlgmr.msra.gmra.mxu0 %vm715_vm2, %v763_v48  ;;  %9006 = vmatprep.subr.bf16.mxu1 %v9206_v50 }
 0x368   : > { %9007 = vmatpush3.bf16.msra.mxu1 %v9206_v50 }
 0x41b   : > { %v808_v51 = vpop.f32.mrf.mxu1 }
 0x41d   : > { %v8984_v52 = vpop.f32.mrf.mxu1  ;;  %v857_v53 = vpop.f32.mrf.mxu0 }
 0x41e   : > { %v961_v54 = vpack.c.bf16 %v857_v53, %v808_v51  ;;  %v1115_v51 = vld [vmem:[%s11792_s5 + $0x80] sm:$0xff]  ;;  %v1116_v53 = vld [vmem:[%s11792_s5 + $0x88] sm:$0xff] }
 0x41f   : > { %v811_v55 = vpop.f32.mrf.mxu1  ;;  %v8990_v56 = vpop.f32.mrf.mxu0  ;;  %v1117_v52 = vld [vmem:[%s11792_s5 + $0xc0] sm:$0xff] }
 0x420   : > { %9008 = vmatprep.mubr.msk.bf16.mxu1 %vm403_vm0, %v961_v54  ;;  %v7637_v54 = vcombine.high %v1115_v51, %v1117_v52  ;;  %v1118_v55 = vld [vmem:[%s11792_s5 + $0xc8] sm:$0xff]  ;;  %v7636_v56 = vcombine.low %v1115_v51, %v1117_v52  ;;  %v1382_v51 = vld [vmem:[%s11792_s5 + $0x18] sm:$0xff] }
 0x421   : > { %v8985_v57 = vpop.f32.mrf.mxu1  ;;  %v860_v58 = vpop.f32.mrf.mxu0 }
 0x422   : > { %v7638_v57 = vcombine.low %v1116_v53, %v1118_v55  ;;  %v7639_v58 = vcombine.high %v1116_v53, %v1118_v55  ;;  %1199 = vmatprep.subr.bf16.mxu0 %v7637_v54 }
 0x423   : > { %v8991_v59 = vpop.f32.mrf.mxu0  ;;  %v906_v60 = vpop.f32.mrf.mxu1  ;;  %1200 = vmatpush1.bf16.msra.mxu0 %v7636_v56 }
 0x424   : > { %1252 = vmatprep.subr.bf16.mxu1 %v7639_v58  ;;  %v1111_v59 = vld [vmem:[%s11792_s5] sm:$0xff] }
 0x425   : > { %v8996_v61 = vpop.f32.mrf.mxu1  ;;  %v955_v62 = vpop.f32.mrf.mxu0 }
 0x426   : > { %v962_v63 = vpack.c.bf16 %v955_v62, %v906_v60  ;;  %v1113_v60 = vld [vmem:[%s11792_s5 + $0x40] sm:$0xff]  ;;  %v1112_v61 = vld [vmem:[%s11792_s5 + $0x8] sm:$0xff] }
 0x427   : > { %v909_v0 = vpop.f32.mrf.mxu1  ;;  %v9002_v1 = vpop.f32.mrf.mxu0  ;;  %v7633_v62 = vcombine.high %v1111_v59, %v1113_v60 }
 0x428   : > { %9009 = vmatmul.mubr.msk.bf16.vlgmr.msra.gmra.mxu1 %vm403_vm0, %v962_v63  ;;  %v1114_v63 = vld [vmem:[%s11792_s5 + $0x48] sm:$0xff]  ;;  %v7632_v0 = vcombine.low %v1111_v59, %v1113_v60  ;;  %v9207_v59 = vld [vmem:[%s11794_s7 + $0x178] sm:$0xff]  }
 0x429   : > { %v8997_v2 = vpop.f32.mrf.mxu1  ;;  %v958_v7 = vpop.f32.mrf.mxu0  ;;  %1253 = vmatpush1.bf16.msra.mxu1 %v7638_v57  ;;  %v7634_v1 = vcombine.low %v1112_v61, %v1114_v63  ;;  %1201 = vmatprep.subr.bf16.mxu0 %v7633_v62  ;;  %v9208_v60 = vld [vmem:[%s11794_s7 + $0x1f8] sm:$0xff]  }
 0x42a   : > { %v7635_v2 = vcombine.high %v1112_v61, %v1114_v63  ;;  %1202 = vmatpush1.bf16.msra.mxu0 %v7632_v0  ;;  %v9650_v7 = vmov 0   ;;  %v9209_v63 = vld [vmem:[%s11794_s7 + $0x138] sm:$0xff]  }
 0x42b   : > { %v9003_v9 = vpop.f32.mrf.mxu0  ;;  %1219 = vmatprep.mubr.bf16.mxu0 %v9650_v7  ;;  %1272 = vmatprep.mubr.bf16.mxu1 %v9650_v7  ;;  %v9210_v0 = vld [vmem:[%s11794_s7 + $0x1b8] sm:$0xff]  }
 0x42c   : > { %1254 = vmatprep.subr.bf16.mxu1 %v7635_v2  ;;  %v1385_v9 = vld [vmem:[%s11792_s5 + $0x90] sm:$0xff] }
 0x42d   : > { %1255 = vmatpush1.bf16.msra.mxu1 %v7634_v1  ;;  %v9211_v1 = vld [vmem:[%s11794_s7 + $0x170] sm:$0xff]  }
 0x42e   : > { %v9212_v2 = vld [vmem:[%s11794_s7 + $0x1f0] sm:$0xff]  }
 0x4e8   : > { %v9010_v11 = vpop.f32.mrf.mxu1 }
 0x4e9   : > { %v1028_v17 = vadd.f32 %v9010_v11, %v7625_v12  ;;  %v1387_v11 = vld [vmem:[%s11792_s5 + $0xd0] sm:$0xff] }
 0x4ea   : > { %v1019_v16 = vpop.f32.mrf.mxu1 }
 0x4eb   : > { %v1020_v18 = vadd.f32 %v7625_v12, %v1019_v16  ;;  %v1036_v26 = vadd.f32 %v1028_v17, %v11804_v20  ;;  %v7650_v16 = vcombine.high %v1385_v9, %v1387_v11  ;;  %v1388_v17 = vld [vmem:[%s11792_s5 + $0xd8] sm:$0xff] }
 0x4ec   : > { %v9011_v21 = vpop.f32.mrf.mxu1 }
 0x4ed   : > { %v1034_v6 = vadd.f32 %v1020_v18, %v365_v15  ;;  %v1031_v24 = vadd.f32 %v9011_v21, %v7625_v12  ;;  %v1046_v29 = vsel %vm403_vm0, %v1036_v26, 0.0  ;;  %v7649_v18 = vcombine.low %v1385_v9, %v1387_v11  ;;  %1464 = vmatprep.subr.bf16.mxu0 %v7650_v16  ;;  %v9213_v9 = vld [vmem:[%s11794_s7 + $0x130] sm:$0xff]   ;;  %v9216_v16 = vld [vmem:[%s11794_s7 + $0x1e8] sm:$0xff]  }
 0x4ee   : > { %v1022_v22 = vpop.f32.mrf.mxu1  ;;  %v9214_v11 = vld [vmem:[%s11794_s7 + $0x1b0] sm:$0xff]  }
 0x4ef   : > { %v1023_v10 = vadd.f32 %v7625_v12, %v1022_v22  ;;  %v1040_v25 = vsel %vm403_vm0, %v1034_v6, 0.0  ;;  %v1037_v30 = vadd.f32 %v1031_v24, %v11802_v23  ;;  %v1386_v12 = vld [vmem:[%s11792_s5 + $0x98] sm:$0xff] }
 0x4f0   : > { %1041 = vadd.xlane.f32.xlu0 %v1040_v25  ;;  %v7651_v21 = vcombine.low %v1386_v12, %v1388_v17 }
 0x4f1   : > { %v1035_v27 = vadd.f32 %v1023_v10, %v11803_v13  ;;  %v1049_v31 = vsel %vm403_vm0, %v1037_v30, 0.0 }
 0x4f3   : > { %v1043_v28 = vsel %vm403_vm0, %v1035_v27, 0.0 }
 0x4f4   : > { %1044 = vadd.xlane.f32.xlu1 %v1043_v28  ;;  %1047 = vadd.xlane.f32.xlu0 %v1046_v29 }
 0x4f8   : > { %1050 = vadd.xlane.f32.xlu0 %v1049_v31 }
 0x579   : > { %v1042_v32 = vpop.xlane.xlu0 %1041 }
 0x57a   : > { %v1053_v8 = vmul.f32 0.03125, %v1042_v32 }
 0x57c   : > { %v9897_v33 = vsub.f32 %v1034_v6, %v1053_v8  ;;  %v7652_v6 = vcombine.high %v1386_v12, %v1388_v17  ;;  %v9215_v12 = vld [vmem:[%s11794_s7 + $0x168] sm:$0xff]  }
 0x57d   : > { %v1045_v34 = vpop.xlane.xlu1 %1044  ;;  %v1048_v35 = vpop.xlane.xlu0 %1047  ;;  %v9217_v17 = vld [vmem:[%s11794_s7 + $0x128] sm:$0xff]  }
 0x57e   : > { %v1054_v36 = vmul.f32 0.03125, %v1045_v34  ;;  %v1055_v37 = vmul.f32 0.03125, %v1048_v35  ;;  %v1061_v38 = vmul.f32 %v9897_v33, %v9897_v33  ;;  %1517 = vmatprep.subr.bf16.mxu1 %v7652_v6  ;;  %v9220_v6 = vld [vmem:[%s11794_s7 + $0x1e0] sm:$0xff]  }
 0x580   : > { %v9901_v39 = vsub.f32 %v1035_v27, %v1054_v36  ;;  %v9903_v40 = vsub.f32 %v1036_v26, %v1055_v37  ;;  %v1065_v41 = vsel %vm403_vm0, %v1061_v38, 0.0  ;;  %v7630_v36 = vld [vmem:[%s11791_s4 + $0x5] ss:$0 sm:$0xff] }
 0x581   : > { %1066 = vadd.xlane.f32.xlu1 %v1065_v41  ;;  %v1051_v42 = vpop.xlane.xlu0 %1050 }
 0x582   : > { %v1056_v43 = vmul.f32 0.03125, %v1051_v42  ;;  %v1062_v44 = vmul.f32 %v9901_v39, %v9901_v39  ;;  %v1063_v45 = vmul.f32 %v9903_v40, %v9903_v40 }
 0x584   : > { %v9910_v46 = vsub.f32 %v1037_v30, %v1056_v43  ;;  %v1068_v47 = vsel %vm403_vm0, %v1062_v44, 0.0  ;;  %v1071_v48 = vsel %vm403_vm0, %v1063_v45, 0.0  ;;  %v7631_v43 = vld [vmem:[%s11791_s4 + $0x6] ss:$0 sm:$0xff] }
 0x585   : > { %1069 = vadd.xlane.f32.xlu0 %v1068_v47  ;;  %1072 = vadd.xlane.f32.xlu1 %v1071_v48 }
 0x586   : > { %v1064_v49 = vmul.f32 %v9910_v46, %v9910_v46 }
 0x588   : > { %v1074_v50 = vsel %vm403_vm0, %v1064_v49, 0.0 }
 0x589   : > { %1075 = vadd.xlane.f32.xlu0 %v1074_v50 }
 0x60a   : > { %v1067_v22 = vpop.xlane.xlu1 %1066 }
 0x60b   : > { %v1077_v24 = vmul.f32 0.03125, %v1067_v22  ;;  %v9221_v22 = vld [vmem:[%s11794_s7 + $0x120] sm:$0xff]  }
 0x60d   : > { %v1081_v10 = vadd.f32 1e-05, %v1077_v24  ;;  %v9222_v24 = vld [vmem:[%s11794_s7 + $0x1a0] sm:$0xff]  }
 0x60e   : > { %v1073_v25 = vpop.xlane.xlu1 %1072  ;;  %v1070_v26 = vpop.xlane.xlu0 %1069 }
 0x60f   : > { %9493 = vrsqrt.f32 %v1081_v10  ;;  %v1079_v27 = vmul.f32 0.03125, %v1073_v25  ;;  %v1078_v28 = vmul.f32 0.03125, %v1070_v26  ;;  %v9223_v10 = vld [vmem:[%s11794_s7 + $0x158] sm:$0xff]  }
 0x610   : > { %v9224_v25 = vld [vmem:[%s11794_s7 + $0x1d8] sm:$0xff]  }
 0x611   : > { %v1082_v29 = vadd.f32 1e-05, %v1078_v28  ;;  %v1083_v30 = vadd.f32 1e-05, %v1079_v27  ;;  %v9225_v26 = vld [vmem:[%s11794_s7 + $0x118] sm:$0xff]   ;;  %v9227_v28 = vld [vmem:[%s11794_s7 + $0x150] sm:$0xff]  }
 0x612   : > { %v1076_v31 = vpop.xlane.xlu0 %1075  ;;  %v9226_v27 = vld [vmem:[%s11794_s7 + $0x198] sm:$0xff]  }
 0x613   : > { %v1080_v32 = vmul.f32 0.03125, %v1076_v31  ;;  %9495 = vrsqrt.f32 %v1082_v29  ;;  %v9228_v29 = vld [vmem:[%s11794_s7 + $0x1d0] sm:$0xff]  }
 0x614   : > { %9497 = vrsqrt.f32 %v1083_v30  ;;  %v9229_v30 = vld [vmem:[%s11794_s7 + $0x110] sm:$0xff]  }
 0x615   : > { %v1084_v8 = vadd.f32 1e-05, %v1080_v32  ;;  %v9230_v31 = vld [vmem:[%s11794_s7 + $0x190] sm:$0xff]   ;;  %v9231_v32 = vld [vmem:[%s11794_s7 + $0x148] sm:$0xff]  }
 0x617   : > { %9499 = vrsqrt.f32 %v1084_v8  ;;  %v9232_v8 = vld [vmem:[%s11794_s7 + $0x1c8] sm:$0xff]  }
 0x61c   : > { %v9494_v34 = vpop.eup %9493 }
 0x61d   : > { %v1089_v35 = vmul.f32 %v9494_v34, %v9897_v33  ;;  %v1381_v33 = vld [vmem:[%s11792_s5 + $0x10] sm:$0xff]  ;;  %v9233_v34 = vld [vmem:[%s11794_s7 + $0x108] sm:$0xff]  }
 0x61f   : > { %v1097_v38 = vmul.f32 %v7630_v36, %v1089_v35  ;;  %v9234_v35 = vld [vmem:[%s11794_s7 + $0x188] sm:$0xff]  }
 0x620   : > { %v9496_v37 = vpop.eup %9495 }
 0x621   : > { %v1090_v41 = vmul.f32 %v9496_v37, %v9901_v39  ;;  %v9498_v42 = vpop.eup %9497  ;;  %v9967_v48 = vadd.f32 %v7631_v43, %v1097_v38  ;;  %v1383_v39 = vld [vmem:[%s11792_s5 + $0x50] sm:$0xff]  ;;  %v9236_v37 = vld [vmem:[%s11794_s7 + $0x1c0] sm:$0xff]  }
 0x622   : > { %v1091_v49 = vmul.f32 %v9498_v42, %v9903_v40  ;;  %v7646_v40 = vcombine.high %v1381_v33, %v1383_v39  ;;  %v7645_v57 = vcombine.low %v1381_v33, %v1383_v39  ;;  %v9237_v38 = vld [vmem:[%s11794_s7 + $0x100] sm:$0xff]   ;;  %v9239_v42 = vld [vmem:[%s11794_s7 + $0x78] sm:$0xff]  }
 0x623   : > { %v1098_v45 = vmul.f32 %v7630_v36, %v1090_v41  ;;  %v9238_v41 = vld [vmem:[%s11794_s7 + $0x180] sm:$0xff]  }
 0x624   : > { %v9500_v44 = vpop.eup %9499  ;;  %v1099_v55 = vmul.f32 %v7630_v36, %v1091_v49 }
 0x625   : > { %v1092_v47 = vmul.f32 %v9500_v44, %v9910_v46  ;;  %v9970_v50 = vadd.f32 %v7631_v43, %v1098_v45  ;;  %v1384_v46 = vld [vmem:[%s11792_s5 + $0x58] sm:$0xff] }
 0x626   : > { %v7648_v54 = vcombine.high %v1382_v51, %v1384_v46  ;;  %v7647_v58 = vcombine.low %v1382_v51, %v1384_v46  ;;  %v9999_v61 = vadd.f32 %v7631_v43, %v1099_v55 }
 0x627   : > { %v9983_v52 = vpack.c.bf16 %v9970_v50, %v9967_v48  ;;  %v1100_v53 = vmul.f32 %v7630_v36, %v1092_v47  ;;  %v9235_v36 = vld [vmem:[%s11794_s7 + $0x140] sm:$0xff]  }
 0x629   : > { %7640 = vmatmul.mubr.msk.bf16.vlgmr.msra.gmra.mxu0 %vm403_vm0, %v9983_v52  ;;  %7642 = vmatmul.mubr.msk.bf16.vlgmr.msra.gmra.mxu1 %vm403_vm0, %v9983_v52  ;;  %v9991_v56 = vadd.f32 %v7631_v43, %v1100_v53  ;;  %v9240_v43 = vld [vmem:[%s11794_s7 + $0xf8] sm:$0xff]   ;;  %v1121_v53 = vlaneseq }
 0x62a   : > { %1229 = vmatprep.mubr.bf16.mxu0 %v9650_v7  ;;  %1282 = vmatprep.mubr.bf16.mxu1 %v9650_v7 }
 0x62b   : > { %1465 = vmatpush1.bf16.msra.mxu0 %v7649_v18  ;;  %1518 = vmatpush1.bf16.msra.mxu1 %v7651_v21  ;;  %v10003_v62 = vpack.c.bf16 %v9991_v56, %v9999_v61  ;;  %v9218_v18 = vld [vmem:[%s11794_s7 + $0x1a8] sm:$0xff]   ;;  %v9219_v21 = vld [vmem:[%s11794_s7 + $0x160] sm:$0xff]  }
 0x62c   : > { %1466 = vmatprep.subr.bf16.mxu0 %v7646_v40  ;;  %1519 = vmatprep.subr.bf16.mxu1 %v7648_v54 }
 0x62f   : > { %1467 = vmatpush1.bf16.msra.mxu0 %v7645_v57  ;;  %1520 = vmatpush1.bf16.msra.mxu1 %v7647_v58  ;;  %v1122_v58 = vshrl.u32 %v1121_v53, 7 }
 0x630   : > { %8445 = vmatprep.subr.bf16.mxu0 %v9207_v59  ;;  %8473 = vmatprep.subr.bf16.mxu1 %v9208_v60 }
 0x631   : > { %7641 = vmatmul.mubr.msk.bf16.gmra.mxu0 %vm403_vm0, %v10003_v62  ;;  %7643 = vmatmul.mubr.msk.bf16.gmra.mxu1 %vm403_vm0, %v10003_v62 }
 0x632   : > { %1484 = vmatprep.mubr.bf16.mxu0 %v9650_v7  ;;  %1537 = vmatprep.mubr.bf16.mxu1 %v9650_v7 }
 0x639   : > { %7653 = vmatmul.mubr.msk.bf16.vlgmr.msra.gmra.mxu0 %vm403_vm0, %v9983_v52  ;;  %7655 = vmatmul.mubr.msk.bf16.vlgmr.msra.gmra.mxu1 %vm403_vm0, %v9983_v52 }
 0x63a   : > { %1494 = vmatprep.mubr.bf16.mxu0 %v9650_v7  ;;  %1547 = vmatprep.mubr.bf16.mxu1 %v9650_v7 }
 0x63b   : > { %8446 = vmatpush3.bf16.msra.mxu0 %v9209_v63  ;;  %8474 = vmatpush3.bf16.msra.mxu1 %v9210_v0 }
 0x63c   : > { %8447 = vmatprep.subr.bf16.mxu0 %v9211_v1  ;;  %8475 = vmatprep.subr.bf16.mxu1 %v9212_v2  ;;  %v10147_v1 = vsub.s32 1, %v1122_v58  ;;  %v10149_v2 = vsub.s32 3, %v1122_v58 }
 0x63f   : > { %8448 = vmatpush3.bf16.msra.mxu0 %v9213_v9  ;;  %8476 = vmatpush3.bf16.msra.mxu1 %v9214_v11  ;;  %v7644_v9 = vld [vmem:[%s11793_s6 + $0x8] ss:$2 sm:$0xf]  ;;  %v10154_v11 = vsub.s32 0, %v1122_v58 }
 0x640   : > { %8449 = vmatprep.subr.bf16.mxu0 %v9215_v12  ;;  %8477 = vmatprep.subr.bf16.mxu1 %v9216_v16  ;;  %v10156_v12 = vsub.s32 2, %v1122_v58 }
 0x641   : > { %7654 = vmatmul.mubr.msk.bf16.gmra.mxu0 %vm403_vm0, %v10003_v62  ;;  %7656 = vmatmul.mubr.msk.bf16.gmra.mxu1 %vm403_vm0, %v10003_v62 }
 0x643   : > { %8450 = vmatpush3.bf16.msra.mxu0 %v9217_v17  ;;  %8478 = vmatpush3.bf16.msra.mxu1 %v9218_v18  ;;  %v1399_v18 = vrot.slane %v7644_v9, %v10147_v1 }
 0x644   : > { %8451 = vmatprep.subr.bf16.mxu0 %v9219_v21  ;;  %8479 = vmatprep.subr.bf16.mxu1 %v9220_v6  ;;  %v1407_v21 = vrot.slane %v7644_v9, %v10149_v2  ;;  %v1395_v6 = vrot.slane %v7644_v9, %v10154_v11 }
 0x647   : > { %8452 = vmatpush3.bf16.msra.mxu0 %v9221_v22  ;;  %8480 = vmatpush3.bf16.msra.mxu1 %v9222_v24  ;;  %v1403_v22 = vrot.slane %v7644_v9, %v10156_v12 }
 0x648   : > { %8453 = vmatprep.subr.bf16.mxu0 %v9223_v10  ;;  %8481 = vmatprep.subr.bf16.mxu1 %v9224_v25 }
 0x64b   : > { %8454 = vmatpush3.bf16.msra.mxu0 %v9225_v26  ;;  %8482 = vmatpush3.bf16.msra.mxu1 %v9226_v27 }
 0x64c   : > { %8455 = vmatprep.subr.bf16.mxu0 %v9227_v28  ;;  %8483 = vmatprep.subr.bf16.mxu1 %v9228_v29 }
 0x64f   : > { %8456 = vmatpush3.bf16.msra.mxu0 %v9229_v30  ;;  %8484 = vmatpush3.bf16.msra.mxu1 %v9230_v31 }
 0x650   : > { %8457 = vmatprep.subr.bf16.mxu0 %v9231_v32  ;;  %8485 = vmatprep.subr.bf16.mxu1 %v9232_v8 }
 0x653   : > { %8458 = vmatpush3.bf16.msra.mxu0 %v9233_v34  ;;  %8486 = vmatpush3.bf16.msra.mxu1 %v9234_v35 }
 0x654   : > { %8459 = vmatprep.subr.bf16.mxu0 %v9235_v36  ;;  %8487 = vmatprep.subr.bf16.mxu1 %v9236_v37  ;;  %v10165_v37 = vld [vmem:[%s11793_s6] ss:$2 sm:$0xf] }
 0x657   : > { %8460 = vmatpush3.bf16.msra.mxu0 %v9237_v38  ;;  %8488 = vmatpush3.bf16.msra.mxu1 %v9238_v41 }
 0x658   : > { %8501 = vmatprep.subr.bf16.mxu0 %v9239_v42  ;;  %8529 = vmatprep.subr.bf16.mxu1 %v9240_v43 }
 0x6e9   : > { %v10117_v44 = vpop.f32.mrf.mxu0  ;;  %v10119_v45 = vpop.f32.mrf.mxu1 }
 0x6eb   : > { %v10121_v47 = vpop.f32.mrf.mxu0  ;;  %v10123_v33 = vpop.f32.mrf.mxu1 }
 0x6ed   : > { %v10125_v49 = vpop.f32.mrf.mxu0  ;;  %v10127_v39 = vpop.f32.mrf.mxu1 }
 0x6ef   : > { %v1227_v51 = vpop.f32.mrf.mxu0  ;;  %v10129_v46 = vpop.f32.mrf.mxu1 }
 0x6f1   : > { %v10131_v40 = vpop.f32.mrf.mxu0  ;;  %v10133_v54 = vpop.f32.mrf.mxu1 }
 0x6f3   : > { %v10135_v55 = vpop.f32.mrf.mxu0  ;;  %v10137_v57 = vpop.f32.mrf.mxu1 }
 0x6f5   : > { %v10139_v59 = vpop.f32.mrf.mxu0  ;;  %v10141_v60 = vpop.f32.mrf.mxu1 }
 0x6f7   : > { %v10143_v63 = vpop.f32.mrf.mxu0  ;;  %v10145_v0 = vpop.f32.mrf.mxu1 }
 0x6f9   : > { %v1486_v16 = vpop.f32.mrf.mxu0  ;;  %v1539_v17 = vpop.f32.mrf.mxu1 }
 0x6fa   : > { %v1487_v31 = vadd.f32 %v1486_v16, %v1395_v6  ;;  %v1540_v32 = vadd.f32 %v1539_v17, %v1403_v22  ;;  %v10169_v16 = vrot.slane %v10165_v37, %v10147_v1 }
 0x6fb   : > { %v1488_v24 = vpop.f32.mrf.mxu0  ;;  %v1541_v10 = vpop.f32.mrf.mxu1 }
 0x6fc   : > { %v1489_v27 = vadd.f32 %v1488_v24, %v1399_v18  ;;  %v1542_v28 = vadd.f32 %v1541_v10, %v1407_v21  ;;  %v1558_v17 = vmax.f32 %v1487_v31, 0.0  ;;  %v1560_v10 = vmax.f32 %v1540_v32, 0.0 }
 0x6fd   : > { %v1490_v25 = vpop.f32.mrf.mxu0  ;;  %v1543_v26 = vpop.f32.mrf.mxu1 }
 0x6fe   : > { %v1491_v29 = vadd.f32 %v1490_v25, %v1395_v6  ;;  %v1544_v30 = vadd.f32 %v1543_v26, %v1403_v22  ;;  %v1559_v53 = vmax.f32 %v1489_v27, 0.0  ;;  %v1561_v58 = vmax.f32 %v1542_v28, 0.0  ;;  %v9241_v27 = vld [vmem:[%s11794_s7 + $0x38] sm:$0xff]  }
 0x6ff   : > { %v1492_v8 = vpop.f32.mrf.mxu0  ;;  %v1545_v34 = vpop.f32.mrf.mxu1  ;;  %v9242_v28 = vld [vmem:[%s11794_s7 + $0xb8] sm:$0xff]  }
 0x700   : > { %v1493_v35 = vadd.f32 %v1492_v8, %v1399_v18  ;;  %v1546_v36 = vadd.f32 %v1545_v34, %v1407_v21  ;;  %v1562_v38 = vmax.f32 %v1491_v29, 0.0  ;;  %v1564_v41 = vmax.f32 %v1544_v30, 0.0 }
 0x701   : > { %v1496_v42 = vpop.f32.mrf.mxu0  ;;  %v1549_v43 = vpop.f32.mrf.mxu1  ;;  %v10173_v8 = vrot.slane %v10165_v37, %v10149_v2  ;;  %v1228_v34 = vadd.f32 %v1227_v51, %v10169_v16 }
 0x702   : > { %v1563_v9 = vmax.f32 %v1493_v35, 0.0  ;;  %v1565_v24 = vmax.f32 %v1546_v36, 0.0  ;;  %v1574_v31 = vpack.c.bf16 %v1562_v38, %v1558_v17  ;;  %v1576_v32 = vpack.c.bf16 %v1564_v41, %v1560_v10 }
 0x703   : > { %v1498_v25 = vpop.f32.mrf.mxu0  ;;  %v1551_v26 = vpop.f32.mrf.mxu1  ;;  %v1281_v51 = vadd.f32 %v10129_v46, %v10173_v8  ;;  %v1497_v38 = vadd.f32 %v1496_v42, %v1395_v6  ;;  %v1550_v41 = vadd.f32 %v1549_v43, %v1403_v22  ;;  %v1224_v46 = vadd.f32 %v10121_v47, %v10169_v16 }
 0x704   : > { %v1575_v29 = vpack.c.bf16 %v1563_v9, %v1559_v53  ;;  %v1577_v30 = vpack.c.bf16 %v1565_v24, %v1561_v58  ;;  %v1499_v35 = vadd.f32 %v1498_v25, %v1399_v18  ;;  %v9243_v53 = vld [vmem:[%s11794_s7 + $0x70] sm:$0xff]   ;;  %v1552_v9 = vadd.f32 %v1551_v26, %v1407_v21 }
 0x705   : > { %v1500_v36 = vpop.f32.mrf.mxu0  ;;  %v1553_v23 = vpop.f32.mrf.mxu1  ;;  %v9244_v58 = vld [vmem:[%s11794_s7 + $0xf0] sm:$0xff]   ;;  %v1298_v47 = vmax.f32 %v1228_v34, 0.0  ;;  %v9251_v34 = vld [vmem:[%s11794_s7 + $0x60] sm:$0xff]  }
 0x706   : > { %v1501_v24 = vadd.f32 %v1500_v36, %v1395_v6  ;;  %v1554_v13 = vadd.f32 %v1553_v23, %v1403_v22  ;;  %1870 = vmatprep.mubr.bf16.mxu0 %v1575_v29  ;;  %1919 = vmatprep.mubr.bf16.mxu1 %v1577_v30  ;;  %v9245_v26 = vld [vmem:[%s11794_s7 + $0x30] sm:$0xff]   ;;  %v1277_v6 = vadd.f32 %v10123_v33, %v10173_v8  ;;  %v1567_v43 = vmax.f32 %v1499_v35, 0.0  ;;  %v9249_v36 = vld [vmem:[%s11794_s7 + $0x28] sm:$0xff]  }
 0x707   : > { %v1502_v17 = vpop.f32.mrf.mxu0  ;;  %v1555_v10 = vpop.f32.mrf.mxu1  ;;  %1871 = vmatmul.mubr.bf16.vlgmr.msra.gmra.mxu0 %v1574_v31  ;;  %1920 = vmatmul.mubr.bf16.vlgmr.msra.gmra.mxu1 %v1576_v32  ;;  %v9246_v23 = vld [vmem:[%s11794_s7 + $0xb0] sm:$0xff]   ;;  %v1569_v29 = vmax.f32 %v1552_v9, 0.0  ;;  %v1566_v31 = vmax.f32 %v1497_v38, 0.0  ;;  %v1568_v33 = vmax.f32 %v1550_v41, 0.0  ;;  %v1294_v35 = vmax.f32 %v1224_v46, 0.0  ;;  %v9253_v41 = vld [vmem:[%s11794_s7 + $0x20] sm:$0xff]  }
 0x708   : > { %v1503_v25 = vadd.f32 %v1502_v17, %v1399_v18  ;;  %v1556_v20 = vadd.f32 %v1555_v10, %v1407_v21  ;;  %8502 = vmatpush3.bf16.msra.mxu0 %v9241_v27  ;;  %8530 = vmatpush3.bf16.msra.mxu1 %v9242_v28  ;;  %v1570_v22 = vmax.f32 %v1501_v24, 0.0  ;;  %v1572_v42 = vmax.f32 %v1554_v13, 0.0  ;;  %v9247_v18 = vld [vmem:[%s11794_s7 + $0x68] sm:$0xff]   ;;  %v9252_v24 = vld [vmem:[%s11794_s7 + $0xe0] sm:$0xff]   ;;  %v9255_v10 = vld [vmem:[%s11794_s7 + $0x58] sm:$0xff]  }
 0x709   : > { %8503 = vmatprep.subr.bf16.mxu0 %v9243_v53  ;;  %8531 = vmatprep.subr.bf16.mxu1 %v9244_v58  ;;  %v9248_v21 = vld [vmem:[%s11794_s7 + $0xe8] sm:$0xff]   ;;  %v1300_v28 = vmax.f32 %v1281_v51, 0.0  ;;  %v1296_v58 = vmax.f32 %v1277_v6, 0.0  ;;  %v1310_v51 = vpack.c.bf16 %v1298_v47, %v1294_v35  ;;  %v9254_v17 = vld [vmem:[%s11794_s7 + $0xa0] sm:$0xff]   ;;  %v9259_v46 = vld [vmem:[%s11794_s7 + $0x50] sm:$0xff]  }
 0x70a   : > { %v1571_v30 = vmax.f32 %v1503_v25, 0.0  ;;  %v1573_v27 = vmax.f32 %v1556_v20, 0.0  ;;  %v9250_v53 = vld [vmem:[%s11794_s7 + $0xa8] sm:$0xff]   ;;  %v1578_v9 = vpack.c.bf16 %v1570_v22, %v1566_v31  ;;  %v1580_v20 = vpack.c.bf16 %v1572_v42, %v1568_v33  ;;  %v9256_v25 = vld [vmem:[%s11794_s7 + $0xd8] sm:$0xff]   ;;  %v9260_v6 = vld [vmem:[%s11794_s7 + $0xd0] sm:$0xff]  }
 0x70b   : > { %v1312_v38 = vpack.c.bf16 %v1300_v28, %v1296_v58  ;;  %v9261_v22 = vld [vmem:[%s11794_s7 + $0x10] sm:$0xff]   ;;  %v9266_v47 = vld [vmem:[%s11794_s7 + $0x88] sm:$0xff]   ;;  %v2230_v31 = vld [vmem:[%s11792_s5 + $0xa0] sm:$0xff] }
 0x70c   : > { %8504 = vmatpush3.bf16.msra.mxu0 %v9245_v26  ;;  %8532 = vmatpush3.bf16.msra.mxu1 %v9246_v23  ;;  %v1579_v13 = vpack.c.bf16 %v1571_v30, %v1567_v43  ;;  %v1581_v32 = vpack.c.bf16 %v1573_v27, %v1569_v29  ;;  %v9257_v26 = vld [vmem:[%s11794_s7 + $0x18] sm:$0xff]   ;;  %v9262_v42 = vld [vmem:[%s11794_s7 + $0x90] sm:$0xff]   ;;  %v1124_v43 = vrot.slane %v10165_v37, %v10154_v11  ;;  %v9265_v27 = vld [vmem:[%s11794_s7 + $0x8] sm:$0xff]  }
 0x70d   : > { %8505 = vmatprep.subr.bf16.mxu0 %v9247_v18  ;;  %8533 = vmatprep.subr.bf16.mxu1 %v9248_v21  ;;  %v9258_v23 = vld [vmem:[%s11794_s7 + $0x98] sm:$0xff]   ;;  %v9263_v18 = vld [vmem:[%s11794_s7 + $0x48] sm:$0xff]   ;;  %v1132_v29 = vrot.slane %v10165_v37, %v10156_v12  ;;  %v9267_v37 = vld [vmem:[%s11794_s7 + $0x40] sm:$0xff]  }
 0x70e   : > { %1878 = vmatprep.mubr.bf16.mxu0 %v1579_v13  ;;  %1927 = vmatprep.mubr.bf16.mxu1 %v1581_v32  ;;  %v9264_v21 = vld [vmem:[%s11794_s7 + $0xc8] sm:$0xff]   ;;  %v1226_v30 = vadd.f32 %v10125_v49, %v1124_v43  ;;  %v9268_v49 = vld [vmem:[%s11794_s7 + $0xc0] sm:$0xff]   ;;  %v1222_v33 = vadd.f32 %v10117_v44, %v1124_v43  ;;  %v1238_v13 = vadd.f32 %v10143_v63, %v10169_v16 }
 0x70f   : > { %1879 = vmatmul.mubr.bf16.gmra.mxu0 %v1578_v9  ;;  %1928 = vmatmul.mubr.bf16.gmra.mxu1 %v1580_v20  ;;  %v1279_v28 = vadd.f32 %v10127_v39, %v1132_v29  ;;  %v1291_v39 = vadd.f32 %v10145_v0, %v10173_v8  ;;  %v2232_v32 = vld [vmem:[%s11792_s5 + $0xe0] sm:$0xff]  ;;  %v1275_v44 = vadd.f32 %v10119_v45, %v1132_v29 }
 0x710   : > { %8506 = vmatpush3.bf16.msra.mxu0 %v9249_v36  ;;  %8534 = vmatpush3.bf16.msra.mxu1 %v9250_v53  ;;  %v2231_v36 = vld [vmem:[%s11792_s5 + $0xa8] sm:$0xff]  ;;  %v1297_v35 = vmax.f32 %v1226_v30, 0.0  ;;  %v1234_v63 = vadd.f32 %v10135_v55, %v10169_v16  ;;  %v1287_v0 = vadd.f32 %v10137_v57, %v10173_v8  ;;  %v9269_v58 = vld [vmem:[%s11794_s7] sm:$0xff]   ;;  %v7727_v45 = vcombine.high %v2230_v31, %v2232_v32 }
 0x711   : > { %2160 = vmatprep.mubr.bf16.mxu0 %v1310_v51  ;;  %2209 = vmatprep.mubr.bf16.mxu1 %v1312_v38  ;;  %v2233_v53 = vld [vmem:[%s11792_s5 + $0xe8] sm:$0xff]  ;;  %v9270_v9 = vld [vmem:[%s11794_s7 + $0x80] sm:$0xff]   ;;  %v1299_v20 = vmax.f32 %v1279_v28, 0.0  ;;  %v1306_v55 = vmax.f32 %v1238_v13, 0.0  ;;  %v1308_v16 = vmax.f32 %v1291_v39, 0.0  ;;  %v1295_v8 = vmax.f32 %v1275_v44, 0.0 }
 0x712   : > { %8507 = vmatprep.subr.bf16.mxu0 %v9251_v34  ;;  %8535 = vmatprep.subr.bf16.mxu1 %v9252_v24  ;;  %v7729_v34 = vcombine.high %v2231_v36, %v2233_v53  ;;  %v1293_v24 = vmax.f32 %v1222_v33, 0.0  ;;  %v2226_v57 = vld [vmem:[%s11792_s5 + $0x20] sm:$0xff]  ;;  %v7726_v51 = vcombine.low %v2230_v31, %v2232_v32  ;;  %v9275_v39 = vld [vmem:[%s11794_s7 + $0x270] sm:$0xff]   ;;  %v9279_v44 = vld [vmem:[%s11794_s7 + $0x268] sm:$0xff]  }
 0x713   : > { %v2228_v38 = vld [vmem:[%s11792_s5 + $0x60] sm:$0xff]  ;;  %v9276_v32 = vld [vmem:[%s11794_s7 + $0x2f0] sm:$0xff]  }
 0x714   : > { %8508 = vmatpush3.bf16.msra.mxu0 %v9253_v41  ;;  %8536 = vmatpush3.bf16.msra.mxu1 %v9254_v17  ;;  %v2227_v41 = vld [vmem:[%s11792_s5 + $0x28] sm:$0xff] }
 0x715   : > { %8509 = vmatprep.subr.bf16.mxu0 %v9255_v10  ;;  %8537 = vmatprep.subr.bf16.mxu1 %v9256_v25  ;;  %v2229_v17 = vld [vmem:[%s11792_s5 + $0x68] sm:$0xff]  ;;  %v1309_v10 = vpack.c.bf16 %v1297_v35, %v1293_v24  ;;  %v1302_v25 = vmax.f32 %v1234_v63, 0.0  ;;  %v9288_v24 = vld [vmem:[%s11794_s7 + $0x2d8] sm:$0xff]  }
 0x716   : > { %v7725_v30 = vcombine.high %v2227_v41, %v2229_v17  ;;  %v9280_v35 = vld [vmem:[%s11794_s7 + $0x2e8] sm:$0xff]  }
 0x717   : > { %v9281_v63 = vld [vmem:[%s11794_s7 + $0x228] sm:$0xff]  }
 0x718   : > { %8510 = vmatpush3.bf16.msra.mxu0 %v9257_v26  ;;  %8538 = vmatpush3.bf16.msra.mxu1 %v9258_v23  ;;  %v1304_v26 = vmax.f32 %v1287_v0, 0.0  ;;  %v7728_v23 = vcombine.low %v2231_v36, %v2233_v53  ;;  %v9277_v36 = vld [vmem:[%s11794_s7 + $0x230] sm:$0xff]   ;;  %v9282_v0 = vld [vmem:[%s11794_s7 + $0x2a8] sm:$0xff]  }
 0x719   : > { %8511 = vmatprep.subr.bf16.mxu0 %v9259_v46  ;;  %8539 = vmatprep.subr.bf16.mxu1 %v9260_v6  ;;  %v1311_v46 = vpack.c.bf16 %v1299_v20, %v1295_v8  ;;  %v1236_v6 = vadd.f32 %v10139_v59, %v1124_v43  ;;  %v7722_v59 = vcombine.low %v2226_v57, %v2228_v38  ;;  %v9278_v53 = vld [vmem:[%s11794_s7 + $0x2b0] sm:$0xff]   ;;  %v9285_v20 = vld [vmem:[%s11794_s7 + $0x220] sm:$0xff]  }
 0x71a   : > { %v9292_v8 = vld [vmem:[%s11794_s7 + $0x2d0] sm:$0xff]  }
 0x71b   : > { %v1305_v28 = vmax.f32 %v1236_v6, 0.0  ;;  %v9302_v6 = vld [vmem:[%s11794_s7 + $0x280] sm:$0xff]  }
 0x71c   : > { %8512 = vmatpush3.bf16.msra.mxu0 %v9261_v22  ;;  %8540 = vmatpush3.bf16.msra.mxu1 %v9262_v42  ;;  %v1289_v22 = vadd.f32 %v10141_v60, %v1132_v29  ;;  %v1314_v42 = vpack.c.bf16 %v1306_v55, %v1302_v25  ;;  %v7724_v60 = vcombine.low %v2227_v41, %v2229_v17  ;;  %v9289_v55 = vld [vmem:[%s11794_s7 + $0x218] sm:$0xff]   ;;  %v9295_v41 = vld [vmem:[%s11794_s7 + $0x248] sm:$0xff]  }
 0x71d   : > { %8513 = vmatprep.subr.bf16.mxu0 %v9263_v18  ;;  %8541 = vmatprep.subr.bf16.mxu1 %v9264_v21  ;;  %v1316_v18 = vpack.c.bf16 %v1308_v16, %v1304_v26  ;;  %v7723_v21 = vcombine.high %v2226_v57, %v2228_v38  ;;  %v9290_v16 = vld [vmem:[%s11794_s7 + $0x298] sm:$0xff]   ;;  %v9291_v57 = vld [vmem:[%s11794_s7 + $0x250] sm:$0xff]   ;;  %v9296_v17 = vld [vmem:[%s11794_s7 + $0x2c8] sm:$0xff]  }
 0x71e   : > { %v9294_v38 = vld [vmem:[%s11794_s7 + $0x290] sm:$0xff]   ;;  %v9298_v25 = vld [vmem:[%s11794_s7 + $0x288] sm:$0xff]   ;;  %v9299_v26 = vld [vmem:[%s11794_s7 + $0x240] sm:$0xff]  }
 0x720   : > { %8514 = vmatpush3.bf16.msra.mxu0 %v9265_v27  ;;  %8542 = vmatpush3.bf16.msra.mxu1 %v9266_v47  ;;  %v1232_v27 = vadd.f32 %v10131_v40, %v1124_v43  ;;  %v1285_v47 = vadd.f32 %v10133_v54, %v1132_v29  ;;  %v9271_v40 = vld [vmem:[%s11794_s7 + $0x278] sm:$0xff]  }
 0x721   : > { %8515 = vmatprep.subr.bf16.mxu0 %v9267_v37  ;;  %8543 = vmatprep.subr.bf16.mxu1 %v9268_v49  ;;  %v1307_v37 = vmax.f32 %v1289_v22, 0.0  ;;  %v9272_v54 = vld [vmem:[%s11794_s7 + $0x2f8] sm:$0xff]   ;;  %v10427_v22 = vld [vmem:[%s11792_s5 + $0xb0] sm:$0xff] }
 0x722   : > { %v1301_v49 = vmax.f32 %v1232_v27, 0.0  ;;  %v1303_v31 = vmax.f32 %v1285_v47, 0.0  ;;  %v9273_v43 = vld [vmem:[%s11794_s7 + $0x238] sm:$0xff]  }
 0x723   : > { %v9274_v29 = vld [vmem:[%s11794_s7 + $0x2b8] sm:$0xff]  }
 0x724   : > { %8516 = vmatpush3.bf16.msra.mxu0 %v9269_v58  ;;  %8544 = vmatpush3.bf16.msra.mxu1 %v9270_v9  ;;  %v1313_v33 = vpack.c.bf16 %v1305_v28, %v1301_v49  ;;  %v1315_v13 = vpack.c.bf16 %v1307_v37, %v1303_v31  ;;  %v9283_v58 = vld [vmem:[%s11794_s7 + $0x260] sm:$0xff]  }
 0x725   : > { %2309 = vmatprep.subr.bf16.mxu0 %v7727_v45  ;;  %2362 = vmatprep.subr.bf16.mxu1 %v7729_v34  ;;  %v9284_v9 = vld [vmem:[%s11794_s7 + $0x2e0] sm:$0xff]   ;;  %v9287_v34 = vld [vmem:[%s11794_s7 + $0x258] sm:$0xff]  }
 0x726   : > { %v9286_v45 = vld [vmem:[%s11794_s7 + $0x2a0] sm:$0xff]  }
 0x727   : > { %2161 = vmatmul.mubr.bf16.vlgmr.msra.gmra.mxu0 %v1309_v10  ;;  %2210 = vmatmul.mubr.bf16.vlgmr.msra.gmra.mxu1 %v1311_v46  ;;  %v9297_v10 = vld [vmem:[%s11794_s7 + $0x208] sm:$0xff]   ;;  %v9301_v46 = vld [vmem:[%s11794_s7 + $0x200] sm:$0xff]  }
 0x728   : > { %2168 = vmatprep.mubr.bf16.mxu0 %v1314_v42  ;;  %2217 = vmatprep.mubr.bf16.mxu1 %v1316_v18  ;;  %v10432_v42 = vld [vmem:[%s11792_s5 + $0xf0] sm:$0xff]  ;;  %v10437_v18 = vld [vmem:[%s11792_s5 + $0xb8] sm:$0xff] }
 0x729   : > { %2310 = vmatpush1.bf16.msra.mxu0 %v7726_v51  ;;  %2363 = vmatpush1.bf16.msra.mxu1 %v7728_v23  ;;  %v9293_v51 = vld [vmem:[%s11794_s7 + $0x210] sm:$0xff]   ;;  %v9300_v23 = vld [vmem:[%s11794_s7 + $0x2c0] sm:$0xff]   ;;  %v7771_v27 = vcombine.low %v10427_v22, %v10432_v42 }
 0x72a   : > { %2311 = vmatprep.subr.bf16.mxu0 %v7723_v21  ;;  %2364 = vmatprep.subr.bf16.mxu1 %v7725_v30  ;;  %v7772_v21 = vcombine.high %v10427_v22, %v10432_v42  ;;  %v10444_v30 = vld [vmem:[%s11792_s5 + $0xf8] sm:$0xff] }
 0x72b   : > { %v7773_v47 = vcombine.low %v10437_v18, %v10444_v30  ;;  %v7774_v28 = vcombine.high %v10437_v18, %v10444_v30 }
 0x72d   : > { %2312 = vmatpush1.bf16.msra.mxu0 %v7722_v59  ;;  %2365 = vmatpush1.bf16.msra.mxu1 %v7724_v60 }
 0x72e   : > { %8557 = vmatprep.subr.bf16.mxu0 %v9271_v40  ;;  %8585 = vmatprep.subr.bf16.mxu1 %v9272_v54 }
 0x72f   : > { %2169 = vmatmul.mubr.bf16.gmra.mxu0 %v1313_v33  ;;  %2218 = vmatmul.mubr.bf16.gmra.mxu1 %v1315_v13 }
 0x730   : > { %2329 = vmatprep.mubr.bf16.mxu0 %v9650_v7  ;;  %2382 = vmatprep.mubr.bf16.mxu1 %v9650_v7 }
 0x737   : > { %7730 = vmatmul.mubr.msk.bf16.vlgmr.msra.gmra.mxu0 %vm403_vm0, %v9983_v52  ;;  %7732 = vmatmul.mubr.msk.bf16.vlgmr.msra.gmra.mxu1 %vm403_vm0, %v9983_v52 }
 0x738   : > { %2339 = vmatprep.mubr.bf16.mxu0 %v9650_v7  ;;  %2392 = vmatprep.mubr.bf16.mxu1 %v9650_v7 }
 0x739   : > { %8558 = vmatpush3.bf16.msra.mxu0 %v9273_v43  ;;  %8586 = vmatpush3.bf16.msra.mxu1 %v9274_v29 }
 0x73a   : > { %8559 = vmatprep.subr.bf16.mxu0 %v9275_v39  ;;  %8587 = vmatprep.subr.bf16.mxu1 %v9276_v32 }
 0x73d   : > { %8560 = vmatpush3.bf16.msra.mxu0 %v9277_v36  ;;  %8588 = vmatpush3.bf16.msra.mxu1 %v9278_v53 }
 0x73e   : > { %8561 = vmatprep.subr.bf16.mxu0 %v9279_v44  ;;  %8589 = vmatprep.subr.bf16.mxu1 %v9280_v35 }
 0x73f   : > { %7731 = vmatmul.mubr.msk.bf16.gmra.mxu0 %vm403_vm0, %v10003_v62  ;;  %7733 = vmatmul.mubr.msk.bf16.gmra.mxu1 %vm403_vm0, %v10003_v62 }
 0x741   : > { %8562 = vmatpush3.bf16.msra.mxu0 %v9281_v63  ;;  %8590 = vmatpush3.bf16.msra.mxu1 %v9282_v0 }
 0x742   : > { %8563 = vmatprep.subr.bf16.mxu0 %v9283_v58  ;;  %8591 = vmatprep.subr.bf16.mxu1 %v9284_v9 }
 0x745   : > { %8564 = vmatpush3.bf16.msra.mxu0 %v9285_v20  ;;  %8592 = vmatpush3.bf16.msra.mxu1 %v9286_v45 }
 0x746   : > { %8565 = vmatprep.subr.bf16.mxu0 %v9287_v34  ;;  %8593 = vmatprep.subr.bf16.mxu1 %v9288_v24 }
 0x749   : > { %8566 = vmatpush3.bf16.msra.mxu0 %v9289_v55  ;;  %8594 = vmatpush3.bf16.msra.mxu1 %v9290_v16 }
 0x74a   : > { %8567 = vmatprep.subr.bf16.mxu0 %v9291_v57  ;;  %8595 = vmatprep.subr.bf16.mxu1 %v9292_v8 }
 0x74d   : > { %8568 = vmatpush3.bf16.msra.mxu0 %v9293_v51  ;;  %8596 = vmatpush3.bf16.msra.mxu1 %v9294_v38 }
 0x74e   : > { %8569 = vmatprep.subr.bf16.mxu0 %v9295_v41  ;;  %8597 = vmatprep.subr.bf16.mxu1 %v9296_v17 }
 0x751   : > { %8570 = vmatpush3.bf16.msra.mxu0 %v9297_v10  ;;  %8598 = vmatpush3.bf16.msra.mxu1 %v9298_v25 }
 0x752   : > { %8571 = vmatprep.subr.bf16.mxu0 %v9299_v26  ;;  %8599 = vmatprep.subr.bf16.mxu1 %v9300_v23 }
 0x755   : > { %8572 = vmatpush3.bf16.msra.mxu0 %v9301_v46  ;;  %8600 = vmatpush3.bf16.msra.mxu1 %v9302_v6 }
 0x756   : > { %2868 = vmatprep.subr.bf16.mxu0 %v7772_v21  ;;  %2921 = vmatprep.subr.bf16.mxu1 %v7774_v28 }
 0x7c7   : > { %v8461_v37 = vpop.f32.mrf.mxu0  ;;  %v8489_v59 = vpop.f32.mrf.mxu1 }
 0x7c9   : > { %v8462_v60 = vpop.f32.mrf.mxu0  ;;  %v8490_v49 = vpop.f32.mrf.mxu1 }
 0x7ca   : > { %v8463_v31 = vadd.f32 %v8462_v60, %v8461_v37  ;;  %v8491_v33 = vadd.f32 %v8490_v49, %v8489_v59 }
 0x7cb   : > { %v8464_v13 = vpop.f32.mrf.mxu0  ;;  %v8492_v40 = vpop.f32.mrf.mxu1 }
 0x7cc   : > { %v1922_v54 = vadd.f32 %v8491_v33, %v8463_v31 }
 0x7cd   : > { %v8465_v43 = vpop.f32.mrf.mxu0  ;;  %v8493_v29 = vpop.f32.mrf.mxu1 }
 0x7ce   : > { %v8466_v39 = vadd.f32 %v8465_v43, %v8464_v13  ;;  %v8494_v32 = vadd.f32 %v8493_v29, %v8492_v40 }
 0x7cf   : > { %v8467_v36 = vpop.f32.mrf.mxu0  ;;  %v8495_v53 = vpop.f32.mrf.mxu1 }
 0x7d0   : > { %v1925_v44 = vadd.f32 %v8494_v32, %v8466_v39 }
 0x7d1   : > { %v8468_v35 = vpop.f32.mrf.mxu0  ;;  %v8496_v63 = vpop.f32.mrf.mxu1 }
 0x7d2   : > { %v8469_v0 = vadd.f32 %v8468_v35, %v8467_v36  ;;  %v8497_v58 = vadd.f32 %v8496_v63, %v8495_v53  ;;  %v7721_v63 = vld [vmem:[%s11793_s6 + $0x10] ss:$2 sm:$0xf] }
 0x7d3   : > { %v8470_v9 = vpop.f32.mrf.mxu0  ;;  %v8498_v20 = vpop.f32.mrf.mxu1 }
 0x7d4   : > { %v1930_v45 = vadd.f32 %v8497_v58, %v8469_v0 }
 0x7d5   : > { %v8471_v34 = vpop.f32.mrf.mxu0  ;;  %v8499_v24 = vpop.f32.mrf.mxu1 }
 0x7d6   : > { %v8472_v55 = vadd.f32 %v8471_v34, %v8470_v9  ;;  %v8500_v16 = vadd.f32 %v8499_v24, %v8498_v20  ;;  %v2244_v20 = vrot.slane %v7721_v63, %v10147_v1  ;;  %v2252_v34 = vrot.slane %v7721_v63, %v10149_v2 }
 0x7d7   : > { %v2240_v24 = vrot.slane %v7721_v63, %v10154_v11 }
 0x7d8   : > { %v1933_v57 = vadd.f32 %v8500_v16, %v8472_v55 }
 0x7e7   : > { %v8517_v8 = vpop.f32.mrf.mxu0  ;;  %v8545_v51 = vpop.f32.mrf.mxu1 }
 0x7e9   : > { %v8518_v38 = vpop.f32.mrf.mxu0  ;;  %v8546_v41 = vpop.f32.mrf.mxu1 }
 0x7ea   : > { %v8519_v17 = vadd.f32 %v8518_v38, %v8517_v8  ;;  %v8547_v10 = vadd.f32 %v8546_v41, %v8545_v51 }
 0x7eb   : > { %v8520_v25 = vpop.f32.mrf.mxu0  ;;  %v8548_v26 = vpop.f32.mrf.mxu1 }
 0x7ec   : > { %v2163_v23 = vadd.f32 %v8519_v17, %v1922_v54 }
 0x7ed   : > { %v8521_v46 = vpop.f32.mrf.mxu0  ;;  %v8549_v6 = vpop.f32.mrf.mxu1 }
 0x7ee   : > { %v10452_v21 = vadd.f32 %v8547_v10, %v2163_v23  ;;  %v8522_v28 = vadd.f32 %v8521_v46, %v8520_v25  ;;  %v8550_v49 = vadd.f32 %v8549_v6, %v8548_v26 }
 0x7ef   : > { %v8523_v37 = vpop.f32.mrf.mxu0  ;;  %v8551_v59 = vpop.f32.mrf.mxu1 }
 0x7f0   : > { %v2166_v60 = vadd.f32 %v8522_v28, %v1925_v44 }
 0x7f1   : > { %v8524_v31 = vpop.f32.mrf.mxu0  ;;  %v8552_v33 = vpop.f32.mrf.mxu1 }
 0x7f2   : > { %v10454_v13 = vadd.f32 %v8550_v49, %v2166_v60  ;;  %v8525_v40 = vadd.f32 %v8524_v31, %v8523_v37  ;;  %v8553_v43 = vadd.f32 %v8552_v33, %v8551_v59  ;;  %v2785_v31 = vld [vmem:[%s11792_s5 + $0x30] sm:$0xff] }
 0x7f3   : > { %v8526_v29 = vpop.f32.mrf.mxu0  ;;  %v8554_v39 = vpop.f32.mrf.mxu1  ;;  %v2787_v33 = vld [vmem:[%s11792_s5 + $0x70] sm:$0xff] }
 0x7f4   : > { %v2171_v32 = vadd.f32 %v8525_v40, %v1930_v45  ;;  %v2248_v45 = vrot.slane %v7721_v63, %v10156_v12 }
 0x7f5   : > { %v8527_v36 = vpop.f32.mrf.mxu0  ;;  %v8555_v54 = vpop.f32.mrf.mxu1 }
 0x7f6   : > { %v10456_v53 = vadd.f32 %v8553_v43, %v2171_v32  ;;  %v8528_v35 = vadd.f32 %v8527_v36, %v8526_v29  ;;  %v8556_v9 = vadd.f32 %v8555_v54, %v8554_v39  ;;  %v2786_v32 = vld [vmem:[%s11792_s5 + $0x38] sm:$0xff] }
 0x7f7   : > { %v2331_v44 = vpop.f32.mrf.mxu0  ;;  %v2384_v0 = vpop.f32.mrf.mxu1  ;;  %v2788_v36 = vld [vmem:[%s11792_s5 + $0x78] sm:$0xff] }
 0x7f8   : > { %v2174_v58 = vadd.f32 %v8528_v35, %v1933_v57  ;;  %v2332_v57 = vadd.f32 %v2331_v44, %v2240_v24  ;;  %v2385_v26 = vadd.f32 %v2384_v0, %v2248_v45 }
 0x7f9   : > { %v2333_v55 = vpop.f32.mrf.mxu0  ;;  %v2386_v16 = vpop.f32.mrf.mxu1 }
 0x7fa   : > { %v10465_v8 = vadd.f32 %v8556_v9, %v2174_v58  ;;  %v2334_v41 = vadd.f32 %v2333_v55, %v2244_v20  ;;  %v2387_v17 = vadd.f32 %v2386_v16, %v2252_v34  ;;  %v2403_v54 = vmax.f32 %v2332_v57, 0.0 }
 0x7fb   : > { %v2335_v51 = vpop.f32.mrf.mxu0  ;;  %v2388_v38 = vpop.f32.mrf.mxu1  ;;  %v2405_v35 = vmax.f32 %v2385_v26, 0.0  ;;  %v7768_v9 = vcombine.high %v2785_v31, %v2787_v33 }
 0x7fc   : > { %v2336_v10 = vadd.f32 %v2335_v51, %v2240_v24  ;;  %v2389_v25 = vadd.f32 %v2388_v38, %v2248_v45  ;;  %v2404_v40 = vmax.f32 %v2334_v41, 0.0  ;;  %v2406_v43 = vmax.f32 %v2387_v17, 0.0 }
 0x7fd   : > { %v2337_v23 = vpop.f32.mrf.mxu0  ;;  %v2390_v46 = vpop.f32.mrf.mxu1  ;;  %v7770_v17 = vcombine.high %v2786_v32, %v2788_v36 }
 0x7fe   : > { %v2338_v6 = vadd.f32 %v2337_v23, %v2244_v20  ;;  %v2391_v28 = vadd.f32 %v2390_v46, %v2252_v34  ;;  %v2407_v37 = vmax.f32 %v2336_v10, 0.0  ;;  %v2409_v59 = vmax.f32 %v2389_v25, 0.0 }
 0x7ff   : > { %v2341_v60 = vpop.f32.mrf.mxu0  ;;  %v2394_v49 = vpop.f32.mrf.mxu1 }
 0x800   : > { %v2408_v29 = vmax.f32 %v2338_v6, 0.0  ;;  %v2410_v39 = vmax.f32 %v2391_v28, 0.0  ;;  %v2419_v55 = vpack.c.bf16 %v2407_v37, %v2403_v54  ;;  %v2421_v16 = vpack.c.bf16 %v2409_v59, %v2405_v35  ;;  %v9312_v54 = vld [vmem:[%s11794_s7 + $0x3e8] sm:$0xff]  }
 0x801   : > { %v2343_v63 = vpop.f32.mrf.mxu0  ;;  %v2396_v44 = vpop.f32.mrf.mxu1  ;;  %v2342_v46 = vadd.f32 %v2341_v60, %v2240_v24  ;;  %v2395_v6 = vadd.f32 %v2394_v49, %v2248_v45  ;;  %v7767_v28 = vcombine.low %v2785_v31, %v2787_v33  ;;  %v7769_v37 = vcombine.low %v2786_v32, %v2788_v36  ;;  %v9305_v31 = vld [vmem:[%s11794_s7 + $0x338] sm:$0xff]   ;;  %v9309_v32 = vld [vmem:[%s11794_s7 + $0x330] sm:$0xff]   ;;  %v9313_v35 = vld [vmem:[%s11794_s7 + $0x328] sm:$0xff]  }
 0x802   : > { %v2420_v0 = vpack.c.bf16 %v2408_v29, %v2404_v40  ;;  %v2422_v58 = vpack.c.bf16 %v2410_v39, %v2406_v43  ;;  %v2344_v51 = vadd.f32 %v2343_v63, %v2244_v20  ;;  %v2397_v10 = vadd.f32 %v2396_v44, %v2252_v34  ;;  %v9306_v33 = vld [vmem:[%s11794_s7 + $0x3b8] sm:$0xff]   ;;  %v9307_v39 = vld [vmem:[%s11794_s7 + $0x370] sm:$0xff]   ;;  %v9314_v63 = vld [vmem:[%s11794_s7 + $0x3a8] sm:$0xff]  }
 0x803   : > { %v2345_v38 = vpop.f32.mrf.mxu0  ;;  %v2398_v41 = vpop.f32.mrf.mxu1  ;;  %v2413_v18 = vmax.f32 %v2395_v6, 0.0  ;;  %v9310_v36 = vld [vmem:[%s11794_s7 + $0x3b0] sm:$0xff]   ;;  %v9315_v44 = vld [vmem:[%s11794_s7 + $0x360] sm:$0xff]   ;;  %v9329_v6 = vld [vmem:[%s11794_s7 + $0x308] sm:$0xff]  }
 0x804   : > { %v2346_v25 = vadd.f32 %v2345_v38, %v2240_v24  ;;  %v2399_v23 = vadd.f32 %v2398_v41, %v2248_v45  ;;  %2715 = vmatprep.mubr.bf16.mxu0 %v2420_v0  ;;  %2764 = vmatprep.mubr.bf16.mxu1 %v2422_v58  ;;  %v9303_v24 = vld [vmem:[%s11794_s7 + $0x378] sm:$0xff]   ;;  %v2414_v22 = vmax.f32 %v2397_v10, 0.0  ;;  %v2411_v45 = vmax.f32 %v2342_v46, 0.0  ;;  %v9316_v0 = vld [vmem:[%s11794_s7 + $0x3e0] sm:$0xff]   ;;  %v9323_v41 = vld [vmem:[%s11794_s7 + $0x350] sm:$0xff]  }
 0x805   : > { %v2347_v57 = vpop.f32.mrf.mxu0  ;;  %v2400_v26 = vpop.f32.mrf.mxu1  ;;  %2716 = vmatmul.mubr.bf16.vlgmr.msra.gmra.mxu0 %v2419_v55  ;;  %2765 = vmatmul.mubr.bf16.vlgmr.msra.gmra.mxu1 %v2421_v16  ;;  %v9317_v58 = vld [vmem:[%s11794_s7 + $0x320] sm:$0xff]   ;;  %v9319_v55 = vld [vmem:[%s11794_s7 + $0x358] sm:$0xff]   ;;  %v9325_v10 = vld [vmem:[%s11794_s7 + $0x310] sm:$0xff]  }
 0x806   : > { %v2348_v40 = vadd.f32 %v2347_v57, %v2244_v20  ;;  %v2401_v43 = vadd.f32 %v2400_v26, %v2252_v34  ;;  %2869 = vmatpush1.bf16.msra.mxu0 %v7771_v27  ;;  %2922 = vmatpush1.bf16.msra.mxu1 %v7773_v47  ;;  %v2415_v59 = vmax.f32 %v2346_v25, 0.0  ;;  %v2417_v29 = vmax.f32 %v2399_v23, 0.0  ;;  %v9304_v20 = vld [vmem:[%s11794_s7 + $0x3f8] sm:$0xff]   ;;  %v9326_v25 = vld [vmem:[%s11794_s7 + $0x390] sm:$0xff]   ;;  %v9327_v23 = vld [vmem:[%s11794_s7 + $0x348] sm:$0xff]  }
 0x807   : > { %2870 = vmatprep.subr.bf16.mxu0 %v7768_v9  ;;  %2923 = vmatprep.subr.bf16.mxu1 %v7770_v17  ;;  %v2412_v34 = vmax.f32 %v2344_v51, 0.0  ;;  %v9318_v9 = vld [vmem:[%s11794_s7 + $0x3a0] sm:$0xff]   ;;  %v9320_v16 = vld [vmem:[%s11794_s7 + $0x3d8] sm:$0xff]   ;;  %v9324_v17 = vld [vmem:[%s11794_s7 + $0x3d0] sm:$0xff]  }
 0x808   : > { %v2416_v42 = vmax.f32 %v2348_v40, 0.0  ;;  %v2418_v27 = vmax.f32 %v2401_v43, 0.0  ;;  %v2423_v60 = vpack.c.bf16 %v2415_v59, %v2411_v45  ;;  %v2425_v49 = vpack.c.bf16 %v2417_v29, %v2413_v18  ;;  %v9321_v51 = vld [vmem:[%s11794_s7 + $0x318] sm:$0xff]   ;;  %v9328_v46 = vld [vmem:[%s11794_s7 + $0x3c8] sm:$0xff]   ;;  %v9331_v26 = vld [vmem:[%s11794_s7 + $0x340] sm:$0xff]  }
 0x809   : > { %v9322_v38 = vld [vmem:[%s11794_s7 + $0x398] sm:$0xff]   ;;  %v9330_v57 = vld [vmem:[%s11794_s7 + $0x388] sm:$0xff]   ;;  %v9333_v40 = vld [vmem:[%s11794_s7 + $0x300] sm:$0xff]  }
 0x80a   : > { %v2424_v30 = vpack.c.bf16 %v2416_v42, %v2412_v34  ;;  %v2426_v47 = vpack.c.bf16 %v2418_v27, %v2414_v22  ;;  %2871 = vmatpush1.bf16.msra.mxu0 %v7767_v28  ;;  %2924 = vmatpush1.bf16.msra.mxu1 %v7769_v37  ;;  %v9332_v28 = vld [vmem:[%s11794_s7 + $0x3c0] sm:$0xff]   ;;  %v10597_v37 = vld [vmem:[%s11788_s1 + $0x18] sm:$0xff]   ;;  %v7829_v59 = vld [vmem:[%s11791_s4 + $0xc] ss:$0 sm:$0xff] }
 0x80b   : > { %8613 = vmatprep.subr.bf16.mxu0 %v9303_v24  ;;  %8641 = vmatprep.subr.bf16.mxu1 %v9304_v20  ;;  %v9334_v43 = vld [vmem:[%s11794_s7 + $0x380] sm:$0xff]  }
 0x80c   : > { %2723 = vmatprep.mubr.bf16.mxu0 %v2424_v30  ;;  %2772 = vmatprep.mubr.bf16.mxu1 %v2426_v47 }
 0x80d   : > { %2724 = vmatmul.mubr.bf16.gmra.mxu0 %v2423_v60  ;;  %2773 = vmatmul.mubr.bf16.gmra.mxu1 %v2425_v49 }
 0x80e   : > { %2888 = vmatprep.mubr.bf16.mxu0 %v9650_v7  ;;  %2941 = vmatprep.mubr.bf16.mxu1 %v9650_v7 }
 0x80f   : > { %3587 = vrot.lane.b32.xlu1 %v7829_v59, %s9645_s12 }
 0x815   : > { %7775 = vmatmul.mubr.msk.bf16.vlgmr.msra.gmra.mxu0 %vm403_vm0, %v9983_v52  ;;  %7777 = vmatmul.mubr.msk.bf16.vlgmr.msra.gmra.mxu1 %vm403_vm0, %v9983_v52  ;;  %v9308_v52 = vld [vmem:[%s11794_s7 + $0x3f0] sm:$0xff]  }
 0x816   : > { %2898 = vmatprep.mubr.bf16.mxu0 %v9650_v7  ;;  %2951 = vmatprep.mubr.bf16.mxu1 %v9650_v7 }
 0x817   : > { %8614 = vmatpush3.bf16.msra.mxu0 %v9305_v31  ;;  %8642 = vmatpush3.bf16.msra.mxu1 %v9306_v33 }
 0x818   : > { %8615 = vmatprep.subr.bf16.mxu0 %v9307_v39  ;;  %8643 = vmatprep.subr.bf16.mxu1 %v9308_v52 }
 0x81b   : > { %8616 = vmatpush3.bf16.msra.mxu0 %v9309_v32  ;;  %8644 = vmatpush3.bf16.msra.mxu1 %v9310_v36 }
 0x81c   : > { %8645 = vmatprep.subr.bf16.mxu1 %v9312_v54 }
 0x81d   : > { %7776 = vmatmul.mubr.msk.bf16.gmra.mxu0 %vm403_vm0, %v10003_v62  ;;  %7778 = vmatmul.mubr.msk.bf16.gmra.mxu1 %vm403_vm0, %v10003_v62  ;;  %v9311_v62 = vld [vmem:[%s11794_s7 + $0x368] sm:$0xff]  }
 0x81e   : > { %8617 = vmatprep.subr.bf16.mxu0 %v9311_v62 }
 0x81f   : > { %8618 = vmatpush3.bf16.msra.mxu0 %v9313_v35  ;;  %8646 = vmatpush3.bf16.msra.mxu1 %v9314_v63 }
 0x820   : > { %8619 = vmatprep.subr.bf16.mxu0 %v9315_v44  ;;  %8647 = vmatprep.subr.bf16.mxu1 %v9316_v0 }
 0x823   : > { %8620 = vmatpush3.bf16.msra.mxu0 %v9317_v58  ;;  %8648 = vmatpush3.bf16.msra.mxu1 %v9318_v9 }
 0x824   : > { %8621 = vmatprep.subr.bf16.mxu0 %v9319_v55  ;;  %8649 = vmatprep.subr.bf16.mxu1 %v9320_v16 }
 0x827   : > { %8622 = vmatpush3.bf16.msra.mxu0 %v9321_v51  ;;  %8650 = vmatpush3.bf16.msra.mxu1 %v9322_v38  ;;  %v7766_v51 = vld [vmem:[%s11793_s6 + $0x18] ss:$2 sm:$0xf] }
 0x828   : > { %8623 = vmatprep.subr.bf16.mxu0 %v9323_v41  ;;  %8651 = vmatprep.subr.bf16.mxu1 %v9324_v17  ;;  %v2803_v17 = vrot.slane %v7766_v51, %v10147_v1 }
 0x82b   : > { %8624 = vmatpush3.bf16.msra.mxu0 %v9325_v10  ;;  %8652 = vmatpush3.bf16.msra.mxu1 %v9326_v25  ;;  %v2811_v10 = vrot.slane %v7766_v51, %v10149_v2  ;;  %v2799_v25 = vrot.slane %v7766_v51, %v10154_v11 }
 0x82c   : > { %8625 = vmatprep.subr.bf16.mxu0 %v9327_v23  ;;  %8653 = vmatprep.subr.bf16.mxu1 %v9328_v46  ;;  %v2807_v23 = vrot.slane %v7766_v51, %v10156_v12 }
 0x82f   : > { %8626 = vmatpush3.bf16.msra.mxu0 %v9329_v6  ;;  %8654 = vmatpush3.bf16.msra.mxu1 %v9330_v57 }
 0x830   : > { %8627 = vmatprep.subr.bf16.mxu0 %v9331_v26  ;;  %8655 = vmatprep.subr.bf16.mxu1 %v9332_v28 }
 0x833   : > { %8628 = vmatpush3.bf16.msra.mxu0 %v9333_v40  ;;  %8656 = vmatpush3.bf16.msra.mxu1 %v9334_v43 }
 0x834   : > { %9020 = vmatprep.subr.bf16.mxu1 %v9646_v5  ;;  %9012 = vmatprep.subr.bf16.mxu0 %v10597_v37 }
 0x8c5   : > { %v8573_v29 = vpop.f32.mrf.mxu0  ;;  %v8601_v24 = vpop.f32.mrf.mxu1 }
 0x8c7   : > { %v8574_v20 = vpop.f32.mrf.mxu0  ;;  %v8602_v34 = vpop.f32.mrf.mxu1 }
 0x8c8   : > { %v8575_v22 = vadd.f32 %v8574_v20, %v8573_v29  ;;  %v8603_v42 = vadd.f32 %v8602_v34, %v8601_v24 }
 0x8c9   : > { %v8576_v27 = vpop.f32.mrf.mxu0  ;;  %v8604_v45 = vpop.f32.mrf.mxu1 }
 0x8ca   : > { %v2767_v18 = vadd.f32 %v8603_v42, %v8575_v22 }
 0x8cb   : > { %v8577_v30 = vpop.f32.mrf.mxu0  ;;  %v8605_v47 = vpop.f32.mrf.mxu1 }
 0x8cc   : > { %v10605_v60 = vadd.f32 %v2767_v18, %v10452_v21  ;;  %v8578_v49 = vadd.f32 %v8577_v30, %v8576_v27  ;;  %v8606_v31 = vadd.f32 %v8605_v47, %v8604_v45 }
 0x8cd   : > { %v8579_v33 = vpop.f32.mrf.mxu0  ;;  %v8607_v39 = vpop.f32.mrf.mxu1 }
 0x8ce   : > { %v2770_v52 = vadd.f32 %v8606_v31, %v8578_v49 }
 0x8cf   : > { %v8580_v32 = vpop.f32.mrf.mxu0  ;;  %v8608_v36 = vpop.f32.mrf.mxu1 }
 0x8d0   : > { %v10608_v62 = vadd.f32 %v2770_v52, %v10454_v13  ;;  %v8581_v54 = vadd.f32 %v8580_v32, %v8579_v33  ;;  %v8609_v35 = vadd.f32 %v8608_v36, %v8607_v39 }
 0x8d1   : > { %v8582_v63 = vpop.f32.mrf.mxu0  ;;  %v8610_v44 = vpop.f32.mrf.mxu1 }
 0x8d2   : > { %v2775_v0 = vadd.f32 %v8609_v35, %v8581_v54 }
 0x8d3   : > { %v8583_v58 = vpop.f32.mrf.mxu0  ;;  %v8611_v9 = vpop.f32.mrf.mxu1 }
 0x8d4   : > { %v10611_v21 = vadd.f32 %v2775_v0, %v10456_v53  ;;  %v8584_v55 = vadd.f32 %v8583_v58, %v8582_v63  ;;  %v8612_v16 = vadd.f32 %v8611_v9, %v8610_v44  ;;  %v9336_v9 = vld [vmem:[%s11788_s1 + $0x10] sm:$0xff]  }
 0x8d5   : > { %v2890_v38 = vpop.f32.mrf.mxu0  ;;  %v2943_v41 = vpop.f32.mrf.mxu1 }
 0x8d6   : > { %v2778_v13 = vadd.f32 %v8612_v16, %v8584_v55  ;;  %v2891_v29 = vadd.f32 %v2890_v38, %v2799_v25  ;;  %v2944_v24 = vadd.f32 %v2943_v41, %v2807_v23 }
 0x8d7   : > { %v2892_v46 = vpop.f32.mrf.mxu0  ;;  %v2945_v53 = vpop.f32.mrf.mxu1 }
 0x8d8   : > { %v10621_v6 = vadd.f32 %v2778_v13, %v10465_v8  ;;  %v2893_v28 = vadd.f32 %v2892_v46, %v2803_v17  ;;  %v2946_v40 = vadd.f32 %v2945_v53, %v2811_v10  ;;  %v2962_v33 = vmax.f32 %v2891_v29, 0.0 }
 0x8d9   : > { %v2894_v57 = vpop.f32.mrf.mxu0  ;;  %v2947_v26 = vpop.f32.mrf.mxu1  ;;  %v2964_v39 = vmax.f32 %v2944_v24, 0.0 }
 0x8da   : > { %v2895_v43 = vadd.f32 %v2894_v57, %v2799_v25  ;;  %v2948_v59 = vadd.f32 %v2947_v26, %v2807_v23  ;;  %v2963_v47 = vmax.f32 %v2893_v28, 0.0  ;;  %v2965_v49 = vmax.f32 %v2946_v40, 0.0 }
 0x8db   : > { %v2896_v20 = vpop.f32.mrf.mxu0  ;;  %v2949_v34 = vpop.f32.mrf.mxu1 }
 0x8dc   : > { %v2897_v22 = vadd.f32 %v2896_v20, %v2803_v17  ;;  %v2950_v42 = vadd.f32 %v2949_v34, %v2811_v10  ;;  %v2966_v27 = vmax.f32 %v2895_v43, 0.0  ;;  %v2968_v45 = vmax.f32 %v2948_v59, 0.0 }
 0x8dd   : > { %v2900_v18 = vpop.f32.mrf.mxu0  ;;  %v2953_v30 = vpop.f32.mrf.mxu1 }
 0x8de   : > { %v2967_v8 = vmax.f32 %v2897_v22, 0.0  ;;  %v2969_v31 = vmax.f32 %v2950_v42, 0.0  ;;  %v2978_v35 = vpack.c.bf16 %v2966_v27, %v2962_v33  ;;  %v2980_v63 = vpack.c.bf16 %v2968_v45, %v2964_v39 }
 0x8df   : > { %v2902_v52 = vpop.f32.mrf.mxu0  ;;  %v2955_v32 = vpop.f32.mrf.mxu1  ;;  %v2901_v38 = vadd.f32 %v2900_v18, %v2799_v25  ;;  %v2954_v41 = vadd.f32 %v2953_v30, %v2807_v23 }
 0x8e0   : > { %v2979_v36 = vpack.c.bf16 %v2967_v8, %v2963_v47  ;;  %v2981_v54 = vpack.c.bf16 %v2969_v31, %v2965_v49  ;;  %v2903_v44 = vadd.f32 %v2902_v52, %v2803_v17  ;;  %v2956_v55 = vadd.f32 %v2955_v32, %v2811_v10 }
 0x8e1   : > { %v2904_v0 = vpop.f32.mrf.mxu0  ;;  %v2957_v58 = vpop.f32.mrf.mxu1  ;;  %v2970_v24 = vmax.f32 %v2901_v38, 0.0  ;;  %v2972_v20 = vmax.f32 %v2954_v41, 0.0 }
 0x8e2   : > { %v2905_v16 = vadd.f32 %v2904_v0, %v2799_v25  ;;  %v2958_v51 = vadd.f32 %v2957_v58, %v2807_v23  ;;  %3274 = vmatprep.mubr.bf16.mxu0 %v2979_v36  ;;  %3323 = vmatprep.mubr.bf16.mxu1 %v2981_v54  ;;  %v2971_v40 = vmax.f32 %v2903_v44, 0.0  ;;  %v2973_v43 = vmax.f32 %v2956_v55, 0.0 }
 0x8e3   : > { %v2906_v13 = vpop.f32.mrf.mxu0  ;;  %v2959_v46 = vpop.f32.mrf.mxu1  ;;  %3275 = vmatmul.mubr.bf16.vlgmr.msra.gmra.mxu0 %v2978_v35  ;;  %3324 = vmatmul.mubr.bf16.vlgmr.msra.gmra.mxu1 %v2980_v63 }
 0x8e4   : > { %v2907_v53 = vadd.f32 %v2906_v13, %v2803_v17  ;;  %v2960_v57 = vadd.f32 %v2959_v46, %v2811_v10  ;;  %9013 = vmatpush3.bf16.msra.mxu0 %v10597_v37  ;;  %v2974_v26 = vmax.f32 %v2905_v16, 0.0  ;;  %v2976_v28 = vmax.f32 %v2958_v51, 0.0  ;;  %v3588_v13 = vpop.permute.xlu1 %3587 }
 0x8e5   : > { %9014 = vmatprep.subr.bf16.mxu0 %v9336_v9 }
 0x8e6   : > { %v2975_v59 = vmax.f32 %v2907_v53, 0.0  ;;  %v2977_v29 = vmax.f32 %v2960_v57, 0.0  ;;  %v2982_v23 = vpack.c.bf16 %v2974_v26, %v2970_v24  ;;  %v2984_v22 = vpack.c.bf16 %v2976_v28, %v2972_v20 }
 0x8e8   : > { %v2983_v34 = vpack.c.bf16 %v2975_v59, %v2971_v40  ;;  %v2985_v25 = vpack.c.bf16 %v2977_v29, %v2973_v43  ;;  %9015 = vmatpush3.bf16.msra.mxu0 %v9336_v9 }
 0x8e9   : > { %9026 = vmatprep.subr.bf16.mxu0 %v9646_v5 }
 0x8ea   : > { %3282 = vmatprep.mubr.bf16.mxu0 %v2983_v34  ;;  %3331 = vmatprep.mubr.bf16.mxu1 %v2985_v25  ;;  %v7828_v34 = vld [vmem:[%s11791_s4 + $0xb] ss:$0 sm:$0xff] }
 0x8eb   : > { %3283 = vmatmul.mubr.bf16.gmra.mxu0 %v2982_v23  ;;  %3332 = vmatmul.mubr.bf16.gmra.mxu1 %v2984_v22 }
 0x8ec   : > { %9016 = vmatprep.mubr.msk.bf16.mxu0 %vm403_vm0, %v9772_v3  ;;  %9022 = vmatprep.mubr.msk.bf16.mxu1 %vm9647_vm1, %v9646_v5 }
 0x8f3   : > { %9017 = vmatmul.mubr.msk.bf16.vlgmr.msra.gmra.mxu0 %vm403_vm0, %v9775_v4 }
 0x8f4   : > { %9028 = vmatprep.mubr.msk.bf16.mxu0 %vm9647_vm1, %v9646_v5 }
 0x9a3   : > { %v8629_v37 = vpop.f32.mrf.mxu0  ;;  %v8657_v17 = vpop.f32.mrf.mxu1 }
 0x9a5   : > { %v8630_v10 = vpop.f32.mrf.mxu0  ;;  %v8658_v42 = vpop.f32.mrf.mxu1 }
 0x9a6   : > { %v8631_v27 = vadd.f32 %v8630_v10, %v8629_v37  ;;  %v8659_v45 = vadd.f32 %v8658_v42, %v8657_v17 }
 0x9a7   : > { %v8632_v18 = vpop.f32.mrf.mxu0  ;;  %v8660_v30 = vpop.f32.mrf.mxu1 }
 0x9a8   : > { %v3326_v47 = vadd.f32 %v8659_v45, %v8631_v27 }
 0x9a9   : > { %v8633_v49 = vpop.f32.mrf.mxu0  ;;  %v8661_v3 = vpop.f32.mrf.mxu1 }
 0x9aa   : > { %v10637_v8 = vadd.f32 %v3326_v47, %v10605_v60  ;;  %v8634_v31 = vadd.f32 %v8633_v49, %v8632_v18  ;;  %v8662_v33 = vadd.f32 %v8661_v3, %v8660_v30 }
 0x9ab   : > { %v8635_v4 = vpop.f32.mrf.mxu0  ;;  %v8663_v39 = vpop.f32.mrf.mxu1 }
 0x9ac   : > { %v3329_v52 = vadd.f32 %v8662_v33, %v8634_v31 }
 0x9ad   : > { %v8636_v32 = vpop.f32.mrf.mxu0  ;;  %v8664_v36 = vpop.f32.mrf.mxu1 }
 0x9ae   : > { %v10640_v54 = vadd.f32 %v3329_v52, %v10608_v62  ;;  %v8637_v35 = vadd.f32 %v8636_v32, %v8635_v4  ;;  %v8665_v63 = vadd.f32 %v8664_v36, %v8663_v39 }
 0x9af   : > { %v8638_v44 = vpop.f32.mrf.mxu0  ;;  %v8666_v0 = vpop.f32.mrf.mxu1 }
 0x9b0   : > { %v3334_v58 = vadd.f32 %v8665_v63, %v8637_v35 }
 0x9b1   : > { %v8639_v9 = vpop.f32.mrf.mxu0  ;;  %v8667_v55 = vpop.f32.mrf.mxu1 }
 0x9b2   : > { %v10643_v60 = vadd.f32 %v3334_v58, %v10611_v21  ;;  %v8640_v16 = vadd.f32 %v8639_v9, %v8638_v44  ;;  %v8668_v51 = vadd.f32 %v8667_v55, %v8666_v0 }
 0x9b3   : > { %v10645_v38 = vpop.f32.mrf.mxu0 }
 0x9b4   : > { %v3337_v41 = vadd.f32 %v8668_v51, %v8640_v16  ;;  %v3592_v43 = vadd.f32 %v10645_v38, %v3588_v13  ;;  %v3580_v45 = vadd.f32 %v10645_v38, %v7828_v34 }
 0x9b5   : > { %v10647_v46 = vpop.f32.mrf.mxu0 }
 0x9b6   : > { %v10650_v62 = vadd.f32 %v3337_v41, %v10621_v6  ;;  %v3590_v53 = vadd.f32 %v3588_v13, %v10647_v46  ;;  %v8403_v6 = vpack.c.bf16 %v3592_v43, %v3592_v43  ;;  %v3578_v25 = vadd.f32 %v7828_v34, %v10647_v46 }
 0x9b7   : > { %v10653_v57 = vpop.f32.mrf.mxu0  ;;  %v8399_v47 = vpack.c.bf16 %v3580_v45, %v3580_v45 }
 0x9b8   : > { %v3593_v26 = vadd.f32 %v10653_v57, %v3588_v13  ;;  %v8401_v28 = vpack.c.bf16 %v3590_v53, %v3590_v53  ;;  %v8397_v37 = vpack.c.bf16 %v3578_v25, %v3578_v25  ;;  %v3581_v49 = vadd.f32 %v10653_v57, %v7828_v34 }
 0x9b9   : > { %v10656_v21 = vpop.f32.mrf.mxu0 }
 0x9ba   : > { %v3591_v40 = vadd.f32 %v3588_v13, %v10656_v21  ;;  %3635 = vrot.lane.b32.xlu0 %v8401_v28, %s11807_s25  ;;  %v8404_v59 = vpack.c.bf16 %v3593_v26, %v3593_v26  ;;  %v3579_v17 = vadd.f32 %v7828_v34, %v10656_v21  ;;  %v8400_v3 = vpack.c.bf16 %v3581_v49, %v3581_v49  ;;  %v7830_v28 = vld [vmem:[%s11791_s4 + $0xd] ss:$0 sm:$0xff] }
 0x9bc   : > { %v8402_v29 = vpack.c.bf16 %v3591_v40, %v3591_v40  ;;  %v8398_v18 = vpack.c.bf16 %v3579_v17, %v3579_v17 }
 0x9be   : > { %3782 = vrot.lane.b32.xlu0 %v8404_v59, %s11807_s25  ;;  %3684 = vrot.lane.b32.xlu1 %v8402_v29, %s11807_s25 }
 0x9c2   : > { %3733 = vrot.lane.b32.xlu1 %v8403_v6, %s11807_s25 }
 0xa2c   : > { %v3636_v24 = vpop.permute.xlu0 %3635 }
 0xa2d   : > { %v3641_v20 = vsel %vm403_vm0, %v3636_v24, 0 }
 0xa2e   : > { %9021 = vmatpush3.bf16.xpose.msra.mxu1 %v3641_v20 }
 0xa2f   : > { %9032 = vmatprep.subr.bf16.mxu1 %v9646_v5 }
 0xa30   : > { %v3685_v23 = vpop.permute.xlu1 %3684  ;;  %v3783_v27 = vpop.permute.xlu0 %3782 }
 0xa31   : > { %v3690_v22 = vsel %vm403_vm0, %v3685_v23, 0  ;;  %v3788_v30 = vsel %vm403_vm0, %v3783_v27, 0 }
 0xa32   : > { %9027 = vmatpush3.bf16.xpose.msra.mxu0 %v3690_v22 }
 0xa33   : > { %9038 = vmatprep.subr.bf16.mxu0 %v9646_v5 }
 0xa34   : > { %v3734_v10 = vpop.permute.xlu1 %3733 }
 0xa35   : > { %v3739_v42 = vsel %vm403_vm0, %v3734_v10, 0  ;;  %9023 = vmatmul.mubr.msk.bf16.vlgmr.msra.gmra.mxu1 %vm403_vm0, %v8397_v37 }
 0xa36   : > { %9033 = vmatpush3.bf16.xpose.msra.mxu1 %v3739_v42  ;;  %9034 = vmatprep.mubr.msk.bf16.mxu1 %vm9647_vm1, %v9646_v5 }
 0xa37   : > { %9044 = vmatprep.subr.bf16.mxu1 %v9646_v5 }
 0xa39   : > { %9029 = vmatmul.mubr.msk.bf16.vlgmr.msra.gmra.mxu0 %vm403_vm0, %v8398_v18 }
 0xa3a   : > { %9039 = vmatpush3.bf16.xpose.msra.mxu0 %v3788_v30  ;;  %9040 = vmatprep.mubr.msk.bf16.mxu0 %vm9647_vm1, %v9646_v5 }
 0xa3b   : > { %9050 = vmatprep.subr.bf16.mxu0 %v9646_v5 }
 0xa3d   : > { %9035 = vmatmul.mubr.msk.bf16.vlgmr.msra.gmra.mxu1 %vm403_vm0, %v8399_v47 }
 0xa3e   : > { %9046 = vmatprep.mubr.msk.bf16.mxu1 %vm9647_vm1, %v9646_v5 }
 0xa41   : > { %9041 = vmatmul.mubr.msk.bf16.vlgmr.msra.gmra.mxu0 %vm403_vm0, %v8400_v3 }
 0xa42   : > { %9052 = vmatprep.mubr.msk.bf16.mxu0 %vm9647_vm1, %v9646_v5 }
 0xaf5   : > { %v3677_v31 = vpop.f32.mrf.mxu1 }
 0xaf6   : > { %v3830_v33 = vsel %vm715_vm2, %v3677_v31, -inf }
 0xaf7   : > { %v9024_v4 = vpop.f32.mrf.mxu1  ;;  %3831 = vmax.xlane.f32.xlu1 %v3830_v33 }
 0xaf9   : > { %v3680_v39 = vpop.f32.mrf.mxu1  ;;  %v3726_v52 = vpop.f32.mrf.mxu0 }
 0xafa   : > { %v3833_v32 = vsel %vm715_vm2, %v3726_v52, -inf }
 0xafb   : > { %v9025_v36 = vpop.f32.mrf.mxu1  ;;  %3834 = vmax.xlane.f32.xlu0 %v3833_v32  ;;  %v9030_v35 = vpop.f32.mrf.mxu0  ;;  %v7811_v32 = vld [vmem:[%s11791_s4 + $0x4] ss:$0 sm:$0xff] }
 0xafc   : > { %v3346_v35 = vadd.f32 %v10643_v60, %v9999_v61 }
 0xafd   : > { %v3729_v63 = vpop.f32.mrf.mxu0  ;;  %v3775_v44 = vpop.f32.mrf.mxu1 }
 0xafe   : > { %v3836_v0 = vsel %vm715_vm2, %v3775_v44, -inf }
 0xaff   : > { %v9036_v58 = vpop.f32.mrf.mxu1  ;;  %3837 = vmax.xlane.f32.xlu0 %v3836_v0  ;;  %v9031_v9 = vpop.f32.mrf.mxu0 }
 0xb00   : > { %v3345_v58 = vadd.f32 %v10640_v54, %v9970_v50 }
 0xb01   : > { %v3778_v55 = vpop.f32.mrf.mxu1  ;;  %v3824_v16 = vpop.f32.mrf.mxu0 }
 0xb02   : > { %v3839_v51 = vsel %vm715_vm2, %v3824_v16, -inf  ;;  %v3354_v61 = vadd.f32 %v7811_v32, %v3345_v58 }
 0xb03   : > { %v9037_v41 = vpop.f32.mrf.mxu1  ;;  %3840 = vmax.xlane.f32.xlu1 %v3839_v51  ;;  %v9042_v13 = vpop.f32.mrf.mxu0 }
 0xb04   : > { %v3362_v60 = vsel %vm403_vm0, %v3354_v61, 0.0 }
 0xb05   : > { %v3827_v53 = vpop.f32.mrf.mxu0 }
 0xb07   : > { %v9043_v26 = vpop.f32.mrf.mxu0 }
 0xb15   : > { %3599 = vrot.lane.b32.xlu0 %v7830_v28, %s11808_s11 }
 0xb80   : > { %v3832_v40 = vpop.xlane.xlu1 %3831 }
 0xb81   : > { %v3842_v43 = vsub.f32 %v3677_v31, %v3832_v40 }
 0xb83   : > { %v3846_v59 = vmul.f32 1.442695, %v3842_v43 }
 0xb84   : > { %v3835_v29 = vpop.xlane.xlu0 %3834 }
 0xb85   : > { %9501 = vpow2.f32 %v3846_v59  ;;  %v3843_v6 = vsub.f32 %v3726_v52, %v3835_v29  ;;  %v3344_v52 = vadd.f32 %v10637_v8, %v9967_v48 }
 0xb87   : > { %v3848_v24 = vmul.f32 1.442695, %v3843_v6  ;;  %v3353_v36 = vadd.f32 %v7811_v32, %v3344_v52 }
 0xb88   : > { %v3838_v20 = vpop.xlane.xlu0 %3837 }
 0xb89   : > { %9503 = vpow2.f32 %v3848_v24  ;;  %v3844_v34 = vsub.f32 %v3775_v44, %v3838_v20  ;;  %v3359_v63 = vsel %vm403_vm0, %v3353_v36, 0.0  ;;  %v3355_v44 = vadd.f32 %v7811_v32, %v3346_v35  ;;  %v9338_v35 = vld [vmem:[%s11790_s3 + $0x10] sm:$0xff]  }
 0xb8b   : > { %v3850_v25 = vmul.f32 1.442695, %v3844_v34  ;;  %v3365_v0 = vsel %vm403_vm0, %v3355_v44, 0.0 }
 0xb8c   : > { %v3600_v23 = vpop.permute.xlu0 %3599  ;;  %v3841_v22 = vpop.xlane.xlu1 %3840 }
 0xb8d   : > { %9505 = vpow2.f32 %v3850_v25  ;;  %v3845_v37 = vsub.f32 %v3824_v16, %v3841_v22  ;;  %v3603_v17 = vadd.f32 %v3600_v23, %v10656_v21  ;;  %v3604_v27 = vadd.f32 %v10645_v38, %v3600_v23 }
 0xb8e   : > { %v3605_v47 = vadd.f32 %v10653_v57, %v3600_v23  ;;  %v3602_v57 = vadd.f32 %v3600_v23, %v10647_v46  ;;  %v3347_v46 = vadd.f32 %v10650_v62, %v9991_v56 }
 0xb8f   : > { %v3852_v10 = vmul.f32 1.442695, %v3845_v37  ;;  %v8406_v42 = vpack.c.bf16 %v3603_v17, %v3603_v17  ;;  %v8407_v30 = vpack.c.bf16 %v3604_v27, %v3604_v27 }
 0xb90   : > { %v8408_v21 = vpack.c.bf16 %v3605_v47, %v3605_v47  ;;  %v8405_v39 = vpack.c.bf16 %v3602_v57, %v3602_v57  ;;  %v10722_v48 = vadd.f32 %v7811_v32, %v3347_v46 }
 0xb91   : > { %9507 = vpow2.f32 %v3852_v10  ;;  %3928 = vrot.lane.b32.xlu0 %v8406_v42, %s11808_s11 }
 0xb92   : > { %v9502_v45 = vpop.eup %9501  ;;  %v3368_v8 = vsel %vm403_vm0, %v10722_v48, 0.0 }
 0xb93   : > { %v3854_v18 = vsel %vm715_vm2, %v9502_v45, 0.0 }
 0xb94   : > { %3855 = vadd.xlane.f32.xlu1 %v3854_v18 }
 0xb95   : > { %3977 = vrot.lane.b32.xlu0 %v8407_v30, %s11808_s11 }
 0xb96   : > { %v9504_v49 = vpop.eup %9503 }
 0xb97   : > { %v3857_v3 = vsel %vm715_vm2, %v9504_v49, 0.0 }
 0xb98   : > { %3858 = vadd.xlane.f32.xlu1 %v3857_v3 }
 0xb99   : > { %4026 = vrot.lane.b32.xlu0 %v8408_v21, %s11808_s11 }
 0xb9a   : > { %v9506_v38 = vpop.eup %9505 }
 0xb9b   : > { %v3860_v31 = vsel %vm715_vm2, %v9506_v38, 0.0 }
 0xb9c   : > { %3861 = vadd.xlane.f32.xlu1 %v3860_v31 }
 0xb9e   : > { %v9508_v33 = vpop.eup %9507 }
 0xb9f   : > { %v3863_v4 = vsel %vm715_vm2, %v9508_v33, 0.0 }
 0xba0   : > { %3864 = vadd.xlane.f32.xlu1 %v3863_v4 }
 0xbb1   : > { %3879 = vrot.lane.b32.xlu1 %v8405_v39, %s11808_s11 }
 0xbb8   : > { %3360 = vadd.xlane.f32.xlu0 %v3359_v63 }
 0xbbc   : > { %3366 = vadd.xlane.f32.xlu0 %v3365_v0 }
 0xbc0   : > { %3369 = vadd.xlane.f32.xlu0 %v3368_v8 }
 0xbd5   : > { %3363 = vadd.xlane.f32.xlu1 %v3362_v60 }
 0xc03   : > { %v3929_v9 = vpop.permute.xlu0 %3928 }
 0xc04   : > { %v3934_v56 = vsel %vm770_vm3, %v3929_v9, 0  ;;  %v7813_v9 = vld [vmem:[%s11791_s4 + $0x8] ss:$0 sm:$0xff] }
 0xc05   : > { %9051 = vmatpush3.bf16.msra.mxu0 %v3934_v56 }
 0xc06   : > { %9062 = vmatprep.subr.bf16.mxu0 %v9646_v5 }
 0xc07   : > { %v3978_v50 = vpop.permute.xlu0 %3977 }
 0xc08   : > { %v3983_v59 = vsel %vm770_vm3, %v3978_v50, 0 }
 0xc0b   : > { %v4027_v43 = vpop.permute.xlu0 %4026 }
 0xc0c   : > { %v4032_v24 = vsel %vm770_vm3, %v4027_v43, 0 }
 0xc1d   : > { %v3856_v62 = vpop.xlane.xlu1 %3855 }
 0xc1e   : > { %9509 = vrcp.f32 %v3856_v62 }
 0xc21   : > { %v3859_v55 = vpop.xlane.xlu1 %3858 }
 0xc22   : > { %9511 = vrcp.f32 %v3859_v55 }
 0xc25   : > { %v3862_v16 = vpop.xlane.xlu1 %3861 }
 0xc26   : > { %9513 = vrcp.f32 %v3862_v16 }
 0xc29   : > { %v3865_v51 = vpop.xlane.xlu1 %3864 }
 0xc2a   : > { %9515 = vrcp.f32 %v3865_v51 }
 0xc2b   : > { %v9510_v41 = vpop.eup %9509 }
 0xc2c   : > { %v3870_v54 = vmul.f32 %v9510_v41, %v9502_v45 }
 0xc2d   : > { %v3880_v13 = vpop.permute.xlu1 %3879 }
 0xc2e   : > { %v3885_v53 = vsel %vm770_vm3, %v3880_v13, 0  ;;  %v3874_v28 = vpack.c.bf16 %v3870_v54, %v3870_v54 }
 0xc2f   : > { %v9512_v26 = vpop.eup %9511  ;;  %9045 = vmatpush3.bf16.msra.mxu1 %v3885_v53 }
 0xc30   : > { %9056 = vmatprep.subr.bf16.mxu1 %v9646_v5  ;;  %v3871_v40 = vmul.f32 %v9512_v26, %v9504_v49 }
 0xc32   : > { %9047 = vmatmul.mubr.msk.bf16.vlgmr.msra.gmra.mxu1 %vm715_vm2, %v3874_v28  ;;  %v3875_v29 = vpack.c.bf16 %v3871_v40, %v3871_v40 }
 0xc33   : > { %v9514_v6 = vpop.eup %9513  ;;  %9057 = vmatpush3.bf16.msra.mxu1 %v3983_v59  ;;  %9058 = vmatprep.mubr.msk.bf16.mxu1 %vm9647_vm1, %v9646_v5 }
 0xc34   : > { %9053 = vmatmul.mubr.msk.bf16.vlgmr.msra.gmra.mxu0 %vm715_vm2, %v3875_v29  ;;  %v3872_v20 = vmul.f32 %v9514_v6, %v9506_v38 }
 0xc35   : > { %9063 = vmatpush3.bf16.msra.mxu0 %v4032_v24  ;;  %9064 = vmatprep.mubr.msk.bf16.mxu0 %vm9647_vm1, %v9646_v5 }
 0xc36   : > { %v3876_v25 = vpack.c.bf16 %v3872_v20, %v3872_v20 }
 0xc37   : > { %v9516_v34 = vpop.eup %9515 }
 0xc38   : > { %v3873_v23 = vmul.f32 %v9516_v34, %v9508_v33 }
 0xc3a   : > { %9059 = vmatmul.mubr.msk.bf16.vlgmr.msra.gmra.mxu1 %vm715_vm2, %v3876_v25  ;;  %v3877_v22 = vpack.c.bf16 %v3873_v23, %v3873_v23 }
 0xc3c   : > { %9065 = vmatmul.mubr.msk.bf16.vlgmr.msra.gmra.mxu0 %vm715_vm2, %v3877_v22 }
 0xc41   : > { %v3361_v37 = vpop.xlane.xlu0 %3360 }
 0xc42   : > { %v3371_v17 = vmul.f32 0.03125, %v3361_v37 }
 0xc44   : > { %v3375_v10 = vsub.f32 %v3353_v36, %v3371_v17  ;;  %v9337_v36 = vld [vmem:[%s11790_s3 + $0x18] sm:$0xff]  }
 0xc45   : > { %v3367_v42 = vpop.xlane.xlu0 %3366  ;;  %9068 = vmatprep.subr.bf16.mxu1 %v9337_v36 }
 0xc46   : > { %v3373_v27 = vmul.f32 0.03125, %v3367_v42  ;;  %v3379_v45 = vmul.f32 %v3375_v10, %v3375_v10  ;;  %9069 = vmatpush3.bf16.msra.mxu1 %v9337_v36 }
 0xc47   : > { %9070 = vmatprep.subr.bf16.mxu1 %v9338_v35 }
 0xc48   : > { %v3377_v18 = vsub.f32 %v3355_v44, %v3373_v27  ;;  %v3383_v30 = vsel %vm403_vm0, %v3379_v45, 0.0 }
 0xc49   : > { %3384 = vadd.xlane.f32.xlu1 %v3383_v30  ;;  %v3370_v3 = vpop.xlane.xlu0 %3369 }
 0xc4a   : > { %v3381_v47 = vmul.f32 %v3377_v18, %v3377_v18  ;;  %v3374_v21 = vmul.f32 0.03125, %v3370_v3  ;;  %9071 = vmatpush3.bf16.msra.mxu1 %v9338_v35 }
 0xc4c   : > { %v3389_v49 = vsel %vm403_vm0, %v3381_v47, 0.0  ;;  %v10746_v33 = vsub.f32 %v10722_v48, %v3374_v21 }
 0xc4d   : > { %3390 = vadd.xlane.f32.xlu1 %v3389_v49 }
 0xc4e   : > { %v3382_v52 = vmul.f32 %v10746_v33, %v10746_v33 }
 0xc50   : > { %v3392_v32 = vsel %vm403_vm0, %v3382_v52, 0.0 }
 0xc5e   : > { %v3364_v38 = vpop.xlane.xlu1 %3363 }
 0xc5f   : > { %v3372_v31 = vmul.f32 0.03125, %v3364_v38 }
 0xc61   : > { %v10748_v4 = vsub.f32 %v3354_v61, %v3372_v31  ;;  %v7812_v61 = vld [vmem:[%s11791_s4 + $0x7] ss:$0 sm:$0xff] }
 0xc63   : > { %v3380_v57 = vmul.f32 %v10748_v4, %v10748_v4 }
 0xc65   : > { %v3386_v39 = vsel %vm403_vm0, %v3380_v57, 0.0 }
 0xc66   : > { %3387 = vadd.xlane.f32.xlu0 %v3386_v39 }
 0xc6a   : > { %3393 = vadd.xlane.f32.xlu0 %v3392_v32 }
 0xcd2   : > { %v3385_v63 = vpop.xlane.xlu1 %3384 }
 0xcd3   : > { %v3395_v44 = vmul.f32 0.03125, %v3385_v63 }
 0xcd5   : > { %v3399_v46 = vadd.f32 1e-05, %v3395_v44  ;;  %v7851_v44 = vld [vmem:[%s11791_s4 + $0xe] ss:$0 sm:$0xff] }
 0xcd6   : > { %v3391_v0 = vpop.xlane.xlu1 %3390 }
 0xcd7   : > { %9517 = vrsqrt.f32 %v3399_v46  ;;  %v3397_v48 = vmul.f32 0.03125, %v3391_v0 }
 0xcd9   : > { %v3401_v8 = vadd.f32 1e-05, %v3397_v48 }
 0xcdb   : > { %9519 = vrsqrt.f32 %v3401_v8 }
 0xce4   : > { %v9518_v58 = vpop.eup %9517 }
 0xce5   : > { %v3407_v60 = vmul.f32 %v9518_v58, %v3375_v10 }
 0xce7   : > { %v3415_v56 = vmul.f32 %v7812_v61, %v3407_v60 }
 0xce8   : > { %v9520_v62 = vpop.eup %9519 }
 0xce9   : > { %v3423_v55 = vadd.f32 %v7813_v9, %v3415_v56  ;;  %v3409_v16 = vmul.f32 %v9520_v62, %v3377_v18 }
 0xceb   : > { %v3429_v51 = vsel %vm403_vm0, %v3423_v55, 0.0  ;;  %v3417_v41 = vmul.f32 %v7812_v61, %v3409_v16 }
 0xcec   : > { %3430 = vadd.xlane.f32.xlu1 %v3429_v51 }
 0xced   : > { %v10769_v50 = vadd.f32 %v7813_v9, %v3417_v41 }
 0xcef   : > { %v3388_v54 = vpop.xlane.xlu0 %3387  ;;  %v3435_v13 = vsel %vm403_vm0, %v10769_v50, 0.0 }
 0xcf0   : > { %v3396_v53 = vmul.f32 0.03125, %v3388_v54  ;;  %3436 = vadd.xlane.f32.xlu1 %v3435_v13  ;;  %v11809_v54 = vunpack.c.l.bf16 %v9880_v19 }
 0xcf2   : > { %v3400_v26 = vadd.f32 1e-05, %v3396_v53  ;;  %v3921_v28 = vpop.f32.mrf.mxu1 }
 0xcf3   : > { %v3394_v40 = vpop.xlane.xlu0 %3393 }
 0xcf4   : > { %9521 = vrsqrt.f32 %v3400_v26  ;;  %v3398_v43 = vmul.f32 0.03125, %v3394_v40  ;;  %v9048_v59 = vpop.f32.mrf.mxu1  ;;  %v3970_v29 = vpop.f32.mrf.mxu0  ;;  %v11810_v26 = vunpack.c.h.bf16 %v9876_v14 }
 0xcf5   : > { %v4074_v6 = vpack.c.bf16 %v3970_v29, %v3921_v28 }
 0xcf6   : > { %v3402_v24 = vadd.f32 1e-05, %v3398_v43  ;;  %v3924_v20 = vpop.f32.mrf.mxu1  ;;  %v9054_v34 = vpop.f32.mrf.mxu0 }
 0xcf7   : > { %9072 = vmatprep.mubr.msk.bf16.mxu1 %vm403_vm0, %v4074_v6  ;;  %v11811_v6 = vunpack.c.h.bf16 %v9880_v19 }
 0xcf8   : > { %9523 = vrsqrt.f32 %v3402_v24  ;;  %v9049_v25 = vpop.f32.mrf.mxu1  ;;  %v3973_v23 = vpop.f32.mrf.mxu0 }
 0xcfa   : > { %v9055_v22 = vpop.f32.mrf.mxu0  ;;  %v4019_v37 = vpop.f32.mrf.mxu1 }
 0xcfc   : > { %v9060_v17 = vpop.f32.mrf.mxu1  ;;  %v4068_v10 = vpop.f32.mrf.mxu0 }
 0xcfd   : > { %v4075_v42 = vpack.c.bf16 %v4068_v10, %v4019_v37  ;;  %v9339_v17 = vld [vmem:[%s11789_s2 + $0x8] sm:$0xff]   ;;  %v9340_v10 = vld [vmem:[%s11789_s2] sm:$0xff]  }
 0xcfe   : > { %v4022_v27 = vpop.f32.mrf.mxu1  ;;  %v9066_v45 = vpop.f32.mrf.mxu0  ;;  %9084 = vmatprep.subr.bf16.mxu1 %v9339_v17 }
 0xcff   : > { %9073 = vmatmul.mubr.msk.bf16.vlgmr.msra.gmra.mxu1 %vm403_vm0, %v4075_v42 }
 0xd00   : > { %v9061_v18 = vpop.f32.mrf.mxu1  ;;  %v4071_v30 = vpop.f32.mrf.mxu0  ;;  %9085 = vmatpush3.bf16.msra.mxu1 %v9339_v17 }
 0xd01   : > { %v9522_v47 = vpop.eup %9521  ;;  %9086 = vmatprep.subr.bf16.mxu1 %v9340_v10 }
 0xd02   : > { %v9067_v49 = vpop.f32.mrf.mxu0  ;;  %v3408_v3 = vmul.f32 %v9522_v47, %v10748_v4 }
 0xd04   : > { %v3416_v21 = vmul.f32 %v7812_v61, %v3408_v3  ;;  %9087 = vmatpush3.bf16.msra.mxu1 %v9340_v10 }
 0xd05   : > { %v9524_v38 = vpop.eup %9523  ;;  %9098 = vmatprep.subr.bf16.mxu1 %v9646_v5 }
 0xd06   : > { %v3424_v31 = vadd.f32 %v7813_v9, %v3416_v21  ;;  %v3410_v57 = vmul.f32 %v9524_v38, %v10746_v33 }
 0xd08   : > { %v3432_v39 = vsel %vm403_vm0, %v3424_v31, 0.0  ;;  %v3418_v52 = vmul.f32 %v7812_v61, %v3410_v57 }
 0xd09   : > { %3433 = vadd.xlane.f32.xlu0 %v3432_v39 }
 0xd0a   : > { %v3426_v32 = vadd.f32 %v7813_v9, %v3418_v52 }
 0xd0c   : > { %v3438_v36 = vsel %vm403_vm0, %v3426_v32, 0.0 }
 0xd0d   : > { %3439 = vadd.xlane.f32.xlu0 %v3438_v36 }
 0xd75   : > { %v3431_v35 = vpop.xlane.xlu1 %3430 }
 0xd76   : > { %v3441_v4 = vmul.f32 0.03125, %v3431_v35 }
 0xd78   : > { %v10784_v60 = vsub.f32 %v3423_v55, %v3441_v4 }
 0xd79   : > { %v3437_v48 = vpop.xlane.xlu1 %3436 }
 0xd7a   : > { %v3443_v9 = vmul.f32 0.03125, %v3437_v48  ;;  %v3449_v55 = vmul.f32 %v10784_v60, %v10784_v60 }
 0xd7c   : > { %v10792_v40 = vsub.f32 %v10769_v50, %v3443_v9  ;;  %v3453_v14 = vsel %vm403_vm0, %v3449_v55, 0.0 }
 0xd7e   : > { %v3451_v34 = vmul.f32 %v10792_v40, %v10792_v40 }
 0xd80   : > { %v3459_v23 = vsel %vm403_vm0, %v3451_v34, 0.0 }
 0xd92   : > { %v3434_v46 = vpop.xlane.xlu0 %3433 }
 0xd93   : > { %v3442_v56 = vmul.f32 0.03125, %v3434_v46 }
 0xd96   : > { %v3440_v53 = vpop.xlane.xlu0 %3439 }
 0xd97   : > { %v3444_v43 = vmul.f32 0.03125, %v3440_v53 }
 0xd99   : > { %v10803_v20 = vsub.f32 %v3426_v32, %v3444_v43 }
 0xd9b   : > { %v3452_v22 = vmul.f32 %v10803_v20, %v10803_v20 }
 0xd9d   : > { %v3462_v37 = vsel %vm403_vm0, %v3452_v22, 0.0 }
 0xdbf   : > { %v9074_v63 = vpop.f32.mrf.mxu1 }
 0xdc0   : > { %v4141_v8 = vadd.f32 %v9074_v63, %v7851_v44 }
 0xdc1   : > { %v4132_v0 = vpop.f32.mrf.mxu1 }
 0xdc2   : > { %v4133_v33 = vadd.f32 %v7851_v44, %v4132_v0  ;;  %v4149_v13 = vadd.f32 %v4141_v8, %v11809_v54 }
 0xdc3   : > { %v9075_v58 = vpop.f32.mrf.mxu1 }
 0xdc4   : > { %v4147_v61 = vadd.f32 %v4133_v33, %v365_v15  ;;  %v4144_v16 = vadd.f32 %v9075_v58, %v7851_v44  ;;  %v10794_v15 = vsub.f32 %v3424_v31, %v3442_v56  ;;  %v4159_v59 = vsel %vm403_vm0, %v4149_v13, 0.0 }
 0xdc5   : > { %v4135_v62 = vpop.f32.mrf.mxu1 }
 0xdc6   : > { %v4136_v51 = vadd.f32 %v7851_v44, %v4135_v62  ;;  %v4153_v41 = vsel %vm403_vm0, %v4147_v61, 0.0  ;;  %v4150_v24 = vadd.f32 %v4144_v16, %v11811_v6  ;;  %v3450_v25 = vmul.f32 %v10794_v15, %v10794_v15 }
 0xdc7   : > { %4154 = vadd.xlane.f32.xlu1 %v4153_v41 }
 0xdc8   : > { %v4148_v28 = vadd.f32 %v4136_v51, %v11810_v26  ;;  %v4162_v50 = vsel %vm403_vm0, %v4150_v24, 0.0  ;;  %v3456_v19 = vsel %vm403_vm0, %v3450_v25, 0.0 }
 0xdca   : > { %v4156_v29 = vsel %vm403_vm0, %v4148_v28, 0.0 }
 0xdcb   : > { %4160 = vadd.xlane.f32.xlu1 %v4159_v59  ;;  %4157 = vadd.xlane.f32.xlu0 %v4156_v29  ;;  %v7815_v59 = vld [vmem:[%s11791_s4 + $0xa] ss:$0 sm:$0xff] }
 0xdcf   : > { %3454 = vadd.xlane.f32.xlu1 %v3453_v14  ;;  %4163 = vadd.xlane.f32.xlu0 %v4162_v50 }
 0xdd3   : > { %3460 = vadd.xlane.f32.xlu1 %v3459_v23  ;;  %3457 = vadd.xlane.f32.xlu0 %v3456_v19 }
 0xdd7   : > { %3463 = vadd.xlane.f32.xlu0 %v3462_v37 }
 0xe50   : > { %v4155_v42 = vpop.xlane.xlu1 %4154 }
 0xe51   : > { %v4165_v27 = vmul.f32 0.03125, %v4155_v42 }
 0xe53   : > { %v10822_v45 = vsub.f32 %v4147_v61, %v4165_v27 }
 0xe54   : > { %v4161_v18 = vpop.xlane.xlu1 %4160  ;;  %v4158_v30 = vpop.xlane.xlu0 %4157 }
 0xe55   : > { %v4167_v47 = vmul.f32 0.03125, %v4161_v18  ;;  %v4166_v49 = vmul.f32 0.03125, %v4158_v30  ;;  %v4173_v3 = vmul.f32 %v10822_v45, %v10822_v45 }
 0xe57   : > { %v10826_v21 = vsub.f32 %v4149_v13, %v4167_v47  ;;  %v10828_v38 = vsub.f32 %v4148_v28, %v4166_v49  ;;  %v4177_v31 = vsel %vm403_vm0, %v4173_v3, 0.0  ;;  %v7814_v13 = vld [vmem:[%s11791_s4 + $0x9] ss:$0 sm:$0xff] }
 0xe58   : > { %4178 = vadd.xlane.f32.xlu1 %v4177_v31  ;;  %v3455_v57 = vpop.xlane.xlu1 %3454  ;;  %v4164_v39 = vpop.xlane.xlu0 %4163 }
 0xe59   : > { %v3465_v52 = vmul.f32 0.03125, %v3455_v57  ;;  %v4168_v32 = vmul.f32 0.03125, %v4164_v39  ;;  %v4175_v36 = vmul.f32 %v10826_v21, %v10826_v21  ;;  %v4174_v35 = vmul.f32 %v10828_v38, %v10828_v38 }
 0xe5b   : > { %v3469_v63 = vadd.f32 1e-05, %v3465_v52  ;;  %v10835_v44 = vsub.f32 %v4150_v24, %v4168_v32  ;;  %v4183_v4 = vsel %vm403_vm0, %v4175_v36, 0.0  ;;  %v4180_v46 = vsel %vm403_vm0, %v4174_v35, 0.0  ;;  %v7856_v52 = vld [vmem:[%s11791_s4 + $0x14] ss:$0 sm:$0xff] }
 0xe5c   : > { %4184 = vadd.xlane.f32.xlu1 %v4183_v4  ;;  %v3461_v0 = vpop.xlane.xlu1 %3460  ;;  %4181 = vadd.xlane.f32.xlu0 %v4180_v46  ;;  %v3458_v48 = vpop.xlane.xlu0 %3457  ;;  %v7857_v46 = vld [vmem:[%s11791_s4 + $0x15] ss:$0 sm:$0xff] }
 0xe5d   : > { %9525 = vrsqrt.f32 %v3469_v63  ;;  %v3467_v8 = vmul.f32 0.03125, %v3461_v0  ;;  %v3466_v33 = vmul.f32 0.03125, %v3458_v48  ;;  %v4176_v58 = vmul.f32 %v10835_v44, %v10835_v44 }
 0xe5f   : > { %v3471_v61 = vadd.f32 1e-05, %v3467_v8  ;;  %v3470_v9 = vadd.f32 1e-05, %v3466_v33  ;;  %v4186_v56 = vsel %vm403_vm0, %v4176_v58, 0.0 }
 0xe60   : > { %4187 = vadd.xlane.f32.xlu0 %v4186_v56  ;;  %v3464_v62 = vpop.xlane.xlu0 %3463 }
 0xe61   : > { %9527 = vrsqrt.f32 %v3471_v61  ;;  %v3468_v16 = vmul.f32 0.03125, %v3464_v62  ;;  %v7875_v62 = vld [vmem:[%s11791_s4 + $0x10] ss:$0 sm:$0xff] }
 0xe62   : > { %9529 = vrsqrt.f32 %v3470_v9 }
 0xe63   : > { %v3472_v51 = vadd.f32 1e-05, %v3468_v16 }
 0xe65   : > { %9531 = vrsqrt.f32 %v3472_v51 }
 0xe6a   : > { %v9526_v41 = vpop.eup %9525 }
 0xe6b   : > { %v3477_v54 = vmul.f32 %v9526_v41, %v10784_v60 }
 0xe6d   : > { %v3485_v43 = vmul.f32 %v7814_v13, %v3477_v54 }
 0xe6e   : > { %v9528_v53 = vpop.eup %9527 }
 0xe6f   : > { %v9530_v26 = vpop.eup %9529  ;;  %v3479_v28 = vmul.f32 %v9528_v53, %v10792_v40  ;;  %v3493_v14 = vadd.f32 %v7815_v59, %v3485_v43 }
 0xe70   : > { %v3478_v55 = vmul.f32 %v9530_v26, %v10794_v15  ;;  %v9341_v15 = vld [vmem:[%s11790_s3 + $0x28] sm:$0xff]  }
 0xe71   : > { %v3487_v60 = vmul.f32 %v7814_v13, %v3479_v28  ;;  %9076 = vmatprep.subr.bf16.mxu0 %v9341_v15 }
 0xe72   : > { %v9532_v29 = vpop.eup %9531  ;;  %v3486_v6 = vmul.f32 %v7814_v13, %v3478_v55  ;;  %9077 = vmatpush3.bf16.msra.mxu0 %v9341_v15 }
 0xe73   : > { %v3480_v24 = vmul.f32 %v9532_v29, %v10803_v20  ;;  %v3495_v23 = vadd.f32 %v7815_v59, %v3487_v60  ;;  %v9342_v20 = vld [vmem:[%s11790_s3 + $0x20] sm:$0xff]   ;;  %v7866_v29 = vld [vmem:[%s11791_s4 + $0xf] ss:$0 sm:$0xff] }
 0xe74   : > { %v3494_v50 = vadd.f32 %v7815_v59, %v3486_v6  ;;  %9078 = vmatprep.subr.bf16.mxu0 %v9342_v20 }
 0xe75   : > { %v3488_v34 = vmul.f32 %v7814_v13, %v3480_v24 }
 0xe76   : > { %v3497_v25 = vpack.c.bf16 %v3494_v50, %v3493_v14  ;;  %9079 = vmatpush3.bf16.msra.mxu0 %v9342_v20 }
 0xe77   : > { %v3496_v19 = vadd.f32 %v7815_v59, %v3488_v34  ;;  %9092 = vmatprep.subr.bf16.mxu0 %v9646_v5 }
 0xe78   : > { %9088 = vmatprep.mubr.msk.bf16.mxu1 %vm403_vm0, %v3497_v25 }
 0xe79   : > { %v3498_v40 = vpack.c.bf16 %v3496_v19, %v3495_v23 }
 0xe7b   : > { %9089 = vmatmul.mubr.msk.bf16.vlgmr.msra.gmra.mxu1 %vm403_vm0, %v3498_v40 }
 0xe7c   : > { %9100 = vmatprep.mubr.msk.bf16.mxu1 %vm9647_vm1, %v9646_v5 }
 0xee1   : > { %v4179_v22 = vpop.xlane.xlu1 %4178 }
 0xee2   : > { %v4189_v37 = vmul.f32 0.03125, %v4179_v22 }
 0xee4   : > { %v4193_v17 = vadd.f32 1e-05, %v4189_v37 }
 0xee5   : > { %v4185_v10 = vpop.xlane.xlu1 %4184  ;;  %v4182_v42 = vpop.xlane.xlu0 %4181 }
 0xee6   : > { %9533 = vrsqrt.f32 %v4193_v17  ;;  %v4191_v27 = vmul.f32 0.03125, %v4185_v10  ;;  %v4190_v18 = vmul.f32 0.03125, %v4182_v42 }
 0xee8   : > { %v4195_v30 = vadd.f32 1e-05, %v4191_v27  ;;  %v4194_v47 = vadd.f32 1e-05, %v4190_v18 }
 0xee9   : > { %v4188_v49 = vpop.xlane.xlu0 %4187 }
 0xeea   : > { %9535 = vrsqrt.f32 %v4195_v30  ;;  %v4192_v3 = vmul.f32 0.03125, %v4188_v49 }
 0xeeb   : > { %9537 = vrsqrt.f32 %v4194_v47 }
 0xeec   : > { %v4196_v31 = vadd.f32 1e-05, %v4192_v3 }
 0xeee   : > { %9539 = vrsqrt.f32 %v4196_v31 }
 0xef3   : > { %v9534_v57 = vpop.eup %9533 }
 0xef4   : > { %v4201_v39 = vmul.f32 %v9534_v57, %v10822_v45 }
 0xef6   : > { %v4209_v4 = vmul.f32 %v7856_v52, %v4201_v39 }
 0xef7   : > { %v9536_v32 = vpop.eup %9535 }
 0xef8   : > { %v9538_v36 = vpop.eup %9537  ;;  %v4203_v35 = vmul.f32 %v9536_v32, %v10826_v21  ;;  %v10873_v33 = vadd.f32 %v7857_v46, %v4209_v4 }
 0xef9   : > { %v4202_v63 = vmul.f32 %v9538_v36, %v10828_v38 }
 0xefa   : > { %v4211_v45 = vmul.f32 %v7856_v52, %v4203_v35 }
 0xefb   : > { %v9540_v0 = vpop.eup %9539  ;;  %v4210_v48 = vmul.f32 %v7856_v52, %v4202_v63 }
 0xefc   : > { %v4204_v8 = vmul.f32 %v9540_v0, %v10835_v44  ;;  %v10879_v9 = vadd.f32 %v7857_v46, %v4211_v45  ;;  %v7876_v45 = vld [vmem:[%s11791_s4 + $0x11] ss:$0 sm:$0xff] }
 0xefd   : > { %v10875_v58 = vadd.f32 %v7857_v46, %v4210_v48 }
 0xefe   : > { %v4212_v61 = vmul.f32 %v7856_v52, %v4204_v8 }
 0xeff   : > { %v4221_v21 = vpack.c.bf16 %v10875_v58, %v10873_v33 }
 0xf00   : > { %v10881_v38 = vadd.f32 %v7857_v46, %v4212_v61 }
 0xf01   : > { %9080 = vmatprep.mubr.msk.bf16.mxu0 %vm403_vm0, %v4221_v21 }
 0xf02   : > { %v4222_v56 = vpack.c.bf16 %v10881_v38, %v10879_v9 }
 0xf04   : > { %9081 = vmatmul.mubr.msk.bf16.vlgmr.msra.gmra.mxu0 %vm403_vm0, %v4222_v56 }
 0xf05   : > { %9094 = vmatprep.mubr.msk.bf16.mxu0 %vm9647_vm1, %v9646_v5 }
 0xf3b   : > { %v10889_v44 = vpop.f32.mrf.mxu1 }
 0xf3c   : > { %v4385_v43 = vadd.f32 %v10889_v44, %v7875_v62 }
 0xf3d   : > { %v10894_v16 = vpop.f32.mrf.mxu1 }
 0xf3e   : > { %v4383_v51 = vadd.f32 %v7875_v62, %v10894_v16  ;;  %v8415_v24 = vpack.c.bf16 %v4385_v43, %v4385_v43 }
 0xf3f   : > { %v10897_v41 = vpop.f32.mrf.mxu1 }
 0xf40   : > { %v8413_v54 = vpack.c.bf16 %v4383_v51, %v4383_v51  ;;  %v4386_v60 = vadd.f32 %v10897_v41, %v7875_v62  ;;  %v4527_v40 = vsel %vm403_vm0, %v8415_v24, 0 }
 0xf41   : > { %v10899_v13 = vpop.f32.mrf.mxu1 }
 0xf42   : > { %v4384_v53 = vadd.f32 %v7875_v62, %v10899_v13  ;;  %v4435_v26 = vsel %vm403_vm0, %v8413_v54, 0  ;;  %v8416_v23 = vpack.c.bf16 %v4386_v60, %v4386_v60 }
 0xf43   : > { %9093 = vmatpush3.bf16.xpose.msra.mxu0 %v4435_v26 }
 0xf44   : > { %v8414_v28 = vpack.c.bf16 %v4384_v53, %v4384_v53  ;;  %9104 = vmatprep.subr.bf16.mxu0 %v9646_v5  ;;  %v4573_v22 = vsel %vm403_vm0, %v8416_v23, 0 }
 0xf46   : > { %v4481_v55 = vsel %vm403_vm0, %v8414_v28, 0 }
 0xf47   : > { %9099 = vmatpush3.bf16.xpose.msra.mxu1 %v4481_v55 }
 0xf48   : > { %9110 = vmatprep.subr.bf16.mxu1 %v9646_v5 }
 0xfc4   : > { %v9082_v59 = vpop.f32.mrf.mxu0 }
 0xfc5   : > { %v4306_v15 = vadd.f32 %v9082_v59, %v7866_v29 }
 0xfc6   : > { %v4297_v6 = vpop.f32.mrf.mxu0 }
 0xfc7   : > { %v4298_v14 = vadd.f32 %v7866_v29, %v4297_v6  ;;  %v8411_v37 = vpack.c.bf16 %v4306_v15, %v4306_v15 }
 0xfc8   : > { %v9083_v50 = vpop.f32.mrf.mxu0 }
 0xfc9   : > { %v8409_v34 = vpack.c.bf16 %v4298_v14, %v4298_v14  ;;  %v4309_v17 = vadd.f32 %v9083_v50, %v7866_v29 }
 0xfca   : > { %v4300_v25 = vpop.f32.mrf.mxu0 }
 0xfcb   : > { %v4301_v19 = vadd.f32 %v7866_v29, %v4300_v25  ;;  %9095 = vmatmul.mubr.msk.bf16.vlgmr.msra.gmra.mxu0 %vm403_vm0, %v8409_v34  ;;  %v8412_v10 = vpack.c.bf16 %v4309_v17, %v4309_v17 }
 0xfcc   : > { %9105 = vmatpush3.bf16.xpose.msra.mxu0 %v4527_v40  ;;  %9106 = vmatprep.mubr.msk.bf16.mxu0 %vm9647_vm1, %v9646_v5 }
 0xfcd   : > { %v8410_v20 = vpack.c.bf16 %v4301_v19, %v4301_v19  ;;  %9116 = vmatprep.subr.bf16.mxu0 %v9646_v5 }
 0xfcf   : > { %9101 = vmatmul.mubr.msk.bf16.vlgmr.msra.gmra.mxu1 %vm403_vm0, %v8410_v20 }
 0xfd0   : > { %9111 = vmatpush3.bf16.xpose.msra.mxu1 %v4573_v22  ;;  %9112 = vmatprep.mubr.msk.bf16.mxu1 %vm9647_vm1, %v9646_v5 }
 0xfd1   : > { %9122 = vmatprep.subr.bf16.mxu1 %v9646_v5 }
 0xfd3   : > { %9107 = vmatmul.mubr.msk.bf16.vlgmr.msra.gmra.mxu0 %vm403_vm0, %v8411_v37 }
 0xfd4   : > { %9118 = vmatprep.mubr.msk.bf16.mxu0 %vm9647_vm1, %v9646_v5 }
 0xfd7   : > { %9113 = vmatmul.mubr.msk.bf16.vlgmr.msra.gmra.mxu1 %vm403_vm0, %v8412_v10 }
 0xfd8   : > { %9124 = vmatprep.mubr.msk.bf16.mxu1 %vm9647_vm1, %v9646_v5 }
0x108b   : > { %v4471_v42 = vpop.f32.mrf.mxu0 }
0x108c   : > { %v4615_v27 = vsel %vm715_vm2, %v4471_v42, -inf }
0x108d   : > { %4616 = vmax.xlane.f32.xlu1 %v4615_v27  ;;  %v9096_v18 = vpop.f32.mrf.mxu0 }
0x108f   : > { %v4474_v30 = vpop.f32.mrf.mxu0  ;;  %v4517_v47 = vpop.f32.mrf.mxu1 }
0x1090   : > { %v4618_v49 = vsel %vm715_vm2, %v4517_v47, -inf }
0x1091   : > { %4619 = vmax.xlane.f32.xlu0 %v4618_v49  ;;  %v9097_v3 = vpop.f32.mrf.mxu0  ;;  %v9102_v31 = vpop.f32.mrf.mxu1 }
0x1093   : > { %v4520_v57 = vpop.f32.mrf.mxu1  ;;  %v4563_v39 = vpop.f32.mrf.mxu0 }
0x1094   : > { %v4621_v52 = vsel %vm715_vm2, %v4563_v39, -inf }
0x1095   : > { %v9103_v32 = vpop.f32.mrf.mxu1  ;;  %4622 = vmax.xlane.f32.xlu1 %v4621_v52  ;;  %v9108_v36 = vpop.f32.mrf.mxu0 }
0x1097   : > { %v4566_v35 = vpop.f32.mrf.mxu0  ;;  %v4609_v63 = vpop.f32.mrf.mxu1 }
0x1098   : > { %v4624_v4 = vsel %vm715_vm2, %v4609_v63, -inf }
0x1099   : > { %4625 = vmax.xlane.f32.xlu0 %v4624_v4  ;;  %v9109_v46 = vpop.f32.mrf.mxu0  ;;  %v9114_v0 = vpop.f32.mrf.mxu1 }
0x109b   : > { %v4612_v48 = vpop.f32.mrf.mxu1 }
0x109d   : > { %v9115_v8 = vpop.f32.mrf.mxu1 }
0x10a6   : > { %4392 = vrot.lane.b32.xlu1 %v7876_v45, %s9645_s12  ;;  %v9343_v45 = vld [vmem:[%s11790_s3 + $0x38] sm:$0xff]   ;;  %s351_s12 = sand.u32 1, %s9635_s14  }
0x10a7   : > { %s7517_s20 = scalar_lea.sflag [#allocation3], %s351_s12 }
0x1116   : > { %v4617_v61 = vpop.xlane.xlu1 %4616 }
0x1117   : > { %v4627_v21 = vsub.f32 %v4471_v42, %v4617_v61  ;;  %v9344_v61 = vld [vmem:[%s11790_s3 + $0x30] sm:$0xff]  }
0x1119   : > { %v4631_v56 = vmul.f32 1.442695, %v4627_v21 }
0x111a   : > { %v4620_v62 = vpop.xlane.xlu0 %4619 }
0x111b   : > { %9541 = vpow2.f32 %v4631_v56  ;;  %v4628_v51 = vsub.f32 %v4517_v47, %v4620_v62 }
0x111d   : > { %v4633_v54 = vmul.f32 1.442695, %v4628_v51 }
0x111e   : > { %v4623_v53 = vpop.xlane.xlu1 %4622 }
0x111f   : > { %9543 = vpow2.f32 %v4633_v54  ;;  %v4629_v26 = vsub.f32 %v4563_v39, %v4623_v53 }
0x1121   : > { %v4635_v28 = vmul.f32 1.442695, %v4629_v26 }
0x1122   : > { %v4626_v55 = vpop.xlane.xlu0 %4625  ;;  %v4393_v43 = vpop.permute.xlu1 %4392 }
0x1123   : > { %9545 = vpow2.f32 %v4635_v28  ;;  %v4630_v59 = vsub.f32 %v4609_v63, %v4626_v55  ;;  %v4395_v29 = vadd.f32 %v4393_v43, %v10894_v16  ;;  %v4397_v60 = vadd.f32 %v10889_v44, %v4393_v43 }
0x1124   : > { %v4398_v25 = vadd.f32 %v10897_v41, %v4393_v43  ;;  %v4396_v41 = vadd.f32 %v4393_v43, %v10899_v13 }
0x1125   : > { %v4637_v6 = vmul.f32 1.442695, %v4630_v59  ;;  %v8417_v24 = vpack.c.bf16 %v4395_v29, %v4395_v29  ;;  %v8419_v34 = vpack.c.bf16 %v4397_v60, %v4397_v60 }
0x1126   : > { %v8420_v16 = vpack.c.bf16 %v4398_v25, %v4398_v25  ;;  %v8418_v22 = vpack.c.bf16 %v4396_v41, %v4396_v41 }
0x1127   : > { %9547 = vpow2.f32 %v4637_v6  ;;  %4664 = vrot.lane.b32.xlu1 %v8417_v24, %s11807_s25 }
0x1128   : > { %v9542_v14 = vpop.eup %9541 }
0x1129   : > { %v4639_v50 = vsel %vm715_vm2, %v9542_v14, 0.0 }
0x112a   : > { %4640 = vadd.xlane.f32.xlu0 %v4639_v50 }
0x112b   : > { %4762 = vrot.lane.b32.xlu1 %v8419_v34, %s11807_s25 }
0x112c   : > { %v9544_v23 = vpop.eup %9543 }
0x112d   : > { %v4642_v19 = vsel %vm715_vm2, %v9544_v23, 0.0 }
0x112e   : > { %4643 = vadd.xlane.f32.xlu0 %v4642_v19 }
0x112f   : > { %4811 = vrot.lane.b32.xlu1 %v8420_v16, %s11807_s25 }
0x1130   : > { %v9546_v44 = vpop.eup %9545 }
0x1131   : > { %v4645_v40 = vsel %vm715_vm2, %v9546_v44, 0.0 }
0x1132   : > { %4646 = vadd.xlane.f32.xlu0 %v4645_v40 }
0x1134   : > { %v9548_v15 = vpop.eup %9547 }
0x1135   : > { %v4648_v20 = vsel %vm715_vm2, %v9548_v15, 0.0 }
0x1136   : > { %4649 = vadd.xlane.f32.xlu0 %v4648_v20 }
0x114c   : > { %4713 = vrot.lane.b32.xlu0 %v8418_v22, %s11807_s25  ;;  %s7593_s25 = sshll.u32 %s351_s12, 2 }
0x114d   : > { %s353_s27 = scalar_lea.vmem [#allocation2], %s7593_s25  ;;  %s9651_s25 = smov [#allocation2]  }
0x114e   : > { %s7530_s28 = sshll.u32 %s353_s27, 4  ;;  %s9587_s26 = sshll.u32 %s9651_s25, 4  ;;  %s11748_s28 = int_to_ptr.vmem [resolvable:$true] %s7530_s28  ;;  %s9588_s26 = int_to_ptr.vmem [resolvable:$false] %s9587_s26 }
0x114f   : > { %s9583_s17 = scalar_lea.vmem %s11748_s28, 64  ;;  %s9589_s11 = scalar_lea.vmem %s9588_s26, 128 }
0x1150   : > { %p9584_p11 = scmp.ne.s32.totalorder %s11748_s28, %s9583_s17  ;;  %p9590_p0 = scmp.lt.s32.totalorder %s11748_s28, %s9588_s26 }
0x1151   : > { %p9591_p1 = scmp.lt.s32.totalorder %s9589_s11, %s9583_s17 }
0x1152   : > { %p9585_p12 = pnand %p9584_p11, %p9745_p5 }
0x1153   : > { %p9592_p2 = por %p9591_p1, %p9590_p0 }
0x1154   : > { %p9586_p13 = pneg %p9585_p12 }
0x1156   : > { %p9593_p3 = pnand %p9592_p2, %p9586_p13 }
0x1199   : > { %v4665_v37 = vpop.permute.xlu1 %4664 }
0x119a   : > { %v4670_v17 = vsel %vm770_vm3, %v4665_v37, 0 }
0x119b   : > { %9117 = vmatpush3.bf16.msra.mxu0 %v4670_v17 }
0x119c   : > { %9128 = vmatprep.subr.bf16.mxu0 %v9646_v5 }
0x119d   : > { %v4763_v47 = vpop.permute.xlu1 %4762 }
0x119e   : > { %v4768_v39 = vsel %vm770_vm3, %v4763_v47, 0 }
0x11a1   : > { %v4812_v32 = vpop.permute.xlu1 %4811 }
0x11a2   : > { %v4817_v63 = vsel %vm770_vm3, %v4812_v32, 0 }
0x11b3   : > { %v4641_v10 = vpop.xlane.xlu0 %4640 }
0x11b4   : > { %9549 = vrcp.f32 %v4641_v10 }
0x11b7   : > { %v4644_v42 = vpop.xlane.xlu0 %4643 }
0x11b8   : > { %9551 = vrcp.f32 %v4644_v42 }
0x11bb   : > { %v4647_v27 = vpop.xlane.xlu0 %4646 }
0x11bc   : > { %9553 = vrcp.f32 %v4647_v27 }
0x11bf   : > { %v4650_v18 = vpop.xlane.xlu0 %4649 }
0x11c0   : > { %9555 = vrcp.f32 %v4650_v18 }
0x11c1   : > { %v9550_v30 = vpop.eup %9549 }
0x11c2   : > { %v4655_v13 = vmul.f32 %v9550_v30, %v9542_v14 }
0x11c3   : > { %v4714_v49 = vpop.permute.xlu0 %4713 }
0x11c4   : > { %v4659_v3 = vpack.c.bf16 %v4655_v13, %v4655_v13  ;;  %v4719_v31 = vsel %vm770_vm3, %v4714_v49, 0 }
0x11c5   : > { %v9552_v57 = vpop.eup %9551  ;;  %9123 = vmatpush3.bf16.msra.mxu1 %v4719_v31 }
0x11c6   : > { %v4656_v52 = vmul.f32 %v9552_v57, %v9544_v23  ;;  %9119 = vmatmul.mubr.msk.bf16.vlgmr.msra.gmra.mxu0 %vm715_vm2, %v4659_v3  ;;  %9134 = vmatprep.subr.bf16.mxu1 %v9646_v5  ;;  %v7897_v23 = vld [vmem:[%s11791_s4 + $0x12] ss:$0 sm:$0xff] }
0x11c7   : > { %9129 = vmatpush3.bf16.msra.mxu0 %v4768_v39  ;;  %9130 = vmatprep.mubr.msk.bf16.mxu0 %vm9647_vm1, %v9646_v5 }
0x11c8   : > { %v4660_v36 = vpack.c.bf16 %v4656_v52, %v4656_v52  ;;  %9140 = vmatprep.subr.bf16.mxu0 %v9343_v45 }
0x11c9   : > { %v9554_v35 = vpop.eup %9553 }
0x11ca   : > { %v4657_v4 = vmul.f32 %v9554_v35, %v9546_v44  ;;  %9125 = vmatmul.mubr.msk.bf16.vlgmr.msra.gmra.mxu1 %vm715_vm2, %v4660_v36 }
0x11cb   : > { %9135 = vmatpush3.bf16.msra.mxu1 %v4817_v63  ;;  %9136 = vmatprep.mubr.msk.bf16.mxu1 %vm9647_vm1, %v9646_v5 }
0x11cc   : > { %v4661_v46 = vpack.c.bf16 %v4657_v4, %v4657_v4 }
0x11cd   : > { %v9556_v0 = vpop.eup %9555 }
0x11ce   : > { %v4658_v48 = vmul.f32 %v9556_v0, %v9548_v15  ;;  %9131 = vmatmul.mubr.msk.bf16.vlgmr.msra.gmra.mxu0 %vm715_vm2, %v4661_v46 }
0x11cf   : > { %9141 = vmatpush3.bf16.msra.mxu0 %v9343_v45  ;;  %v7910_v45 = vld [vmem:[%s11792_s5 + $0x1c0] sm:$0xff] }
0x11d0   : > { %v4662_v8 = vpack.c.bf16 %v4658_v48, %v4658_v48  ;;  %9142 = vmatprep.subr.bf16.mxu0 %v9344_v61 }
0x11d2   : > { %9137 = vmatmul.mubr.msk.bf16.vlgmr.msra.gmra.mxu1 %vm715_vm2, %v4662_v8  ;;  %v7908_v8 = vld [vmem:[%s11792_s5 + $0x180] sm:$0xff] }
0x11d3   : > { %5118 = vmatprep.mubr.bf16.mxu1 %v9650_v7  ;;  %9143 = vmatpush3.bf16.msra.mxu0 %v9344_v61  ;;  %v7909_v61 = vld [vmem:[%s11792_s5 + $0x188] sm:$0xff] }
0x1286   : > { %v4706_v21 = vpop.f32.mrf.mxu0 }
0x1288   : > { %v9120_v56 = vpop.f32.mrf.mxu0 }
0x1289   : > { %v7911_v56 = vld [vmem:[%s11792_s5 + $0x1c8] sm:$0xff] }
0x128a   : > { %v4709_v62 = vpop.f32.mrf.mxu0  ;;  %v4755_v51 = vpop.f32.mrf.mxu1 }
0x128b   : > { %v4859_v54 = vpack.c.bf16 %v4755_v51, %v4706_v21  ;;  %v7918_v21 = vcombine.high %v7908_v8, %v7910_v45  ;;  %v7917_v62 = vcombine.low %v7908_v8, %v7910_v45  ;;  %v7919_v51 = vcombine.low %v7909_v61, %v7911_v56 }
0x128c   : > { %v9121_v53 = vpop.f32.mrf.mxu0  ;;  %v9126_v26 = vpop.f32.mrf.mxu1 }
0x128d   : > { %9144 = vmatprep.mubr.msk.bf16.mxu0 %vm403_vm0, %v4859_v54  ;;  %v7920_v54 = vcombine.high %v7909_v61, %v7911_v56  ;;  %5098 = vmatprep.subr.bf16.mxu1 %v7918_v21  ;;  %v7904_v53 = vld [vmem:[%s11792_s5 + $0x100] sm:$0xff]  ;;  %v9345_v56 = vld [vmem:[%s11794_s7 + $0x578] sm:$0xff]  }
0x128e   : > { %v4758_v28 = vpop.f32.mrf.mxu1  ;;  %v4804_v55 = vpop.f32.mrf.mxu0  ;;  %5099 = vmatpush1.bf16.msra.mxu1 %v7917_v62  ;;  %v7906_v26 = vld [vmem:[%s11792_s5 + $0x140] sm:$0xff]  ;;  %v9346_v62 = vld [vmem:[%s11794_s7 + $0x5f8] sm:$0xff]  }
0x128f   : > { %5151 = vmatprep.subr.bf16.mxu0 %v7920_v54  ;;  %v7905_v28 = vld [vmem:[%s11792_s5 + $0x108] sm:$0xff] }
0x1290   : > { %v9127_v43 = vpop.f32.mrf.mxu1  ;;  %v9132_v59 = vpop.f32.mrf.mxu0 }
0x1291   : > { %v7907_v43 = vld [vmem:[%s11792_s5 + $0x148] sm:$0xff]  ;;  %v7913_v59 = vcombine.low %v7904_v53, %v7906_v26 }
0x1292   : > { %v4807_v29 = vpop.f32.mrf.mxu0  ;;  %v4853_v6 = vpop.f32.mrf.mxu1 }
0x1293   : > { %v4860_v24 = vpack.c.bf16 %v4853_v6, %v4804_v55  ;;  %v7914_v55 = vcombine.high %v7904_v53, %v7906_v26  ;;  %v7915_v29 = vcombine.low %v7905_v28, %v7907_v43  ;;  %v7916_v6 = vcombine.high %v7905_v28, %v7907_v43  ;;  %v9347_v53 = vld [vmem:[%s11794_s7 + $0x538] sm:$0xff]   ;;  %v9349_v28 = vld [vmem:[%s11794_s7 + $0x570] sm:$0xff]  }
0x1294   : > { %v9133_v60 = vpop.f32.mrf.mxu0  ;;  %v9138_v14 = vpop.f32.mrf.mxu1  ;;  %v9348_v26 = vld [vmem:[%s11794_s7 + $0x5b8] sm:$0xff]   ;;  %v9351_v43 = vld [vmem:[%s11794_s7 + $0x530] sm:$0xff]  }
0x1295   : > { %9145 = vmatmul.mubr.msk.bf16.vlgmr.msra.gmra.mxu0 %vm403_vm0, %v4860_v24  ;;  %5100 = vmatprep.subr.bf16.mxu1 %v7914_v55  ;;  %v7993_v24 = vld [vmem:[%s11792_s5 + $0x190] sm:$0xff]  ;;  %v7994_v14 = vld [vmem:[%s11792_s5 + $0x198] sm:$0xff] }
0x1296   : > { %v4856_v50 = vpop.f32.mrf.mxu1  ;;  %5171 = vmatprep.mubr.bf16.mxu0 %v9650_v7  ;;  %5152 = vmatpush1.bf16.msra.mxu0 %v7919_v51  ;;  %v7995_v60 = vld [vmem:[%s11792_s5 + $0x1d0] sm:$0xff] }
0x1297   : > { %5153 = vmatprep.subr.bf16.mxu0 %v7916_v6  ;;  %5101 = vmatpush1.bf16.msra.mxu1 %v7913_v59  ;;  %v8003_v50 = vcombine.high %v7993_v24, %v7995_v60  ;;  %v9350_v55 = vld [vmem:[%s11794_s7 + $0x5f0] sm:$0xff]   ;;  %v9354_v6 = vld [vmem:[%s11794_s7 + $0x5e8] sm:$0xff]  }
0x1298   : > { %v9139_v34 = vpop.f32.mrf.mxu1  ;;  %v9352_v59 = vld [vmem:[%s11794_s7 + $0x5b0] sm:$0xff]  }
0x1299   : > { %v7996_v34 = vld [vmem:[%s11792_s5 + $0x1d8] sm:$0xff]  ;;  %5364 = vmatprep.subr.bf16.mxu1 %v8003_v50  ;;  %v9358_v50 = vld [vmem:[%s11794_s7 + $0x5e0] sm:$0xff]  }
0x129a   : > { %5154 = vmatpush1.bf16.msra.mxu0 %v7915_v29  ;;  %v9353_v29 = vld [vmem:[%s11794_s7 + $0x568] sm:$0xff]  }
0x1355   : > { %v9146_v25 = vpop.f32.mrf.mxu0 }
0x1356   : > { %v4926_v16 = vadd.f32 %v9146_v25, %v7897_v23  ;;  %v8002_v25 = vcombine.low %v7993_v24, %v7995_v60  ;;  %v9355_v24 = vld [vmem:[%s11794_s7 + $0x528] sm:$0xff]  }
0x1357   : > { %v4917_v19 = vpop.f32.mrf.mxu0  ;;  %v9356_v60 = vld [vmem:[%s11794_s7 + $0x5a8] sm:$0xff]  }
0x1358   : > { %v4918_v44 = vadd.f32 %v7897_v23, %v4917_v19  ;;  %v4934_v17 = vadd.f32 %v4926_v16, %v10879_v9  ;;  %v8005_v19 = vcombine.high %v7994_v14, %v7996_v34 }
0x1359   : > { %v9147_v40 = vpop.f32.mrf.mxu0 }
0x135a   : > { %v4932_v15 = vadd.f32 %v4918_v44, %v10873_v33  ;;  %v4929_v41 = vadd.f32 %v9147_v40, %v7897_v23  ;;  %v4944_v27 = vsel %vm403_vm0, %v4934_v17, 0.0  ;;  %5417 = vmatprep.subr.bf16.mxu0 %v8005_v19  ;;  %v9362_v19 = vld [vmem:[%s11794_s7 + $0x5d8] sm:$0xff]  }
0x135b   : > { %v4920_v20 = vpop.f32.mrf.mxu0 }
0x135c   : > { %v4921_v22 = vadd.f32 %v7897_v23, %v4920_v20  ;;  %v4938_v37 = vsel %vm403_vm0, %v4932_v15, 0.0  ;;  %v4935_v18 = vadd.f32 %v4929_v41, %v10881_v38  ;;  %v8004_v23 = vcombine.low %v7994_v14, %v7996_v34  ;;  %v9357_v14 = vld [vmem:[%s11794_s7 + $0x560] sm:$0xff]  }
0x135d   : > { %4939 = vadd.xlane.f32.xlu1 %v4938_v37  ;;  %v9359_v34 = vld [vmem:[%s11794_s7 + $0x520] sm:$0xff]  }
0x135e   : > { %v4933_v10 = vadd.f32 %v4921_v22, %v10875_v58  ;;  %v4947_v33 = vsel %vm403_vm0, %v4935_v18, 0.0 }
0x1360   : > { %v4941_v42 = vsel %vm403_vm0, %v4933_v10, 0.0 }
0x1361   : > { %4942 = vadd.xlane.f32.xlu0 %v4941_v42  ;;  %4945 = vadd.xlane.f32.xlu1 %v4944_v27 }
0x1365   : > { %4948 = vadd.xlane.f32.xlu1 %v4947_v33 }
0x13e6   : > { %v4940_v30 = vpop.xlane.xlu1 %4939 }
0x13e7   : > { %v4950_v47 = vmul.f32 0.03125, %v4940_v30  ;;  %v7902_v30 = vld [vmem:[%s11791_s4 + $0x16] ss:$0 sm:$0xff] }
0x13e9   : > { %v10982_v13 = vsub.f32 %v4932_v15, %v4950_v47 }
0x13ea   : > { %v4943_v49 = vpop.xlane.xlu0 %4942  ;;  %v4946_v9 = vpop.xlane.xlu1 %4945 }
0x13eb   : > { %v4951_v3 = vmul.f32 0.03125, %v4943_v49  ;;  %v4952_v31 = vmul.f32 0.03125, %v4946_v9  ;;  %v4958_v58 = vmul.f32 %v10982_v13, %v10982_v13 }
0x13ed   : > { %v10986_v57 = vsub.f32 %v4933_v10, %v4951_v3  ;;  %v10988_v39 = vsub.f32 %v4934_v17, %v4952_v31  ;;  %v4962_v38 = vsel %vm403_vm0, %v4958_v58, 0.0  ;;  %v7903_v31 = vld [vmem:[%s11791_s4 + $0x17] ss:$0 sm:$0xff] }
0x13ee   : > { %4963 = vadd.xlane.f32.xlu0 %v4962_v38  ;;  %v4949_v52 = vpop.xlane.xlu1 %4948 }
0x13ef   : > { %v4953_v32 = vmul.f32 0.03125, %v4949_v52  ;;  %v4959_v36 = vmul.f32 %v10986_v57, %v10986_v57  ;;  %v4960_v35 = vmul.f32 %v10988_v39, %v10988_v39 }
0x13f1   : > { %v10995_v63 = vsub.f32 %v4935_v18, %v4953_v32  ;;  %v4965_v4 = vsel %vm403_vm0, %v4959_v36, 0.0  ;;  %v4968_v46 = vsel %vm403_vm0, %v4960_v35, 0.0 }
0x13f2   : > { %4966 = vadd.xlane.f32.xlu1 %v4965_v4  ;;  %4969 = vadd.xlane.f32.xlu0 %v4968_v46  ;;  %v7990_v4 = vld [vmem:[%s11792_s5 + $0x118] sm:$0xff] }
0x13f3   : > { %v4961_v0 = vmul.f32 %v10995_v63, %v10995_v63 }
0x13f5   : > { %v4971_v48 = vsel %vm403_vm0, %v4961_v0, 0.0 }
0x13f6   : > { %4972 = vadd.xlane.f32.xlu1 %v4971_v48 }
0x1477   : > { %v4964_v16 = vpop.xlane.xlu0 %4963 }
0x1478   : > { %v4974_v44 = vmul.f32 0.03125, %v4964_v16  ;;  %v9363_v16 = vld [vmem:[%s11794_s7 + $0x518] sm:$0xff]  }
0x147a   : > { %v4978_v40 = vadd.f32 1e-05, %v4974_v44  ;;  %v9364_v44 = vld [vmem:[%s11794_s7 + $0x598] sm:$0xff]  }
0x147b   : > { %v4970_v15 = vpop.xlane.xlu0 %4969  ;;  %v4967_v20 = vpop.xlane.xlu1 %4966 }
0x147c   : > { %9557 = vrsqrt.f32 %v4978_v40  ;;  %v4976_v41 = vmul.f32 0.03125, %v4970_v15  ;;  %v4975_v22 = vmul.f32 0.03125, %v4967_v20  ;;  %v9365_v40 = vld [vmem:[%s11794_s7 + $0x550] sm:$0xff]  }
0x147d   : > { %v9366_v15 = vld [vmem:[%s11794_s7 + $0x5d0] sm:$0xff]  }
0x147e   : > { %v4979_v37 = vadd.f32 1e-05, %v4975_v22  ;;  %v4980_v17 = vadd.f32 1e-05, %v4976_v41  ;;  %v9367_v20 = vld [vmem:[%s11794_s7 + $0x510] sm:$0xff]   ;;  %v9369_v22 = vld [vmem:[%s11794_s7 + $0x548] sm:$0xff]  }
0x147f   : > { %v4973_v10 = vpop.xlane.xlu1 %4972  ;;  %v9368_v41 = vld [vmem:[%s11794_s7 + $0x590] sm:$0xff]  }
0x1480   : > { %v4977_v42 = vmul.f32 0.03125, %v4973_v10  ;;  %9559 = vrsqrt.f32 %v4979_v37  ;;  %v9370_v37 = vld [vmem:[%s11794_s7 + $0x5c8] sm:$0xff]  }
0x1481   : > { %9561 = vrsqrt.f32 %v4980_v17  ;;  %v9371_v17 = vld [vmem:[%s11794_s7 + $0x508] sm:$0xff]  }
0x1482   : > { %v4981_v27 = vadd.f32 1e-05, %v4977_v42  ;;  %v9372_v10 = vld [vmem:[%s11794_s7 + $0x588] sm:$0xff]   ;;  %v9373_v42 = vld [vmem:[%s11794_s7 + $0x540] sm:$0xff]  }
0x1484   : > { %9563 = vrsqrt.f32 %v4981_v27  ;;  %v9374_v27 = vld [vmem:[%s11794_s7 + $0x5c0] sm:$0xff]  }
0x1489   : > { %v9558_v18 = vpop.eup %9557 }
0x148a   : > { %v4986_v33 = vmul.f32 %v9558_v18, %v10982_v13  ;;  %v7989_v13 = vld [vmem:[%s11792_s5 + $0x110] sm:$0xff]  ;;  %v9375_v18 = vld [vmem:[%s11794_s7 + $0x500] sm:$0xff]  }
0x148c   : > { %v4994_v49 = vmul.f32 %v7902_v30, %v4986_v33  ;;  %v9376_v33 = vld [vmem:[%s11794_s7 + $0x580] sm:$0xff]  }
0x148d   : > { %v9560_v47 = vpop.eup %9559 }
0x148e   : > { %v4987_v9 = vmul.f32 %v9560_v47, %v10986_v57  ;;  %v9562_v3 = vpop.eup %9561  ;;  %v11050_v32 = vadd.f32 %v7903_v31, %v4994_v49  ;;  %v7991_v57 = vld [vmem:[%s11792_s5 + $0x150] sm:$0xff]  ;;  %v9378_v47 = vld [vmem:[%s11794_s7 + $0x4f8] sm:$0xff]  }
0x148f   : > { %v4988_v36 = vmul.f32 %v9562_v3, %v10988_v39  ;;  %v7999_v39 = vcombine.high %v7989_v13, %v7991_v57  ;;  %v7998_v61 = vcombine.low %v7989_v13, %v7991_v57 }
0x1490   : > { %v4995_v38 = vmul.f32 %v7902_v30, %v4987_v9 }
0x1491   : > { %v9564_v58 = vpop.eup %9563  ;;  %v4996_v8 = vmul.f32 %v7902_v30, %v4988_v36 }
0x1492   : > { %v4989_v52 = vmul.f32 %v9564_v58, %v10995_v63  ;;  %v11053_v35 = vadd.f32 %v7903_v31, %v4995_v38  ;;  %v7992_v63 = vld [vmem:[%s11792_s5 + $0x158] sm:$0xff] }
0x1493   : > { %v8001_v48 = vcombine.high %v7990_v4, %v7992_v63  ;;  %v8000_v21 = vcombine.low %v7990_v4, %v7992_v63  ;;  %v11082_v51 = vadd.f32 %v7903_v31, %v4996_v8 }
0x1494   : > { %v11066_v46 = vpack.c.bf16 %v11053_v35, %v11050_v32  ;;  %v4997_v0 = vmul.f32 %v7902_v30, %v4989_v52  ;;  %v9377_v30 = vld [vmem:[%s11794_s7 + $0x478] sm:$0xff]  }
0x1496   : > { %7921 = vmatmul.mubr.msk.bf16.vlgmr.msra.gmra.mxu1 %vm403_vm0, %v11066_v46  ;;  %7923 = vmatmul.mubr.msk.bf16.vlgmr.msra.gmra.mxu0 %vm403_vm0, %v11066_v46  ;;  %v11074_v45 = vadd.f32 %v7903_v31, %v4997_v0 }
0x1497   : > { %5128 = vmatprep.mubr.bf16.mxu1 %v9650_v7  ;;  %5181 = vmatprep.mubr.bf16.mxu0 %v9650_v7 }
0x1498   : > { %5365 = vmatpush1.bf16.msra.mxu1 %v8002_v25  ;;  %5418 = vmatpush1.bf16.msra.mxu0 %v8004_v23  ;;  %v11086_v54 = vpack.c.bf16 %v11074_v45, %v11082_v51  ;;  %v9360_v25 = vld [vmem:[%s11794_s7 + $0x5a0] sm:$0xff]   ;;  %v9361_v23 = vld [vmem:[%s11794_s7 + $0x558] sm:$0xff]  }
0x1499   : > { %5366 = vmatprep.subr.bf16.mxu1 %v7999_v39  ;;  %5419 = vmatprep.subr.bf16.mxu0 %v8001_v48 }
0x149c   : > { %5367 = vmatpush1.bf16.msra.mxu1 %v7998_v61  ;;  %5420 = vmatpush1.bf16.msra.mxu0 %v8000_v21  ;;  %v7997_v61 = vld [vmem:[%s11793_s6 + $0x9] ss:$2 sm:$0xf] }
0x149d   : > { %8721 = vmatprep.subr.bf16.mxu1 %v9345_v56  ;;  %8749 = vmatprep.subr.bf16.mxu0 %v9346_v62  ;;  %v5299_v62 = vrot.slane %v7997_v61, %v10147_v1 }
0x149e   : > { %7922 = vmatmul.mubr.msk.bf16.gmra.mxu1 %vm403_vm0, %v11086_v54  ;;  %7924 = vmatmul.mubr.msk.bf16.gmra.mxu0 %vm403_vm0, %v11086_v54 }
0x149f   : > { %5384 = vmatprep.mubr.bf16.mxu1 %v9650_v7  ;;  %5437 = vmatprep.mubr.bf16.mxu0 %v9650_v7 }
0x14a6   : > { %8006 = vmatmul.mubr.msk.bf16.vlgmr.msra.gmra.mxu1 %vm403_vm0, %v11066_v46  ;;  %8008 = vmatmul.mubr.msk.bf16.vlgmr.msra.gmra.mxu0 %vm403_vm0, %v11066_v46 }
0x14a7   : > { %5394 = vmatprep.mubr.bf16.mxu1 %v9650_v7  ;;  %5447 = vmatprep.mubr.bf16.mxu0 %v9650_v7 }
0x14a8   : > { %8722 = vmatpush3.bf16.msra.mxu1 %v9347_v53  ;;  %8750 = vmatpush3.bf16.msra.mxu0 %v9348_v26  ;;  %v5307_v53 = vrot.slane %v7997_v61, %v10149_v2  ;;  %v5295_v26 = vrot.slane %v7997_v61, %v10154_v11 }
0x14a9   : > { %8723 = vmatprep.subr.bf16.mxu1 %v9349_v28  ;;  %8751 = vmatprep.subr.bf16.mxu0 %v9350_v55  ;;  %v5303_v28 = vrot.slane %v7997_v61, %v10156_v12 }
0x14ac   : > { %8724 = vmatpush3.bf16.msra.mxu1 %v9351_v43  ;;  %8752 = vmatpush3.bf16.msra.mxu0 %v9352_v59 }
0x14ad   : > { %8725 = vmatprep.subr.bf16.mxu1 %v9353_v29  ;;  %8753 = vmatprep.subr.bf16.mxu0 %v9354_v6 }
0x14ae   : > { %8007 = vmatmul.mubr.msk.bf16.gmra.mxu1 %vm403_vm0, %v11086_v54  ;;  %8009 = vmatmul.mubr.msk.bf16.gmra.mxu0 %vm403_vm0, %v11086_v54 }
0x14b0   : > { %8726 = vmatpush3.bf16.msra.mxu1 %v9355_v24  ;;  %8754 = vmatpush3.bf16.msra.mxu0 %v9356_v60 }
0x14b1   : > { %8727 = vmatprep.subr.bf16.mxu1 %v9357_v14  ;;  %8755 = vmatprep.subr.bf16.mxu0 %v9358_v50 }
0x14b4   : > { %8728 = vmatpush3.bf16.msra.mxu1 %v9359_v34  ;;  %8756 = vmatpush3.bf16.msra.mxu0 %v9360_v25 }
0x14b5   : > { %8729 = vmatprep.subr.bf16.mxu1 %v9361_v23  ;;  %8757 = vmatprep.subr.bf16.mxu0 %v9362_v19 }
0x14b8   : > { %8730 = vmatpush3.bf16.msra.mxu1 %v9363_v16  ;;  %8758 = vmatpush3.bf16.msra.mxu0 %v9364_v44  ;;  %v11238_v44 = vld [vmem:[%s11793_s6 + $0x1] ss:$2 sm:$0xf] }
0x14b9   : > { %8731 = vmatprep.subr.bf16.mxu1 %v9365_v40  ;;  %8759 = vmatprep.subr.bf16.mxu0 %v9366_v15 }
0x14bc   : > { %8732 = vmatpush3.bf16.msra.mxu1 %v9367_v20  ;;  %8760 = vmatpush3.bf16.msra.mxu0 %v9368_v41 }
0x14bd   : > { %8733 = vmatprep.subr.bf16.mxu1 %v9369_v22  ;;  %8761 = vmatprep.subr.bf16.mxu0 %v9370_v37 }
0x14c0   : > { %8734 = vmatpush3.bf16.msra.mxu1 %v9371_v17  ;;  %8762 = vmatpush3.bf16.msra.mxu0 %v9372_v10 }
0x14c1   : > { %8735 = vmatprep.subr.bf16.mxu1 %v9373_v42  ;;  %8763 = vmatprep.subr.bf16.mxu0 %v9374_v27  ;;  %v11242_v42 = vrot.slane %v11238_v44, %v10147_v1 }
0x14c4   : > { %8736 = vmatpush3.bf16.msra.mxu1 %v9375_v18  ;;  %8764 = vmatpush3.bf16.msra.mxu0 %v9376_v33 }
0x14c5   : > { %8777 = vmatprep.subr.bf16.mxu1 %v9377_v30  ;;  %8805 = vmatprep.subr.bf16.mxu0 %v9378_v47  ;;  %v11246_v47 = vrot.slane %v11238_v44, %v10149_v2 }
0x1556   : > { %v11200_v49 = vpop.f32.mrf.mxu1  ;;  %v11202_v9 = vpop.f32.mrf.mxu0 }
0x1558   : > { %v11204_v3 = vpop.f32.mrf.mxu1  ;;  %v11206_v31 = vpop.f32.mrf.mxu0 }
0x155a   : > { %v11208_v58 = vpop.f32.mrf.mxu1  ;;  %v11210_v38 = vpop.f32.mrf.mxu0 }
0x155c   : > { %v5126_v52 = vpop.f32.mrf.mxu1  ;;  %v5179_v13 = vpop.f32.mrf.mxu0 }
0x155e   : > { %v11212_v36 = vpop.f32.mrf.mxu1  ;;  %v11214_v57 = vpop.f32.mrf.mxu0 }
0x1560   : > { %v11216_v4 = vpop.f32.mrf.mxu1  ;;  %v11218_v63 = vpop.f32.mrf.mxu0 }
0x1562   : > { %v11220_v0 = vpop.f32.mrf.mxu1  ;;  %v11222_v39 = vpop.f32.mrf.mxu0 }
0x1564   : > { %v11224_v48 = vpop.f32.mrf.mxu1  ;;  %v11226_v8 = vpop.f32.mrf.mxu0 }
0x1566   : > { %v5386_v21 = vpop.f32.mrf.mxu1  ;;  %v5439_v56 = vpop.f32.mrf.mxu0 }
0x1567   : > { %v5387_v50 = vadd.f32 %v5386_v21, %v5295_v26  ;;  %v5440_v34 = vadd.f32 %v5439_v56, %v5303_v28  ;;  %v9379_v56 = vld [vmem:[%s11794_s7 + $0x438] sm:$0xff]  }
0x1568   : > { %v5388_v55 = vpop.f32.mrf.mxu1  ;;  %v5441_v43 = vpop.f32.mrf.mxu0 }
0x1569   : > { %v5389_v6 = vadd.f32 %v5388_v55, %v5299_v62  ;;  %v5442_v24 = vadd.f32 %v5441_v43, %v5307_v53  ;;  %v5458_v27 = vmax.f32 %v5387_v50, 0.0  ;;  %v5460_v18 = vmax.f32 %v5440_v34, 0.0  ;;  %v9380_v55 = vld [vmem:[%s11794_s7 + $0x4b8] sm:$0xff]   ;;  %v9382_v50 = vld [vmem:[%s11794_s7 + $0x4f0] sm:$0xff]  }
0x156a   : > { %v5390_v59 = vpop.f32.mrf.mxu1  ;;  %v5443_v29 = vpop.f32.mrf.mxu0  ;;  %v5127_v43 = vadd.f32 %v5126_v52, %v11242_v42  ;;  %v5180_v52 = vadd.f32 %v5179_v13, %v11246_v47  ;;  %v5123_v13 = vadd.f32 %v11204_v3, %v11242_v42 }
0x156b   : > { %v5391_v60 = vadd.f32 %v5390_v59, %v5295_v26  ;;  %v5444_v14 = vadd.f32 %v5443_v29, %v5303_v28  ;;  %v5459_v22 = vmax.f32 %v5389_v6, 0.0  ;;  %v5461_v37 = vmax.f32 %v5442_v24, 0.0 }
0x156c   : > { %v5392_v25 = vpop.f32.mrf.mxu1  ;;  %v5445_v23 = vpop.f32.mrf.mxu0  ;;  %v5197_v3 = vmax.f32 %v5127_v43, 0.0  ;;  %v9389_v43 = vld [vmem:[%s11794_s7 + $0x460] sm:$0xff]  }
0x156d   : > { %v5393_v19 = vadd.f32 %v5392_v25, %v5299_v62  ;;  %v5446_v16 = vadd.f32 %v5445_v23, %v5307_v53  ;;  %v5462_v40 = vmax.f32 %v5391_v60, 0.0  ;;  %v5464_v15 = vmax.f32 %v5444_v14, 0.0  ;;  %v9381_v14 = vld [vmem:[%s11794_s7 + $0x470] sm:$0xff]  }
0x156e   : > { %v5396_v20 = vpop.f32.mrf.mxu1  ;;  %v5449_v41 = vpop.f32.mrf.mxu0 }
0x156f   : > { %v5463_v17 = vmax.f32 %v5393_v19, 0.0  ;;  %v5465_v10 = vmax.f32 %v5446_v16, 0.0  ;;  %v5474_v59 = vpack.c.bf16 %v5462_v40, %v5458_v27  ;;  %v5476_v29 = vpack.c.bf16 %v5464_v15, %v5460_v18 }
0x1570   : > { %v5398_v33 = vpop.f32.mrf.mxu1  ;;  %v5451_v30 = vpop.f32.mrf.mxu0  ;;  %v5397_v19 = vadd.f32 %v5396_v20, %v5295_v26  ;;  %v5450_v16 = vadd.f32 %v5449_v41, %v5303_v28 }
0x1571   : > { %v5475_v61 = vpack.c.bf16 %v5463_v17, %v5459_v22  ;;  %v5477_v21 = vpack.c.bf16 %v5465_v10, %v5461_v37  ;;  %v5399_v6 = vadd.f32 %v5398_v33, %v5299_v62  ;;  %v5452_v34 = vadd.f32 %v5451_v30, %v5307_v53  ;;  %v9383_v17 = vld [vmem:[%s11794_s7 + $0x430] sm:$0xff]  }
0x1572   : > { %v5400_v24 = vpop.f32.mrf.mxu1  ;;  %v5453_v60 = vpop.f32.mrf.mxu0  ;;  %v9384_v10 = vld [vmem:[%s11794_s7 + $0x4b0] sm:$0xff]   ;;  %v5199_v30 = vmax.f32 %v5180_v52, 0.0  ;;  %v9393_v52 = vld [vmem:[%s11794_s7 + $0x458] sm:$0xff]  }
0x1573   : > { %v5401_v25 = vadd.f32 %v5400_v24, %v5295_v26  ;;  %v5454_v23 = vadd.f32 %v5453_v60, %v5303_v28  ;;  %5770 = vmatprep.mubr.bf16.mxu1 %v5475_v61  ;;  %5819 = vmatprep.mubr.bf16.mxu0 %v5477_v21  ;;  %v5176_v26 = vadd.f32 %v11206_v31, %v11246_v47  ;;  %v5467_v41 = vmax.f32 %v5399_v6, 0.0 }
0x1574   : > { %v5402_v40 = vpop.f32.mrf.mxu1  ;;  %v5455_v15 = vpop.f32.mrf.mxu0  ;;  %5771 = vmatmul.mubr.bf16.vlgmr.msra.gmra.mxu1 %v5474_v59  ;;  %5820 = vmatmul.mubr.bf16.vlgmr.msra.gmra.mxu0 %v5476_v29  ;;  %v5469_v27 = vmax.f32 %v5452_v34, 0.0  ;;  %v5466_v61 = vmax.f32 %v5397_v19, 0.0  ;;  %v5468_v31 = vmax.f32 %v5450_v16, 0.0  ;;  %v9388_v59 = vld [vmem:[%s11794_s7 + $0x4a8] sm:$0xff]   ;;  %v5193_v29 = vmax.f32 %v5123_v13, 0.0  ;;  %v9394_v19 = vld [vmem:[%s11794_s7 + $0x4d8] sm:$0xff]  }
0x1575   : > { %v5403_v22 = vadd.f32 %v5402_v40, %v5299_v62  ;;  %v5456_v37 = vadd.f32 %v5455_v15, %v5307_v53  ;;  %8778 = vmatpush3.bf16.msra.mxu1 %v9379_v56  ;;  %8806 = vmatpush3.bf16.msra.mxu0 %v9380_v55  ;;  %v5470_v28 = vmax.f32 %v5401_v25, 0.0  ;;  %v5472_v20 = vmax.f32 %v5454_v23, 0.0  ;;  %v9385_v62 = vld [vmem:[%s11794_s7 + $0x468] sm:$0xff]   ;;  %v9391_v25 = vld [vmem:[%s11794_s7 + $0x420] sm:$0xff]   ;;  %v9395_v16 = vld [vmem:[%s11794_s7 + $0x418] sm:$0xff]  }
0x1576   : > { %8779 = vmatprep.subr.bf16.mxu1 %v9381_v14  ;;  %8807 = vmatprep.subr.bf16.mxu0 %v9382_v50  ;;  %v9386_v53 = vld [vmem:[%s11794_s7 + $0x4e8] sm:$0xff]   ;;  %v5195_v6 = vmax.f32 %v5176_v26, 0.0  ;;  %v9390_v14 = vld [vmem:[%s11794_s7 + $0x4e0] sm:$0xff]   ;;  %v5209_v50 = vpack.c.bf16 %v5197_v3, %v5193_v29  ;;  %v9396_v40 = vld [vmem:[%s11794_s7 + $0x498] sm:$0xff]   ;;  %v5023_v26 = vrot.slane %v11238_v44, %v10154_v11 }
0x1577   : > { %v5471_v18 = vmax.f32 %v5403_v22, 0.0  ;;  %v5473_v33 = vmax.f32 %v5456_v37, 0.0  ;;  %v9387_v55 = vld [vmem:[%s11794_s7 + $0x428] sm:$0xff]   ;;  %v5478_v24 = vpack.c.bf16 %v5470_v28, %v5466_v61  ;;  %v5480_v60 = vpack.c.bf16 %v5472_v20, %v5468_v31  ;;  %v9392_v23 = vld [vmem:[%s11794_s7 + $0x4a0] sm:$0xff]   ;;  %v9397_v15 = vld [vmem:[%s11794_s7 + $0x450] sm:$0xff]  }
0x1578   : > { %v5211_v34 = vpack.c.bf16 %v5199_v30, %v5195_v6  ;;  %v9398_v22 = vld [vmem:[%s11794_s7 + $0x4d0] sm:$0xff]   ;;  %v9402_v13 = vld [vmem:[%s11794_s7 + $0x4c8] sm:$0xff]   ;;  %v5031_v28 = vrot.slane %v11238_v44, %v10156_v12  ;;  %v5125_v20 = vadd.f32 %v11208_v58, %v5023_v26  ;;  %v9405_v44 = vld [vmem:[%s11794_s7 + $0x440] sm:$0xff]  }
0x1579   : > { %v5479_v21 = vpack.c.bf16 %v5471_v18, %v5467_v41  ;;  %v5481_v56 = vpack.c.bf16 %v5473_v33, %v5469_v27  ;;  %8780 = vmatpush3.bf16.msra.mxu1 %v9383_v17  ;;  %8808 = vmatpush3.bf16.msra.mxu0 %v9384_v10  ;;  %v9399_v37 = vld [vmem:[%s11794_s7 + $0x410] sm:$0xff]   ;;  %v9401_v10 = vld [vmem:[%s11794_s7 + $0x448] sm:$0xff]   ;;  %v9406_v58 = vld [vmem:[%s11794_s7 + $0x4c0] sm:$0xff]   ;;  %v5121_v18 = vadd.f32 %v11200_v49, %v5023_v26 }
0x157a   : > { %8781 = vmatprep.subr.bf16.mxu1 %v9385_v62  ;;  %8809 = vmatprep.subr.bf16.mxu0 %v9386_v53  ;;  %v9400_v17 = vld [vmem:[%s11794_s7 + $0x490] sm:$0xff]   ;;  %v9403_v62 = vld [vmem:[%s11794_s7 + $0x408] sm:$0xff]   ;;  %v5178_v41 = vadd.f32 %v11210_v38, %v5031_v28  ;;  %v8142_v27 = vld [vmem:[%s11792_s5 + $0x1a0] sm:$0xff]  ;;  %v5137_v33 = vadd.f32 %v11224_v48, %v11242_v42  ;;  %v5190_v38 = vadd.f32 %v11226_v8, %v11246_v47  ;;  %v5196_v31 = vmax.f32 %v5125_v20, 0.0 }
0x157b   : > { %5778 = vmatprep.mubr.bf16.mxu1 %v5479_v21  ;;  %5827 = vmatprep.mubr.bf16.mxu0 %v5481_v56  ;;  %v9404_v53 = vld [vmem:[%s11794_s7 + $0x488] sm:$0xff]   ;;  %v8144_v3 = vld [vmem:[%s11792_s5 + $0x1e0] sm:$0xff]  ;;  %v5174_v49 = vadd.f32 %v11202_v9, %v5031_v28  ;;  %v5133_v48 = vadd.f32 %v11216_v4, %v11242_v42  ;;  %v5186_v8 = vadd.f32 %v11218_v63, %v11246_v47  ;;  %v5192_v29 = vmax.f32 %v5121_v18, 0.0  ;;  %v9416_v18 = vld [vmem:[%s11794_s7 + $0x6b0] sm:$0xff]  }
0x157c   : > { %5779 = vmatmul.mubr.bf16.gmra.mxu1 %v5478_v24  ;;  %5828 = vmatmul.mubr.bf16.gmra.mxu0 %v5480_v60  ;;  %v8143_v30 = vld [vmem:[%s11792_s5 + $0x1a8] sm:$0xff]  ;;  %v9407_v21 = vld [vmem:[%s11794_s7 + $0x400] sm:$0xff]   ;;  %v8152_v9 = vcombine.high %v8142_v27, %v8144_v3  ;;  %v5205_v4 = vmax.f32 %v5137_v33, 0.0  ;;  %v5207_v42 = vmax.f32 %v5190_v38, 0.0  ;;  %v8151_v6 = vcombine.low %v8142_v27, %v8144_v3  ;;  %v9415_v27 = vld [vmem:[%s11794_s7 + $0x630] sm:$0xff]  }
0x157d   : > { %8782 = vmatpush3.bf16.msra.mxu1 %v9387_v55  ;;  %8810 = vmatpush3.bf16.msra.mxu0 %v9388_v59  ;;  %v8145_v61 = vld [vmem:[%s11792_s5 + $0x1e8] sm:$0xff]  ;;  %v9408_v56 = vld [vmem:[%s11794_s7 + $0x480] sm:$0xff]   ;;  %v5198_v55 = vmax.f32 %v5178_v41, 0.0  ;;  %v5194_v47 = vmax.f32 %v5174_v49, 0.0 }
0x157e   : > { %6060 = vmatprep.mubr.bf16.mxu1 %v5209_v50  ;;  %6109 = vmatprep.mubr.bf16.mxu0 %v5211_v34  ;;  %v8154_v59 = vcombine.high %v8143_v30, %v8145_v61  ;;  %v8138_v63 = vld [vmem:[%s11792_s5 + $0x120] sm:$0xff]  ;;  %v8139_v60 = vld [vmem:[%s11792_s5 + $0x128] sm:$0xff]  ;;  %v5201_v50 = vmax.f32 %v5133_v48, 0.0  ;;  %v5203_v34 = vmax.f32 %v5186_v8, 0.0  ;;  %v9425_v8 = vld [vmem:[%s11794_s7 + $0x658] sm:$0xff]  }
0x157f   : > { %8783 = vmatprep.subr.bf16.mxu1 %v9389_v43  ;;  %8811 = vmatprep.subr.bf16.mxu0 %v9390_v14  ;;  %v8140_v24 = vld [vmem:[%s11792_s5 + $0x160] sm:$0xff]  ;;  %v8141_v43 = vld [vmem:[%s11792_s5 + $0x168] sm:$0xff]  ;;  %v5208_v14 = vpack.c.bf16 %v5196_v31, %v5192_v29  ;;  %v9431_v29 = vld [vmem:[%s11794_s7 + $0x610] sm:$0xff]  }
0x1580   : > { %v9417_v33 = vld [vmem:[%s11794_s7 + $0x668] sm:$0xff]   ;;  %v9422_v49 = vld [vmem:[%s11794_s7 + $0x6e0] sm:$0xff]  }
0x1581   : > { %8784 = vmatpush3.bf16.msra.mxu1 %v9391_v25  ;;  %8812 = vmatpush3.bf16.msra.mxu0 %v9392_v23  ;;  %v8153_v25 = vcombine.low %v8143_v30, %v8145_v61  ;;  %v5210_v23 = vpack.c.bf16 %v5198_v55, %v5194_v47  ;;  %v9418_v38 = vld [vmem:[%s11794_s7 + $0x6e8] sm:$0xff]   ;;  %v9421_v61 = vld [vmem:[%s11794_s7 + $0x660] sm:$0xff]   ;;  %v9428_v55 = vld [vmem:[%s11794_s7 + $0x698] sm:$0xff]  }
0x1582   : > { %8785 = vmatprep.subr.bf16.mxu1 %v9393_v52  ;;  %8813 = vmatprep.subr.bf16.mxu0 %v9394_v19  ;;  %v5135_v52 = vadd.f32 %v11220_v0, %v5023_v26  ;;  %v5188_v19 = vadd.f32 %v11222_v39, %v5031_v28  ;;  %v8147_v0 = vcombine.low %v8138_v63, %v8140_v24  ;;  %v9419_v3 = vld [vmem:[%s11794_s7 + $0x628] sm:$0xff]   ;;  %v9423_v31 = vld [vmem:[%s11794_s7 + $0x620] sm:$0xff]  }
0x1583   : > { %v8149_v39 = vcombine.low %v8139_v60, %v8141_v43  ;;  %v9420_v30 = vld [vmem:[%s11794_s7 + $0x6a8] sm:$0xff]   ;;  %v9424_v48 = vld [vmem:[%s11794_s7 + $0x6a0] sm:$0xff]  }
0x1584   : > { %v9435_v47 = vld [vmem:[%s11794_s7 + $0x608] sm:$0xff]  }
0x1585   : > { %8786 = vmatpush3.bf16.msra.mxu1 %v9395_v16  ;;  %8814 = vmatpush3.bf16.msra.mxu0 %v9396_v40  ;;  %v5213_v16 = vpack.c.bf16 %v5205_v4, %v5201_v50  ;;  %v5215_v40 = vpack.c.bf16 %v5207_v42, %v5203_v34  ;;  %v9432_v4 = vld [vmem:[%s11794_s7 + $0x690] sm:$0xff]   ;;  %v9433_v42 = vld [vmem:[%s11794_s7 + $0x648] sm:$0xff]  }
0x1586   : > { %8787 = vmatprep.subr.bf16.mxu1 %v9397_v15  ;;  %8815 = vmatprep.subr.bf16.mxu0 %v9398_v22  ;;  %v8148_v15 = vcombine.high %v8138_v63, %v8140_v24  ;;  %v8150_v22 = vcombine.high %v8139_v60, %v8141_v43  ;;  %v9434_v63 = vld [vmem:[%s11794_s7 + $0x6c8] sm:$0xff]   ;;  %v9437_v24 = vld [vmem:[%s11794_s7 + $0x640] sm:$0xff]   ;;  %v11499_v50 = vld [vmem:[%s11792_s5 + $0x1b0] sm:$0xff] }
0x1587   : > { %v9438_v60 = vld [vmem:[%s11794_s7 + $0x6c0] sm:$0xff]   ;;  %v11504_v34 = vld [vmem:[%s11792_s5 + $0x1f0] sm:$0xff] }
0x1588   : > { %v9439_v43 = vld [vmem:[%s11794_s7 + $0x600] sm:$0xff]  }
0x1589   : > { %8788 = vmatpush3.bf16.msra.mxu1 %v9399_v37  ;;  %8816 = vmatpush3.bf16.msra.mxu0 %v9400_v17  ;;  %v5131_v37 = vadd.f32 %v11212_v36, %v5023_v26  ;;  %v5184_v17 = vadd.f32 %v11214_v57, %v5031_v28  ;;  %v9409_v36 = vld [vmem:[%s11794_s7 + $0x678] sm:$0xff]  }
0x158a   : > { %8789 = vmatprep.subr.bf16.mxu1 %v9401_v10  ;;  %8817 = vmatprep.subr.bf16.mxu0 %v9402_v13  ;;  %v5204_v10 = vmax.f32 %v5135_v52, 0.0  ;;  %v5206_v13 = vmax.f32 %v5188_v19, 0.0  ;;  %v9410_v57 = vld [vmem:[%s11794_s7 + $0x6f8] sm:$0xff]   ;;  %v8268_v19 = vcombine.low %v11499_v50, %v11504_v34 }
0x158b   : > { %v5200_v20 = vmax.f32 %v5131_v37, 0.0  ;;  %v9411_v26 = vld [vmem:[%s11794_s7 + $0x638] sm:$0xff]  }
0x158c   : > { %v9412_v28 = vld [vmem:[%s11794_s7 + $0x6b8] sm:$0xff]  }
0x158d   : > { %8790 = vmatpush3.bf16.msra.mxu1 %v9403_v62  ;;  %8818 = vmatpush3.bf16.msra.mxu0 %v9404_v53  ;;  %v5202_v62 = vmax.f32 %v5184_v17, 0.0  ;;  %v5212_v53 = vpack.c.bf16 %v5204_v10, %v5200_v20  ;;  %v11516_v52 = vld [vmem:[%s11792_s5 + $0x1f8] sm:$0xff] }
0x158e   : > { %8791 = vmatprep.subr.bf16.mxu1 %v9405_v44  ;;  %8819 = vmatprep.subr.bf16.mxu0 %v9406_v58  ;;  %v9413_v44 = vld [vmem:[%s11794_s7 + $0x670] sm:$0xff]  }
0x158f   : > { %v5214_v41 = vpack.c.bf16 %v5206_v13, %v5202_v62  ;;  %v9414_v58 = vld [vmem:[%s11794_s7 + $0x6f0] sm:$0xff]  }
0x1591   : > { %8792 = vmatpush3.bf16.msra.mxu1 %v9407_v21  ;;  %8820 = vmatpush3.bf16.msra.mxu0 %v9408_v56  ;;  %v9426_v21 = vld [vmem:[%s11794_s7 + $0x6d8] sm:$0xff]  }
0x1592   : > { %6209 = vmatprep.subr.bf16.mxu1 %v8152_v9  ;;  %6262 = vmatprep.subr.bf16.mxu0 %v8154_v59  ;;  %v9427_v56 = vld [vmem:[%s11794_s7 + $0x618] sm:$0xff]   ;;  %v9429_v9 = vld [vmem:[%s11794_s7 + $0x650] sm:$0xff]  }
0x1593   : > { %v9430_v59 = vld [vmem:[%s11794_s7 + $0x6d0] sm:$0xff]  }
0x1594   : > { %6061 = vmatmul.mubr.bf16.vlgmr.msra.gmra.mxu1 %v5208_v14  ;;  %6110 = vmatmul.mubr.bf16.vlgmr.msra.gmra.mxu0 %v5210_v23  ;;  %v9440_v14 = vld [vmem:[%s11794_s7 + $0x680] sm:$0xff]   ;;  %v8269_v23 = vcombine.high %v11499_v50, %v11504_v34 }
0x1595   : > { %6068 = vmatprep.mubr.bf16.mxu1 %v5213_v16  ;;  %6117 = vmatprep.mubr.bf16.mxu0 %v5215_v40 }
0x1596   : > { %6210 = vmatpush1.bf16.msra.mxu1 %v8151_v6  ;;  %6263 = vmatpush1.bf16.msra.mxu0 %v8153_v25  ;;  %v9436_v6 = vld [vmem:[%s11794_s7 + $0x688] sm:$0xff]   ;;  %v11509_v25 = vld [vmem:[%s11792_s5 + $0x1b8] sm:$0xff] }
0x1597   : > { %6211 = vmatprep.subr.bf16.mxu1 %v8148_v15  ;;  %6264 = vmatprep.subr.bf16.mxu0 %v8150_v22  ;;  %v8270_v16 = vcombine.low %v11509_v25, %v11516_v52  ;;  %v8271_v40 = vcombine.high %v11509_v25, %v11516_v52 }
0x159a   : > { %6212 = vmatpush1.bf16.msra.mxu1 %v8147_v0  ;;  %6265 = vmatpush1.bf16.msra.mxu0 %v8149_v39 }
0x159b   : > { %8833 = vmatprep.subr.bf16.mxu1 %v9409_v36  ;;  %8861 = vmatprep.subr.bf16.mxu0 %v9410_v57 }
0x159c   : > { %6069 = vmatmul.mubr.bf16.gmra.mxu1 %v5212_v53  ;;  %6118 = vmatmul.mubr.bf16.gmra.mxu0 %v5214_v41 }
0x159d   : > { %6229 = vmatprep.mubr.bf16.mxu1 %v9650_v7  ;;  %6282 = vmatprep.mubr.bf16.mxu0 %v9650_v7 }
0x15a4   : > { %8155 = vmatmul.mubr.msk.bf16.vlgmr.msra.gmra.mxu1 %vm403_vm0, %v11066_v46  ;;  %8157 = vmatmul.mubr.msk.bf16.vlgmr.msra.gmra.mxu0 %vm403_vm0, %v11066_v46 }
0x15a5   : > { %6239 = vmatprep.mubr.bf16.mxu1 %v9650_v7  ;;  %6292 = vmatprep.mubr.bf16.mxu0 %v9650_v7 }
0x15a6   : > { %8834 = vmatpush3.bf16.msra.mxu1 %v9411_v26  ;;  %8862 = vmatpush3.bf16.msra.mxu0 %v9412_v28 }
0x15a7   : > { %8835 = vmatprep.subr.bf16.mxu1 %v9413_v44  ;;  %8863 = vmatprep.subr.bf16.mxu0 %v9414_v58 }
0x15aa   : > { %8836 = vmatpush3.bf16.msra.mxu1 %v9415_v27  ;;  %8864 = vmatpush3.bf16.msra.mxu0 %v9416_v18 }
0x15ab   : > { %8837 = vmatprep.subr.bf16.mxu1 %v9417_v33  ;;  %8865 = vmatprep.subr.bf16.mxu0 %v9418_v38 }
0x15ac   : > { %8156 = vmatmul.mubr.msk.bf16.gmra.mxu1 %vm403_vm0, %v11086_v54  ;;  %8158 = vmatmul.mubr.msk.bf16.gmra.mxu0 %vm403_vm0, %v11086_v54 }
0x15ae   : > { %8838 = vmatpush3.bf16.msra.mxu1 %v9419_v3  ;;  %8866 = vmatpush3.bf16.msra.mxu0 %v9420_v30 }
0x15af   : > { %8839 = vmatprep.subr.bf16.mxu1 %v9421_v61  ;;  %8867 = vmatprep.subr.bf16.mxu0 %v9422_v49 }
0x15b2   : > { %8840 = vmatpush3.bf16.msra.mxu1 %v9423_v31  ;;  %8868 = vmatpush3.bf16.msra.mxu0 %v9424_v48 }
0x15b3   : > { %8841 = vmatprep.subr.bf16.mxu1 %v9425_v8  ;;  %8869 = vmatprep.subr.bf16.mxu0 %v9426_v21 }
0x15b6   : > { %8842 = vmatpush3.bf16.msra.mxu1 %v9427_v56  ;;  %8870 = vmatpush3.bf16.msra.mxu0 %v9428_v55 }
0x15b7   : > { %8843 = vmatprep.subr.bf16.mxu1 %v9429_v9  ;;  %8871 = vmatprep.subr.bf16.mxu0 %v9430_v59 }
0x15ba   : > { %8844 = vmatpush3.bf16.msra.mxu1 %v9431_v29  ;;  %8872 = vmatpush3.bf16.msra.mxu0 %v9432_v4 }
0x15bb   : > { %8845 = vmatprep.subr.bf16.mxu1 %v9433_v42  ;;  %8873 = vmatprep.subr.bf16.mxu0 %v9434_v63 }
0x15be   : > { %8846 = vmatpush3.bf16.msra.mxu1 %v9435_v47  ;;  %8874 = vmatpush3.bf16.msra.mxu0 %v9436_v6 }
0x15bf   : > { %8847 = vmatprep.subr.bf16.mxu1 %v9437_v24  ;;  %8875 = vmatprep.subr.bf16.mxu0 %v9438_v60 }
0x15c2   : > { %8848 = vmatpush3.bf16.msra.mxu1 %v9439_v43  ;;  %8876 = vmatpush3.bf16.msra.mxu0 %v9440_v14 }
0x15c3   : > { %6768 = vmatprep.subr.bf16.mxu1 %v8269_v23  ;;  %6821 = vmatprep.subr.bf16.mxu0 %v8271_v40 }
0x1634   : > { %v8737_v15 = vpop.f32.mrf.mxu1  ;;  %v8765_v22 = vpop.f32.mrf.mxu0 }
0x1636   : > { %v8738_v37 = vpop.f32.mrf.mxu1  ;;  %v8766_v17 = vpop.f32.mrf.mxu0 }
0x1637   : > { %v8739_v10 = vadd.f32 %v8738_v37, %v8737_v15  ;;  %v8767_v13 = vadd.f32 %v8766_v17, %v8765_v22 }
0x1638   : > { %v8740_v0 = vpop.f32.mrf.mxu1  ;;  %v8768_v39 = vpop.f32.mrf.mxu0 }
0x1639   : > { %v5822_v20 = vadd.f32 %v8767_v13, %v8739_v10 }
0x163a   : > { %v8741_v62 = vpop.f32.mrf.mxu1  ;;  %v8769_v53 = vpop.f32.mrf.mxu0 }
0x163b   : > { %v8742_v41 = vadd.f32 %v8741_v62, %v8740_v0  ;;  %v8770_v36 = vadd.f32 %v8769_v53, %v8768_v39 }
0x163c   : > { %v8743_v57 = vpop.f32.mrf.mxu1  ;;  %v8771_v26 = vpop.f32.mrf.mxu0 }
0x163d   : > { %v5825_v28 = vadd.f32 %v8770_v36, %v8742_v41  ;;  %v8146_v36 = vld [vmem:[%s11793_s6 + $0x11] ss:$2 sm:$0xf] }
0x163e   : > { %v8744_v44 = vpop.f32.mrf.mxu1  ;;  %v8772_v58 = vpop.f32.mrf.mxu0 }
0x163f   : > { %v8745_v27 = vadd.f32 %v8744_v44, %v8743_v57  ;;  %v8773_v18 = vadd.f32 %v8772_v58, %v8771_v26  ;;  %v6144_v44 = vrot.slane %v8146_v36, %v10147_v1  ;;  %v6152_v58 = vrot.slane %v8146_v36, %v10149_v2 }
0x1640   : > { %v8746_v33 = vpop.f32.mrf.mxu1  ;;  %v8774_v38 = vpop.f32.mrf.mxu0 }
0x1641   : > { %v5830_v3 = vadd.f32 %v8773_v18, %v8745_v27  ;;  %v6140_v27 = vrot.slane %v8146_v36, %v10154_v11  ;;  %v6148_v18 = vrot.slane %v8146_v36, %v10156_v12 }
0x1642   : > { %v8747_v30 = vpop.f32.mrf.mxu1  ;;  %v8775_v61 = vpop.f32.mrf.mxu0 }
0x1643   : > { %v8748_v49 = vadd.f32 %v8747_v30, %v8746_v33  ;;  %v8776_v31 = vadd.f32 %v8775_v61, %v8774_v38 }
0x1645   : > { %v5833_v48 = vadd.f32 %v8776_v31, %v8748_v49 }
0x1654   : > { %v8793_v8 = vpop.f32.mrf.mxu1  ;;  %v8821_v21 = vpop.f32.mrf.mxu0 }
0x1656   : > { %v8794_v56 = vpop.f32.mrf.mxu1  ;;  %v8822_v55 = vpop.f32.mrf.mxu0 }
0x1657   : > { %v8795_v9 = vadd.f32 %v8794_v56, %v8793_v8  ;;  %v8823_v59 = vadd.f32 %v8822_v55, %v8821_v21 }
0x1658   : > { %v8796_v29 = vpop.f32.mrf.mxu1  ;;  %v8824_v4 = vpop.f32.mrf.mxu0 }
0x1659   : > { %v6063_v42 = vadd.f32 %v8795_v9, %v5822_v20 }
0x165a   : > { %v8797_v63 = vpop.f32.mrf.mxu1  ;;  %v8825_v47 = vpop.f32.mrf.mxu0 }
0x165b   : > { %v11524_v6 = vadd.f32 %v8823_v59, %v6063_v42  ;;  %v8798_v24 = vadd.f32 %v8797_v63, %v8796_v29  ;;  %v8826_v60 = vadd.f32 %v8825_v47, %v8824_v4 }
0x165c   : > { %v8799_v43 = vpop.f32.mrf.mxu1  ;;  %v8827_v14 = vpop.f32.mrf.mxu0 }
0x165d   : > { %v6066_v23 = vadd.f32 %v8798_v24, %v5825_v28  ;;  %v8255_v24 = vld [vmem:[%s11792_s5 + $0x130] sm:$0xff] }
0x165e   : > { %v8800_v40 = vpop.f32.mrf.mxu1  ;;  %v8828_v15 = vpop.f32.mrf.mxu0 }
0x165f   : > { %v11526_v22 = vadd.f32 %v8826_v60, %v6066_v23  ;;  %v8801_v37 = vadd.f32 %v8800_v40, %v8799_v43  ;;  %v8829_v17 = vadd.f32 %v8828_v15, %v8827_v14  ;;  %v8257_v60 = vld [vmem:[%s11792_s5 + $0x170] sm:$0xff]  ;;  %v8256_v15 = vld [vmem:[%s11792_s5 + $0x138] sm:$0xff] }
0x1660   : > { %v8802_v10 = vpop.f32.mrf.mxu1  ;;  %v8830_v13 = vpop.f32.mrf.mxu0 }
0x1661   : > { %v6071_v0 = vadd.f32 %v8801_v37, %v5830_v3  ;;  %v8258_v37 = vld [vmem:[%s11792_s5 + $0x178] sm:$0xff] }
0x1662   : > { %v8803_v39 = vpop.f32.mrf.mxu1  ;;  %v8831_v20 = vpop.f32.mrf.mxu0 }
0x1663   : > { %v11528_v62 = vadd.f32 %v8829_v17, %v6071_v0  ;;  %v8804_v53 = vadd.f32 %v8803_v39, %v8802_v10  ;;  %v8832_v41 = vadd.f32 %v8831_v20, %v8830_v13 }
0x1664   : > { %v6231_v57 = vpop.f32.mrf.mxu1  ;;  %v6284_v26 = vpop.f32.mrf.mxu0 }
0x1665   : > { %v6074_v28 = vadd.f32 %v8804_v53, %v5833_v48  ;;  %v6232_v56 = vadd.f32 %v6231_v57, %v6140_v27  ;;  %v6285_v48 = vadd.f32 %v6284_v26, %v6148_v18  ;;  %v8265_v53 = vcombine.high %v8255_v24, %v8257_v60 }
0x1666   : > { %v6233_v33 = vpop.f32.mrf.mxu1  ;;  %v6286_v38 = vpop.f32.mrf.mxu0 }
0x1667   : > { %v11537_v3 = vadd.f32 %v8832_v41, %v6074_v28  ;;  %v6234_v49 = vadd.f32 %v6233_v33, %v6144_v44  ;;  %v6287_v31 = vadd.f32 %v6286_v38, %v6152_v58  ;;  %v6303_v17 = vmax.f32 %v6232_v56, 0.0 }
0x1668   : > { %v6235_v30 = vpop.f32.mrf.mxu1  ;;  %v6288_v61 = vpop.f32.mrf.mxu0  ;;  %v6305_v10 = vmax.f32 %v6285_v48, 0.0  ;;  %v8267_v33 = vcombine.high %v8256_v15, %v8258_v37  ;;  %v8264_v56 = vcombine.low %v8255_v24, %v8257_v60  ;;  %v9445_v24 = vld [vmem:[%s11794_s7 + $0x770] sm:$0xff]  }
0x1669   : > { %v6236_v8 = vadd.f32 %v6235_v30, %v6140_v27  ;;  %v6289_v21 = vadd.f32 %v6288_v61, %v6148_v18  ;;  %v6304_v43 = vmax.f32 %v6234_v49, 0.0  ;;  %v6306_v14 = vmax.f32 %v6287_v31, 0.0  ;;  %v9448_v60 = vld [vmem:[%s11794_s7 + $0x7b0] sm:$0xff]  }
0x166a   : > { %v6237_v55 = vpop.f32.mrf.mxu1  ;;  %v6290_v9 = vpop.f32.mrf.mxu0 }
0x166b   : > { %v6238_v59 = vadd.f32 %v6237_v55, %v6144_v44  ;;  %v6291_v29 = vadd.f32 %v6290_v9, %v6152_v58  ;;  %v6307_v4 = vmax.f32 %v6236_v8, 0.0  ;;  %v6309_v42 = vmax.f32 %v6289_v21, 0.0 }
0x166c   : > { %v6241_v63 = vpop.f32.mrf.mxu1  ;;  %v6294_v47 = vpop.f32.mrf.mxu0  ;;  %v8266_v9 = vcombine.low %v8256_v15, %v8258_v37  ;;  %v9454_v15 = vld [vmem:[%s11794_s7 + $0x7e0] sm:$0xff]  }
0x166d   : > { %v6308_v23 = vmax.f32 %v6238_v59, 0.0  ;;  %v6310_v40 = vmax.f32 %v6291_v29, 0.0  ;;  %v6319_v41 = vpack.c.bf16 %v6307_v4, %v6303_v17  ;;  %v6321_v36 = vpack.c.bf16 %v6309_v42, %v6305_v10  ;;  %v9455_v37 = vld [vmem:[%s11794_s7 + $0x720] sm:$0xff]   ;;  %v9457_v10 = vld [vmem:[%s11794_s7 + $0x758] sm:$0xff]  }
0x166e   : > { %v6243_v13 = vpop.f32.mrf.mxu1  ;;  %v6296_v0 = vpop.f32.mrf.mxu0  ;;  %v6242_v49 = vadd.f32 %v6241_v63, %v6140_v27  ;;  %v6295_v31 = vadd.f32 %v6294_v47, %v6148_v18  ;;  %v9443_v63 = vld [vmem:[%s11794_s7 + $0x738] sm:$0xff]   ;;  %v9456_v17 = vld [vmem:[%s11794_s7 + $0x7a0] sm:$0xff]  }
0x166f   : > { %v6320_v39 = vpack.c.bf16 %v6308_v23, %v6304_v43  ;;  %v6322_v20 = vpack.c.bf16 %v6310_v40, %v6306_v14  ;;  %v6244_v57 = vadd.f32 %v6243_v13, %v6144_v44  ;;  %v6297_v38 = vadd.f32 %v6296_v0, %v6152_v58  ;;  %v9444_v47 = vld [vmem:[%s11794_s7 + $0x7b8] sm:$0xff]   ;;  %v9450_v43 = vld [vmem:[%s11794_s7 + $0x7e8] sm:$0xff]   ;;  %v9453_v40 = vld [vmem:[%s11794_s7 + $0x760] sm:$0xff]  }
0x1670   : > { %v6245_v26 = vpop.f32.mrf.mxu1  ;;  %v6298_v28 = vpop.f32.mrf.mxu0  ;;  %v6313_v25 = vmax.f32 %v6295_v31, 0.0  ;;  %v9451_v14 = vld [vmem:[%s11794_s7 + $0x728] sm:$0xff]   ;;  %v9458_v13 = vld [vmem:[%s11794_s7 + $0x7d8] sm:$0xff]  }
0x1671   : > { %v6246_v30 = vadd.f32 %v6245_v26, %v6140_v27  ;;  %v6299_v61 = vadd.f32 %v6298_v28, %v6148_v18  ;;  %6615 = vmatprep.mubr.bf16.mxu1 %v6320_v39  ;;  %6664 = vmatprep.mubr.bf16.mxu0 %v6322_v20  ;;  %v9441_v27 = vld [vmem:[%s11794_s7 + $0x778] sm:$0xff]   ;;  %v6314_v50 = vmax.f32 %v6297_v38, 0.0  ;;  %v6311_v18 = vmax.f32 %v6242_v49, 0.0  ;;  %v9452_v23 = vld [vmem:[%s11794_s7 + $0x7a8] sm:$0xff]   ;;  %v9461_v20 = vld [vmem:[%s11794_s7 + $0x750] sm:$0xff]  }
0x1672   : > { %v6247_v8 = vpop.f32.mrf.mxu1  ;;  %v6300_v21 = vpop.f32.mrf.mxu0  ;;  %6616 = vmatmul.mubr.bf16.vlgmr.msra.gmra.mxu1 %v6319_v41  ;;  %6665 = vmatmul.mubr.bf16.vlgmr.msra.gmra.mxu0 %v6321_v36  ;;  %v9459_v0 = vld [vmem:[%s11794_s7 + $0x718] sm:$0xff]   ;;  %v9463_v41 = vld [vmem:[%s11794_s7 + $0x710] sm:$0xff]   ;;  %v9466_v26 = vld [vmem:[%s11794_s7 + $0x7c8] sm:$0xff]  }
0x1673   : > { %v6248_v48 = vadd.f32 %v6247_v8, %v6144_v44  ;;  %v6301_v55 = vadd.f32 %v6300_v21, %v6152_v58  ;;  %6769 = vmatpush1.bf16.msra.mxu1 %v8268_v19  ;;  %6822 = vmatpush1.bf16.msra.mxu0 %v8270_v16  ;;  %v6315_v59 = vmax.f32 %v6246_v30, 0.0  ;;  %v6317_v29 = vmax.f32 %v6299_v61, 0.0  ;;  %v9442_v44 = vld [vmem:[%s11794_s7 + $0x7f8] sm:$0xff]   ;;  %v9464_v36 = vld [vmem:[%s11794_s7 + $0x790] sm:$0xff]   ;;  %v9467_v28 = vld [vmem:[%s11794_s7 + $0x708] sm:$0xff]  }
0x1674   : > { %6770 = vmatprep.subr.bf16.mxu1 %v8265_v53  ;;  %6823 = vmatprep.subr.bf16.mxu0 %v8267_v33  ;;  %v6312_v58 = vmax.f32 %v6244_v57, 0.0  ;;  %v9460_v39 = vld [vmem:[%s11794_s7 + $0x798] sm:$0xff]   ;;  %v9462_v53 = vld [vmem:[%s11794_s7 + $0x7d0] sm:$0xff]   ;;  %v9465_v57 = vld [vmem:[%s11794_s7 + $0x748] sm:$0xff]  }
0x1675   : > { %v6316_v34 = vmax.f32 %v6248_v48, 0.0  ;;  %v6318_v19 = vmax.f32 %v6301_v55, 0.0  ;;  %v6323_v4 = vpack.c.bf16 %v6315_v59, %v6311_v18  ;;  %v6325_v42 = vpack.c.bf16 %v6317_v29, %v6313_v25  ;;  %v9468_v33 = vld [vmem:[%s11794_s7 + $0x788] sm:$0xff]   ;;  %v9469_v38 = vld [vmem:[%s11794_s7 + $0x740] sm:$0xff]  }
0x1676   : > { %v9470_v30 = vld [vmem:[%s11794_s7 + $0x7c0] sm:$0xff]  }
0x1677   : > { %v6324_v52 = vpack.c.bf16 %v6316_v34, %v6312_v58  ;;  %v6326_v16 = vpack.c.bf16 %v6318_v19, %v6314_v50  ;;  %6771 = vmatpush1.bf16.msra.mxu1 %v8264_v56  ;;  %6824 = vmatpush1.bf16.msra.mxu0 %v8266_v9  ;;  %v9471_v61 = vld [vmem:[%s11794_s7 + $0x700] sm:$0xff]  }
0x1678   : > { %8889 = vmatprep.subr.bf16.mxu1 %v9441_v27  ;;  %8917 = vmatprep.subr.bf16.mxu0 %v9442_v44  ;;  %v9472_v49 = vld [vmem:[%s11794_s7 + $0x780] sm:$0xff]  }
0x1679   : > { %6623 = vmatprep.mubr.bf16.mxu1 %v6324_v52  ;;  %6672 = vmatprep.mubr.bf16.mxu0 %v6326_v16 }
0x167a   : > { %6624 = vmatmul.mubr.bf16.gmra.mxu1 %v6323_v4  ;;  %6673 = vmatmul.mubr.bf16.gmra.mxu0 %v6325_v42 }
0x167b   : > { %6788 = vmatprep.mubr.bf16.mxu1 %v9650_v7  ;;  %6841 = vmatprep.mubr.bf16.mxu0 %v9650_v7 }
0x1682   : > { %8272 = vmatmul.mubr.msk.bf16.vlgmr.msra.gmra.mxu1 %vm403_vm0, %v11066_v46  ;;  %8274 = vmatmul.mubr.msk.bf16.vlgmr.msra.gmra.mxu0 %vm403_vm0, %v11066_v46  ;;  %v9446_v46 = vld [vmem:[%s11794_s7 + $0x7f0] sm:$0xff]  }
0x1683   : > { %6798 = vmatprep.mubr.bf16.mxu1 %v9650_v7  ;;  %6851 = vmatprep.mubr.bf16.mxu0 %v9650_v7  ;;  %v9447_v7 = vld [vmem:[%s11794_s7 + $0x730] sm:$0xff]  }
0x1684   : > { %8890 = vmatpush3.bf16.msra.mxu1 %v9443_v63  ;;  %8918 = vmatpush3.bf16.msra.mxu0 %v9444_v47 }
0x1685   : > { %8891 = vmatprep.subr.bf16.mxu1 %v9445_v24  ;;  %8919 = vmatprep.subr.bf16.mxu0 %v9446_v46 }
0x1688   : > { %8892 = vmatpush3.bf16.msra.mxu1 %v9447_v7  ;;  %8920 = vmatpush3.bf16.msra.mxu0 %v9448_v60 }
0x1689   : > { %8921 = vmatprep.subr.bf16.mxu0 %v9450_v43 }
0x168a   : > { %8273 = vmatmul.mubr.msk.bf16.gmra.mxu1 %vm403_vm0, %v11086_v54  ;;  %8275 = vmatmul.mubr.msk.bf16.gmra.mxu0 %vm403_vm0, %v11086_v54  ;;  %v9449_v54 = vld [vmem:[%s11794_s7 + $0x768] sm:$0xff]  }
0x168b   : > { %8893 = vmatprep.subr.bf16.mxu1 %v9449_v54 }
0x168c   : > { %8894 = vmatpush3.bf16.msra.mxu1 %v9451_v14  ;;  %8922 = vmatpush3.bf16.msra.mxu0 %v9452_v23  ;;  %v8263_v14 = vld [vmem:[%s11793_s6 + $0x19] ss:$2 sm:$0xf] }
0x168d   : > { %8895 = vmatprep.subr.bf16.mxu1 %v9453_v40  ;;  %8923 = vmatprep.subr.bf16.mxu0 %v9454_v15  ;;  %v6703_v15 = vrot.slane %v8263_v14, %v10147_v1 }
0x1690   : > { %8896 = vmatpush3.bf16.msra.mxu1 %v9455_v37  ;;  %8924 = vmatpush3.bf16.msra.mxu0 %v9456_v17  ;;  %v6711_v37 = vrot.slane %v8263_v14, %v10149_v2  ;;  %v6699_v17 = vrot.slane %v8263_v14, %v10154_v11 }
0x1691   : > { %8897 = vmatprep.subr.bf16.mxu1 %v9457_v10  ;;  %8925 = vmatprep.subr.bf16.mxu0 %v9458_v13  ;;  %v6707_v10 = vrot.slane %v8263_v14, %v10156_v12 }
0x1694   : > { %8898 = vmatpush3.bf16.msra.mxu1 %v9459_v0  ;;  %8926 = vmatpush3.bf16.msra.mxu0 %v9460_v39 }
0x1695   : > { %8899 = vmatprep.subr.bf16.mxu1 %v9461_v20  ;;  %8927 = vmatprep.subr.bf16.mxu0 %v9462_v53 }
0x1698   : > { %8900 = vmatpush3.bf16.msra.mxu1 %v9463_v41  ;;  %8928 = vmatpush3.bf16.msra.mxu0 %v9464_v36 }
0x1699   : > { %8901 = vmatprep.subr.bf16.mxu1 %v9465_v57  ;;  %8929 = vmatprep.subr.bf16.mxu0 %v9466_v26 }
0x169c   : > { %8902 = vmatpush3.bf16.msra.mxu1 %v9467_v28  ;;  %8930 = vmatpush3.bf16.msra.mxu0 %v9468_v33 }
0x169d   : > { %8903 = vmatprep.subr.bf16.mxu1 %v9469_v38  ;;  %8931 = vmatprep.subr.bf16.mxu0 %v9470_v30 }
0x16a0   : > { %8904 = vmatpush3.bf16.msra.mxu1 %v9471_v61  ;;  %8932 = vmatpush3.bf16.msra.mxu0 %v9472_v49 }
0x16a1   : > { %9148 = vmatprep.subr.bf16.mxu1 %v9646_v5 }
0x1732   : > { %v8849_v31 = vpop.f32.mrf.mxu1  ;;  %v8877_v8 = vpop.f32.mrf.mxu0 }
0x1734   : > { %v8850_v21 = vpop.f32.mrf.mxu1  ;;  %v8878_v56 = vpop.f32.mrf.mxu0 }
0x1735   : > { %v8851_v48 = vadd.f32 %v8850_v21, %v8849_v31  ;;  %v8879_v55 = vadd.f32 %v8878_v56, %v8877_v8 }
0x1736   : > { %v8852_v9 = vpop.f32.mrf.mxu1  ;;  %v8880_v59 = vpop.f32.mrf.mxu0 }
0x1737   : > { %v6667_v29 = vadd.f32 %v8879_v55, %v8851_v48 }
0x1738   : > { %v8853_v27 = vpop.f32.mrf.mxu1  ;;  %v8881_v44 = vpop.f32.mrf.mxu0 }
0x1739   : > { %v11667_v58 = vadd.f32 %v6667_v29, %v11524_v6  ;;  %v8854_v50 = vadd.f32 %v8853_v27, %v8852_v9  ;;  %v8882_v34 = vadd.f32 %v8881_v44, %v8880_v59 }
0x173a   : > { %v8855_v19 = vpop.f32.mrf.mxu1  ;;  %v8883_v18 = vpop.f32.mrf.mxu0 }
0x173b   : > { %v6670_v25 = vadd.f32 %v8882_v34, %v8854_v50 }
0x173c   : > { %v8856_v52 = vpop.f32.mrf.mxu1  ;;  %v8884_v16 = vpop.f32.mrf.mxu0 }
0x173d   : > { %v11670_v4 = vadd.f32 %v6670_v25, %v11526_v22  ;;  %v8857_v42 = vadd.f32 %v8856_v52, %v8855_v19  ;;  %v8885_v63 = vadd.f32 %v8884_v16, %v8883_v18 }
0x173e   : > { %v8858_v47 = vpop.f32.mrf.mxu1  ;;  %v8886_v24 = vpop.f32.mrf.mxu0 }
0x173f   : > { %v6675_v46 = vadd.f32 %v8885_v63, %v8857_v42 }
0x1740   : > { %v8859_v7 = vpop.f32.mrf.mxu1  ;;  %v8887_v60 = vpop.f32.mrf.mxu0 }
0x1741   : > { %v11673_v6 = vadd.f32 %v6675_v46, %v11528_v62  ;;  %v8860_v54 = vadd.f32 %v8859_v7, %v8858_v47  ;;  %v8888_v43 = vadd.f32 %v8887_v60, %v8886_v24 }
0x1742   : > { %v6790_v23 = vpop.f32.mrf.mxu1  ;;  %v6843_v40 = vpop.f32.mrf.mxu0 }
0x1743   : > { %v6678_v22 = vadd.f32 %v8888_v43, %v8860_v54  ;;  %v6791_v26 = vadd.f32 %v6790_v23, %v6699_v17  ;;  %v6844_v28 = vadd.f32 %v6843_v40, %v6707_v10 }
0x1744   : > { %v6792_v13 = vpop.f32.mrf.mxu1  ;;  %v6845_v62 = vpop.f32.mrf.mxu0 }
0x1745   : > { %v11683_v0 = vadd.f32 %v6678_v22, %v11537_v3  ;;  %v6793_v53 = vadd.f32 %v6792_v13, %v6703_v15  ;;  %v6846_v41 = vadd.f32 %v6845_v62, %v6711_v37  ;;  %v6862_v21 = vmax.f32 %v6791_v26, 0.0 }
0x1746   : > { %v6794_v39 = vpop.f32.mrf.mxu1  ;;  %v6847_v20 = vpop.f32.mrf.mxu0  ;;  %v6864_v56 = vmax.f32 %v6844_v28, 0.0 }
0x1747   : > { %v6795_v36 = vadd.f32 %v6794_v39, %v6699_v17  ;;  %v6848_v57 = vadd.f32 %v6847_v20, %v6707_v10  ;;  %v6863_v49 = vmax.f32 %v6793_v53, 0.0  ;;  %v6865_v31 = vmax.f32 %v6846_v41, 0.0 }
0x1748   : > { %v6796_v1 = vpop.f32.mrf.mxu1  ;;  %v6849_v33 = vpop.f32.mrf.mxu0 }
0x1749   : > { %v6797_v2 = vadd.f32 %v6796_v1, %v6703_v15  ;;  %v6850_v38 = vadd.f32 %v6849_v33, %v6711_v37  ;;  %v6866_v11 = vmax.f32 %v6795_v36, 0.0  ;;  %v6868_v30 = vmax.f32 %v6848_v57, 0.0 }
0x174a   : > { %v6800_v12 = vpop.f32.mrf.mxu1  ;;  %v6853_v61 = vpop.f32.mrf.mxu0 }
0x174b   : > { %v6867_v3 = vmax.f32 %v6797_v2, 0.0  ;;  %v6869_v8 = vmax.f32 %v6850_v38, 0.0  ;;  %v6878_v29 = vpack.c.bf16 %v6866_v11, %v6862_v21  ;;  %v6880_v27 = vpack.c.bf16 %v6868_v30, %v6864_v56  ;;  %v8372_v30 = vld [vmem:[%s11791_s4 + $0x13] ss:$0 sm:$0xff] }
0x174c   : > { %v6802_v48 = vpop.f32.mrf.mxu1  ;;  %v6855_v55 = vpop.f32.mrf.mxu0  ;;  %v6801_v52 = vadd.f32 %v6800_v12, %v6699_v17  ;;  %v6854_v16 = vadd.f32 %v6853_v61, %v6707_v10 }
0x174d   : > { %v6879_v9 = vpack.c.bf16 %v6867_v3, %v6863_v49  ;;  %v6881_v59 = vpack.c.bf16 %v6869_v8, %v6865_v31  ;;  %v6803_v44 = vadd.f32 %v6802_v48, %v6703_v15  ;;  %v6856_v19 = vadd.f32 %v6855_v55, %v6711_v37 }
0x174e   : > { %v6804_v50 = vpop.f32.mrf.mxu1  ;;  %v6857_v34 = vpop.f32.mrf.mxu0  ;;  %v6870_v23 = vmax.f32 %v6801_v52, 0.0  ;;  %v6872_v40 = vmax.f32 %v6854_v16, 0.0 }
0x174f   : > { %v6805_v18 = vadd.f32 %v6804_v50, %v6699_v17  ;;  %v6858_v25 = vadd.f32 %v6857_v34, %v6707_v10  ;;  %7174 = vmatprep.mubr.bf16.mxu1 %v6879_v9  ;;  %7223 = vmatprep.mubr.bf16.mxu0 %v6881_v59  ;;  %v6871_v60 = vmax.f32 %v6803_v44, 0.0  ;;  %v6873_v54 = vmax.f32 %v6856_v19, 0.0 }
0x1750   : > { %v6806_v42 = vpop.f32.mrf.mxu1  ;;  %v6859_v63 = vpop.f32.mrf.mxu0  ;;  %7175 = vmatmul.mubr.bf16.vlgmr.msra.gmra.mxu1 %v6878_v29  ;;  %7224 = vmatmul.mubr.bf16.vlgmr.msra.gmra.mxu0 %v6880_v27 }
0x1751   : > { %v6807_v47 = vadd.f32 %v6806_v42, %v6703_v15  ;;  %v6860_v24 = vadd.f32 %v6859_v63, %v6711_v37  ;;  %v6874_v46 = vmax.f32 %v6805_v18, 0.0  ;;  %v6876_v7 = vmax.f32 %v6858_v25, 0.0 }
0x1753   : > { %v6875_v43 = vmax.f32 %v6807_v47, 0.0  ;;  %v6877_v14 = vmax.f32 %v6860_v24, 0.0  ;;  %v6882_v62 = vpack.c.bf16 %v6874_v46, %v6870_v23  ;;  %v6884_v39 = vpack.c.bf16 %v6876_v7, %v6872_v40 }
0x1755   : > { %v6883_v22 = vpack.c.bf16 %v6875_v43, %v6871_v60  ;;  %v6885_v13 = vpack.c.bf16 %v6877_v14, %v6873_v54 }
0x1757   : > { %7182 = vmatprep.mubr.bf16.mxu1 %v6883_v22  ;;  %7231 = vmatprep.mubr.bf16.mxu0 %v6885_v13 }
0x1758   : > { %7183 = vmatmul.mubr.bf16.gmra.mxu1 %v6882_v62  ;;  %7232 = vmatmul.mubr.bf16.gmra.mxu0 %v6884_v39 }
0x1759   : > { %9152 = vmatprep.mubr.msk.bf16.mxu1 %vm9647_vm1, %v9646_v5 }
0x1810   : > { %v8905_v15 = vpop.f32.mrf.mxu1  ;;  %v8933_v37 = vpop.f32.mrf.mxu0 }
0x1812   : > { %v8906_v17 = vpop.f32.mrf.mxu1  ;;  %v8934_v10 = vpop.f32.mrf.mxu0 }
0x1813   : > { %v8907_v20 = vadd.f32 %v8906_v17, %v8905_v15  ;;  %v8935_v53 = vadd.f32 %v8934_v10, %v8933_v37 }
0x1814   : > { %v8908_v41 = vpop.f32.mrf.mxu1  ;;  %v8936_v36 = vpop.f32.mrf.mxu0 }
0x1815   : > { %v7226_v57 = vadd.f32 %v8935_v53, %v8907_v20 }
0x1816   : > { %v8909_v26 = vpop.f32.mrf.mxu1  ;;  %v8937_v28 = vpop.f32.mrf.mxu0 }
0x1817   : > { %v7240_v1 = vadd.f32 %v7226_v57, %v11667_v58  ;;  %v8910_v33 = vadd.f32 %v8909_v26, %v8908_v41  ;;  %v8938_v2 = vadd.f32 %v8937_v28, %v8936_v36 }
0x1818   : > { %v8911_v38 = vpop.f32.mrf.mxu1  ;;  %v8939_v11 = vpop.f32.mrf.mxu0 }
0x1819   : > { %v7229_v12 = vadd.f32 %v8938_v2, %v8910_v33  ;;  %v7244_v61 = vadd.f32 %v7240_v1, %v11050_v32 }
0x181a   : > { %v8912_v49 = vpop.f32.mrf.mxu1  ;;  %v8940_v31 = vpop.f32.mrf.mxu0 }
0x181b   : > { %v7241_v3 = vadd.f32 %v7229_v12, %v11670_v4  ;;  %v8913_v8 = vadd.f32 %v8912_v49, %v8911_v38  ;;  %v8941_v21 = vadd.f32 %v8940_v31, %v8939_v11  ;;  %v7253_v56 = vadd.f32 %v8372_v30, %v7244_v61  ;;  %v8373_v11 = vld [vmem:[%s11791_s4 + $0x18] ss:$0 sm:$0xff]  ;;  %v8374_v12 = vld [vmem:[%s11791_s4 + $0x19] ss:$0 sm:$0xff] }
0x181c   : > { %v8914_v48 = vpop.f32.mrf.mxu1  ;;  %v8942_v58 = vpop.f32.mrf.mxu0 }
0x181d   : > { %v7234_v55 = vadd.f32 %v8941_v21, %v8913_v8  ;;  %v7259_v9 = vsel %vm403_vm0, %v7253_v56, 0.0  ;;  %v7245_v59 = vadd.f32 %v7241_v3, %v11053_v35 }
0x181e   : > { %v8915_v29 = vpop.f32.mrf.mxu1  ;;  %v8943_v27 = vpop.f32.mrf.mxu0  ;;  %7260 = vadd.xlane.f32.xlu0 %v7259_v9 }
0x181f   : > { %v7242_v44 = vadd.f32 %v7234_v55, %v11673_v6  ;;  %v8916_v32 = vadd.f32 %v8915_v29, %v8914_v48  ;;  %v8944_v50 = vadd.f32 %v8943_v27, %v8942_v58  ;;  %v7254_v34 = vadd.f32 %v8372_v30, %v7245_v59 }
0x1821   : > { %v7237_v19 = vadd.f32 %v8944_v50, %v8916_v32  ;;  %v7262_v4 = vsel %vm403_vm0, %v7254_v34, 0.0  ;;  %v7246_v18 = vadd.f32 %v7242_v44, %v11082_v51 }
0x1822   : > { %7263 = vadd.xlane.f32.xlu1 %v7262_v4 }
0x1823   : > { %v7243_v25 = vadd.f32 %v7237_v19, %v11683_v0  ;;  %v7255_v52 = vadd.f32 %v8372_v30, %v7246_v18 }
0x1825   : > { %v7265_v16 = vsel %vm403_vm0, %v7255_v52, 0.0  ;;  %v7247_v35 = vadd.f32 %v7243_v25, %v11074_v45 }
0x1826   : > { %7266 = vadd.xlane.f32.xlu0 %v7265_v16 }
0x1827   : > { %v7256_v42 = vadd.f32 %v8372_v30, %v7247_v35 }
0x1829   : > { %v7268_v6 = vsel %vm403_vm0, %v7256_v42, 0.0 }
0x182a   : > { %7269 = vadd.xlane.f32.xlu1 %v7268_v6 }
0x18a7   : > { %v7261_v63 = vpop.xlane.xlu0 %7260 }
0x18a8   : > { %v7271_v47 = vmul.f32 0.03125, %v7261_v63 }
0x18aa   : > { %v7275_v24 = vsub.f32 %v7253_v56, %v7271_v47 }
0x18ab   : > { %v7264_v46 = vpop.xlane.xlu1 %7263 }
0x18ac   : > { %v7272_v7 = vmul.f32 0.03125, %v7264_v46  ;;  %v7279_v60 = vmul.f32 %v7275_v24, %v7275_v24 }
0x18ae   : > { %v7276_v51 = vsub.f32 %v7254_v34, %v7272_v7  ;;  %v7283_v54 = vsel %vm403_vm0, %v7279_v60, 0.0 }
0x18af   : > { %7284 = vadd.xlane.f32.xlu0 %v7283_v54  ;;  %v7267_v0 = vpop.xlane.xlu0 %7266 }
0x18b0   : > { %v7273_v43 = vmul.f32 0.03125, %v7267_v0  ;;  %v7280_v14 = vmul.f32 %v7276_v51, %v7276_v51 }
0x18b2   : > { %v7277_v23 = vsub.f32 %v7255_v52, %v7273_v43  ;;  %v7286_v45 = vsel %vm403_vm0, %v7280_v14, 0.0 }
0x18b3   : > { %7287 = vadd.xlane.f32.xlu1 %v7286_v45  ;;  %v7270_v40 = vpop.xlane.xlu1 %7269  ;;  %v9474_v45 = vld [vmem:[%s11795_s8] sm:$0xff]  }
0x18b4   : > { %v7274_v22 = vmul.f32 0.03125, %v7270_v40  ;;  %v7281_v13 = vmul.f32 %v7277_v23, %v7277_v23 }
0x18b6   : > { %v7278_v62 = vsub.f32 %v7256_v42, %v7274_v22  ;;  %v7289_v39 = vsel %vm403_vm0, %v7281_v13, 0.0 }
0x18b7   : > { %7290 = vadd.xlane.f32.xlu0 %v7289_v39 }
0x18b8   : > { %v7282_v15 = vmul.f32 %v7278_v62, %v7278_v62 }
0x18ba   : > { %v7292_v37 = vsel %vm403_vm0, %v7282_v15, 0.0 }
0x18bb   : > { %7293 = vadd.xlane.f32.xlu1 %v7292_v37 }
0x1938   : > { %v7285_v17 = vpop.xlane.xlu0 %7284 }
0x1939   : > { %v7295_v10 = vmul.f32 0.03125, %v7285_v17 }
0x193b   : > { %v7299_v20 = vadd.f32 1e-05, %v7295_v10 }
0x193c   : > { %v7288_v53 = vpop.xlane.xlu1 %7287 }
0x193d   : > { %9565 = vrsqrt.f32 %v7299_v20  ;;  %v7296_v41 = vmul.f32 0.03125, %v7288_v53 }
0x193f   : > { %v7300_v36 = vadd.f32 1e-05, %v7296_v41 }
0x1940   : > { %v7291_v57 = vpop.xlane.xlu0 %7290 }
0x1941   : > { %9567 = vrsqrt.f32 %v7300_v36  ;;  %v7297_v26 = vmul.f32 0.03125, %v7291_v57  ;;  %v8375_v36 = vld [vmem:[%s11791_s4 + $0x1a] ss:$0 sm:$0xff] }
0x1943   : > { %v7301_v28 = vadd.f32 1e-05, %v7297_v26  ;;  %v8376_v26 = vld [vmem:[%s11791_s4 + $0x1b] ss:$0 sm:$0xff] }
0x1944   : > { %v7294_v1 = vpop.xlane.xlu1 %7293 }
0x1945   : > { %9569 = vrsqrt.f32 %v7301_v28  ;;  %v7298_v33 = vmul.f32 0.03125, %v7294_v1 }
0x1947   : > { %v7302_v2 = vadd.f32 1e-05, %v7298_v33 }
0x1949   : > { %9571 = vrsqrt.f32 %v7302_v2 }
0x194a   : > { %v9566_v38 = vpop.eup %9565 }
0x194b   : > { %v7307_v30 = vmul.f32 %v9566_v38, %v7275_v24 }
0x194d   : > { %v7315_v61 = vmul.f32 %v8373_v11, %v7307_v30 }
0x194e   : > { %v9568_v49 = vpop.eup %9567 }
0x194f   : > { %v7323_v31 = vadd.f32 %v8374_v12, %v7315_v61  ;;  %v7308_v3 = vmul.f32 %v9568_v49, %v7276_v51 }
0x1951   : > { %v7329_v8 = vsel %vm403_vm0, %v7323_v31, 0.0  ;;  %v7316_v21 = vmul.f32 %v8373_v11, %v7308_v3 }
0x1952   : > { %v9570_v56 = vpop.eup %9569  ;;  %7330 = vadd.xlane.f32.xlu0 %v7329_v8 }
0x1953   : > { %v7324_v48 = vadd.f32 %v8374_v12, %v7316_v21  ;;  %v7309_v58 = vmul.f32 %v9570_v56, %v7277_v23  ;;  %v9473_v23 = vld [vmem:[%s11795_s8 + $0x8] sm:$0xff]  }
0x1954   : > { %9149 = vmatpush3.bf16.msra.mxu1 %v9473_v23 }
0x1955   : > { %v7332_v55 = vsel %vm403_vm0, %v7324_v48, 0.0  ;;  %v7317_v9 = vmul.f32 %v8373_v11, %v7309_v58  ;;  %9150 = vmatprep.subr.bf16.mxu1 %v9646_v5 }
0x1956   : > { %v9572_v59 = vpop.eup %9571  ;;  %7333 = vadd.xlane.f32.xlu1 %v7332_v55 }
0x1957   : > { %v7325_v29 = vadd.f32 %v8374_v12, %v7317_v9  ;;  %v7310_v27 = vmul.f32 %v9572_v59, %v7278_v62 }
0x1958   : > { %9151 = vmatpush3.bf16.msra.mxu1 %v9474_v45 }
0x1959   : > { %v7335_v44 = vsel %vm403_vm0, %v7325_v29, 0.0  ;;  %v7318_v32 = vmul.f32 %v8373_v11, %v7310_v27 }
0x195a   : > { %7336 = vadd.xlane.f32.xlu0 %v7335_v44 }
0x195b   : > { %v7326_v50 = vadd.f32 %v8374_v12, %v7318_v32 }
0x195d   : > { %v7338_v34 = vsel %vm403_vm0, %v7326_v50, 0.0 }
0x195e   : > { %7339 = vadd.xlane.f32.xlu1 %v7338_v34 }
0x19db   : > { %v7331_v19 = vpop.xlane.xlu0 %7330 }
0x19dc   : > { %v7341_v4 = vmul.f32 0.03125, %v7331_v19 }
0x19de   : > { %v7345_v18 = vsub.f32 %v7323_v31, %v7341_v4 }
0x19df   : > { %v7334_v25 = vpop.xlane.xlu1 %7333 }
0x19e0   : > { %v7342_v52 = vmul.f32 0.03125, %v7334_v25  ;;  %v7349_v16 = vmul.f32 %v7345_v18, %v7345_v18 }
0x19e2   : > { %v7346_v35 = vsub.f32 %v7324_v48, %v7342_v52  ;;  %v7353_v42 = vsel %vm403_vm0, %v7349_v16, 0.0 }
0x19e3   : > { %7354 = vadd.xlane.f32.xlu0 %v7353_v42  ;;  %v7337_v6 = vpop.xlane.xlu0 %7336 }
0x19e4   : > { %v7343_v63 = vmul.f32 0.03125, %v7337_v6  ;;  %v7350_v47 = vmul.f32 %v7346_v35, %v7346_v35 }
0x19e6   : > { %v7347_v24 = vsub.f32 %v7325_v29, %v7343_v63  ;;  %v7356_v46 = vsel %vm403_vm0, %v7350_v47, 0.0 }
0x19e7   : > { %7357 = vadd.xlane.f32.xlu1 %v7356_v46  ;;  %v7340_v7 = vpop.xlane.xlu1 %7339 }
0x19e8   : > { %v7344_v60 = vmul.f32 0.03125, %v7340_v7  ;;  %v7351_v51 = vmul.f32 %v7347_v24, %v7347_v24 }
0x19ea   : > { %v7348_v54 = vsub.f32 %v7326_v50, %v7344_v60  ;;  %v7359_v0 = vsel %vm403_vm0, %v7351_v51, 0.0 }
0x19eb   : > { %7360 = vadd.xlane.f32.xlu0 %v7359_v0 }
0x19ec   : > { %v7352_v43 = vmul.f32 %v7348_v54, %v7348_v54 }
0x19ee   : > { %v7362_v14 = vsel %vm403_vm0, %v7352_v43, 0.0 }
0x19ef   : > { %7363 = vadd.xlane.f32.xlu1 %v7362_v14 }
0x1a6c   : > { %v7355_v40 = vpop.xlane.xlu0 %7354 }
0x1a6d   : > { %v7365_v22 = vmul.f32 0.03125, %v7355_v40 }
0x1a6f   : > { %v7369_v13 = vadd.f32 1e-05, %v7365_v22 }
0x1a70   : > { %v7358_v62 = vpop.xlane.xlu1 %7357 }
0x1a71   : > { %9573 = vrsqrt.f32 %v7369_v13  ;;  %v7366_v39 = vmul.f32 0.03125, %v7358_v62 }
0x1a73   : > { %v7370_v15 = vadd.f32 1e-05, %v7366_v39 }
0x1a74   : > { %v7361_v37 = vpop.xlane.xlu0 %7360 }
0x1a75   : > { %9575 = vrsqrt.f32 %v7370_v15  ;;  %v7367_v17 = vmul.f32 0.03125, %v7361_v37 }
0x1a77   : > { %v7371_v10 = vadd.f32 1e-05, %v7367_v17 }
0x1a78   : > { %v7364_v20 = vpop.xlane.xlu1 %7363 }
0x1a79   : > { %9577 = vrsqrt.f32 %v7371_v10  ;;  %v7368_v53 = vmul.f32 0.03125, %v7364_v20 }
0x1a7b   : > { %v7372_v5 = vadd.f32 1e-05, %v7368_v53  ;;  %v8377_v53 = vld [vmem:[%s11796_s9] ss:$0 sm:$0xff] }
0x1a7d   : > { %9579 = vrsqrt.f32 %v7372_v5 }
0x1a7e   : > { %v9574_v41 = vpop.eup %9573 }
0x1a7f   : > { %v7377_v57 = vmul.f32 %v9574_v41, %v7345_v18 }
0x1a81   : > { %v7385_v28 = vmul.f32 %v8375_v36, %v7377_v57 }
0x1a82   : > { %v9576_v1 = vpop.eup %9575 }
0x1a83   : > { %v7393_v33 = vadd.f32 %v8376_v26, %v7385_v28  ;;  %v7378_v2 = vmul.f32 %v9576_v1, %v7346_v35 }
0x1a85   : > { %v7397_v38 = vsel %vm403_vm0, %v7393_v33, 0.0  ;;  %v7386_v11 = vmul.f32 %v8375_v36, %v7378_v2 }
0x1a86   : > { %v9578_v30 = vpop.eup %9577  ;;  %v7398_v12 = vrot.slane %v7397_v38, 4 }
0x1a87   : > { %v7394_v61 = vadd.f32 %v8376_v26, %v7386_v11  ;;  %v7379_v49 = vmul.f32 %v9578_v30, %v7347_v24 }
0x1a88   : > { %v7399_v31 = vadd.f32 %v7398_v12, %v7397_v38 }
0x1a89   : > { %v7404_v3 = vsel %vm403_vm0, %v7394_v61, 0.0  ;;  %v7387_v8 = vmul.f32 %v8375_v36, %v7379_v49 }
0x1a8a   : > { %v9580_v21 = vpop.eup %9579  ;;  %v7400_v56 = vrot.slane %v7399_v31, 2  ;;  %v7405_v48 = vrot.slane %v7404_v3, 4 }
0x1a8b   : > { %v7395_v58 = vadd.f32 %v8376_v26, %v7387_v8  ;;  %v7380_v55 = vmul.f32 %v9580_v21, %v7348_v54 }
0x1a8c   : > { %v7401_v9 = vadd.f32 %v7400_v56, %v7399_v31  ;;  %v7406_v59 = vadd.f32 %v7405_v48, %v7404_v3 }
0x1a8d   : > { %v7411_v29 = vsel %vm403_vm0, %v7395_v58, 0.0  ;;  %v7388_v27 = vmul.f32 %v8375_v36, %v7380_v55 }
0x1a8e   : > { %v7407_v44 = vrot.slane %v7406_v59, 2  ;;  %v7412_v32 = vrot.slane %v7411_v29, 4  ;;  %v7402_v34 = vrot.slane %v7401_v9, 1 }
0x1a8f   : > { %v7396_v50 = vadd.f32 %v8376_v26, %v7388_v27 }
0x1a90   : > { %v7408_v19 = vadd.f32 %v7407_v44, %v7406_v59  ;;  %v7413_v4 = vadd.f32 %v7412_v32, %v7411_v29  ;;  %v7403_v35 = vadd.f32 %v7402_v34, %v7401_v9 }
0x1a91   : > { %v7418_v18 = vsel %vm403_vm0, %v7396_v50, 0.0 }
0x1a92   : > { %v7409_v25 = vrot.slane %v7408_v19, 1  ;;  %v7414_v52 = vrot.slane %v7413_v4, 2  ;;  %v7419_v16 = vrot.slane %v7418_v18, 4  ;;  %v7425_v7 = vmul.f32 0.125, %v7403_v35 }
0x1a94   : > { %v7410_v42 = vadd.f32 %v7409_v25, %v7408_v19  ;;  %v7415_v6 = vadd.f32 %v7414_v52, %v7413_v4  ;;  %v7420_v63 = vadd.f32 %v7419_v16, %v7418_v18  ;;  %v7429_v14 = vpack.c.bf16 %v7425_v7, %v7425_v7 }
0x1a96   : > { %v7426_v47 = vmul.f32 0.125, %v7410_v42  ;;  %v7416_v24 = vrot.slane %v7415_v6, 1  ;;  %v7421_v46 = vrot.slane %v7420_v63, 2  ;;  %v7448_v62 = vunpack.c.l.b16 %v7429_v14 }
0x1a98   : > { %v7417_v60 = vadd.f32 %v7416_v24, %v7415_v6  ;;  %v7422_v51 = vadd.f32 %v7421_v46, %v7420_v63  ;;  %v7430_v54 = vpack.c.bf16 %v7426_v47, %v7426_v47 }
0x1a9a   : > { %v7427_v0 = vmul.f32 0.125, %v7417_v60  ;;  %v7423_v43 = vrot.slane %v7422_v51, 1  ;;  %v7449_v40 = vunpack.c.l.b16 %v7430_v54 }
0x1a9c   : > { %v7431_v23 = vpack.c.bf16 %v7427_v0, %v7427_v0  ;;  %v7424_v45 = vadd.f32 %v7423_v43, %v7422_v51  ;;  %v7453_v37 = vsel %vm7452_vm4, %v7449_v40, %v7448_v62 }
0x1a9e   : > { %v7428_v22 = vmul.f32 0.125, %v7424_v45  ;;  %v7450_v13 = vunpack.c.l.b16 %v7431_v23 }
0x1aa0   : > { %v7432_v39 = vpack.c.bf16 %v7428_v22, %v7428_v22  ;;  %v7455_v17 = vsel %vm7454_vm5, %v7450_v13, %v7453_v37 }
0x1aa2   : > { %v7451_v15 = vunpack.c.l.b16 %v7432_v39 }
0x1aa4   : > { %v7457_v10 = vsel %vm7456_vm6, %v7451_v15, %v7455_v17 }
0x1aa5   : > { %v7458_v20 = vpack.c.b16 %v7457_v10, %v7457_v10 }
0x1aa7   : > { %9153 = vmatmul.mubr.msk.bf16.vlgmr.msra.gmra.mxu1 %vm403_vm0, %v7458_v20 }
0x1b67   : > { %v7508_v5 = vpop.f32.mrf.mxu1 }
0x1b68   : > { %v7509_v41 = vadd.f32 %v8377_v53, %v7508_v5 }
0x1b69   : > { %v9154_v36 = vpop.f32.mrf.mxu1 }
0x1b6a   : > { %7515 = vst.msk [vmem:[%s353_s27] sm:$0xf] %vm7514_vm7, %v7509_v41 }
0x1b6b   : > { %v7511_v57 = vpop.f32.mrf.mxu1 }
0x1b6c   : > { %9596 = shalt.err (!%p9593_p3)
}
0x1b6d   : > { %s9597_s21 = scalar_lea.hbm %s11746_s18, 64  ;;  %s9601_s29 = scalar_lea.hbm %s11797_s10, 128 }
0x1b6e   : > { %p9598_p4 = scmp.ne.s32.totalorder %s11746_s18, %s9597_s21  ;;  %p9602_p9 = scmp.lt.s32.totalorder %s11746_s18, %s11797_s10 }
0x1b6f   : > { %p9603_p10 = scmp.lt.s32.totalorder %s9601_s29, %s9597_s21 }
0x1b70   : > { %p9599_p7 = pnand %p9598_p4, %p9745_p5 }
0x1b71   : > { %p9604_p11 = por %p9603_p10, %p9602_p9 }
0x1b72   : > { %p9600_p8 = pneg %p9599_p7 }
0x1b74   : > { %p9605_p12 = pnand %p9604_p11, %p9600_p8 }
0x1b76   : > { %9608 = shalt.err (!%p9605_p12)
}
0x1b77   : > { %9156 = dma.vmem_to_hbm [thread:$0]  (%p9745_p5), %s11748_s28, 64, %s11746_s18, %s7517_s20   ;;  %v9155_v26 = vpop.f32.mrf.mxu1 }
0x1b78 PF: > { %p9162_p13 = scmp.ge.s32.totalorder %s9643_s16, 2  ;;  %s7542_s17 = sand.u32 1, %s9631_s13  }
0x1b79   : > { %s7543_s26 = scalar_lea.sflag [#allocation3], %s7542_s17 }
0x1b7a   : > { %p9159_p0 = pnand %p9162_p13, %p9749_p6 }
0x1b7c   : > { %p9160_p1 = pneg %p9159_p0 }
0x1b7e   : > { %9626 = dma.done.wait (%p9160_p1), %s7543_s26, 64  }
0x1b7f   : > { %9628 = vsyncadd (%p9160_p1), %s7543_s26, 4294967232  ;;  %p20_p2 = scmp.ge.s32.totalorder %s9732_s19, 4   ;;  %s11812_s13 = smov %s9635_s14 }
0x1b80   : > { %s11813_s14 = smov %s9639_s15  ;;  %s11814_s15 = smov %s9743_s22 }
0x1b81   : > { %s11815_s16 = smov %s9732_s19  ;;  %22 = sbr.rel (!%p20_p2) target bundleno = 3 (0x3), region = 108 }
0x1b86   :  { %7548 = vsyncpa [#allocation3], 1 }
0x1b87   :  { %7550 = vsyncpa [#allocation3 + $0x1], 1 }

</bundles_post_ra>
